<compile_context>
chip_gen: v7x
topology: tpu7x:2x2x1
jax: 0.10.0
libtpu: 0.0.40
codegen_flags: <defaults>
</compile_context>

<pallas_src>
import jax
import jax.numpy as jnp
from jax.experimental import pallas as pl
from jax.experimental.pallas import tpu as pltpu


def se_block_kernel(g_ref, w1_ref, b1_ref, x_ref, w2_ref, o_ref):
    # Squeeze-excite gate: gate[c] = sigmoid(sum_s w1[c,s] * g[s] + b1[c]).
    # VPU multiply (bf16 weight promoted to f32) + XLU lane-reduction; recomputed
    # per grid step (cheap) so it never depends on scratch persisting across steps.
    prod = w1_ref[...].astype(jnp.float32) * g_ref[...]                 # (C, Cse) f32
    gate = jax.nn.sigmoid(jnp.sum(prod, axis=1, keepdims=True)
                          + b1_ref[...])                                # (C, 1)  f32

    # Broadcast-scale the activations along the spatial (lane) dim in f32, then
    # cast once to bf16 for the MXU.
    scaled = (x_ref[...] * gate).astype(jnp.bfloat16)                   # (C, HW) bf16

    # conv2d93 (1x1, no bias): one (TR, C) @ (C, HW) MXU tile per grid step with
    # f32 accumulation.  Rows are already in NCHW channel order -> no transpose.
    o_ref[...] = jnp.dot(w2_ref[...], scaled,
                         preferred_element_type=jnp.float32).astype(o_ref.dtype)


def prepare_params(w1, b1, w2):
    """One-time weight prep (bf16 cast only; hoisted/cached in a real model)."""
    C, C_se = w1.shape[0], w1.shape[1]
    C_out = w2.shape[0]
    w1_m = w1.reshape(C, C_se).astype(jnp.bfloat16)       # (C, Cse)
    b1_m = b1.reshape(C, 1).astype(jnp.float32)           # (C, 1)
    w2_m = w2.reshape(C_out, w2.shape[1]).astype(jnp.bfloat16)  # (C_out, C_in)
    return (w1_m, b1_m, w2_m)


def se_block(x290, x287, params, *, n_row_tiles=2):
    """x290: (1, C_se, 1, 1), x287: (1, C, H, W) -> (1, C_out, H, W) f32."""
    N, C, H, W = x287.shape
    assert N == 1
    hw = H * W
    w1_m, b1_m, w2_m = params
    C_out, C_in = w2_m.shape
    C_se = w1_m.shape[1]
    assert C_in == C and w1_m.shape[0] == C

    # Output-channel tiling: 2 tiles -> one per TensorCore on v7x, 2 cheap
    # sequential steps on v5e/v6e.  Fall back to a single tile if not divisible.
    nt = n_row_tiles
    if nt < 1 or C_out % nt != 0 or (C_out // nt) % 8 != 0:
        nt = 1
    tr = C_out // nt

    # Per-call layout work: free reshapes only (contiguous), no transpose/pad/cast.
    x_mat = x287.reshape(C, hw)          # (C, HW)  f32
    g_row = x290.reshape(1, C_se)        # (1, Cse) f32

    flops = 2 * C_out * C_in * hw + 2 * C * C_se + C * hw
    bytes_accessed = (2 * (w1_m.size + w2_m.size)                  # bf16 weights
                      + 4 * (x_mat.size + g_row.size + b1_m.size)  # f32 activations
                      + 4 * C_out * hw)                            # f32 output

    out_mat = pl.pallas_call(
        se_block_kernel,
        out_shape=jax.ShapeDtypeStruct((C_out, hw), jnp.float32),
        grid_spec=pltpu.PrefetchScalarGridSpec(
            num_scalar_prefetch=0,
            grid=(nt,),
            in_specs=[
                pl.BlockSpec((1, C_se), lambda i: (0, 0)),    # g     (resident)
                pl.BlockSpec((C, C_se), lambda i: (0, 0)),    # w1    (resident)
                pl.BlockSpec((C, 1), lambda i: (0, 0)),       # b1    (resident)
                pl.BlockSpec((C, hw), lambda i: (0, 0)),      # x     (resident)
                pl.BlockSpec((tr, C_in), lambda i: (i, 0)),   # w2 row tile (streamed)
            ],
            out_specs=pl.BlockSpec((tr, hw), lambda i: (i, 0)),
        ),
        compiler_params=pltpu.CompilerParams(
            dimension_semantics=("parallel",),
            vmem_limit_bytes=32 * 1024 * 1024,   # ~12 MiB actually used; safe on all gens
        ),
        cost_estimate=pl.CostEstimate(
            flops=flops, transcendentals=C, bytes_accessed=bytes_accessed),
    )(g_row, w1_m, b1_m, x_mat, w2_m)

    # Output rows are already in channel order -> free reshape back to NCHW.
    return out_mat.reshape(1, C_out, H, W)


def reference(x290, x287, w1, b1, w2):
    """Pure-JAX f32 reference of the PyTorch forward (1x1 convs as einsums)."""
    x291 = jnp.einsum('oc,nchw->nohw', w1.reshape(w1.shape[0], w1.shape[1]),
                      x290) + b1[None, :, None, None]
    x292 = jax.nn.sigmoid(x291)
    x293 = x292 * x287
    x294 = jnp.einsum('oc,nchw->nohw', w2.reshape(w2.shape[0], w2.shape[1]), x293)
    return x294


if __name__ == "__main__":
    # Shapes from the module spec: conv2d92 348->1392 (bias), conv2d93 1392->1392.
    C_se, C, H, W = 348, 1392, 14, 14

    key = jax.random.PRNGKey(0)
    k1, k2, k3, k4, k5 = jax.random.split(key, 5)

    # forward args
    x287 = jax.random.normal(k1, (1, C, H, W), dtype=jnp.float32)
    x290 = jax.random.normal(k2, (1, C_se, 1, 1), dtype=jnp.float32)

    # parameters
    w1 = jax.random.normal(k3, (C, C_se, 1, 1), dtype=jnp.float32) * 0.05
    b1 = jax.random.normal(k4, (C,), dtype=jnp.float32) * 0.05
    w2 = jax.random.normal(k5, (C, C, 1, 1), dtype=jnp.float32) * 0.02

    params = prepare_params(w1, b1, w2)
    out = se_block(x290, x287, params)
    out = jax.block_until_ready(out)

    ref = reference(x290, x287, w1, b1, w2)
    assert out.shape == (1, C, H, W), out.shape

    # bf16 matmul operands with f32 accumulation: slightly looser element-wise
    # tolerance than pure f32, plus a tight relative-L2 check for rigor.
    max_err = float(jnp.max(jnp.abs(out - ref)))
    rel_l2 = float(jnp.linalg.norm(out - ref) / jnp.linalg.norm(ref))
    assert jnp.allclose(out, ref, atol=6e-2, rtol=6e-2), (max_err, rel_l2)
    assert rel_l2 < 1e-2, rel_l2

    print("KERNEL_OK")
</pallas_src>

<mosaic_0001>
module attributes {stable_mosaic.version = 11 : i64} {
  func.func @se_block_kernel(%arg0: i32, %arg1: memref<1x348xf32, #tpu.memory_space<vmem>>, %arg2: memref<1392x348xbf16, #tpu.memory_space<vmem>>, %arg3: memref<1392x1xf32, #tpu.memory_space<vmem>>, %arg4: memref<1392x196xf32, #tpu.memory_space<vmem>>, %arg5: memref<696x1392xbf16, #tpu.memory_space<vmem>>, %arg6: memref<696x196xf32, #tpu.memory_space<vmem>>) attributes {dimension_semantics = [#tpu.dimension_semantics<parallel>], iteration_bounds = array<i64: 2>, scalar_prefetch = 0 : i64, scratch_operands = 0 : i64, tpu.core_type = #tpu.core_type<tc>, window_params = [{pipeline_mode = #tpu.pipeline_mode<synchronous>, transform_indices = @transform_0, window_bounds = array<i64: 1, 348>}, {pipeline_mode = #tpu.pipeline_mode<synchronous>, transform_indices = @transform_1, window_bounds = array<i64: 1392, 348>}, {pipeline_mode = #tpu.pipeline_mode<synchronous>, transform_indices = @transform_2, window_bounds = array<i64: 1392, 1>}, {pipeline_mode = #tpu.pipeline_mode<synchronous>, transform_indices = @transform_3, window_bounds = array<i64: 1392, 196>}, {transform_indices = @transform_4, window_bounds = array<i64: 696, 1392>}, {transform_indices = @transform_5, window_bounds = array<i64: 696, 196>}]} {
    %c0 = arith.constant 0 : index
    %c0_0 = arith.constant 0 : index
    %0 = vector.load %arg2[%c0, %c0_0] : memref<1392x348xbf16, #tpu.memory_space<vmem>>, vector<1392x348xbf16>
    %1 = arith.extf %0 : vector<1392x348xbf16> to vector<1392x348xf32>
    %c0_1 = arith.constant 0 : index
    %c0_2 = arith.constant 0 : index
    %2 = vector.load %arg1[%c0_1, %c0_2] : memref<1x348xf32, #tpu.memory_space<vmem>>, vector<1x348xf32>
    %3 = vector.broadcast %2 : vector<1x348xf32> to vector<1392x348xf32>
    %4 = arith.mulf %1, %3 : vector<1392x348xf32>
    %cst = arith.constant dense<0.000000e+00> : vector<1392xf32>
    %5 = vector.multi_reduction <add>, %4, %cst [1] : vector<1392x348xf32> to vector<1392xf32>
    %6 = vector.shape_cast %5 : vector<1392xf32> to vector<1392x1xf32>
    %c0_3 = arith.constant 0 : index
    %c0_4 = arith.constant 0 : index
    %7 = vector.load %arg3[%c0_3, %c0_4] : memref<1392x1xf32, #tpu.memory_space<vmem>>, vector<1392x1xf32>
    %8 = arith.addf %6, %7 : vector<1392x1xf32>
    %9 = arith.negf %8 : vector<1392x1xf32>
    %10 = math.exp %9 : vector<1392x1xf32>
    %cst_5 = arith.constant 1.000000e+00 : f32
    %11 = vector.broadcast %cst_5 : f32 to vector<1392x1xf32>
    %12 = arith.addf %11, %10 : vector<1392x1xf32>
    %13 = arith.divf %11, %12 : vector<1392x1xf32>
    %c0_6 = arith.constant 0 : index
    %c0_7 = arith.constant 0 : index
    %14 = vector.load %arg4[%c0_6, %c0_7] : memref<1392x196xf32, #tpu.memory_space<vmem>>, vector<1392x196xf32>
    %15 = vector.broadcast %13 : vector<1392x1xf32> to vector<1392x196xf32>
    %16 = arith.mulf %14, %15 : vector<1392x196xf32>
    %17 = arith.truncf %16 : vector<1392x196xf32> to vector<1392x196xbf16>
    %c0_8 = arith.constant 0 : index
    %c0_9 = arith.constant 0 : index
    %18 = vector.load %arg5[%c0_8, %c0_9] : memref<696x1392xbf16, #tpu.memory_space<vmem>>, vector<696x1392xbf16>
    %cst_10 = arith.constant dense<0.000000e+00> : vector<696x196xf32>
    %19 = tpu.matmul %18, %17, %cst_10 {dimension_numbers = #tpu.dot_dimension_numbers<[1], [0], [0], [1], [0, 0, 1, 1], [], []>} : vector<696x1392xbf16>, vector<1392x196xbf16>, vector<696x196xf32> -> vector<696x196xf32>
    %c0_11 = arith.constant 0 : index
    %c0_12 = arith.constant 0 : index
    %20 = vector.load %arg6[%c0_11, %c0_12] : memref<696x196xf32, #tpu.memory_space<vmem>>, vector<696x196xf32>
    tpu.vector_store %arg6[%c0_11, %c0_12], %19 {strides = array<i32>} : memref<696x196xf32, #tpu.memory_space<vmem>>, vector<696x196xf32>,
    return
  }
  func.func @transform_0(%arg0: i32) -> (i32, i32) {
    %c0_i32 = arith.constant 0 : i32
    %c0_i32_0 = arith.constant 0 : i32
    %c0_i32_1 = arith.constant 0 : i32
    return %c0_i32, %c0_i32_0 : i32, i32
  }
  func.func @transform_1(%arg0: i32) -> (i32, i32) {
    %c0_i32 = arith.constant 0 : i32
    %c0_i32_0 = arith.constant 0 : i32
    %c0_i32_1 = arith.constant 0 : i32
    return %c0_i32, %c0_i32_0 : i32, i32
  }
  func.func @transform_2(%arg0: i32) -> (i32, i32) {
    %c0_i32 = arith.constant 0 : i32
    %c0_i32_0 = arith.constant 0 : i32
    %c0_i32_1 = arith.constant 0 : i32
    return %c0_i32, %c0_i32_0 : i32, i32
  }
  func.func @transform_3(%arg0: i32) -> (i32, i32) {
    %c0_i32 = arith.constant 0 : i32
    %c0_i32_0 = arith.constant 0 : i32
    %c0_i32_1 = arith.constant 0 : i32
    return %c0_i32, %c0_i32_0 : i32, i32
  }
  func.func @transform_4(%arg0: i32) -> (i32, i32) {
    %c0_i32 = arith.constant 0 : i32
    %c0_i32_0 = arith.constant 0 : i32
    return %arg0, %c0_i32 : i32, i32
  }
  func.func @transform_5(%arg0: i32) -> (i32, i32) {
    %c0_i32 = arith.constant 0 : i32
    %c0_i32_0 = arith.constant 0 : i32
    return %arg0, %c0_i32 : i32, i32
  }
}

</mosaic_0001>

<bundles_post_ra>
// kernel: tpu_custom_call.1
= control target key start
LH: loop header
LB: loop body
LE: loop exit
PB: predicated region body
PF: predicated region fallthrough
CT: control target
= control target key end

     0   :  { %s14800_s18 = smov 0   ;;  %s19593_s0 = inlined_call_operand.vmem [shape: f32[1,348], index: 0, kind: input, shape index: {}]   ;;  %s19594_s1 = inlined_call_operand.vmem [shape: bf16[1392,348], index: 1, kind: input, shape index: {}]   ;;  %s19595_s2 = inlined_call_operand.vmem [shape: f32[1392,1], index: 2, kind: input, shape index: {}]   ;;  %s19596_s3 = inlined_call_operand.vmem [shape: f32[1392,196], index: 3, kind: input, shape index: {}]   ;;  %s19597_s4 = inlined_call_operand.vmem [shape: bf16[1392,1392], index: 4, kind: input, shape index: {}]   ;;  %s19598_s5 = inlined_call_operand.vmem [shape: f32[1392,196], index: 5, kind: output, shape index: {}]  }
   0x1 LB: > { %s11763_s19 = sadd.s32 4294967295, %s14767_s18   ;;  %p11767_p0 = scmp.ge.s32.totalorder %s14767_s18, 1  ;;  %s14767_s18 = sphi %s14800_s18, %s15_s18  }
   0x2   : > { %p189_p1 = scmp.lt.s32.totalorder %s14767_s18, 3 }
   0x4   : > { %p190_p2 = pnand %p11767_p0, %p189_p1 }
   0x6   : > { %193 = sbr.rel (%p190_p2) target bundleno = 1745 (0x6d1), region = 40 }
   0xd   : > { %v426_v0 = vld [vmem:[%s19594_s1 + $0x480] sm:$0xff]  ;;  %v427_v1 = vld [vmem:[%s19594_s1 + $0x488] ss:$12 sps:$4 sm:$0xff]   ;;  %v1106_v2 = vlaneseq  ;;  %vm1644_vm0 = vcmask 752640   ;;  %v428_v8 = vld [vmem:[%s19594_s1 + $0x48c] sm:$0xff]  ;;  %s219_s10 = smul.u32 87, %s11763_s19 }
   0xe   : > { %v870_v3 = vunpack.c.l.bf16 %v426_v0  ;;  %v871_v4 = vunpack.c.h.bf16 %v426_v0  ;;  %v872_v5 = vunpack.c.l.bf16 %v427_v1  ;;  %v234_v6 = vld [vmem:[%s19594_s1] sm:$0xff]  ;;  %v235_v7 = vld [vmem:[%s19594_s1 + $0x8] ss:$12 sps:$4 sm:$0xff]   ;;  %v875_v9 = vunpack.c.h.bf16 %v427_v1  ;;  %v236_v14 = vld [vmem:[%s19594_s1 + $0xc] sm:$0xff] }
   0xf   : > { %v1107_v10 = vshrl.u32 %v1106_v2, 7  ;;  %v582_v11 = vunpack.c.l.bf16 %v234_v6  ;;  %v583_v12 = vunpack.c.h.bf16 %v234_v6  ;;  %v584_v13 = vunpack.c.l.bf16 %v235_v7  ;;  %v240_v15 = vld [vmem:[%s19594_s1 + $0x24] sm:$0xff]  ;;  %v1104_v17 = vld [vmem:[%s19593_s0] sm:$0x7]  ;;  %p220_p3 = scmp.lt.s32.totalorder %s219_s10, 173 }
  0x10   : > { %v14832_v16 = vld [vmem:[%s19594_s1 + $0x2c] ss:$24 sps:$4 sm:$0xff]   ;;  %v873_v18 = vunpack.c.l.bf16 %v428_v8  ;;  %v874_v19 = vunpack.c.h.bf16 %v428_v8  ;;  %v585_v20 = vunpack.c.l.bf16 %v236_v14  ;;  %v586_v21 = vunpack.c.h.bf16 %v236_v14  ;;  %v244_v28 = vld [vmem:[%s19594_s1 + $0x3c] sm:$0xff] }
  0x11   : > { %v432_v22 = vld [vmem:[%s19594_s1 + $0x4a4] sm:$0xff]  ;;  %v1108_v23 = vsub.s32 0, %v1107_v10  ;;  %v1112_v24 = vsub.s32 1, %v1107_v10  ;;  %v1116_v25 = vsub.s32 2, %v1107_v10  ;;  %v587_v26 = vunpack.c.h.bf16 %v235_v7  ;;  %v14843_v27 = vld [vmem:[%s19594_s1 + $0x20] ss:$1164 sps:$4 sm:$0xff]  }
  0x12   : > { %v591_v29 = vunpack.c.l.bf16 %v240_v15  ;;  %v592_v30 = vunpack.c.h.bf16 %v240_v15  ;;  %v593_v31 = vunpack.c.l.bf16 %v14832_v16  ;;  %v879_v32 = vunpack.c.l.bf16 %v432_v22  ;;  %v436_v14 = vld [vmem:[%s19594_s1 + $0x4bc] sm:$0xff]  ;;  %s19607_s10 = smov (!%p220_p3, %s219_s10), 173 }
  0x13   : > { %v14849_v33 = vrot.slane %v1104_v17, %v1108_v23  ;;  %v14851_v34 = vrot.slane %v1104_v17, %v1112_v24  ;;  %v14853_v35 = vrot.slane %v1104_v17, %v1116_v25  ;;  %v880_v36 = vunpack.c.h.bf16 %v432_v22  ;;  %s13354_s16 = smul.u32 44, %s19607_s10  ;;  %s12475_s11 = sshll.u32 %s19607_s10, 4 }
  0x14   : > { %v881_v37 = vunpack.c.h.bf16 %v14843_v27  ;;  %v597_v38 = vunpack.c.l.bf16 %v244_v28  ;;  %v598_v39 = vunpack.c.h.bf16 %v244_v28  ;;  %v599_v40 = vunpack.c.h.bf16 %v14832_v16  ;;  %s19247_s14 = scalar_lea.vmem %s19598_s5, %s12475_s11 }
  0x15   : > { %v1409_v41 = vmul.f32 %v14849_v33, %v870_v3  ;;  %v1410_v42 = vmul.f32 %v14851_v34, %v871_v4  ;;  %v1411_v43 = vmul.f32 %v14853_v35, %v872_v5  ;;  %v1121_v44 = vmul.f32 %v14849_v33, %v582_v11  ;;  %v238_v5 = vld [vmem:[%s19594_s1 + $0x18] sm:$0xff]  ;;  %s15910_s6 = scalar_lea.vmem %s19597_s4, %s13354_s16 }
  0x16   : > { %v1122_v45 = vmul.f32 %v14851_v34, %v583_v12  ;;  %v1123_v46 = vmul.f32 %v14853_v35, %v584_v13  ;;  %v1412_v47 = vmul.f32 %v14849_v33, %v873_v18  ;;  %v1413_v48 = vmul.f32 %v14851_v34, %v874_v19  ;;  %v437_v19 = vld [vmem:[%s19594_s1 + $0x5c] ss:$1128 sps:$4 sm:$0xff]  }
  0x17   : > { %v2124_v49 = vadd.f32 %v1410_v42, %v1409_v41  ;;  %v2125_v50 = vsel %vm1644_vm0, %v1411_v43, 0.0  ;;  %v1414_v51 = vmul.f32 %v14853_v35, %v875_v9  ;;  %v1124_v52 = vmul.f32 %v14849_v33, %v585_v20  ;;  %v248_v20 = vld [vmem:[%s19594_s1 + $0x54] sm:$0xff]  ;;  %v431_v41 = vld [vmem:[%s19594_s1 + $0x4a0] ss:$60 sps:$4 sm:$0xff]  }
  0x18   : > { %v1643_v53 = vadd.f32 %v1122_v45, %v1121_v44  ;;  %v1645_v54 = vsel %vm1644_vm0, %v1123_v46, 0.0  ;;  %v2129_v55 = vadd.f32 %v1413_v48, %v1412_v47  ;;  %v1125_v56 = vmul.f32 %v14851_v34, %v586_v21  ;;  %v440_v46 = vld [vmem:[%s19594_s1 + $0x4d4] sm:$0xff] }
  0x19   : > { %v2126_v57 = vadd.f32 %v2125_v50, %v2124_v49  ;;  %v2130_v58 = vsel %vm1644_vm0, %v1414_v51, 0.0  ;;  %v1126_v59 = vmul.f32 %v14853_v35, %v587_v26  ;;  %v1130_v60 = vmul.f32 %v14849_v33, %v591_v29 }
  0x1a   : > { %v1646_v61 = vadd.f32 %v1645_v54, %v1643_v53  ;;  %v2131_v62 = vadd.f32 %v2130_v58, %v2129_v55  ;;  %v1649_v63 = vadd.f32 %v1125_v56, %v1124_v52  ;;  %v1131_v0 = vmul.f32 %v14851_v34, %v592_v30  ;;  %v252_v55 = vld [vmem:[%s19594_s1 + $0x6c] sm:$0xff] }
  0x1b   : > { %2127 = vadd.xlane.f32.xlu1 %v2126_v57  ;;  %v1650_v1 = vsel %vm1644_vm0, %v1126_v59, 0.0  ;;  %v1132_v2 = vmul.f32 %v14853_v35, %v593_v31  ;;  %v1418_v3 = vmul.f32 %v14849_v33, %v879_v32  ;;  %v1419_v4 = vmul.f32 %v14851_v34, %v880_v36 }
  0x1c   : > { %1647 = vadd.xlane.f32.xlu0 %v1646_v61  ;;  %v1651_v6 = vadd.f32 %v1650_v1, %v1649_v63  ;;  %v1659_v7 = vadd.f32 %v1131_v0, %v1130_v60  ;;  %v1420_v8 = vmul.f32 %v14853_v35, %v881_v37  ;;  %v1136_v9 = vmul.f32 %v14849_v33, %v597_v38  ;;  %v430_v37 = vld [vmem:[%s19594_s1 + $0x498] sm:$0xff]  ;;  %v242_v1 = vld [vmem:[%s19594_s1 + $0x30] sm:$0xff] }
  0x1d   : > { %v1660_v10 = vsel %vm1644_vm0, %v1132_v2, 0.0  ;;  %v2139_v11 = vadd.f32 %v1419_v4, %v1418_v3  ;;  %v1137_v12 = vmul.f32 %v14851_v34, %v598_v39  ;;  %v1138_v13 = vmul.f32 %v14853_v35, %v599_v40  ;;  %v253_v0 = vld [vmem:[%s19594_s1 + $0x38] ss:$60 sps:$4 sm:$0xff]  }
  0x1e   : > { %v1661_v15 = vadd.f32 %v1660_v10, %v1659_v7  ;;  %v2140_v16 = vsel %vm1644_vm0, %v1420_v8, 0.0  ;;  %v588_v17 = vunpack.c.l.bf16 %v238_v5  ;;  %v589_v18 = vunpack.c.h.bf16 %v238_v5 }
  0x1f   : > { %2132 = vadd.xlane.f32.xlu1 %v2131_v62  ;;  %v2141_v21 = vadd.f32 %v2140_v16, %v2139_v11  ;;  %v1669_v22 = vadd.f32 %v1137_v12, %v1136_v9  ;;  %v1670_v23 = vsel %vm1644_vm0, %v1138_v13, 0.0  ;;  %v590_v24 = vunpack.c.l.bf16 %v14843_v27 }
  0x20   : > { %1652 = vadd.xlane.f32.xlu0 %v1651_v6  ;;  %v1127_v25 = vmul.f32 %v14849_v33, %v588_v17  ;;  %v1128_v26 = vmul.f32 %v14851_v34, %v589_v18  ;;  %v885_v28 = vunpack.c.l.bf16 %v436_v14  ;;  %v886_v29 = vunpack.c.h.bf16 %v436_v14  ;;  %v444_v14 = vld [vmem:[%s19594_s1 + $0x4ec] sm:$0xff] }
  0x21   : > { %v1671_v30 = vadd.f32 %v1670_v23, %v1669_v22  ;;  %v1129_v31 = vmul.f32 %v14853_v35, %v590_v24  ;;  %v887_v32 = vunpack.c.h.bf16 %v437_v19  ;;  %v603_v36 = vunpack.c.l.bf16 %v248_v20  ;;  %v434_v24 = vld [vmem:[%s19594_s1 + $0x4b0] sm:$0xff] }
  0x22   : > { %v1654_v38 = vadd.f32 %v1128_v26, %v1127_v25  ;;  %v1424_v39 = vmul.f32 %v14849_v33, %v885_v28  ;;  %v1425_v27 = vmul.f32 %v14851_v34, %v886_v29  ;;  %v604_v40 = vunpack.c.h.bf16 %v248_v20 }
  0x23   : > { %1662 = vadd.xlane.f32.xlu1 %v1661_v15  ;;  %v1655_v42 = vsel %vm1644_vm0, %v1129_v31, 0.0  ;;  %v1426_v43 = vmul.f32 %v14853_v35, %v887_v32  ;;  %v605_v44 = vunpack.c.l.bf16 %v437_v19  ;;  %v1142_v45 = vmul.f32 %v14849_v33, %v603_v36  ;;  %v445_v19 = vld [vmem:[%s19594_s1 + $0x4b8] ss:$60 sps:$4 sm:$0xff]  }
  0x24   : > { %v1656_v47 = vadd.f32 %v1655_v42, %v1654_v38  ;;  %v2149_v48 = vadd.f32 %v1425_v27, %v1424_v39  ;;  %v1143_v49 = vmul.f32 %v14851_v34, %v604_v40  ;;  %v876_v50 = vunpack.c.l.bf16 %v430_v37 }
  0x25   : > { %v2150_v51 = vsel %vm1644_vm0, %v1426_v43, 0.0  ;;  %v1144_v52 = vmul.f32 %v14853_v35, %v605_v44  ;;  %v877_v53 = vunpack.c.h.bf16 %v430_v37  ;;  %v878_v54 = vunpack.c.l.bf16 %v431_v41  ;;  %v256_v37 = vld [vmem:[%s19594_s1 + $0x84] sm:$0xff] }
  0x26   : > { %1657 = vadd.xlane.f32.xlu0 %v1656_v47  ;;  %v2151_v56 = vadd.f32 %v2150_v51, %v2149_v48  ;;  %v1679_v57 = vadd.f32 %v1143_v49, %v1142_v45  ;;  %v1415_v58 = vmul.f32 %v14849_v33, %v876_v50  ;;  %v891_v59 = vunpack.c.l.bf16 %v440_v46  ;;  %v257_v45 = vld [vmem:[%s19594_s1 + $0x50] ss:$60 sps:$4 sm:$0xff]  }
  0x27   : > { %2142 = vadd.xlane.f32.xlu1 %v2141_v21  ;;  %v1680_v60 = vsel %vm1644_vm0, %v1144_v52, 0.0  ;;  %v1416_v61 = vmul.f32 %v14851_v34, %v877_v53  ;;  %v1417_v62 = vmul.f32 %v14853_v35, %v878_v54  ;;  %v892_v63 = vunpack.c.h.bf16 %v440_v46  ;;  %v246_v46 = vld [vmem:[%s19594_s1 + $0x48] sm:$0xff] }
  0x28   : > { %v1681_v2 = vadd.f32 %v1680_v60, %v1679_v57  ;;  %v893_v3 = vunpack.c.h.bf16 %v431_v41  ;;  %v1430_v4 = vmul.f32 %v14849_v33, %v891_v59  ;;  %v609_v5 = vunpack.c.l.bf16 %v252_v55  ;;  %v448_v59 = vld [vmem:[%s19594_s1 + $0x504] sm:$0xff] }
  0x29   : > { %v2134_v6 = vadd.f32 %v1416_v61, %v1415_v58  ;;  %v2135_v7 = vsel %vm1644_vm0, %v1417_v62, 0.0  ;;  %v1431_v8 = vmul.f32 %v14851_v34, %v892_v63  ;;  %v610_v9 = vunpack.c.h.bf16 %v252_v55 }
  0x2a   : > { %v1432_v10 = vmul.f32 %v14853_v35, %v893_v3  ;;  %v611_v11 = vunpack.c.h.bf16 %v253_v0  ;;  %v1148_v12 = vmul.f32 %v14849_v33, %v609_v5  ;;  %v594_v13 = vunpack.c.l.bf16 %v242_v1  ;;  %v438_v5 = vld [vmem:[%s19594_s1 + $0x4c8] sm:$0xff] }
  0x2b   : > { %1672 = vadd.xlane.f32.xlu1 %v1671_v30  ;;  %v2136_v15 = vadd.f32 %v2135_v7, %v2134_v6  ;;  %v2159_v16 = vadd.f32 %v1431_v8, %v1430_v4  ;;  %v1149_v17 = vmul.f32 %v14851_v34, %v610_v9  ;;  %v595_v18 = vunpack.c.h.bf16 %v242_v1 }
  0x2c   : > { %v2160_v20 = vsel %vm1644_vm0, %v1432_v10, 0.0  ;;  %v1150_v21 = vmul.f32 %v14853_v35, %v611_v11  ;;  %v596_v22 = vunpack.c.l.bf16 %v253_v0  ;;  %v1133_v23 = vmul.f32 %v14849_v33, %v594_v13  ;;  %v449_v0 = vld [vmem:[%s19594_s1 + $0x4d0] ss:$60 sps:$4 sm:$0xff]  }
  0x2d   : > { %2137 = vadd.xlane.f32.xlu0 %v2136_v15  ;;  %v2161_v25 = vadd.f32 %v2160_v20, %v2159_v16  ;;  %v1689_v26 = vadd.f32 %v1149_v17, %v1148_v12  ;;  %v1134_v28 = vmul.f32 %v14851_v34, %v595_v18  ;;  %v897_v29 = vunpack.c.l.bf16 %v444_v14 }
  0x2e   : > { %v1690_v30 = vsel %vm1644_vm0, %v1150_v21, 0.0  ;;  %v1135_v31 = vmul.f32 %v14853_v35, %v596_v22  ;;  %v898_v32 = vunpack.c.h.bf16 %v444_v14  ;;  %v899_v36 = vunpack.c.h.bf16 %v445_v19  ;;  %v260_v14 = vld [vmem:[%s19594_s1 + $0x9c] sm:$0xff] }
  0x2f   : > { %2152 = vadd.xlane.f32.xlu1 %v2151_v56  ;;  %v1691_v38 = vadd.f32 %v1690_v30, %v1689_v26  ;;  %v1664_v39 = vadd.f32 %v1134_v28, %v1133_v23  ;;  %v1436_v27 = vmul.f32 %v14849_v33, %v897_v29  ;;  %v882_v40 = vunpack.c.l.bf16 %v434_v24  ;;  %v261_v23 = vld [vmem:[%s19594_s1 + $0x68] ss:$60 sps:$4 sm:$0xff]  }
  0x30   : > { %v1665_v41 = vsel %vm1644_vm0, %v1135_v31, 0.0  ;;  %v1437_v42 = vmul.f32 %v14851_v34, %v898_v32  ;;  %v1438_v43 = vmul.f32 %v14853_v35, %v899_v36  ;;  %v883_v44 = vunpack.c.h.bf16 %v434_v24  ;;  %v250_v24 = vld [vmem:[%s19594_s1 + $0x60] sm:$0xff] }
  0x31   : > { %v1666_v47 = vadd.f32 %v1665_v41, %v1664_v39  ;;  %v884_v48 = vunpack.c.l.bf16 %v445_v19  ;;  %v1421_v49 = vmul.f32 %v14849_v33, %v882_v40  ;;  %v615_v50 = vunpack.c.l.bf16 %v256_v37  ;;  %v452_v41 = vld [vmem:[%s19594_s1 + $0x51c] sm:$0xff] }
  0x32   : > { %v2169_v51 = vadd.f32 %v1437_v42, %v1436_v27  ;;  %v2170_v52 = vsel %vm1644_vm0, %v1438_v43, 0.0  ;;  %v1422_v53 = vmul.f32 %v14851_v34, %v883_v44  ;;  %v616_v54 = vunpack.c.h.bf16 %v256_v37 }
  0x33   : > { %1682 = vadd.xlane.f32.xlu1 %v1681_v2  ;;  %1667 = vadd.xlane.f32.xlu0 %v1666_v47  ;;  %v1423_v55 = vmul.f32 %v14853_v35, %v884_v48  ;;  %v617_v56 = vunpack.c.h.bf16 %v257_v45  ;;  %v1154_v57 = vmul.f32 %v14849_v33, %v615_v50  ;;  %v600_v58 = vunpack.c.l.bf16 %v246_v46  ;;  %v442_v50 = vld [vmem:[%s19594_s1 + $0x4e0] sm:$0xff] }
  0x34   : > { %v2171_v60 = vadd.f32 %v2170_v52, %v2169_v51  ;;  %v2144_v61 = vadd.f32 %v1422_v53, %v1421_v49  ;;  %v1155_v62 = vmul.f32 %v14851_v34, %v616_v54  ;;  %v601_v63 = vunpack.c.h.bf16 %v246_v46 }
  0x35   : > { %v2145_v1 = vsel %vm1644_vm0, %v1423_v55, 0.0  ;;  %v1156_v2 = vmul.f32 %v14853_v35, %v617_v56  ;;  %v602_v3 = vunpack.c.l.bf16 %v257_v45  ;;  %v1139_v4 = vmul.f32 %v14849_v33, %v600_v58  ;;  %v453_v45 = vld [vmem:[%s19594_s1 + $0x4e8] ss:$60 sps:$4 sm:$0xff]  }
  0x36   : > { %v2146_v6 = vadd.f32 %v2145_v1, %v2144_v61  ;;  %v1699_v7 = vadd.f32 %v1155_v62, %v1154_v57  ;;  %v1140_v8 = vmul.f32 %v14851_v34, %v601_v63  ;;  %v903_v9 = vunpack.c.l.bf16 %v448_v59 }
  0x37   : > { %2162 = vadd.xlane.f32.xlu1 %v2161_v25  ;;  %v1700_v10 = vsel %vm1644_vm0, %v1156_v2, 0.0  ;;  %v1141_v11 = vmul.f32 %v14853_v35, %v602_v3  ;;  %v904_v12 = vunpack.c.h.bf16 %v448_v59  ;;  %v905_v13 = vunpack.c.h.bf16 %v449_v0  ;;  %v264_v59 = vld [vmem:[%s19594_s1 + $0xb4] sm:$0xff] }
  0x38   : > { %2147 = vadd.xlane.f32.xlu0 %v2146_v6  ;;  %v1701_v15 = vadd.f32 %v1700_v10, %v1699_v7  ;;  %v1674_v16 = vadd.f32 %v1140_v8, %v1139_v4  ;;  %v1442_v17 = vmul.f32 %v14849_v33, %v903_v9  ;;  %v888_v18 = vunpack.c.l.bf16 %v438_v5  ;;  %v265_v4 = vld [vmem:[%s19594_s1 + $0x80] ss:$60 sps:$4 sm:$0xff]  }
  0x39   : > { %v1675_v19 = vsel %vm1644_vm0, %v1141_v11, 0.0  ;;  %v1443_v20 = vmul.f32 %v14851_v34, %v904_v12  ;;  %v1444_v21 = vmul.f32 %v14853_v35, %v905_v13  ;;  %v889_v22 = vunpack.c.h.bf16 %v438_v5  ;;  %v254_v5 = vld [vmem:[%s19594_s1 + $0x78] sm:$0xff] }
  0x3a   : > { %v1676_v25 = vadd.f32 %v1675_v19, %v1674_v16  ;;  %v890_v26 = vunpack.c.l.bf16 %v449_v0  ;;  %v1427_v28 = vmul.f32 %v14849_v33, %v888_v18  ;;  %v621_v29 = vunpack.c.l.bf16 %v260_v14 }
  0x3b   : > { %1692 = vadd.xlane.f32.xlu1 %v1691_v38  ;;  %v2179_v30 = vadd.f32 %v1443_v20, %v1442_v17  ;;  %v2180_v31 = vsel %vm1644_vm0, %v1444_v21, 0.0  ;;  %v1428_v32 = vmul.f32 %v14851_v34, %v889_v22  ;;  %v622_v36 = vunpack.c.h.bf16 %v260_v14 }
  0x3c   : > { %1677 = vadd.xlane.f32.xlu0 %v1676_v25  ;;  %v1429_v37 = vmul.f32 %v14853_v35, %v890_v26  ;;  %v623_v39 = vunpack.c.h.bf16 %v261_v23  ;;  %v1160_v27 = vmul.f32 %v14849_v33, %v621_v29  ;;  %v606_v40 = vunpack.c.l.bf16 %v250_v24  ;;  %v446_v29 = vld [vmem:[%s19594_s1 + $0x4f8] sm:$0xff] }
  0x3d   : > { %v2181_v42 = vadd.f32 %v2180_v31, %v2179_v30  ;;  %v2154_v43 = vadd.f32 %v1428_v32, %v1427_v28  ;;  %v1161_v38 = vmul.f32 %v14851_v34, %v622_v36  ;;  %v607_v44 = vunpack.c.h.bf16 %v250_v24 }
  0x3e   : > { %v2155_v46 = vsel %vm1644_vm0, %v1429_v37, 0.0  ;;  %v1162_v47 = vmul.f32 %v14853_v35, %v623_v39  ;;  %v608_v48 = vunpack.c.l.bf16 %v261_v23  ;;  %v1145_v49 = vmul.f32 %v14849_v33, %v606_v40  ;;  %v457_v23 = vld [vmem:[%s19594_s1 + $0x500] ss:$60 sps:$4 sm:$0xff]  }
  0x3f   : > { %2172 = vadd.xlane.f32.xlu1 %v2171_v60  ;;  %v2156_v51 = vadd.f32 %v2155_v46, %v2154_v43  ;;  %v1709_v52 = vadd.f32 %v1161_v38, %v1160_v27  ;;  %v1146_v53 = vmul.f32 %v14851_v34, %v607_v44  ;;  %v909_v54 = vunpack.c.l.bf16 %v452_v41 }
  0x40   : > { %v1710_v55 = vsel %vm1644_vm0, %v1162_v47, 0.0  ;;  %v1147_v56 = vmul.f32 %v14853_v35, %v608_v48  ;;  %v910_v57 = vunpack.c.h.bf16 %v452_v41  ;;  %v911_v58 = vunpack.c.h.bf16 %v453_v45  ;;  %v268_v41 = vld [vmem:[%s19594_s1 + $0xcc] sm:$0xff] }
  0x41   : > { %2157 = vadd.xlane.f32.xlu0 %v2156_v51  ;;  %v1711_v61 = vadd.f32 %v1710_v55, %v1709_v52  ;;  %v1684_v62 = vadd.f32 %v1146_v53, %v1145_v49  ;;  %v1448_v60 = vmul.f32 %v14849_v33, %v909_v54  ;;  %v894_v63 = vunpack.c.l.bf16 %v442_v50  ;;  %v269_v49 = vld [vmem:[%s19594_s1 + $0x98] ss:$60 sps:$4 sm:$0xff]  }
  0x42   : > { %v1685_v0 = vsel %vm1644_vm0, %v1147_v56, 0.0  ;;  %v1449_v1 = vmul.f32 %v14851_v34, %v910_v57  ;;  %v1450_v2 = vmul.f32 %v14853_v35, %v911_v58  ;;  %v895_v3 = vunpack.c.h.bf16 %v442_v50  ;;  %v258_v50 = vld [vmem:[%s19594_s1 + $0x90] sm:$0xff] }
  0x43   : > { %1702 = vadd.xlane.f32.xlu1 %v1701_v15  ;;  %v1686_v6 = vadd.f32 %v1685_v0, %v1684_v62  ;;  %v896_v7 = vunpack.c.l.bf16 %v453_v45  ;;  %v1433_v8 = vmul.f32 %v14849_v33, %v894_v63  ;;  %v627_v9 = vunpack.c.l.bf16 %v264_v59  ;;  %v456_v15 = vld [vmem:[%s19594_s1 + $0x534] sm:$0xff]  ;;  %v460_v63 = vld [vmem:[%s19594_s1 + $0x54c] sm:$0xff] }
  0x44   : > { %v2189_v10 = vadd.f32 %v1449_v1, %v1448_v60  ;;  %v2190_v11 = vsel %vm1644_vm0, %v1450_v2, 0.0  ;;  %v1434_v12 = vmul.f32 %v14851_v34, %v895_v3  ;;  %v628_v13 = vunpack.c.h.bf16 %v264_v59 }
  0x45   : > { %1687 = vadd.xlane.f32.xlu0 %v1686_v6  ;;  %v1435_v14 = vmul.f32 %v14853_v35, %v896_v7  ;;  %v629_v16 = vunpack.c.h.bf16 %v265_v4  ;;  %v1166_v17 = vmul.f32 %v14849_v33, %v627_v9  ;;  %v612_v18 = vunpack.c.l.bf16 %v254_v5  ;;  %v450_v9 = vld [vmem:[%s19594_s1 + $0x510] sm:$0xff] }
  0x46   : > { %v2191_v19 = vadd.f32 %v2190_v11, %v2189_v10  ;;  %v2164_v20 = vadd.f32 %v1434_v12, %v1433_v8  ;;  %v1167_v21 = vmul.f32 %v14851_v34, %v628_v13  ;;  %v613_v22 = vunpack.c.h.bf16 %v254_v5 }
  0x47   : > { %2182 = vadd.xlane.f32.xlu1 %v2181_v42  ;;  %v2165_v24 = vsel %vm1644_vm0, %v1435_v14, 0.0  ;;  %v1168_v25 = vmul.f32 %v14853_v35, %v629_v16  ;;  %v614_v26 = vunpack.c.l.bf16 %v265_v4  ;;  %v1151_v28 = vmul.f32 %v14849_v33, %v612_v18  ;;  %v461_v4 = vld [vmem:[%s19594_s1 + $0x518] ss:$60 sps:$4 sm:$0xff]  }
  0x48   : > { %v2166_v30 = vadd.f32 %v2165_v24, %v2164_v20  ;;  %v1719_v31 = vadd.f32 %v1167_v21, %v1166_v17  ;;  %v1152_v32 = vmul.f32 %v14851_v34, %v613_v22  ;;  %v915_v36 = vunpack.c.l.bf16 %v456_v15 }
  0x49   : > { %v1720_v37 = vsel %vm1644_vm0, %v1168_v25, 0.0  ;;  %v1153_v39 = vmul.f32 %v14853_v35, %v614_v26  ;;  %v916_v27 = vunpack.c.h.bf16 %v456_v15  ;;  %v917_v40 = vunpack.c.h.bf16 %v457_v23  ;;  %v272_v15 = vld [vmem:[%s19594_s1 + $0xe4] sm:$0xff] }
  0x4a   : > { %2167 = vadd.xlane.f32.xlu0 %v2166_v30  ;;  %v1721_v42 = vadd.f32 %v1720_v37, %v1719_v31  ;;  %v1694_v43 = vadd.f32 %v1152_v32, %v1151_v28  ;;  %v1454_v38 = vmul.f32 %v14849_v33, %v915_v36  ;;  %v900_v44 = vunpack.c.l.bf16 %v446_v29  ;;  %v273_v28 = vld [vmem:[%s19594_s1 + $0xb0] ss:$60 sps:$4 sm:$0xff]  }
  0x4b   : > { %1712 = vadd.xlane.f32.xlu1 %v1711_v61  ;;  %v1695_v45 = vsel %vm1644_vm0, %v1153_v39, 0.0  ;;  %v1455_v46 = vmul.f32 %v14851_v34, %v916_v27  ;;  %v1456_v47 = vmul.f32 %v14853_v35, %v917_v40  ;;  %v901_v48 = vunpack.c.h.bf16 %v446_v29  ;;  %v262_v29 = vld [vmem:[%s19594_s1 + $0xa8] sm:$0xff] }
  0x4c   : > { %v1696_v51 = vadd.f32 %v1695_v45, %v1694_v43  ;;  %v902_v52 = vunpack.c.l.bf16 %v457_v23  ;;  %v1439_v53 = vmul.f32 %v14849_v33, %v900_v44  ;;  %v633_v54 = vunpack.c.l.bf16 %v268_v41  ;;  %v464_v44 = vld [vmem:[%s19594_s1 + $0x564] sm:$0xff] }
  0x4d   : > { %v2199_v55 = vadd.f32 %v1455_v46, %v1454_v38  ;;  %v2200_v56 = vsel %vm1644_vm0, %v1456_v47, 0.0  ;;  %v1440_v57 = vmul.f32 %v14851_v34, %v901_v48  ;;  %v634_v58 = vunpack.c.h.bf16 %v268_v41 }
  0x4e   : > { %1697 = vadd.xlane.f32.xlu0 %v1696_v51  ;;  %v1441_v59 = vmul.f32 %v14853_v35, %v902_v52  ;;  %v635_v61 = vunpack.c.h.bf16 %v269_v49  ;;  %v1172_v62 = vmul.f32 %v14849_v33, %v633_v54  ;;  %v618_v60 = vunpack.c.l.bf16 %v258_v50  ;;  %v454_v54 = vld [vmem:[%s19594_s1 + $0x528] sm:$0xff] }
  0x4f   : > { %2192 = vadd.xlane.f32.xlu1 %v2191_v19  ;;  %v2201_v0 = vadd.f32 %v2200_v56, %v2199_v55  ;;  %v2174_v1 = vadd.f32 %v1440_v57, %v1439_v53  ;;  %v1173_v2 = vmul.f32 %v14851_v34, %v634_v58  ;;  %v619_v3 = vunpack.c.h.bf16 %v258_v50 }
  0x50   : > { %v2175_v5 = vsel %vm1644_vm0, %v1441_v59, 0.0  ;;  %v1174_v6 = vmul.f32 %v14853_v35, %v635_v61  ;;  %v620_v7 = vunpack.c.l.bf16 %v269_v49  ;;  %v1157_v8 = vmul.f32 %v14849_v33, %v618_v60  ;;  %v465_v49 = vld [vmem:[%s19594_s1 + $0x530] ss:$60 sps:$4 sm:$0xff]  }
  0x51   : > { %v2176_v10 = vadd.f32 %v2175_v5, %v2174_v1  ;;  %v1729_v11 = vadd.f32 %v1173_v2, %v1172_v62  ;;  %v1158_v12 = vmul.f32 %v14851_v34, %v619_v3  ;;  %v921_v13 = vunpack.c.l.bf16 %v460_v63 }
  0x52   : > { %v1730_v14 = vsel %vm1644_vm0, %v1174_v6, 0.0  ;;  %v1159_v16 = vmul.f32 %v14853_v35, %v620_v7  ;;  %v922_v17 = vunpack.c.h.bf16 %v460_v63  ;;  %v923_v18 = vunpack.c.h.bf16 %v461_v4  ;;  %v276_v63 = vld [vmem:[%s19594_s1 + $0xfc] sm:$0xff] }
  0x53   : > { %1722 = vadd.xlane.f32.xlu1 %v1721_v42  ;;  %2177 = vadd.xlane.f32.xlu0 %v2176_v10  ;;  %v1731_v19 = vadd.f32 %v1730_v14, %v1729_v11  ;;  %v1704_v20 = vadd.f32 %v1158_v12, %v1157_v8  ;;  %v1460_v21 = vmul.f32 %v14849_v33, %v921_v13  ;;  %v906_v22 = vunpack.c.l.bf16 %v450_v9  ;;  %v277_v8 = vld [vmem:[%s19594_s1 + $0xc8] ss:$60 sps:$4 sm:$0xff]  }
  0x54   : > { %v1705_v23 = vsel %vm1644_vm0, %v1159_v16, 0.0  ;;  %v1461_v24 = vmul.f32 %v14851_v34, %v922_v17  ;;  %v1462_v25 = vmul.f32 %v14853_v35, %v923_v18  ;;  %v907_v26 = vunpack.c.h.bf16 %v450_v9  ;;  %v266_v9 = vld [vmem:[%s19594_s1 + $0xc0] sm:$0xff] }
  0x55   : > { %v1706_v30 = vadd.f32 %v1705_v23, %v1704_v20  ;;  %v908_v31 = vunpack.c.l.bf16 %v461_v4  ;;  %v1445_v32 = vmul.f32 %v14849_v33, %v906_v22  ;;  %v639_v36 = vunpack.c.l.bf16 %v272_v15  ;;  %v468_v22 = vld [vmem:[%s19594_s1 + $0x57c] sm:$0xff] }
  0x56   : > { %v2209_v37 = vadd.f32 %v1461_v24, %v1460_v21  ;;  %v2210_v39 = vsel %vm1644_vm0, %v1462_v25, 0.0  ;;  %v1446_v27 = vmul.f32 %v14851_v34, %v907_v26  ;;  %v640_v40 = vunpack.c.h.bf16 %v272_v15 }
  0x57   : > { %2202 = vadd.xlane.f32.xlu1 %v2201_v0  ;;  %1707 = vadd.xlane.f32.xlu0 %v1706_v30  ;;  %v1447_v41 = vmul.f32 %v14853_v35, %v908_v31  ;;  %v641_v42 = vunpack.c.h.bf16 %v273_v28  ;;  %v1178_v43 = vmul.f32 %v14849_v33, %v639_v36  ;;  %v624_v38 = vunpack.c.l.bf16 %v262_v29  ;;  %v458_v36 = vld [vmem:[%s19594_s1 + $0x540] sm:$0xff] }
  0x58   : > { %v2211_v45 = vadd.f32 %v2210_v39, %v2209_v37  ;;  %v2184_v46 = vadd.f32 %v1446_v27, %v1445_v32  ;;  %v1179_v47 = vmul.f32 %v14851_v34, %v640_v40  ;;  %v625_v48 = vunpack.c.h.bf16 %v262_v29 }
  0x59   : > { %v2185_v50 = vsel %vm1644_vm0, %v1447_v41, 0.0  ;;  %v1180_v51 = vmul.f32 %v14853_v35, %v641_v42  ;;  %v626_v52 = vunpack.c.l.bf16 %v273_v28  ;;  %v1163_v53 = vmul.f32 %v14849_v33, %v624_v38  ;;  %v469_v28 = vld [vmem:[%s19594_s1 + $0x548] ss:$60 sps:$4 sm:$0xff]  }
  0x5a   : > { %v2186_v55 = vadd.f32 %v2185_v50, %v2184_v46  ;;  %v1739_v56 = vadd.f32 %v1179_v47, %v1178_v43  ;;  %v1164_v57 = vmul.f32 %v14851_v34, %v625_v48  ;;  %v927_v58 = vunpack.c.l.bf16 %v464_v44 }
  0x5b   : > { %1732 = vadd.xlane.f32.xlu1 %v1731_v19  ;;  %v1740_v59 = vsel %vm1644_vm0, %v1180_v51, 0.0  ;;  %v1165_v61 = vmul.f32 %v14853_v35, %v626_v52  ;;  %v928_v62 = vunpack.c.h.bf16 %v464_v44  ;;  %v929_v60 = vunpack.c.h.bf16 %v465_v49  ;;  %v280_v44 = vld [vmem:[%s19594_s1 + $0x114] sm:$0xff] }
  0x5c   : > { %2187 = vadd.xlane.f32.xlu0 %v2186_v55  ;;  %v1741_v0 = vadd.f32 %v1740_v59, %v1739_v56  ;;  %v1714_v1 = vadd.f32 %v1164_v57, %v1163_v53  ;;  %v1466_v2 = vmul.f32 %v14849_v33, %v927_v58  ;;  %v912_v3 = vunpack.c.l.bf16 %v454_v54  ;;  %v281_v53 = vld [vmem:[%s19594_s1 + $0xe0] ss:$60 sps:$4 sm:$0xff]  }
  0x5d   : > { %v1715_v4 = vsel %vm1644_vm0, %v1165_v61, 0.0  ;;  %v1467_v5 = vmul.f32 %v14851_v34, %v928_v62  ;;  %v1468_v6 = vmul.f32 %v14853_v35, %v929_v60  ;;  %v913_v7 = vunpack.c.h.bf16 %v454_v54  ;;  %v270_v54 = vld [vmem:[%s19594_s1 + $0xd8] sm:$0xff] }
  0x5e   : > { %v1716_v10 = vadd.f32 %v1715_v4, %v1714_v1  ;;  %v914_v11 = vunpack.c.l.bf16 %v465_v49  ;;  %v1451_v12 = vmul.f32 %v14849_v33, %v912_v3  ;;  %v645_v13 = vunpack.c.l.bf16 %v276_v63  ;;  %v472_v3 = vld [vmem:[%s19594_s1 + $0x594] sm:$0xff] }
  0x5f   : > { %2212 = vadd.xlane.f32.xlu1 %v2211_v45  ;;  %v2219_v14 = vadd.f32 %v1467_v5, %v1466_v2  ;;  %v2220_v16 = vsel %vm1644_vm0, %v1468_v6, 0.0  ;;  %v1452_v17 = vmul.f32 %v14851_v34, %v913_v7  ;;  %v646_v18 = vunpack.c.h.bf16 %v276_v63 }
  0x60   : > { %1717 = vadd.xlane.f32.xlu0 %v1716_v10  ;;  %v1453_v15 = vmul.f32 %v14853_v35, %v914_v11  ;;  %v647_v19 = vunpack.c.h.bf16 %v277_v8  ;;  %v1184_v20 = vmul.f32 %v14849_v33, %v645_v13  ;;  %v630_v21 = vunpack.c.l.bf16 %v266_v9  ;;  %v462_v13 = vld [vmem:[%s19594_s1 + $0x558] sm:$0xff] }
  0x61   : > { %v2221_v23 = vadd.f32 %v2220_v16, %v2219_v14  ;;  %v2194_v24 = vadd.f32 %v1452_v17, %v1451_v12  ;;  %v1185_v25 = vmul.f32 %v14851_v34, %v646_v18  ;;  %v631_v26 = vunpack.c.h.bf16 %v266_v9 }
  0x62   : > { %v2195_v29 = vsel %vm1644_vm0, %v1453_v15, 0.0  ;;  %v1186_v30 = vmul.f32 %v14853_v35, %v647_v19  ;;  %v632_v31 = vunpack.c.l.bf16 %v277_v8  ;;  %v1169_v32 = vmul.f32 %v14849_v33, %v630_v21  ;;  %v473_v8 = vld [vmem:[%s19594_s1 + $0x560] ss:$60 sps:$4 sm:$0xff]  }
  0x63   : > { %1742 = vadd.xlane.f32.xlu1 %v1741_v0  ;;  %v2196_v37 = vadd.f32 %v2195_v29, %v2194_v24  ;;  %v1749_v39 = vadd.f32 %v1185_v25, %v1184_v20  ;;  %v1170_v27 = vmul.f32 %v14851_v34, %v631_v26  ;;  %v933_v40 = vunpack.c.l.bf16 %v468_v22 }
  0x64   : > { %v1750_v41 = vsel %vm1644_vm0, %v1186_v30, 0.0  ;;  %v1171_v42 = vmul.f32 %v14853_v35, %v632_v31  ;;  %v934_v43 = vunpack.c.h.bf16 %v468_v22  ;;  %v935_v38 = vunpack.c.h.bf16 %v469_v28  ;;  %v284_v22 = vld [vmem:[%s19594_s1 + $0x12c] sm:$0xff] }
  0x65   : > { %2197 = vadd.xlane.f32.xlu0 %v2196_v37  ;;  %v1751_v45 = vadd.f32 %v1750_v41, %v1749_v39  ;;  %v1724_v46 = vadd.f32 %v1170_v27, %v1169_v32  ;;  %v1472_v47 = vmul.f32 %v14849_v33, %v933_v40  ;;  %v918_v48 = vunpack.c.l.bf16 %v458_v36  ;;  %v285_v32 = vld [vmem:[%s19594_s1 + $0xf8] ss:$60 sps:$4 sm:$0xff]  }
  0x66   : > { %v1725_v49 = vsel %vm1644_vm0, %v1171_v42, 0.0  ;;  %v1473_v50 = vmul.f32 %v14851_v34, %v934_v43  ;;  %v1474_v51 = vmul.f32 %v14853_v35, %v935_v38  ;;  %v919_v52 = vunpack.c.h.bf16 %v458_v36  ;;  %v274_v36 = vld [vmem:[%s19594_s1 + $0xf0] sm:$0xff] }
  0x67   : > { %2222 = vadd.xlane.f32.xlu1 %v2221_v23  ;;  %v1726_v55 = vadd.f32 %v1725_v49, %v1724_v46  ;;  %v920_v56 = vunpack.c.l.bf16 %v469_v28  ;;  %v1457_v57 = vmul.f32 %v14849_v33, %v918_v48  ;;  %v651_v58 = vunpack.c.l.bf16 %v280_v44  ;;  %v476_v48 = vld [vmem:[%s19594_s1 + $0x5ac] sm:$0xff] }
  0x68   : > { %v2229_v59 = vadd.f32 %v1473_v50, %v1472_v47  ;;  %v2230_v61 = vsel %vm1644_vm0, %v1474_v51, 0.0  ;;  %v1458_v62 = vmul.f32 %v14851_v34, %v919_v52  ;;  %v652_v60 = vunpack.c.h.bf16 %v280_v44 }
  0x69   : > { %1727 = vadd.xlane.f32.xlu0 %v1726_v55  ;;  %v1459_v63 = vmul.f32 %v14853_v35, %v920_v56  ;;  %v653_v0 = vunpack.c.h.bf16 %v281_v53  ;;  %v1190_v1 = vmul.f32 %v14849_v33, %v651_v58  ;;  %v636_v2 = vunpack.c.l.bf16 %v270_v54  ;;  %v466_v58 = vld [vmem:[%s19594_s1 + $0x570] sm:$0xff] }
  0x6a   : > { %v2231_v4 = vadd.f32 %v2230_v61, %v2229_v59  ;;  %v2204_v5 = vadd.f32 %v1458_v62, %v1457_v57  ;;  %v1191_v6 = vmul.f32 %v14851_v34, %v652_v60  ;;  %v637_v7 = vunpack.c.h.bf16 %v270_v54 }
  0x6b   : > { %1752 = vadd.xlane.f32.xlu1 %v1751_v45  ;;  %v2205_v9 = vsel %vm1644_vm0, %v1459_v63, 0.0  ;;  %v1192_v10 = vmul.f32 %v14853_v35, %v653_v0  ;;  %v638_v11 = vunpack.c.l.bf16 %v281_v53  ;;  %v1175_v12 = vmul.f32 %v14849_v33, %v636_v2  ;;  %v477_v53 = vld [vmem:[%s19594_s1 + $0x578] ss:$60 sps:$4 sm:$0xff]  }
  0x6c   : > { %v2206_v14 = vadd.f32 %v2205_v9, %v2204_v5  ;;  %v1759_v16 = vadd.f32 %v1191_v6, %v1190_v1  ;;  %v1176_v17 = vmul.f32 %v14851_v34, %v637_v7  ;;  %v939_v18 = vunpack.c.l.bf16 %v472_v3 }
  0x6d   : > { %v1760_v15 = vsel %vm1644_vm0, %v1192_v10, 0.0  ;;  %v1177_v19 = vmul.f32 %v14853_v35, %v638_v11  ;;  %v940_v20 = vunpack.c.h.bf16 %v472_v3  ;;  %v941_v21 = vunpack.c.h.bf16 %v473_v8  ;;  %v288_v3 = vld [vmem:[%s19594_s1 + $0x144] sm:$0xff] }
  0x6e   : > { %2207 = vadd.xlane.f32.xlu0 %v2206_v14  ;;  %v1761_v23 = vadd.f32 %v1760_v15, %v1759_v16  ;;  %v1734_v24 = vadd.f32 %v1176_v17, %v1175_v12  ;;  %v1478_v25 = vmul.f32 %v14849_v33, %v939_v18  ;;  %v924_v26 = vunpack.c.l.bf16 %v462_v13  ;;  %v289_v12 = vld [vmem:[%s19594_s1 + $0x110] ss:$60 sps:$4 sm:$0xff]  }
  0x6f   : > { %2232 = vadd.xlane.f32.xlu1 %v2231_v4  ;;  %v1735_v28 = vsel %vm1644_vm0, %v1177_v19, 0.0  ;;  %v1479_v29 = vmul.f32 %v14851_v34, %v940_v20  ;;  %v1480_v30 = vmul.f32 %v14853_v35, %v941_v21  ;;  %v925_v31 = vunpack.c.h.bf16 %v462_v13  ;;  %v278_v13 = vld [vmem:[%s19594_s1 + $0x108] sm:$0xff] }
  0x70   : > { %v1736_v37 = vadd.f32 %v1735_v28, %v1734_v24  ;;  %v926_v39 = vunpack.c.l.bf16 %v473_v8  ;;  %v1463_v27 = vmul.f32 %v14849_v33, %v924_v26  ;;  %v657_v40 = vunpack.c.l.bf16 %v284_v22  ;;  %v480_v26 = vld [vmem:[%s19594_s1 + $0x5c4] sm:$0xff] }
  0x71   : > { %v2239_v41 = vadd.f32 %v1479_v29, %v1478_v25  ;;  %v2240_v42 = vsel %vm1644_vm0, %v1480_v30, 0.0  ;;  %v1464_v43 = vmul.f32 %v14851_v34, %v925_v31  ;;  %v658_v38 = vunpack.c.h.bf16 %v284_v22 }
  0x72   : > { %1737 = vadd.xlane.f32.xlu0 %v1736_v37  ;;  %v1465_v44 = vmul.f32 %v14853_v35, %v926_v39  ;;  %v659_v45 = vunpack.c.h.bf16 %v285_v32  ;;  %v1196_v46 = vmul.f32 %v14849_v33, %v657_v40  ;;  %v642_v47 = vunpack.c.l.bf16 %v274_v36  ;;  %v470_v40 = vld [vmem:[%s19594_s1 + $0x588] sm:$0xff] }
  0x73   : > { %1762 = vadd.xlane.f32.xlu1 %v1761_v23  ;;  %v2241_v49 = vadd.f32 %v2240_v42, %v2239_v41  ;;  %v2214_v50 = vadd.f32 %v1464_v43, %v1463_v27  ;;  %v1197_v51 = vmul.f32 %v14851_v34, %v658_v38  ;;  %v643_v52 = vunpack.c.h.bf16 %v274_v36 }
  0x74   : > { %v2215_v54 = vsel %vm1644_vm0, %v1465_v44, 0.0  ;;  %v1198_v55 = vmul.f32 %v14853_v35, %v659_v45  ;;  %v644_v56 = vunpack.c.l.bf16 %v285_v32  ;;  %v1181_v57 = vmul.f32 %v14849_v33, %v642_v47  ;;  %v481_v32 = vld [vmem:[%s19594_s1 + $0x590] ss:$60 sps:$4 sm:$0xff]  }
  0x75   : > { %v2216_v59 = vadd.f32 %v2215_v54, %v2214_v50  ;;  %v1769_v61 = vadd.f32 %v1197_v51, %v1196_v46  ;;  %v1182_v62 = vmul.f32 %v14851_v34, %v643_v52  ;;  %v945_v60 = vunpack.c.l.bf16 %v476_v48 }
  0x76   : > { %v1770_v63 = vsel %vm1644_vm0, %v1198_v55, 0.0  ;;  %v1183_v0 = vmul.f32 %v14853_v35, %v644_v56  ;;  %v946_v1 = vunpack.c.h.bf16 %v476_v48  ;;  %v947_v2 = vunpack.c.h.bf16 %v477_v53  ;;  %v292_v48 = vld [vmem:[%s19594_s1 + $0x15c] sm:$0xff] }
  0x77   : > { %2242 = vadd.xlane.f32.xlu1 %v2241_v49  ;;  %2217 = vadd.xlane.f32.xlu0 %v2216_v59  ;;  %v1771_v4 = vadd.f32 %v1770_v63, %v1769_v61  ;;  %v1744_v5 = vadd.f32 %v1182_v62, %v1181_v57  ;;  %v1484_v6 = vmul.f32 %v14849_v33, %v945_v60  ;;  %v930_v7 = vunpack.c.l.bf16 %v466_v58  ;;  %v293_v57 = vld [vmem:[%s19594_s1 + $0x128] ss:$60 sps:$4 sm:$0xff]  }
  0x78   : > { %v1745_v8 = vsel %vm1644_vm0, %v1183_v0, 0.0  ;;  %v1485_v9 = vmul.f32 %v14851_v34, %v946_v1  ;;  %v1486_v10 = vmul.f32 %v14853_v35, %v947_v2  ;;  %v931_v11 = vunpack.c.h.bf16 %v466_v58  ;;  %v282_v58 = vld [vmem:[%s19594_s1 + $0x120] sm:$0xff] }
  0x79   : > { %v1746_v14 = vadd.f32 %v1745_v8, %v1744_v5  ;;  %v932_v16 = vunpack.c.l.bf16 %v477_v53  ;;  %v1469_v17 = vmul.f32 %v14849_v33, %v930_v7  ;;  %v663_v18 = vunpack.c.l.bf16 %v288_v3  ;;  %v484_v7 = vld [vmem:[%s19594_s1 + $0x5dc] sm:$0xff] }
  0x7a   : > { %v2249_v15 = vadd.f32 %v1485_v9, %v1484_v6  ;;  %v2250_v19 = vsel %vm1644_vm0, %v1486_v10, 0.0  ;;  %v1470_v20 = vmul.f32 %v14851_v34, %v931_v11  ;;  %v664_v21 = vunpack.c.h.bf16 %v288_v3 }
  0x7b   : > { %1772 = vadd.xlane.f32.xlu1 %v1771_v4  ;;  %1747 = vadd.xlane.f32.xlu0 %v1746_v14  ;;  %v1471_v22 = vmul.f32 %v14853_v35, %v932_v16  ;;  %v665_v23 = vunpack.c.h.bf16 %v289_v12  ;;  %v1202_v24 = vmul.f32 %v14849_v33, %v663_v18  ;;  %v648_v25 = vunpack.c.l.bf16 %v278_v13  ;;  %v474_v18 = vld [vmem:[%s19594_s1 + $0x5a0] sm:$0xff] }
  0x7c   : > { %v2251_v28 = vadd.f32 %v2250_v19, %v2249_v15  ;;  %v2224_v29 = vadd.f32 %v1470_v20, %v1469_v17  ;;  %v1203_v30 = vmul.f32 %v14851_v34, %v664_v21  ;;  %v649_v31 = vunpack.c.h.bf16 %v278_v13 }
  0x7d   : > { %v2225_v36 = vsel %vm1644_vm0, %v1471_v22, 0.0  ;;  %v1204_v37 = vmul.f32 %v14853_v35, %v665_v23  ;;  %v650_v39 = vunpack.c.l.bf16 %v289_v12  ;;  %v1187_v27 = vmul.f32 %v14849_v33, %v648_v25  ;;  %v485_v12 = vld [vmem:[%s19594_s1 + $0x5a8] ss:$60 sps:$4 sm:$0xff]  }
  0x7e   : > { %v2226_v41 = vadd.f32 %v2225_v36, %v2224_v29  ;;  %v1779_v42 = vadd.f32 %v1203_v30, %v1202_v24  ;;  %v1188_v43 = vmul.f32 %v14851_v34, %v649_v31  ;;  %v951_v38 = vunpack.c.l.bf16 %v480_v26 }
  0x7f   : > { %2252 = vadd.xlane.f32.xlu1 %v2251_v28  ;;  %v1780_v44 = vsel %vm1644_vm0, %v1204_v37, 0.0  ;;  %v1189_v45 = vmul.f32 %v14853_v35, %v650_v39  ;;  %v952_v46 = vunpack.c.h.bf16 %v480_v26  ;;  %v953_v47 = vunpack.c.h.bf16 %v481_v32  ;;  %v296_v26 = vld [vmem:[%s19594_s1 + $0x174] sm:$0xff] }
  0x80   : > { %2227 = vadd.xlane.f32.xlu0 %v2226_v41  ;;  %v1781_v49 = vadd.f32 %v1780_v44, %v1779_v42  ;;  %v1754_v50 = vadd.f32 %v1188_v43, %v1187_v27  ;;  %v1490_v51 = vmul.f32 %v14849_v33, %v951_v38  ;;  %v936_v52 = vunpack.c.l.bf16 %v470_v40  ;;  %v297_v27 = vld [vmem:[%s19594_s1 + $0x140] ss:$60 sps:$4 sm:$0xff]  }
  0x81   : > { %v1755_v53 = vsel %vm1644_vm0, %v1189_v45, 0.0  ;;  %v1491_v54 = vmul.f32 %v14851_v34, %v952_v46  ;;  %v1492_v55 = vmul.f32 %v14853_v35, %v953_v47  ;;  %v937_v56 = vunpack.c.h.bf16 %v470_v40  ;;  %v286_v40 = vld [vmem:[%s19594_s1 + $0x138] sm:$0xff] }
  0x82   : > { %v1756_v59 = vadd.f32 %v1755_v53, %v1754_v50  ;;  %v938_v61 = vunpack.c.l.bf16 %v481_v32  ;;  %v1475_v62 = vmul.f32 %v14849_v33, %v936_v52  ;;  %v669_v60 = vunpack.c.l.bf16 %v292_v48  ;;  %v488_v52 = vld [vmem:[%s19594_s1 + $0x5f4] sm:$0xff] }
  0x83   : > { %1782 = vadd.xlane.f32.xlu1 %v1781_v49  ;;  %v2259_v63 = vadd.f32 %v1491_v54, %v1490_v51  ;;  %v2260_v0 = vsel %vm1644_vm0, %v1492_v55, 0.0  ;;  %v1476_v1 = vmul.f32 %v14851_v34, %v937_v56  ;;  %v670_v2 = vunpack.c.h.bf16 %v292_v48 }
  0x84   : > { %1757 = vadd.xlane.f32.xlu0 %v1756_v59  ;;  %v1477_v3 = vmul.f32 %v14853_v35, %v938_v61  ;;  %v671_v4 = vunpack.c.h.bf16 %v293_v57  ;;  %v1208_v5 = vmul.f32 %v14849_v33, %v669_v60  ;;  %v654_v6 = vunpack.c.l.bf16 %v282_v58  ;;  %v478_v60 = vld [vmem:[%s19594_s1 + $0x5b8] sm:$0xff] }
  0x85   : > { %v2261_v8 = vadd.f32 %v2260_v0, %v2259_v63  ;;  %v2234_v9 = vadd.f32 %v1476_v1, %v1475_v62  ;;  %v1209_v10 = vmul.f32 %v14851_v34, %v670_v2  ;;  %v655_v11 = vunpack.c.h.bf16 %v282_v58 }
  0x86   : > { %v2235_v13 = vsel %vm1644_vm0, %v1477_v3, 0.0  ;;  %v1210_v14 = vmul.f32 %v14853_v35, %v671_v4  ;;  %v656_v16 = vunpack.c.l.bf16 %v293_v57  ;;  %v1193_v17 = vmul.f32 %v14849_v33, %v654_v6  ;;  %v489_v57 = vld [vmem:[%s19594_s1 + $0x5c0] ss:$60 sps:$4 sm:$0xff]  }
  0x87   : > { %2262 = vadd.xlane.f32.xlu1 %v2261_v8  ;;  %v2236_v15 = vadd.f32 %v2235_v13, %v2234_v9  ;;  %v1789_v19 = vadd.f32 %v1209_v10, %v1208_v5  ;;  %v1194_v20 = vmul.f32 %v14851_v34, %v655_v11  ;;  %v957_v21 = vunpack.c.l.bf16 %v484_v7 }
  0x88   : > { %v1790_v22 = vsel %vm1644_vm0, %v1210_v14, 0.0  ;;  %v1195_v23 = vmul.f32 %v14853_v35, %v656_v16  ;;  %v958_v24 = vunpack.c.h.bf16 %v484_v7  ;;  %v959_v25 = vunpack.c.h.bf16 %v485_v12  ;;  %v290_v7 = vld [vmem:[%s19594_s1 + $0x150] sm:$0xff] }
  0x89   : > { %2237 = vadd.xlane.f32.xlu0 %v2236_v15  ;;  %v1791_v28 = vadd.f32 %v1790_v22, %v1789_v19  ;;  %v1764_v29 = vadd.f32 %v1194_v20, %v1193_v17  ;;  %v1496_v30 = vmul.f32 %v14849_v33, %v957_v21  ;;  %v942_v31 = vunpack.c.l.bf16 %v474_v18  ;;  %v291_v17 = vld [vmem:[%s19594_s1 + $0x158] ss:$24 sps:$4 sm:$0xff]  }
  0x8a   : > { %v1765_v32 = vsel %vm1644_vm0, %v1195_v23, 0.0  ;;  %v1497_v36 = vmul.f32 %v14851_v34, %v958_v24  ;;  %v1498_v37 = vmul.f32 %v14853_v35, %v959_v25  ;;  %v943_v39 = vunpack.c.h.bf16 %v474_v18  ;;  %v482_v18 = vld [vmem:[%s19594_s1 + $0x5d0] sm:$0xff] }
  0x8b   : > { %1792 = vadd.xlane.f32.xlu1 %v1791_v28  ;;  %v1766_v41 = vadd.f32 %v1765_v32, %v1764_v29  ;;  %v944_v42 = vunpack.c.l.bf16 %v485_v12  ;;  %v1481_v43 = vmul.f32 %v14849_v33, %v942_v31  ;;  %v675_v38 = vunpack.c.l.bf16 %v296_v26  ;;  %v294_v32 = vld [vmem:[%s19594_s1 + $0x168] sm:$0xff] }
  0x8c   : > { %v2269_v44 = vadd.f32 %v1497_v36, %v1496_v30  ;;  %v2270_v45 = vsel %vm1644_vm0, %v1498_v37, 0.0  ;;  %v1482_v46 = vmul.f32 %v14851_v34, %v943_v39  ;;  %v676_v47 = vunpack.c.h.bf16 %v296_v26  ;;  %v483_v26 = vld [vmem:[%s19594_s1 + $0x5d8] ss:$24 sps:$4 sm:$0xff]  }
  0x8d   : > { %1767 = vadd.xlane.f32.xlu0 %v1766_v41  ;;  %v1483_v48 = vmul.f32 %v14853_v35, %v944_v42  ;;  %v677_v49 = vunpack.c.h.bf16 %v297_v27  ;;  %v1214_v50 = vmul.f32 %v14849_v33, %v675_v38  ;;  %v660_v51 = vunpack.c.l.bf16 %v286_v40  ;;  %v486_v38 = vld [vmem:[%s19594_s1 + $0x5e8] sm:$0xff] }
  0x8e   : > { %v2271_v53 = vadd.f32 %v2270_v45, %v2269_v44  ;;  %v2244_v54 = vadd.f32 %v1482_v46, %v1481_v43  ;;  %v1215_v55 = vmul.f32 %v14851_v34, %v676_v47  ;;  %v661_v56 = vunpack.c.h.bf16 %v286_v40 }
  0x8f   : > { %v2245_v58 = vsel %vm1644_vm0, %v1483_v48, 0.0  ;;  %v1216_v59 = vmul.f32 %v14853_v35, %v677_v49  ;;  %v662_v61 = vunpack.c.l.bf16 %v297_v27  ;;  %v1199_v62 = vmul.f32 %v14849_v33, %v660_v51 }
  0x90   : > { %2272 = vadd.xlane.f32.xlu1 %v2271_v53  ;;  %v2246_v63 = vadd.f32 %v2245_v58, %v2244_v54  ;;  %v1799_v0 = vadd.f32 %v1215_v55, %v1214_v50  ;;  %v1200_v1 = vmul.f32 %v14851_v34, %v661_v56  ;;  %v963_v2 = vunpack.c.l.bf16 %v488_v52 }
  0x91   : > { %v1800_v3 = vsel %vm1644_vm0, %v1216_v59, 0.0  ;;  %v1201_v4 = vmul.f32 %v14853_v35, %v662_v61  ;;  %v964_v5 = vunpack.c.h.bf16 %v488_v52  ;;  %v965_v6 = vunpack.c.h.bf16 %v489_v57 }
  0x92   : > { %2247 = vadd.xlane.f32.xlu0 %v2246_v63  ;;  %v1801_v8 = vadd.f32 %v1800_v3, %v1799_v0  ;;  %v1774_v9 = vadd.f32 %v1200_v1, %v1199_v62  ;;  %v1502_v10 = vmul.f32 %v14849_v33, %v963_v2  ;;  %v948_v11 = vunpack.c.l.bf16 %v478_v60 }
  0x93   : > { %v1775_v12 = vsel %vm1644_vm0, %v1201_v4, 0.0  ;;  %v1503_v13 = vmul.f32 %v14851_v34, %v964_v5  ;;  %v1504_v14 = vmul.f32 %v14853_v35, %v965_v6  ;;  %v949_v16 = vunpack.c.h.bf16 %v478_v60 }
  0x94   : > { %1802 = vadd.xlane.f32.xlu1 %v1801_v8  ;;  %v1776_v15 = vadd.f32 %v1775_v12, %v1774_v9  ;;  %v950_v19 = vunpack.c.l.bf16 %v489_v57  ;;  %v1487_v20 = vmul.f32 %v14849_v33, %v948_v11  ;;  %v666_v21 = vunpack.c.l.bf16 %v290_v7  ;;  %v2514_v9 = vld [vmem:[%s19595_s2] sm:$0xff] }
  0x95   : > { %v2279_v22 = vadd.f32 %v1503_v13, %v1502_v10  ;;  %v2280_v23 = vsel %vm1644_vm0, %v1504_v14, 0.0  ;;  %v1488_v24 = vmul.f32 %v14851_v34, %v949_v16  ;;  %v667_v25 = vunpack.c.h.bf16 %v290_v7  ;;  %v2610_v7 = vld [vmem:[%s19595_s2 + $0x300] sm:$0xff]  ;;  %v2611_v14 = vld [vmem:[%s19595_s2 + $0x308] sm:$0xff] }
  0x96   : > { %1777 = vadd.xlane.f32.xlu0 %v1776_v15  ;;  %v1489_v28 = vmul.f32 %v14853_v35, %v950_v19  ;;  %v668_v29 = vunpack.c.l.bf16 %v291_v17  ;;  %v1205_v30 = vmul.f32 %v14849_v33, %v666_v21  ;;  %v954_v31 = vunpack.c.l.bf16 %v482_v18 }
  0x97   : > { %v2281_v36 = vadd.f32 %v2280_v23, %v2279_v22  ;;  %v2254_v37 = vadd.f32 %v1488_v24, %v1487_v20  ;;  %v1206_v39 = vmul.f32 %v14851_v34, %v667_v25  ;;  %v955_v27 = vunpack.c.h.bf16 %v482_v18  ;;  %v2517_v22 = vld [vmem:[%s19595_s2 + $0x18] sm:$0xff] }
  0x98   : > { %v2255_v40 = vsel %vm1644_vm0, %v1489_v28, 0.0  ;;  %v1207_v41 = vmul.f32 %v14853_v35, %v668_v29  ;;  %v956_v42 = vunpack.c.l.bf16 %v483_v26  ;;  %v1493_v43 = vmul.f32 %v14849_v33, %v954_v31 }
  0x99   : > { %2282 = vadd.xlane.f32.xlu1 %v2281_v36  ;;  %v2256_v44 = vadd.f32 %v2255_v40, %v2254_v37  ;;  %v1784_v45 = vadd.f32 %v1206_v39, %v1205_v30  ;;  %v1494_v46 = vmul.f32 %v14851_v34, %v955_v27  ;;  %v672_v47 = vunpack.c.l.bf16 %v294_v32  ;;  %v2519_v36 = vld [vmem:[%s19595_s2 + $0x28] sm:$0xff] }
  0x9a   : > { %v1785_v48 = vsel %vm1644_vm0, %v1207_v41, 0.0  ;;  %v1495_v49 = vmul.f32 %v14853_v35, %v956_v42  ;;  %v673_v50 = vunpack.c.h.bf16 %v294_v32  ;;  %v674_v51 = vunpack.c.h.bf16 %v291_v17  ;;  %v2515_v17 = vld [vmem:[%s19595_s2 + $0x8] sm:$0xff]  ;;  %v2612_v41 = vld [vmem:[%s19595_s2 + $0x310] sm:$0xff] }
  0x9b   : > { %2257 = vadd.xlane.f32.xlu0 %v2256_v44  ;;  %v1786_v52 = vadd.f32 %v1785_v48, %v1784_v45  ;;  %v2264_v53 = vadd.f32 %v1494_v46, %v1493_v43  ;;  %v1211_v54 = vmul.f32 %v14849_v33, %v672_v47  ;;  %v960_v55 = vunpack.c.l.bf16 %v486_v38  ;;  %v2613_v43 = vld [vmem:[%s19595_s2 + $0x318] sm:$0xff]  ;;  %v2615_v45 = vld [vmem:[%s19595_s2 + $0x328] sm:$0xff] }
  0x9c   : > { %v2265_v56 = vsel %vm1644_vm0, %v1495_v49, 0.0  ;;  %v1212_v57 = vmul.f32 %v14851_v34, %v673_v50  ;;  %v1213_v58 = vmul.f32 %v14853_v35, %v674_v51  ;;  %v961_v59 = vunpack.c.h.bf16 %v486_v38 }
  0x9d   : > { %v962_v61 = vunpack.c.h.bf16 %v483_v26  ;;  %v19599_v62 = vmov 0   ;;  %v2266_v60 = vadd.f32 %v2265_v56, %v2264_v53  ;;  %v1499_v0 = vmul.f32 %v14849_v33, %v960_v55  ;;  %v2516_v26 = vld [vmem:[%s19595_s2 + $0x10] sm:$0xff]  ;;  %v2521_v56 = vld [vmem:[%s19595_s2 + $0x38] sm:$0xff] }
  0x9e   : > { %13364 = vset.pattern.permute.xlu0 %v19599_v62  ;;  %13365 = vset.pattern.permute.xlu1 %v19599_v62  ;;  %v1794_v63 = vadd.f32 %v1212_v57, %v1211_v54  ;;  %v1500_v1 = vmul.f32 %v14851_v34, %v961_v59  ;;  %v1795_v2 = vsel %vm1644_vm0, %v1213_v58, 0.0  ;;  %v2518_v57 = vld [vmem:[%s19595_s2 + $0x20] sm:$0xff]  ;;  %vm8571_vm1 = vcmask 916480  }
  0x9f   : > { %1787 = vadd.xlane.f32.xlu0 %v1786_v52  ;;  %v1501_v3 = vmul.f32 %v14853_v35, %v962_v61  ;;  %vm11531_vm2 = vcmask 556032  }
  0xa0   : > { %v1796_v4 = vadd.f32 %v1795_v2, %v1794_v63  ;;  %v2274_v5 = vadd.f32 %v1500_v1, %v1499_v0 }
  0xa1   : > { %v2275_v6 = vsel %vm1644_vm0, %v1501_v3, 0.0  ;;  %v2617_v3 = vld [vmem:[%s19595_s2 + $0x338] sm:$0xff] }
  0xa2   : > { %v2276_v8 = vadd.f32 %v2275_v6, %v2274_v5  ;;  %v2614_v6 = vld [vmem:[%s19595_s2 + $0x320] sm:$0xff] }
  0xa3   : > { %2267 = vadd.xlane.f32.xlu0 %v2266_v60 }
  0xa7   : > { %1797 = vadd.xlane.f32.xlu0 %v1796_v4 }
  0xa8   : > { %v2128_v10 = vpop.xlane.xlu1 %2127 }
  0xa9   : > { %v2784_v11 = vadd.f32 %v2610_v7, %v2128_v10  ;;  %v1648_v12 = vpop.xlane.xlu0 %1647 }
  0xaa   : > { %v2688_v13 = vadd.f32 %v2514_v9, %v1648_v12 }
  0xab   : > { %2277 = vadd.xlane.f32.xlu0 %v2276_v8  ;;  %v11867_v16 = vmul.f32 -1.442695, %v2784_v11 }
  0xac   : > { %v11771_v18 = vmul.f32 -1.442695, %v2688_v13  ;;  %v2133_v15 = vpop.xlane.xlu1 %2132  ;;  %v2523_v13 = vld [vmem:[%s19595_s2 + $0x48] sm:$0xff] }
  0xad   : > { %14065 = vpow2.f32 %v11867_v16  ;;  %v2785_v19 = vadd.f32 %v2611_v14, %v2133_v15  ;;  %v1653_v20 = vpop.xlane.xlu0 %1652 }
  0xae   : > { %14067 = vpow2.f32 %v11771_v18  ;;  %v2689_v21 = vadd.f32 %v2515_v17, %v1653_v20  ;;  %v2520_v18 = vld [vmem:[%s19595_s2 + $0x30] sm:$0xff] }
  0xaf   : > { %v11868_v23 = vmul.f32 -1.442695, %v2785_v19 }
  0xb0   : > { %v11772_v24 = vmul.f32 -1.442695, %v2689_v21  ;;  %v1663_v25 = vpop.xlane.xlu1 %1662 }
  0xb1   : > { %v2691_v28 = vadd.f32 %v2517_v22, %v1663_v25 }
  0xb2   : > { %14069 = vpow2.f32 %v11772_v24 }
  0xb3   : > { %v1658_v29 = vpop.xlane.xlu0 %1657  ;;  %14071 = vpow2.f32 %v11868_v23  ;;  %v11774_v32 = vmul.f32 -1.442695, %v2691_v28  ;;  %v2619_v28 = vld [vmem:[%s19595_s2 + $0x348] sm:$0xff] }
  0xb4   : > { %v2143_v30 = vpop.xlane.xlu1 %2142  ;;  %v2690_v31 = vadd.f32 %v2516_v26, %v1658_v29 }
  0xb5   : > { %v2787_v50 = vadd.f32 %v2613_v43, %v2143_v30 }
  0xb6   : > { %v11773_v37 = vmul.f32 -1.442695, %v2690_v31 }
  0xb7   : > { %v14066_v39 = vpop.eup %14065  ;;  %v11870_v59 = vmul.f32 -1.442695, %v2787_v50 }
  0xb8   : > { %v14068_v27 = vpop.eup %14067  ;;  %v1673_v40 = vpop.xlane.xlu1 %1672  ;;  %14073 = vpow2.f32 %v11773_v37  ;;  %v3480_v44 = vadd.f32 1.0, %v14066_v39 }
  0xb9   : > { %v3384_v42 = vadd.f32 1.0, %v14068_v27  ;;  %v2693_v38 = vadd.f32 %v2519_v36, %v1673_v40  ;;  %14075 = vpow2.f32 %v11774_v32  ;;  %v2616_v27 = vld [vmem:[%s19595_s2 + $0x330] sm:$0xff] }
  0xba   : > { %v2138_v46 = vpop.xlane.xlu0 %2137 }
  0xbb   : > { %14077 = vrcp.f32 %v3384_v42  ;;  %v11776_v47 = vmul.f32 -1.442695, %v2693_v38  ;;  %v2786_v48 = vadd.f32 %v2612_v41, %v2138_v46  ;;  %v2525_v42 = vld [vmem:[%s19595_s2 + $0x58] sm:$0xff] }
  0xbc   : > { %v14070_v49 = vpop.eup %14069  ;;  %v2153_v51 = vpop.xlane.xlu1 %2152 }
  0xbd   : > { %v3385_v52 = vadd.f32 1.0, %v14070_v49  ;;  %14079 = vpow2.f32 %v11776_v47  ;;  %v2789_v53 = vadd.f32 %v2615_v45, %v2153_v51  ;;  %v11869_v54 = vmul.f32 -1.442695, %v2786_v48  ;;  %v14072_v55 = vpop.eup %14071  ;;  %v2522_v48 = vld [vmem:[%s19595_s2 + $0x40] sm:$0xff] }
  0xbe   : > { %14081 = vrcp.f32 %v3480_v44  ;;  %v3481_v63 = vadd.f32 1.0, %v14072_v55  ;;  %v2621_v55 = vld [vmem:[%s19595_s2 + $0x358] sm:$0xff] }
  0xbf   : > { %14083 = vrcp.f32 %v3385_v52  ;;  %v11872_v58 = vmul.f32 -1.442695, %v2789_v53 }
  0xc0   : > { %v1683_v61 = vpop.xlane.xlu1 %1682  ;;  %14085 = vpow2.f32 %v11869_v54  ;;  %v1668_v60 = vpop.xlane.xlu0 %1667 }
  0xc1   : > { %14087 = vpow2.f32 %v11872_v58  ;;  %v2695_v0 = vadd.f32 %v2521_v56, %v1683_v61  ;;  %v2692_v1 = vadd.f32 %v2518_v57, %v1668_v60 }
  0xc2   : > { %v14074_v2 = vpop.eup %14073  ;;  %14089 = vpow2.f32 %v11870_v59 }
  0xc3   : > { %v3386_v4 = vadd.f32 1.0, %v14074_v2  ;;  %v11778_v5 = vmul.f32 -1.442695, %v2695_v0  ;;  %v14076_v7 = vpop.eup %14075  ;;  %v11775_v9 = vmul.f32 -1.442695, %v2692_v1  ;;  %14091 = vrcp.f32 %v3481_v63 }
  0xc4   : > { %v2163_v8 = vpop.xlane.xlu1 %2162  ;;  %v3387_v19 = vadd.f32 1.0, %v14076_v7 }
  0xc5   : > { %v14078_v10 = vpop.eup %14077  ;;  %v2791_v11 = vadd.f32 %v2617_v3, %v2163_v8  ;;  %v2148_v12 = vpop.xlane.xlu0 %2147  ;;  %14093 = vrcp.f32 %v3386_v4  ;;  %v2527_v4 = vld [vmem:[%s19595_s2 + $0x68] sm:$0xff] }
  0xc6   : > { %4256 = vperm.xlu0 %13364, %v14078_v10   ;;  %v2788_v14 = vadd.f32 %v2614_v6, %v2148_v12  ;;  %14095 = vpow2.f32 %v11778_v5 }
  0xc7   : > { %v14080_v16 = vpop.eup %14079  ;;  %v11874_v17 = vmul.f32 -1.442695, %v2791_v11  ;;  %14097 = vpow2.f32 %v11775_v9  ;;  %v2618_v9 = vld [vmem:[%s19595_s2 + $0x340] sm:$0xff] }
  0xc8   : > { %v14082_v15 = vpop.eup %14081  ;;  %v3389_v20 = vadd.f32 1.0, %v14080_v16  ;;  %v1693_v21 = vpop.xlane.xlu1 %1692  ;;  %v11871_v22 = vmul.f32 -1.442695, %v2788_v14  ;;  %v2524_v16 = vld [vmem:[%s19595_s2 + $0x50] sm:$0xff] }
  0xc9   : > { %v14084_v23 = vpop.eup %14083  ;;  %14099 = vpow2.f32 %v11874_v17  ;;  %v2697_v24 = vadd.f32 %v2523_v13, %v1693_v21  ;;  %v1678_v25 = vpop.xlane.xlu0 %1677 }
  0xca   : > { %v14086_v26 = vpop.eup %14085  ;;  %14101 = vrcp.f32 %v3389_v20  ;;  %4261 = vperm.xlu1 %13365, %v14084_v23   ;;  %v2694_v29 = vadd.f32 %v2520_v18, %v1678_v25 }
  0xcb   : > { %v14088_v30 = vpop.eup %14087  ;;  %v3482_v31 = vadd.f32 1.0, %v14086_v26  ;;  %v11780_v32 = vmul.f32 -1.442695, %v2697_v24  ;;  %14103 = vpow2.f32 %v11871_v22 }
  0xcc   : > { %14105 = vrcp.f32 %v3387_v19  ;;  %v3485_v36 = vadd.f32 1.0, %v14088_v30  ;;  %v2173_v37 = vpop.xlane.xlu1 %2172  ;;  %v11777_v39 = vmul.f32 -1.442695, %v2694_v29  ;;  %v14090_v41 = vpop.eup %14089 }
  0xcd   : > { %14107 = vrcp.f32 %v3482_v31  ;;  %v2793_v40 = vadd.f32 %v2619_v28, %v2173_v37  ;;  %v14092_v38 = vpop.eup %14091  ;;  %v3483_v50 = vadd.f32 1.0, %v14090_v41  ;;  %v2620_v37 = vld [vmem:[%s19595_s2 + $0x350] sm:$0xff] }
  0xce   : > { %14109 = vrcp.f32 %v3485_v36  ;;  %4736 = vperm.xlu1 %13365, %v14082_v15   ;;  %v2158_v43 = vpop.xlane.xlu0 %2157  ;;  %v2623_v15 = vld [vmem:[%s19595_s2 + $0x368] sm:$0xff]  ;;  %v2529_v36 = vld [vmem:[%s19595_s2 + $0x78] sm:$0xff] }
  0xcf   : > { %14111 = vpow2.f32 %v11780_v32  ;;  %v11876_v44 = vmul.f32 -1.442695, %v2793_v40  ;;  %v2790_v45 = vadd.f32 %v2616_v27, %v2158_v43  ;;  %v14094_v46 = vpop.eup %14093 }
  0xd0   : > { %v1703_v47 = vpop.xlane.xlu1 %1702  ;;  %14113 = vpow2.f32 %v11777_v39  ;;  %v14096_v49 = vpop.eup %14095 }
  0xd1   : > { %14115 = vpow2.f32 %v11876_v44  ;;  %v2699_v51 = vadd.f32 %v2525_v42, %v1703_v47  ;;  %v11873_v52 = vmul.f32 -1.442695, %v2790_v45  ;;  %v14098_v53 = vpop.eup %14097  ;;  %v3391_v54 = vadd.f32 1.0, %v14096_v49  ;;  %v2526_v49 = vld [vmem:[%s19595_s2 + $0x60] sm:$0xff] }
  0xd2   : > { %4741 = vperm.xlu1 %13365, %v14092_v38   ;;  %v1688_v56 = vpop.xlane.xlu0 %1687  ;;  %v3388_v63 = vadd.f32 1.0, %v14098_v53 }
  0xd3   : > { %v14100_v57 = vpop.eup %14099  ;;  %v11782_v58 = vmul.f32 -1.442695, %v2699_v51  ;;  %14117 = vpow2.f32 %v11873_v52  ;;  %v2696_v59 = vadd.f32 %v2522_v48, %v1688_v56  ;;  %v2625_v48 = vld [vmem:[%s19595_s2 + $0x378] sm:$0xff] }
  0xd4   : > { %v14102_v61 = vpop.eup %14101  ;;  %14119 = vrcp.f32 %v3391_v54  ;;  %v3487_v60 = vadd.f32 1.0, %v14100_v57  ;;  %v2183_v0 = vpop.xlane.xlu1 %2182 }
  0xd5   : > { %v14104_v1 = vpop.eup %14103  ;;  %14121 = vrcp.f32 %v3483_v50  ;;  %v2795_v2 = vadd.f32 %v2621_v55, %v2183_v0  ;;  %4281 = vperm.xlu0 %13364, %v14102_v61   ;;  %v11779_v5 = vmul.f32 -1.442695, %v2696_v59 }
  0xd6   : > { %v14106_v3 = vpop.eup %14105  ;;  %14123 = vrcp.f32 %v3487_v60  ;;  %4266 = vperm.xlu1 %13365, %v14094_v46   ;;  %v3484_v7 = vadd.f32 1.0, %v14104_v1 }
  0xd7   : > { %v14108_v6 = vpop.eup %14107  ;;  %14125 = vpow2.f32 %v11782_v58  ;;  %v11878_v8 = vmul.f32 -1.442695, %v2795_v2  ;;  %v2168_v10 = vpop.xlane.xlu0 %2167 }
  0xd8   : > { %v14110_v11 = vpop.eup %14109  ;;  %14127 = vrcp.f32 %v3388_v63  ;;  %v1713_v12 = vpop.xlane.xlu1 %1712  ;;  %v2792_v19 = vadd.f32 %v2618_v9, %v2168_v10  ;;  %v2531_v63 = vld [vmem:[%s19595_s2 + $0x88] sm:$0xff] }
  0xd9   : > { %v14112_v13 = vpop.eup %14111  ;;  %14129 = vpow2.f32 %v11878_v8  ;;  %v2701_v14 = vadd.f32 %v2527_v4, %v1713_v12  ;;  %4761 = vperm.xlu0 %13364, %v14110_v11   ;;  %v2627_v11 = vld [vmem:[%s19595_s2 + $0x388] sm:$0xff] }
  0xda   : > { %v14114_v17 = vpop.eup %14113  ;;  %v3393_v18 = vadd.f32 1.0, %v14112_v13  ;;  %14131 = vpow2.f32 %v11779_v5  ;;  %4271 = vperm.xlu1 %13365, %v14106_v3   ;;  %v11875_v32 = vmul.f32 -1.442695, %v2792_v19  ;;  %v2622_v5 = vld [vmem:[%s19595_s2 + $0x360] sm:$0xff] }
  0xdb   : > { %v14116_v20 = vpop.eup %14115  ;;  %14133 = vrcp.f32 %v3484_v7  ;;  %v3390_v21 = vadd.f32 1.0, %v14114_v17  ;;  %v11784_v22 = vmul.f32 -1.442695, %v2701_v14  ;;  %v1698_v23 = vpop.xlane.xlu0 %1697 }
  0xdc   : > { %14135 = vrcp.f32 %v3393_v18  ;;  %v3489_v24 = vadd.f32 1.0, %v14116_v20  ;;  %v2193_v25 = vpop.xlane.xlu1 %2192  ;;  %v2698_v26 = vadd.f32 %v2524_v16, %v1698_v23  ;;  %v2528_v16 = vld [vmem:[%s19595_s2 + $0x70] sm:$0xff] }
  0xdd   : > { %v14118_v28 = vpop.eup %14117  ;;  %14137 = vrcp.f32 %v3390_v21  ;;  %v2797_v29 = vadd.f32 %v2623_v15, %v2193_v25  ;;  %v2533_v25 = vld [vmem:[%s19595_s2 + $0x98] sm:$0xff] }
  0xde   : > { %v14120_v30 = vpop.eup %14119  ;;  %14139 = vrcp.f32 %v3489_v24  ;;  %v3486_v31 = vadd.f32 1.0, %v14118_v28  ;;  %4746 = vperm.xlu1 %13365, %v14108_v6   ;;  %v11781_v40 = vmul.f32 -1.442695, %v2698_v26 }
  0xdf   : > { %v14122_v39 = vpop.eup %14121  ;;  %14141 = vpow2.f32 %v11784_v22  ;;  %v11880_v27 = vmul.f32 -1.442695, %v2797_v29  ;;  %4291 = vperm.xlu0 %13364, %v14120_v30  }
  0xe0   : > { %v14124_v41 = vpop.eup %14123  ;;  %14143 = vrcp.f32 %v3486_v31  ;;  %v1723_v42 = vpop.xlane.xlu1 %1722 }
  0xe1   : > { %v2178_v43 = vpop.xlane.xlu0 %2177  ;;  %v14126_v38 = vpop.eup %14125  ;;  %14145 = vpow2.f32 %v11880_v27  ;;  %v2703_v44 = vadd.f32 %v2529_v36, %v1723_v42  ;;  %v2629_v42 = vld [vmem:[%s19595_s2 + $0x398] sm:$0xff] }
  0xe2   : > { %v2794_v45 = vadd.f32 %v2620_v37, %v2178_v43  ;;  %v14128_v46 = vpop.eup %14127  ;;  %v3395_v47 = vadd.f32 1.0, %v14126_v38  ;;  %14147 = vpow2.f32 %v11875_v32  ;;  %4751 = vperm.xlu1 %13365, %v14122_v39   ;;  %v2624_v39 = vld [vmem:[%s19595_s2 + $0x370] sm:$0xff] }
  0xe3   : > { %v14130_v50 = vpop.eup %14129  ;;  %v11786_v51 = vmul.f32 -1.442695, %v2703_v44  ;;  %14149 = vpow2.f32 %v11781_v40  ;;  %4771 = vperm.xlu0 %13364, %v14124_v41  }
  0xe4   : > { %v14132_v52 = vpop.eup %14131  ;;  %14151 = vrcp.f32 %v3395_v47  ;;  %v3491_v53 = vadd.f32 1.0, %v14130_v50  ;;  %v2203_v54 = vpop.xlane.xlu1 %2202  ;;  %v11877_v55 = vmul.f32 -1.442695, %v2794_v45  ;;  %v2530_v50 = vld [vmem:[%s19595_s2 + $0x80] sm:$0xff] }
  0xe5   : > { %v1708_v56 = vpop.xlane.xlu0 %1707  ;;  %v14134_v57 = vpop.eup %14133  ;;  %v3392_v58 = vadd.f32 1.0, %v14132_v52  ;;  %14153 = vpow2.f32 %v11786_v51  ;;  %v2799_v59 = vadd.f32 %v2625_v48, %v2203_v54  ;;  %v2535_v54 = vld [vmem:[%s19595_s2 + $0xa8] sm:$0xff] }
  0xe6   : > { %v2700_v61 = vadd.f32 %v2526_v49, %v1708_v56  ;;  %v14136_v60 = vpop.eup %14135  ;;  %14155 = vrcp.f32 %v3491_v53  ;;  %4276 = vperm.xlu1 %13365, %v14128_v46  }
  0xe7   : > { %v14138_v0 = vpop.eup %14137  ;;  %14157 = vrcp.f32 %v3392_v58  ;;  %v11882_v1 = vmul.f32 -1.442695, %v2799_v59  ;;  %4301 = vperm.xlu0 %13364, %v14136_v60  }
  0xe8   : > { %v11783_v2 = vmul.f32 -1.442695, %v2700_v61  ;;  %v14140_v3 = vpop.eup %14139  ;;  %14159 = vpow2.f32 %v11877_v55  ;;  %v1733_v4 = vpop.xlane.xlu1 %1732 }
  0xe9   : > { %v14142_v6 = vpop.eup %14141  ;;  %14161 = vpow2.f32 %v11882_v1  ;;  %v2705_v7 = vadd.f32 %v2531_v63, %v1733_v4  ;;  %v2188_v8 = vpop.xlane.xlu0 %2187 }
  0xea   : > { %v14144_v9 = vpop.eup %14143  ;;  %v3397_v10 = vadd.f32 1.0, %v14142_v6  ;;  %14163 = vpow2.f32 %v11783_v2  ;;  %4756 = vperm.xlu1 %13365, %v14134_v57   ;;  %v2796_v14 = vadd.f32 %v2622_v5, %v2188_v8  ;;  %v2631_v5 = vld [vmem:[%s19595_s2 + $0x3a8] sm:$0xff] }
  0xeb   : > { %v14146_v12 = vpop.eup %14145  ;;  %v11788_v13 = vmul.f32 -1.442695, %v2705_v7  ;;  %4781 = vperm.xlu0 %13364, %v14140_v3   ;;  %v2626_v3 = vld [vmem:[%s19595_s2 + $0x380] sm:$0xff] }
  0xec   : > { %v14148_v17 = vpop.eup %14147  ;;  %14165 = vrcp.f32 %v3397_v10  ;;  %v3493_v18 = vadd.f32 1.0, %v14146_v12  ;;  %v2213_v15 = vpop.xlane.xlu1 %2212  ;;  %v11879_v30 = vmul.f32 -1.442695, %v2796_v14 }
  0xed   : > { %v14150_v19 = vpop.eup %14149  ;;  %v3488_v20 = vadd.f32 1.0, %v14148_v17  ;;  %14167 = vpow2.f32 %v11788_v13  ;;  %v2801_v21 = vadd.f32 %v2627_v11, %v2213_v15  ;;  %v1718_v22 = vpop.xlane.xlu0 %1717  ;;  %v300_v17 = vld [vmem:[%s19594_s1 + $0x18c] sm:$0xff] }
  0xee   : > { %v14152_v23 = vpop.eup %14151  ;;  %14169 = vrcp.f32 %v3493_v18  ;;  %v3394_v24 = vadd.f32 1.0, %v14150_v19  ;;  %4286 = vperm.xlu1 %13365, %v14138_v0   ;;  %v2702_v26 = vadd.f32 %v2528_v16, %v1718_v22  ;;  %v2532_v16 = vld [vmem:[%s19595_s2 + $0x90] sm:$0xff]  ;;  %v2537_v19 = vld [vmem:[%s19595_s2 + $0xb8] sm:$0xff] }
  0xef   : > { %v14154_v28 = vpop.eup %14153  ;;  %14171 = vrcp.f32 %v3488_v20  ;;  %v11884_v29 = vmul.f32 -1.442695, %v2801_v21  ;;  %4311 = vperm.xlu0 %13364, %v14152_v23  }
  0xf0   : > { %v14156_v31 = vpop.eup %14155  ;;  %v3399_v32 = vadd.f32 1.0, %v14154_v28  ;;  %14173 = vrcp.f32 %v3394_v24  ;;  %v1743_v36 = vpop.xlane.xlu1 %1742  ;;  %v11785_v37 = vmul.f32 -1.442695, %v2702_v26 }
  0xf1   : > { %v14158_v27 = vpop.eup %14157  ;;  %14175 = vpow2.f32 %v11884_v29  ;;  %v2707_v40 = vadd.f32 %v2533_v25, %v1743_v36  ;;  %v681_v29 = vunpack.c.l.bf16 %v300_v17  ;;  %v682_v36 = vunpack.c.h.bf16 %v300_v17 }
  0xf2   : > { %v14160_v41 = vpop.eup %14159  ;;  %14177 = vrcp.f32 %v3399_v32  ;;  %4766 = vperm.xlu1 %13365, %v14144_v9   ;;  %v2198_v43 = vpop.xlane.xlu0 %2197  ;;  %v15503_v32 = vld [vmem:[%s19594_s1 + $0x194] ss:$1140 sps:$4 sm:$0xff]  }
  0xf3   : > { %v14162_v38 = vpop.eup %14161  ;;  %v3490_v44 = vadd.f32 1.0, %v14160_v41  ;;  %14179 = vpow2.f32 %v11879_v30  ;;  %4791 = vperm.xlu0 %13364, %v14156_v31   ;;  %v2798_v45 = vadd.f32 %v2624_v39, %v2198_v43  ;;  %v11790_v48 = vmul.f32 -1.442695, %v2707_v40  ;;  %v2628_v40 = vld [vmem:[%s19595_s2 + $0x390] sm:$0xff] }
  0xf4   : > { %v14164_v46 = vpop.eup %14163  ;;  %v3495_v47 = vadd.f32 1.0, %v14162_v38  ;;  %14181 = vpow2.f32 %v11785_v37  ;;  %v2223_v49 = vpop.xlane.xlu1 %2222  ;;  %v490_v38 = vld [vmem:[%s19594_s1 + $0x600] sm:$0xff] }
  0xf5   : > { %14183 = vrcp.f32 %v3490_v44  ;;  %v3396_v51 = vadd.f32 1.0, %v14164_v46  ;;  %v2803_v52 = vadd.f32 %v2629_v42, %v2223_v49  ;;  %v11881_v58 = vmul.f32 -1.442695, %v2798_v45 }
  0xf6   : > { %v14166_v53 = vpop.eup %14165  ;;  %14185 = vrcp.f32 %v3495_v47  ;;  %4296 = vperm.xlu1 %13365, %v14158_v27   ;;  %v1728_v55 = vpop.xlane.xlu0 %1727  ;;  %v2633_v27 = vld [vmem:[%s19595_s2 + $0x3b8] sm:$0xff]  ;;  %v1220_v49 = vmul.f32 %v14849_v33, %v681_v29 }
  0xf7   : > { %v14168_v56 = vpop.eup %14167  ;;  %14187 = vrcp.f32 %v3396_v51  ;;  %v11886_v57 = vmul.f32 -1.442695, %v2803_v52  ;;  %4321 = vperm.xlu0 %13364, %v14166_v53   ;;  %v2704_v59 = vadd.f32 %v2530_v50, %v1728_v55  ;;  %v1221_v53 = vmul.f32 %v14851_v34, %v682_v36 }
  0xf8   : > { %v14170_v61 = vpop.eup %14169  ;;  %v3401_v60 = vadd.f32 1.0, %v14168_v56  ;;  %14189 = vpow2.f32 %v11790_v48  ;;  %v1753_v63 = vpop.xlane.xlu1 %1752  ;;  %v683_v48 = vunpack.c.l.bf16 %v15503_v32  ;;  %v2539_v56 = vld [vmem:[%s19595_s2 + $0xc8] sm:$0xff] }
  0xf9   : > { %v14172_v0 = vpop.eup %14171  ;;  %14191 = vpow2.f32 %v11886_v57  ;;  %v2709_v1 = vadd.f32 %v2535_v54, %v1753_v63  ;;  %v11787_v2 = vmul.f32 -1.442695, %v2704_v59  ;;  %v2534_v57 = vld [vmem:[%s19595_s2 + $0xa0] sm:$0xff]  ;;  %v967_v59 = vunpack.c.h.bf16 %v490_v38 }
  0xfa   : > { %v14174_v4 = vpop.eup %14173  ;;  %14193 = vrcp.f32 %v3401_v60  ;;  %4776 = vperm.xlu1 %13365, %v14172_v0   ;;  %v968_v0 = vunpack.c.h.bf16 %v15503_v32 }
  0xfb   : > { %v14176_v6 = vpop.eup %14175  ;;  %14195 = vpow2.f32 %v11881_v58  ;;  %v11792_v7 = vmul.f32 -1.442695, %v2709_v1  ;;  %4801 = vperm.xlu0 %13364, %v14170_v61   ;;  %v2208_v8 = vpop.xlane.xlu0 %2207  ;;  %v966_v58 = vunpack.c.l.bf16 %v490_v38 }
  0xfc   : > { %v14178_v9 = vpop.eup %14177  ;;  %v3497_v10 = vadd.f32 1.0, %v14176_v6  ;;  %14197 = vpow2.f32 %v11787_v2  ;;  %v2233_v11 = vpop.xlane.xlu1 %2232  ;;  %v2800_v12 = vadd.f32 %v2626_v3, %v2208_v8  ;;  %v1222_v6 = vmul.f32 %v14853_v35, %v683_v48 }
  0xfd   : > { %v14180_v13 = vpop.eup %14179  ;;  %14199 = vpow2.f32 %v11792_v7  ;;  %v2805_v14 = vadd.f32 %v2631_v5, %v2233_v11  ;;  %v2635_v11 = vld [vmem:[%s19595_s2 + $0x3c8] sm:$0xff] }
  0xfe   : > { %v14182_v18 = vpop.eup %14181  ;;  %14201 = vrcp.f32 %v3497_v10  ;;  %v3492_v15 = vadd.f32 1.0, %v14180_v13  ;;  %4306 = vperm.xlu1 %13365, %v14174_v4   ;;  %v11883_v23 = vmul.f32 -1.442695, %v2800_v12  ;;  %v15531_v12 = vadd.f32 %v1221_v53, %v1220_v49 }
  0xff   : > { %v14184_v20 = vpop.eup %14183  ;;  %v3398_v21 = vadd.f32 1.0, %v14182_v18  ;;  %v11888_v22 = vmul.f32 -1.442695, %v2805_v14  ;;  %4331 = vperm.xlu0 %13364, %v14178_v9   ;;  %v1738_v24 = vpop.xlane.xlu0 %1737  ;;  %v302_v9 = vld [vmem:[%s19594_s1 + $0x198] sm:$0xff]  ;;  %v1505_v13 = vmul.f32 %v14849_v33, %v966_v58  ;;  %v1506_v14 = vmul.f32 %v14851_v34, %v967_v59 }
 0x100   : > { %v14186_v25 = vpop.eup %14185  ;;  %14203 = vrcp.f32 %v3492_v15  ;;  %v1763_v26 = vpop.xlane.xlu1 %1762  ;;  %v2706_v28 = vadd.f32 %v2532_v16, %v1738_v24  ;;  %v15538_v16 = vld [vmem:[%s19594_s1 + $0x1a0] ss:$24 sps:$4 sm:$0xff]   ;;  %v684_v24 = vunpack.c.l.bf16 %v302_v9 }
 0x101   : > { %v14188_v30 = vpop.eup %14187  ;;  %14205 = vrcp.f32 %v3398_v21  ;;  %v2711_v31 = vadd.f32 %v2537_v19, %v1763_v26  ;;  %v2630_v19 = vld [vmem:[%s19595_s2 + $0x3a0] sm:$0xff]  ;;  %v2637_v59 = vld [vmem:[%s19595_s2 + $0x3d8] sm:$0xff] }
 0x102   : > { %v14190_v37 = vpop.eup %14189  ;;  %14207 = vpow2.f32 %v11888_v22  ;;  %v11789_v39 = vmul.f32 -1.442695, %v2706_v28  ;;  %4786 = vperm.xlu1 %13365, %v14184_v20   ;;  %v1507_v20 = vmul.f32 %v14853_v35, %v968_v0  ;;  %v1223_v49 = vmul.f32 %v14849_v33, %v684_v24 }
 0x103   : > { %v14192_v41 = vpop.eup %14191  ;;  %v3403_v42 = vadd.f32 1.0, %v14190_v37  ;;  %14209 = vpow2.f32 %v11883_v23  ;;  %v11794_v43 = vmul.f32 -1.442695, %v2711_v31  ;;  %4811 = vperm.xlu0 %13364, %v14186_v25   ;;  %v1810_v23 = vsel %vm1644_vm0, %v1222_v6, 0.0 }
 0x104   : > { %v14194_v44 = vpop.eup %14193  ;;  %v3499_v45 = vadd.f32 1.0, %v14192_v41  ;;  %14211 = vpow2.f32 %v11789_v39  ;;  %v2243_v46 = vpop.xlane.xlu1 %2242  ;;  %v685_v25 = vunpack.c.h.bf16 %v302_v9  ;;  %v686_v31 = vunpack.c.l.bf16 %v15538_v16  ;;  %v2541_v39 = vld [vmem:[%s19595_s2 + $0xd8] sm:$0xff] }
 0x105   : > { %v2218_v47 = vpop.xlane.xlu0 %2217  ;;  %v14196_v50 = vpop.eup %14195  ;;  %14213 = vrcp.f32 %v3403_v42  ;;  %v2807_v51 = vadd.f32 %v2633_v27, %v2243_v46  ;;  %v2536_v27 = vld [vmem:[%s19595_s2 + $0xb0] sm:$0xff]  ;;  %v494_v41 = vld [vmem:[%s19594_s1 + $0x618] sm:$0xff] }
 0x106   : > { %v2802_v52 = vadd.f32 %v2628_v40, %v2218_v47  ;;  %v14198_v54 = vpop.eup %14197  ;;  %14215 = vrcp.f32 %v3499_v45  ;;  %v3494_v55 = vadd.f32 1.0, %v14196_v50  ;;  %4316 = vperm.xlu1 %13365, %v14188_v30   ;;  %v2284_v40 = vadd.f32 %v1506_v14, %v1505_v13  ;;  %v15559_v45 = vld [vmem:[%s19594_s1 + $0x620] ss:$24 sps:$4 sm:$0xff]  }
 0x107   : > { %v14200_v61 = vpop.eup %14199  ;;  %v3400_v60 = vadd.f32 1.0, %v14198_v54  ;;  %14217 = vpow2.f32 %v11794_v43  ;;  %v11890_v63 = vmul.f32 -1.442695, %v2807_v51  ;;  %4341 = vperm.xlu0 %13364, %v14194_v44   ;;  %v2285_v44 = vsel %vm1644_vm0, %v1507_v20, 0.0 }
 0x108   : > { %v14202_v1 = vpop.eup %14201  ;;  %14219 = vrcp.f32 %v3494_v55  ;;  %v3405_v2 = vadd.f32 1.0, %v14200_v61  ;;  %v11885_v3 = vmul.f32 -1.442695, %v2802_v52  ;;  %v1773_v4 = vpop.xlane.xlu1 %1772  ;;  %v1224_v50 = vmul.f32 %v14851_v34, %v685_v25 }
 0x109   : > { %v1748_v5 = vpop.xlane.xlu0 %1747  ;;  %14221 = vrcp.f32 %v3400_v60  ;;  %v2713_v7 = vadd.f32 %v2539_v56, %v1773_v4  ;;  %v972_v54 = vunpack.c.l.bf16 %v494_v41  ;;  %v973_v55 = vunpack.c.h.bf16 %v494_v41  ;;  %v2632_v4 = vld [vmem:[%s19595_s2 + $0x3b0] sm:$0xff] }
 0x10a   : > { %v2708_v8 = vadd.f32 %v2534_v57, %v1748_v5  ;;  %v14204_v10 = vpop.eup %14203  ;;  %14223 = vrcp.f32 %v3405_v2  ;;  %v974_v61 = vunpack.c.l.bf16 %v15559_v45  ;;  %v1225_v0 = vmul.f32 %v14853_v35, %v686_v31 }
 0x10b   : > { %v14206_v17 = vpop.eup %14205  ;;  %14225 = vpow2.f32 %v11890_v63  ;;  %v11796_v18 = vmul.f32 -1.442695, %v2713_v7  ;;  %4821 = vperm.xlu0 %13364, %v14202_v1   ;;  %4796 = vperm.xlu1 %13365, %v14204_v10   ;;  %v15572_v5 = vadd.f32 %v1810_v23, %v15531_v12  ;;  %v15574_v6 = vadd.f32 %v2285_v44, %v2284_v40  ;;  %v306_v7 = vld [vmem:[%s19594_s1 + $0x1b0] sm:$0xff]  ;;  %v2543_v12 = vld [vmem:[%s19595_s2 + $0xe8] sm:$0xff] }
 0x10c   : > { %v11791_v15 = vmul.f32 -1.442695, %v2708_v8  ;;  %v14208_v21 = vpop.eup %14207  ;;  %14227 = vpow2.f32 %v11885_v3  ;;  %v2253_v22 = vpop.xlane.xlu1 %2252  ;;  %v1814_v10 = vadd.f32 %v1224_v50, %v1223_v49  ;;  %v690_v23 = vunpack.c.l.bf16 %v306_v7 }
 0x10d   : > { %v14210_v26 = vpop.eup %14209  ;;  %v3501_v28 = vadd.f32 1.0, %v14208_v21  ;;  %14229 = vpow2.f32 %v11796_v18  ;;  %v2809_v29 = vadd.f32 %v2635_v11, %v2253_v22  ;;  %v2228_v30 = vpop.xlane.xlu0 %2227  ;;  %v1511_v11 = vmul.f32 %v14849_v33, %v972_v54  ;;  %v15611_v54 = vld [vmem:[%s19594_s1 + $0x188] ss:$72 sps:$4 sm:$0xff]  }
 0x10e   : > { %v14212_v32 = vpop.eup %14211  ;;  %v3496_v36 = vadd.f32 1.0, %v14210_v26  ;;  %14231 = vpow2.f32 %v11791_v15  ;;  %v2804_v37 = vadd.f32 %v2630_v19, %v2228_v30  ;;  %v1512_v18 = vmul.f32 %v14851_v34, %v973_v55 }
 0x10f   : > { %v14214_v42 = vpop.eup %14213  ;;  %14233 = vrcp.f32 %v3501_v28  ;;  %v3402_v43 = vadd.f32 1.0, %v14212_v32  ;;  %v11892_v38 = vmul.f32 -1.442695, %v2809_v29  ;;  %4326 = vperm.xlu1 %13365, %v14206_v17   ;;  %v1513_v15 = vmul.f32 %v14853_v35, %v974_v61  ;;  %v2538_v29 = vld [vmem:[%s19595_s2 + $0xc0] sm:$0xff] }
 0x110   : > { %v14216_v46 = vpop.eup %14215  ;;  %14235 = vrcp.f32 %v3496_v36  ;;  %v11887_v47 = vmul.f32 -1.442695, %v2804_v37  ;;  %4351 = vperm.xlu0 %13364, %v14214_v42   ;;  %v1783_v48 = vpop.xlane.xlu1 %1782  ;;  %v1815_v22 = vsel %vm1644_vm0, %v1225_v0, 0.0  ;;  %v691_v30 = vunpack.c.h.bf16 %v306_v7 }
 0x111   : > { %v14218_v51 = vpop.eup %14217  ;;  %14237 = vrcp.f32 %v3402_v43  ;;  %v2715_v52 = vadd.f32 %v2541_v39, %v1783_v48  ;;  %v1758_v53 = vpop.xlane.xlu0 %1757  ;;  %v498_v39 = vld [vmem:[%s19594_s1 + $0x630] sm:$0xff]  ;;  %v15592_v41 = vadd.f32 %v1815_v22, %v1814_v10  ;;  %v15594_v42 = vadd.f32 %v1512_v18, %v1511_v11  ;;  %v310_v22 = vld [vmem:[%s19594_s1 + $0x1c8] sm:$0xff] }
 0x112   : > { %v14220_v56 = vpop.eup %14219  ;;  %v3407_v57 = vadd.f32 1.0, %v14218_v51  ;;  %14239 = vpow2.f32 %v11892_v38  ;;  %v2710_v58 = vadd.f32 %v2536_v27, %v1758_v53  ;;  %v15597_v43 = vsel %vm1644_vm0, %v1513_v15, 0.0  ;;  %v298_v53 = vld [vmem:[%s19594_s1 + $0x180] sm:$0xff] }
 0x113   : > { %v14222_v60 = vpop.eup %14221  ;;  %14241 = vpow2.f32 %v11887_v47  ;;  %v11798_v63 = vmul.f32 -1.442695, %v2715_v52  ;;  %4806 = vperm.xlu1 %13365, %v14220_v56   ;;  %v2639_v47 = vld [vmem:[%s19595_s2 + $0x3e8] sm:$0xff]  ;;  %v692_v48 = vunpack.c.h.bf16 %v15538_v16  ;;  %v1229_v50 = vmul.f32 %v14849_v33, %v690_v23 }
 0x114   : > { %v14224_v1 = vpop.eup %14223  ;;  %14243 = vrcp.f32 %v3407_v57  ;;  %v11793_v2 = vmul.f32 -1.442695, %v2710_v58  ;;  %4831 = vperm.xlu0 %13364, %v14216_v46   ;;  %v2263_v3 = vpop.xlane.xlu1 %2262  ;;  %v1230_v51 = vmul.f32 %v14851_v34, %v691_v30  ;;  %v978_v52 = vunpack.c.l.bf16 %v498_v39  ;;  %v2634_v58 = vld [vmem:[%s19595_s2 + $0x3c0] sm:$0xff] }
 0x115   : > { %v14226_v8 = vpop.eup %14225  ;;  %14245 = vpow2.f32 %v11798_v63  ;;  %v2811_v9 = vadd.f32 %v2637_v59, %v2263_v3  ;;  %v979_v59 = vunpack.c.h.bf16 %v498_v39  ;;  %v980_v0 = vunpack.c.h.bf16 %v15559_v45  ;;  %v2545_v3 = vld [vmem:[%s19595_s2 + $0xf8] sm:$0xff] }
 0x116   : > { %v14228_v13 = vpop.eup %14227  ;;  %v3503_v14 = vadd.f32 1.0, %v14226_v8  ;;  %14247 = vpow2.f32 %v11793_v2  ;;  %v2238_v17 = vpop.xlane.xlu0 %2237  ;;  %v679_v7 = vunpack.c.h.bf16 %v298_v53  ;;  %v680_v8 = vunpack.c.l.bf16 %v15611_v54 }
 0x117   : > { %v14230_v19 = vpop.eup %14229  ;;  %v3498_v20 = vadd.f32 1.0, %v14228_v13  ;;  %v2806_v21 = vadd.f32 %v2632_v4, %v2238_v17  ;;  %4336 = vperm.xlu1 %13365, %v14222_v60   ;;  %v11894_v26 = vmul.f32 -1.442695, %v2811_v9  ;;  %v678_v4 = vunpack.c.l.bf16 %v298_v53  ;;  %v2540_v17 = vld [vmem:[%s19595_s2 + $0xd0] sm:$0xff] }
 0x118   : > { %v14232_v24 = vpop.eup %14231  ;;  %14249 = vrcp.f32 %v3503_v14  ;;  %v3409_v25 = vadd.f32 1.0, %v14230_v19  ;;  %4361 = vperm.xlu0 %13364, %v14224_v1   ;;  %v1793_v28 = vpop.xlane.xlu1 %1792  ;;  %v1517_v18 = vmul.f32 %v14849_v33, %v978_v52  ;;  %v1824_v39 = vadd.f32 %v1230_v51, %v1229_v50 }
 0x119   : > { %v14234_v31 = vpop.eup %14233  ;;  %14251 = vrcp.f32 %v3498_v20  ;;  %v3404_v32 = vadd.f32 1.0, %v14232_v24  ;;  %v11889_v36 = vmul.f32 -1.442695, %v2806_v21  ;;  %v2717_v37 = vadd.f32 %v2543_v12, %v1793_v28 }
 0x11a   : > { %v14236_v27 = vpop.eup %14235  ;;  %14253 = vrcp.f32 %v3409_v25  ;;  %v1768_v40 = vpop.xlane.xlu0 %1767  ;;  %v1231_v12 = vmul.f32 %v14853_v35, %v692_v48  ;;  %v1518_v21 = vmul.f32 %v14851_v34, %v979_v59  ;;  %v1519_v25 = vmul.f32 %v14853_v35, %v980_v0 }
 0x11b   : > { %v14238_v38 = vpop.eup %14237  ;;  %14255 = vrcp.f32 %v3404_v32  ;;  %v11800_v44 = vmul.f32 -1.442695, %v2717_v37  ;;  %v2712_v46 = vadd.f32 %v2538_v29, %v1768_v40  ;;  %4816 = vperm.xlu1 %13365, %v14236_v27   ;;  %v1218_v28 = vmul.f32 %v14851_v34, %v679_v7  ;;  %v2641_v32 = vld [vmem:[%s19595_s2 + $0x3f8] sm:$0xff]  ;;  %v492_v7 = vld [vmem:[%s19594_s1 + $0x60c] sm:$0xff] }
 0x11c   : > { %v14240_v49 = vpop.eup %14239  ;;  %14257 = vpow2.f32 %v11894_v26  ;;  %4841 = vperm.xlu0 %13364, %v14234_v31   ;;  %v1217_v26 = vmul.f32 %v14849_v33, %v678_v4  ;;  %v1825_v27 = vsel %vm1644_vm0, %v1231_v12, 0.0  ;;  %v696_v40 = vunpack.c.l.bf16 %v310_v22 }
 0x11d   : > { %v14242_v55 = vpop.eup %14241  ;;  %v3505_v56 = vadd.f32 1.0, %v14240_v49  ;;  %14259 = vpow2.f32 %v11889_v36  ;;  %v11795_v16 = vmul.f32 -1.442695, %v2712_v46  ;;  %v2273_v57 = vpop.xlane.xlu1 %2272  ;;  %v1219_v36 = vmul.f32 %v14853_v35, %v680_v8 }
 0x11e   : > { %v14244_v61 = vpop.eup %14243  ;;  %v3500_v60 = vadd.f32 1.0, %v14242_v55  ;;  %14261 = vpow2.f32 %v11800_v44  ;;  %v2813_v63 = vadd.f32 %v2639_v47, %v2273_v57  ;;  %v2636_v47 = vld [vmem:[%s19595_s2 + $0x3d0] sm:$0xff]  ;;  %v697_v48 = vunpack.c.h.bf16 %v310_v22 }
 0x11f   : > { %v14246_v1 = vpop.eup %14245  ;;  %14263 = vrcp.f32 %v3505_v56  ;;  %v2248_v2 = vpop.xlane.xlu0 %2247  ;;  %4346 = vperm.xlu1 %13365, %v14238_v38   ;;  %v698_v49 = vunpack.c.h.bf16 %v15611_v54  ;;  %v2304_v56 = vadd.f32 %v1518_v21, %v1517_v18  ;;  %v2305_v50 = vsel %vm1644_vm0, %v1519_v25, 0.0  ;;  %v304_v21 = vld [vmem:[%s19594_s1 + $0x1a4] sm:$0xff] }
 0x120   : > { %v14248_v9 = vpop.eup %14247  ;;  %14265 = vrcp.f32 %v3500_v60  ;;  %v3411_v10 = vadd.f32 1.0, %v14246_v1  ;;  %v11896_v11 = vmul.f32 -1.442695, %v2813_v63  ;;  %v2808_v13 = vadd.f32 %v2634_v58, %v2248_v2  ;;  %4371 = vperm.xlu0 %13364, %v14244_v61   ;;  %v2542_v1 = vld [vmem:[%s19595_s2 + $0xe0] sm:$0xff] }
 0x121   : > { %v3406_v14 = vadd.f32 1.0, %v14248_v9  ;;  %14267 = vpow2.f32 %v11795_v16  ;;  %v1803_v45 = vpop.xlane.xlu1 %1802  ;;  %v1804_v58 = vadd.f32 %v1218_v28, %v1217_v26  ;;  %v1805_v59 = vsel %vm1644_vm0, %v1219_v36, 0.0  ;;  %v15679_v28 = vld [vmem:[%s19594_s1 + $0x1ac] ss:$60 sps:$4 sm:$0xff]  }
 0x122   : > { %v14250_v15 = vpop.eup %14249  ;;  %14269 = vrcp.f32 %v3411_v10  ;;  %v11891_v19 = vmul.f32 -1.442695, %v2808_v13  ;;  %v2719_v20 = vadd.f32 %v2545_v3, %v1803_v45  ;;  %v1235_v2 = vmul.f32 %v14849_v33, %v696_v40  ;;  %v493_v13 = vld [vmem:[%s19594_s1 + $0x614] ss:$60 sps:$4 sm:$0xff]  }
 0x123   : > { %v14252_v23 = vpop.eup %14251  ;;  %14271 = vrcp.f32 %v3406_v14  ;;  %v1778_v24 = vpop.xlane.xlu0 %1777  ;;  %v1236_v3 = vmul.f32 %v14851_v34, %v697_v48  ;;  %v1237_v4 = vmul.f32 %v14853_v35, %v698_v49  ;;  %v15655_v10 = vadd.f32 %v15597_v43, %v15594_v42  ;;  %v502_v42 = vld [vmem:[%s19594_s1 + $0x648] sm:$0xff] }
 0x124   : > { %v14254_v29 = vpop.eup %14253  ;;  %14273 = vpow2.f32 %v11896_v11  ;;  %v11802_v30 = vmul.f32 -1.442695, %v2719_v20  ;;  %v2714_v31 = vadd.f32 %v2540_v17, %v1778_v24  ;;  %4851 = vperm.xlu0 %13364, %v14250_v15   ;;  %4826 = vperm.xlu1 %13365, %v14252_v23   ;;  %v15657_v11 = vadd.f32 %v1825_v27, %v1824_v39  ;;  %v2638_v23 = vld [vmem:[%s19595_s2 + $0x3e0] sm:$0xff] }
 0x125   : > { %v14256_v37 = vpop.eup %14255  ;;  %14275 = vpow2.f32 %v11891_v19  ;;  %v15662_v12 = vadd.f32 %v2305_v50, %v2304_v56  ;;  %v15664_v18 = vadd.f32 %v1805_v59, %v1804_v58  ;;  %v969_v19 = vunpack.c.l.bf16 %v492_v7  ;;  %v314_v58 = vld [vmem:[%s19594_s1 + $0x1e0] sm:$0xff] }
 0x126   : > { %v14258_v38 = vpop.eup %14257  ;;  %14277 = vpow2.f32 %v11802_v30  ;;  %v11797_v44 = vmul.f32 -1.442695, %v2714_v31  ;;  %v2283_v46 = vpop.xlane.xlu1 %2282  ;;  %v970_v20 = vunpack.c.h.bf16 %v492_v7  ;;  %v1834_v24 = vadd.f32 %v1236_v3, %v1235_v2  ;;  %v2640_v7 = vld [vmem:[%s19595_s2 + $0x3f0] sm:$0xff] }
 0x127   : > { %v14260_v52 = vpop.eup %14259  ;;  %v3507_v53 = vadd.f32 1.0, %v14258_v38  ;;  %v2815_v55 = vadd.f32 %v2641_v32, %v2283_v46  ;;  %v1835_v25 = vsel %vm1644_vm0, %v1237_v4, 0.0  ;;  %v971_v26 = vunpack.c.l.bf16 %v493_v13 }
 0x128   : > { %v14262_v51 = vpop.eup %14261  ;;  %v3502_v16 = vadd.f32 1.0, %v14260_v52  ;;  %14279 = vpow2.f32 %v11797_v44  ;;  %v2258_v57 = vpop.xlane.xlu0 %2257  ;;  %4381 = vperm.xlu0 %13364, %v14254_v29   ;;  %4356 = vperm.xlu1 %13365, %v14256_v37   ;;  %v984_v31 = vunpack.c.l.bf16 %v502_v42  ;;  %v985_v32 = vunpack.c.h.bf16 %v502_v42  ;;  %v2544_v52 = vld [vmem:[%s19595_s2 + $0xf0] sm:$0xff] }
 0x129   : > { %v14264_v61 = vpop.eup %14263  ;;  %14281 = vrcp.f32 %v3507_v53  ;;  %v3413_v60 = vadd.f32 1.0, %v14262_v51  ;;  %v11898_v63 = vmul.f32 -1.442695, %v2815_v55  ;;  %v2810_v54 = vadd.f32 %v2636_v47, %v2258_v57 }
 0x12a   : > { %v14266_v0 = vpop.eup %14265  ;;  %14283 = vrcp.f32 %v3502_v16  ;;  %v986_v36 = vunpack.c.h.bf16 %v493_v13  ;;  %v687_v38 = vunpack.c.l.bf16 %v304_v21  ;;  %v688_v44 = vunpack.c.h.bf16 %v304_v21 }
 0x12b   : > { %v14268_v8 = vpop.eup %14267  ;;  %14285 = vrcp.f32 %v3413_v60  ;;  %v11893_v9 = vmul.f32 -1.442695, %v2810_v54  ;;  %v689_v48 = vunpack.c.l.bf16 %v15679_v28  ;;  %v1508_v53 = vmul.f32 %v14849_v33, %v969_v19 }
 0x12c   : > { %v14270_v14 = vpop.eup %14269  ;;  %v3408_v45 = vadd.f32 1.0, %v14268_v8  ;;  %14287 = vpow2.f32 %v11898_v63  ;;  %v1788_v17 = vpop.xlane.xlu0 %1787  ;;  %4861 = vperm.xlu0 %13364, %v14264_v61   ;;  %4836 = vperm.xlu1 %13365, %v14266_v0   ;;  %v1509_v55 = vmul.f32 %v14851_v34, %v970_v20  ;;  %v1510_v56 = vmul.f32 %v14853_v35, %v971_v26  ;;  %v496_v26 = vld [vmem:[%s19594_s1 + $0x624] sm:$0xff] }
 0x12d   : > { %v14272_v43 = vpop.eup %14271  ;;  %14289 = vpow2.f32 %v11893_v9  ;;  %v2716_v15 = vadd.f32 %v2542_v1, %v1788_v17  ;;  %v1523_v57 = vmul.f32 %v14849_v33, %v984_v31  ;;  %v1524_v60 = vmul.f32 %v14851_v34, %v985_v32 }
 0x12e   : > { %v14274_v22 = vpop.eup %14273  ;;  %14291 = vrcp.f32 %v3408_v45  ;;  %v1525_v63 = vmul.f32 %v14853_v35, %v986_v36  ;;  %v1226_v54 = vmul.f32 %v14849_v33, %v687_v38  ;;  %v1227_v2 = vmul.f32 %v14851_v34, %v688_v44  ;;  %v15724_v44 = vld [vmem:[%s19594_s1 + $0x1c4] ss:$60 sps:$4 sm:$0xff]  }
 0x12f   : > { %v14276_v29 = vpop.eup %14275  ;;  %v3509_v30 = vadd.f32 1.0, %v14274_v22  ;;  %v11799_v27 = vmul.f32 -1.442695, %v2716_v15  ;;  %v1228_v3 = vmul.f32 %v14853_v35, %v689_v48  ;;  %v702_v8 = vunpack.c.l.bf16 %v314_v58 }
 0x130   : > { %v14278_v37 = vpop.eup %14277  ;;  %v3504_v39 = vadd.f32 1.0, %v14276_v29  ;;  %v2268_v40 = vpop.xlane.xlu0 %2267  ;;  %4391 = vperm.xlu0 %13364, %v14270_v14   ;;  %4366 = vperm.xlu1 %13365, %v14272_v43   ;;  %v703_v9 = vunpack.c.h.bf16 %v314_v58  ;;  %v704_v13 = vunpack.c.h.bf16 %v15679_v28  ;;  %v15701_v42 = vadd.f32 %v1835_v25, %v1834_v24  ;;  %v497_v25 = vld [vmem:[%s19594_s1 + $0x62c] ss:$60 sps:$4 sm:$0xff]  }
 0x131   : > { %14293 = vrcp.f32 %v3509_v30  ;;  %v3415_v46 = vadd.f32 1.0, %v14278_v37  ;;  %v2812_v47 = vadd.f32 %v2638_v23, %v2268_v40  ;;  %v2289_v43 = vadd.f32 %v1509_v55, %v1508_v53  ;;  %v506_v30 = vld [vmem:[%s19594_s1 + $0x660] sm:$0xff] }
 0x132   : > { %v14280_v49 = vpop.eup %14279  ;;  %14295 = vrcp.f32 %v3504_v39  ;;  %v2290_v21 = vsel %vm1644_vm0, %v1510_v56, 0.0  ;;  %v2314_v22 = vadd.f32 %v1524_v60, %v1523_v57  ;;  %v2315_v23 = vsel %vm1644_vm0, %v1525_v63, 0.0  ;;  %v308_v37 = vld [vmem:[%s19594_s1 + $0x1bc] sm:$0xff] }
 0x133   : > { %v14282_v50 = vpop.eup %14281  ;;  %14297 = vrcp.f32 %v3415_v46  ;;  %v3410_v51 = vadd.f32 1.0, %v14280_v49  ;;  %v11895_v16 = vmul.f32 -1.442695, %v2812_v47  ;;  %v1819_v29 = vadd.f32 %v1227_v2, %v1226_v54 }
 0x134   : > { %v14284_v59 = vpop.eup %14283  ;;  %14299 = vpow2.f32 %v11799_v27  ;;  %v1798_v61 = vpop.xlane.xlu0 %1797  ;;  %4871 = vperm.xlu0 %13364, %v14282_v50   ;;  %v1820_v24 = vsel %vm1644_vm0, %v1228_v3, 0.0  ;;  %v1241_v31 = vmul.f32 %v14849_v33, %v702_v8  ;;  %v1242_v32 = vmul.f32 %v14851_v34, %v703_v9  ;;  %v500_v9 = vld [vmem:[%s19594_s1 + $0x63c] sm:$0xff] }
 0x135   : > { %v14286_v0 = vpop.eup %14285  ;;  %14301 = vrcp.f32 %v3410_v51  ;;  %v2718_v1 = vadd.f32 %v2544_v52, %v1798_v61  ;;  %4846 = vperm.xlu1 %13365, %v14284_v59   ;;  %v1243_v36 = vmul.f32 %v14853_v35, %v704_v13  ;;  %v975_v40 = vunpack.c.l.bf16 %v496_v26 }
 0x136   : > { %v14288_v4 = vpop.eup %14287  ;;  %14303 = vpow2.f32 %v11895_v16  ;;  %v976_v38 = vunpack.c.h.bf16 %v496_v26  ;;  %v977_v47 = vunpack.c.l.bf16 %v497_v25  ;;  %v990_v48 = vunpack.c.l.bf16 %v506_v30 }
 0x137   : > { %v14290_v14 = vpop.eup %14289  ;;  %v3511_v45 = vadd.f32 1.0, %v14288_v4  ;;  %v11801_v17 = vmul.f32 -1.442695, %v2718_v1  ;;  %v991_v49 = vunpack.c.h.bf16 %v506_v30  ;;  %v992_v52 = vunpack.c.h.bf16 %v497_v25  ;;  %v318_v1 = vld [vmem:[%s19594_s1 + $0x1f8] sm:$0xff] }
 0x138   : > { %v14292_v15 = vpop.eup %14291  ;;  %v3506_v19 = vadd.f32 1.0, %v14290_v14  ;;  %v2278_v20 = vpop.xlane.xlu0 %2277  ;;  %4401 = vperm.xlu0 %13364, %v14286_v0   ;;  %v15726_v55 = vadd.f32 %v2290_v21, %v2289_v43  ;;  %v693_v56 = vunpack.c.l.bf16 %v308_v37  ;;  %v694_v50 = vunpack.c.h.bf16 %v308_v37  ;;  %v510_v21 = vld [vmem:[%s19594_s1 + $0x678] sm:$0xff] }
 0x139   : > { %14305 = vrcp.f32 %v3511_v45  ;;  %v2814_v28 = vadd.f32 %v2640_v7, %v2278_v20  ;;  %4376 = vperm.xlu1 %13365, %v14292_v15   ;;  %v15728_v16 = vadd.f32 %v2315_v23, %v2314_v22  ;;  %v15730_v57 = vadd.f32 %v1820_v24, %v1819_v29  ;;  %v501_v20 = vld [vmem:[%s19594_s1 + $0x644] ss:$60 sps:$4 sm:$0xff]  }
 0x13a   : > { %14307 = vrcp.f32 %v3506_v19  ;;  %v1844_v58 = vadd.f32 %v1242_v32, %v1241_v31  ;;  %v695_v59 = vunpack.c.l.bf16 %v15724_v44  ;;  %v1845_v63 = vsel %vm1644_vm0, %v1243_v36, 0.0  ;;  %v312_v32 = vld [vmem:[%s19594_s1 + $0x1d4] sm:$0xff] }
 0x13b   : > { %v14294_v39 = vpop.eup %14293  ;;  %14309 = vpow2.f32 %v11801_v17  ;;  %v11897_v27 = vmul.f32 -1.442695, %v2814_v28  ;;  %v1514_v54 = vmul.f32 %v14849_v33, %v975_v40  ;;  %v1515_v0 = vmul.f32 %v14851_v34, %v976_v38 }
 0x13c   : > { %v14296_v46 = vpop.eup %14295  ;;  %4881 = vperm.xlu0 %13364, %v14294_v39   ;;  %v1516_v3 = vmul.f32 %v14853_v35, %v977_v47  ;;  %v1529_v4 = vmul.f32 %v14849_v33, %v990_v48  ;;  %v1530_v7 = vmul.f32 %v14851_v34, %v991_v49  ;;  %v1531_v8 = vmul.f32 %v14853_v35, %v992_v52  ;;  %v15784_v49 = vld [vmem:[%s19594_s1 + $0x1dc] ss:$60 sps:$4 sm:$0xff]  }
 0x13d   : > { %v14298_v53 = vpop.eup %14297  ;;  %14311 = vpow2.f32 %v11897_v27  ;;  %4856 = vperm.xlu1 %13365, %v14296_v46   ;;  %v1232_v14 = vmul.f32 %v14849_v33, %v693_v56  ;;  %v1233_v45 = vmul.f32 %v14851_v34, %v694_v50  ;;  %v15748_v17 = vadd.f32 %v1845_v63, %v1844_v58  ;;  %v3909_v56 = vld [vmem:[%s19596_s3 + $0x18] sm:$0xff]  ;;  %v3906_v50 = vld [vmem:[%s19596_s3] sm:$0xff] }
 0x13e   : > { %v14300_v51 = vpop.eup %14299  ;;  %v1234_v43 = vmul.f32 %v14853_v35, %v695_v59  ;;  %v708_v15 = vunpack.c.l.bf16 %v318_v1  ;;  %v709_v19 = vunpack.c.h.bf16 %v318_v1  ;;  %v15757_v23 = vadd.f32 %v1515_v0, %v1514_v54 }
 0x13f   : > { %v14302_v61 = vpop.eup %14301  ;;  %v3412_v60 = vadd.f32 1.0, %v14300_v51  ;;  %v710_v26 = vunpack.c.h.bf16 %v15724_v44  ;;  %v981_v28 = vunpack.c.l.bf16 %v500_v9  ;;  %v15761_v24 = vsel %vm1644_vm0, %v1516_v3, 0.0  ;;  %v3907_v44 = vld [vmem:[%s19596_s3 + $0x8] sm:$0xff]  ;;  %v3908_v51 = vld [vmem:[%s19596_s3 + $0x10] sm:$0xff] }
 0x140   : > { %v14304_v2 = vpop.eup %14303  ;;  %4411 = vperm.xlu0 %13364, %v14298_v53   ;;  %v15763_v25 = vadd.f32 %v1530_v7, %v1529_v4  ;;  %v15766_v30 = vsel %vm1644_vm0, %v1531_v8, 0.0  ;;  %v982_v31 = vunpack.c.h.bf16 %v500_v9  ;;  %v15771_v37 = vadd.f32 %v1233_v45, %v1232_v14  ;;  %v322_v8 = vld [vmem:[%s19594_s1 + $0x210] sm:$0xff] }
 0x141   : > { %14313 = vrcp.f32 %v3412_v60  ;;  %v3508_v13 = vadd.f32 1.0, %v14304_v2  ;;  %4386 = vperm.xlu1 %13365, %v14302_v61   ;;  %v983_v39 = vunpack.c.l.bf16 %v501_v20  ;;  %v996_v27 = vunpack.c.l.bf16 %v510_v21 }
 0x142   : > { %v997_v40 = vunpack.c.h.bf16 %v510_v21  ;;  %v15777_v46 = vsel %vm1644_vm0, %v1234_v43, 0.0  ;;  %v1247_v47 = vmul.f32 %v14849_v33, %v708_v15  ;;  %v1248_v48 = vmul.f32 %v14851_v34, %v709_v19  ;;  %v504_v43 = vld [vmem:[%s19594_s1 + $0x654] sm:$0xff] }
 0x143   : > { %v14306_v22 = vpop.eup %14305  ;;  %14315 = vrcp.f32 %v3508_v13  ;;  %v1249_v58 = vmul.f32 %v14853_v35, %v710_v26  ;;  %v1520_v59 = vmul.f32 %v14849_v33, %v981_v28  ;;  %v998_v61 = vunpack.c.h.bf16 %v501_v20 }
 0x144   : > { %v14308_v29 = vpop.eup %14307  ;;  %4891 = vperm.xlu0 %13364, %v14306_v22   ;;  %v699_v60 = vunpack.c.l.bf16 %v312_v32  ;;  %v1521_v54 = vmul.f32 %v14851_v34, %v982_v31  ;;  %v700_v0 = vunpack.c.h.bf16 %v312_v32  ;;  %v1522_v2 = vmul.f32 %v14853_v35, %v983_v39  ;;  %v505_v31 = vld [vmem:[%s19594_s1 + $0x65c] ss:$60 sps:$4 sm:$0xff]   ;;  %v514_v32 = vld [vmem:[%s19594_s1 + $0x690] sm:$0xff] }
 0x145   : > { %v14310_v36 = vpop.eup %14309  ;;  %4866 = vperm.xlu1 %13365, %v14308_v29   ;;  %v4257_v53 = vpop.permute.xlu0 %4256  ;;  %v1535_v3 = vmul.f32 %v14849_v33, %v996_v27  ;;  %v1536_v4 = vmul.f32 %v14851_v34, %v997_v40  ;;  %v701_v7 = vunpack.c.l.bf16 %v15784_v49  ;;  %v15808_v19 = vadd.f32 %v1248_v48, %v1247_v47  ;;  %v4099_v47 = vld [vmem:[%s19596_s3 + $0x608] sm:$0xff] }
 0x146   : > { %v3414_v38 = vadd.f32 1.0, %v14310_v36  ;;  %v5125_v9 = vmul.f32 %v4257_v53, %v3907_v44  ;;  %v5124_v14 = vmul.f32 %v4257_v53, %v3906_v50  ;;  %v1537_v20 = vmul.f32 %v14853_v35, %v998_v61  ;;  %v4101_v50 = vld [vmem:[%s19596_s3 + $0x618] sm:$0xff] }
 0x147   : > { %v14312_v52 = vpop.eup %14311  ;;  %v1238_v21 = vmul.f32 %v14849_v33, %v699_v60  ;;  %v1239_v28 = vmul.f32 %v14851_v34, %v700_v0  ;;  %v714_v29 = vunpack.c.l.bf16 %v322_v8  ;;  %v1240_v27 = vmul.f32 %v14853_v35, %v701_v7 }
 0x148   : > { %14317 = vrcp.f32 %v3414_v38  ;;  %v3510_v63 = vadd.f32 1.0, %v14312_v52  ;;  %v715_v40 = vunpack.c.h.bf16 %v322_v8  ;;  %v716_v38 = vunpack.c.h.bf16 %v15784_v49  ;;  %v4098_v49 = vld [vmem:[%s19596_s3 + $0x600] sm:$0xff] }
 0x149   : > { %v4262_v1 = vpop.permute.xlu1 %4261  ;;  %v987_v44 = vunpack.c.l.bf16 %v504_v43  ;;  %v1855_v48 = vsel %vm1644_vm0, %v1249_v58, 0.0  ;;  %v2309_v52 = vadd.f32 %v1521_v54, %v1520_v59  ;;  %v2310_v53 = vsel %vm1644_vm0, %v1522_v2, 0.0  ;;  %v316_v2 = vld [vmem:[%s19594_s1 + $0x1ec] sm:$0xff] }
 0x14a   : > { %v5127_v13 = vmul.f32 %v4262_v1, %v3909_v56  ;;  %v5126_v45 = vmul.f32 %v4262_v1, %v3908_v51  ;;  %14319 = vrcp.f32 %v3510_v63  ;;  %v2334_v56 = vadd.f32 %v1536_v4, %v1535_v3  ;;  %v4100_v51 = vld [vmem:[%s19596_s3 + $0x610] sm:$0xff] }
 0x14b   : > { %v14314_v15 = vpop.eup %14313  ;;  %v2335_v58 = vsel %vm1644_vm0, %v1537_v20, 0.0  ;;  %v988_v59 = vunpack.c.h.bf16 %v504_v43  ;;  %v989_v61 = vunpack.c.l.bf16 %v505_v31  ;;  %v1002_v60 = vunpack.c.l.bf16 %v514_v32 }
 0x14c   : > { %4396 = vperm.xlu1 %13365, %v14314_v15   ;;  %v5473_v22 = vpack.c.bf16 %v5127_v13, %v5125_v9  ;;  %v5472_v26 = vpack.c.bf16 %v5126_v45, %v5124_v14  ;;  %v1839_v63 = vadd.f32 %v1239_v28, %v1238_v21  ;;  %v1253_v54 = vmul.f32 %v14849_v33, %v714_v29 }
 0x14d   : > { %v14316_v36 = vpop.eup %14315  ;;  %v4737_v39 = vpop.permute.xlu1 %4736  ;;  %v1003_v0 = vunpack.c.h.bf16 %v514_v32  ;;  %v1004_v1 = vunpack.c.h.bf16 %v505_v31  ;;  %v1840_v4 = vsel %vm1644_vm0, %v1240_v27, 0.0  ;;  %v1254_v7 = vmul.f32 %v14851_v34, %v715_v40 }
 0x14e   : > { %8704 = vmatprep.subr.bf16.mxu1 %v5473_v22  ;;  %v1255_v8 = vmul.f32 %v14853_v35, %v716_v38  ;;  %v1526_v9 = vmul.f32 %v14849_v33, %v987_v44  ;;  %v5317_v14 = vmul.f32 %v4737_v39, %v4099_v47  ;;  %v5316_v43 = vmul.f32 %v4737_v39, %v4098_v49  ;;  %v317_v39 = vld [vmem:[%s19594_s1 + $0x1f4] ss:$60 sps:$4 sm:$0xff]   ;;  %v3910_v49 = vld [vmem:[%s19596_s3 + $0x20] sm:$0xff] }
 0x14f   : > { %8705 = vmatpush1.bf16.msra.mxu1 %v5472_v26  ;;  %v1527_v20 = vmul.f32 %v14851_v34, %v988_v59  ;;  %v1528_v21 = vmul.f32 %v14853_v35, %v989_v61  ;;  %v1541_v22 = vmul.f32 %v14849_v33, %v1002_v60  ;;  %v705_v26 = vunpack.c.l.bf16 %v316_v2 }
 0x150   : > { %4876 = vperm.xlu1 %13365, %v14316_v36   ;;  %v1542_v32 = vmul.f32 %v14851_v34, %v1003_v0  ;;  %v1543_v36 = vmul.f32 %v14853_v35, %v1004_v1  ;;  %v15860_v38 = vadd.f32 %v15761_v24, %v15757_v23  ;;  %v15864_v44 = vadd.f32 %v15766_v30, %v15763_v25  ;;  %v326_v25 = vld [vmem:[%s19594_s1 + $0x228] sm:$0xff] }
 0x151   : > { %v4742_v3 = vpop.permute.xlu1 %4741  ;;  %v15868_v47 = vadd.f32 %v15777_v46, %v15771_v37  ;;  %v15876_v59 = vadd.f32 %v2310_v53, %v2309_v52  ;;  %v15878_v23 = vadd.f32 %v2335_v58, %v2334_v56  ;;  %v15880_v24 = vadd.f32 %v1840_v4, %v1839_v63  ;;  %v3911_v30 = vld [vmem:[%s19596_s3 + $0x28] sm:$0xff]  ;;  %v3912_v37 = vld [vmem:[%s19596_s3 + $0x30] sm:$0xff]  ;;  %v3913_v46 = vld [vmem:[%s19596_s3 + $0x38] sm:$0xff] }
 0x152   : > { %v14318_v13 = vpop.eup %14317  ;;  %v5319_v45 = vmul.f32 %v4742_v3, %v4101_v50  ;;  %v5318_v15 = vmul.f32 %v4742_v3, %v4100_v51  ;;  %v706_v50 = vunpack.c.h.bf16 %v316_v2  ;;  %v15874_v51 = vadd.f32 %v1855_v48, %v15808_v19  ;;  %v508_v0 = vld [vmem:[%s19594_s1 + $0x66c] sm:$0xff] }
 0x153   : > { %v1864_v19 = vadd.f32 %v1254_v7, %v1253_v54  ;;  %v1865_v48 = vsel %vm1644_vm0, %v1255_v8, 0.0  ;;  %v2319_v52 = vadd.f32 %v1527_v20, %v1526_v9  ;;  %v707_v53 = vunpack.c.l.bf16 %v317_v39  ;;  %v509_v54 = vld [vmem:[%s19594_s1 + $0x674] ss:$60 sps:$4 sm:$0xff]   ;;  %v518_v8 = vld [vmem:[%s19594_s1 + $0x6a8] sm:$0xff] }
 0x154   : > { %4406 = vperm.xlu1 %13365, %v14318_v13   ;;  %v15849_v28 = vpop.permute.xlu0 %4281  ;;  %v5569_v29 = vpack.c.bf16 %v5319_v45, %v5317_v14  ;;  %v5568_v31 = vpack.c.bf16 %v5318_v15, %v5316_v43  ;;  %v14320_v27 = vpop.eup %14319  ;;  %v2320_v58 = vsel %vm1644_vm0, %v1528_v21, 0.0  ;;  %v2344_v61 = vadd.f32 %v1542_v32, %v1541_v22  ;;  %v13368_v43 = vld [vmem:[%s15910_s6 + $0x4] ss:$44 sps:$4 sm:$0xff]  }
 0x155   : > { %v4267_v40 = vpop.permute.xlu1 %4266  ;;  %v2345_v60 = vsel %vm1644_vm0, %v1543_v36, 0.0  ;;  %v1244_v63 = vmul.f32 %v14849_v33, %v705_v26  ;;  %v1245_v2 = vmul.f32 %v14851_v34, %v706_v50  ;;  %v720_v3 = vunpack.c.l.bf16 %v326_v25  ;;  %v320_v36 = vld [vmem:[%s19594_s1 + $0x204] sm:$0xff]  ;;  %8736 = vmatprep.mubr.bf16.mxu1 %v13368_v43  ;;  %v4104_v50 = vld [vmem:[%s19596_s3 + $0x630] sm:$0xff] }
 0x156   : > { %10117 = vmatprep.subr.bf16.mxu0 %v5569_v29  ;;  %v721_v4 = vunpack.c.h.bf16 %v326_v25  ;;  %v722_v7 = vunpack.c.h.bf16 %v317_v39  ;;  %v5128_v9 = vmul.f32 %v4267_v40, %v3910_v49  ;;  %v5129_v13 = vmul.f32 %v4267_v40, %v3911_v30  ;;  %v4102_v39 = vld [vmem:[%s19596_s3 + $0x620] sm:$0xff]  ;;  %v4105_v49 = vld [vmem:[%s19596_s3 + $0x638] sm:$0xff] }
 0x157   : > { %10118 = vmatpush1.bf16.msra.mxu0 %v5568_v31  ;;  %v1246_v15 = vmul.f32 %v14853_v35, %v707_v53  ;;  %v993_v20 = vunpack.c.l.bf16 %v508_v0  ;;  %v994_v21 = vunpack.c.h.bf16 %v508_v0  ;;  %v995_v22 = vunpack.c.l.bf16 %v509_v54 }
 0x158   : > { %4886 = vperm.xlu1 %13365, %v14320_v27   ;;  %v15896_v56 = vpop.permute.xlu0 %4761  ;;  %v1008_v31 = vunpack.c.l.bf16 %v518_v8  ;;  %v1009_v32 = vunpack.c.h.bf16 %v518_v8  ;;  %v4103_v27 = vld [vmem:[%s19596_s3 + $0x628] sm:$0xff]  ;;  %v1259_v25 = vmul.f32 %v14849_v33, %v720_v3  ;;  %v1260_v30 = vmul.f32 %v14851_v34, %v721_v4 }
 0x159   : > { %v4272_v1 = vpop.permute.xlu1 %4271  ;;  %v15938_v0 = vadd.f32 %v1865_v48, %v1864_v19  ;;  %v15942_v8 = vadd.f32 %v2345_v60, %v2344_v61  ;;  %v13371_v3 = vld [vmem:[%s15910_s6 + $0x1c] ss:$44 sps:$4 sm:$0xff]   ;;  %v1532_v4 = vmul.f32 %v14849_v33, %v993_v20  ;;  %v711_v19 = vunpack.c.l.bf16 %v320_v36  ;;  %v330_v60 = vld [vmem:[%s19594_s1 + $0x240] sm:$0xff] }
 0x15a   : > { %v5130_v14 = vmul.f32 %v4272_v1, %v3912_v37  ;;  %v5131_v45 = vmul.f32 %v4272_v1, %v3913_v46  ;;  %v1261_v37 = vmul.f32 %v14853_v35, %v722_v7  ;;  %v1010_v46 = vunpack.c.h.bf16 %v509_v54  ;;  %10149 = vmatprep.mubr.bf16.mxu0 %v13371_v3 }
 0x15b   : > { %v15940_v1 = vadd.f32 %v2320_v58, %v2319_v52  ;;  %v1533_v54 = vmul.f32 %v14851_v34, %v994_v21  ;;  %v1534_v7 = vmul.f32 %v14853_v35, %v995_v22  ;;  %v1850_v48 = vsel %vm1644_vm0, %v1246_v15, 0.0 }
 0x15c   : > { %v5475_v26 = vpack.c.bf16 %v5131_v45, %v5129_v13  ;;  %v5474_v29 = vpack.c.bf16 %v5130_v14, %v5128_v9  ;;  %v1849_v9 = vadd.f32 %v1245_v2, %v1244_v63  ;;  %v15947_v13 = vld [vmem:[%s19594_s1 + $0x20c] ss:$60 sps:$4 sm:$0xff]   ;;  %v1547_v52 = vmul.f32 %v14849_v33, %v1008_v31  ;;  %v3916_v63 = vld [vmem:[%s19596_s3 + $0x50] sm:$0xff]  ;;  %v3917_v2 = vld [vmem:[%s19596_s3 + $0x58] sm:$0xff] }
 0x15d   : > { %v4747_v40 = vpop.permute.xlu1 %4746  ;;  %v1548_v58 = vmul.f32 %v14851_v34, %v1009_v32  ;;  %v712_v61 = vunpack.c.h.bf16 %v320_v36  ;;  %v3914_v45 = vld [vmem:[%s19596_s3 + $0x40] sm:$0xff]  ;;  %v1874_v43 = vadd.f32 %v1260_v30, %v1259_v25  ;;  %v1875_v15 = vsel %vm1644_vm0, %v1261_v37, 0.0  ;;  %v3915_v36 = vld [vmem:[%s19596_s3 + $0x48] sm:$0xff] }
 0x15e   : > { %v15936_v53 = vpop.permute.xlu0 %4291  ;;  %8706 = vmatprep.subr.bf16.mxu1 %v5475_v26  ;;  %v1549_v20 = vmul.f32 %v14853_v35, %v1010_v46  ;;  %v713_v21 = vunpack.c.l.bf16 %v15947_v13  ;;  %v5320_v22 = vmul.f32 %v4747_v40, %v4102_v39  ;;  %v5321_v26 = vmul.f32 %v4747_v40, %v4103_v27  ;;  %v4108_v40 = vld [vmem:[%s19596_s3 + $0x650] sm:$0xff] }
 0x15f   : > { %8707 = vmatpush1.bf16.msra.mxu1 %v5474_v29  ;;  %v2329_v3 = vadd.f32 %v1533_v54, %v1532_v4  ;;  %v2330_v25 = vsel %vm1644_vm0, %v1534_v7, 0.0  ;;  %v1250_v30 = vmul.f32 %v14849_v33, %v711_v19  ;;  %v726_v37 = vunpack.c.l.bf16 %v330_v60  ;;  %v4107_v4 = vld [vmem:[%s19596_s3 + $0x648] sm:$0xff] }
 0x160   : > { %v2354_v39 = vadd.f32 %v1548_v58, %v1547_v52  ;;  %v1251_v27 = vmul.f32 %v14851_v34, %v712_v61  ;;  %v2355_v54 = vsel %vm1644_vm0, %v1549_v20, 0.0  ;;  %v1252_v7 = vmul.f32 %v14853_v35, %v713_v21  ;;  %v16005_v20 = vld [vmem:[%s19594_s1 + $0x68c] ss:$60 sps:$4 sm:$0xff]  }
 0x161   : > { %v4752_v14 = vpop.permute.xlu1 %4751  ;;  %v727_v19 = vunpack.c.h.bf16 %v330_v60  ;;  %v728_v52 = vunpack.c.h.bf16 %v15947_v13  ;;  %v5134_v58 = vmul.f32 %v15849_v28, %v3916_v63  ;;  %v5135_v61 = vmul.f32 %v15849_v28, %v3917_v2  ;;  %v522_v63 = vld [vmem:[%s19594_s1 + $0x6c0] sm:$0xff] }
 0x162   : > { %v5322_v29 = vmul.f32 %v4752_v14, %v4104_v50  ;;  %v5323_v31 = vmul.f32 %v4752_v14, %v4105_v49  ;;  %v15971_v32 = vpop.permute.xlu0 %4771  ;;  %v4106_v49 = vld [vmem:[%s19596_s3 + $0x640] sm:$0xff]  ;;  %v16008_v13 = vadd.f32 %v1850_v48, %v1849_v9  ;;  %v16010_v28 = vadd.f32 %v1875_v15, %v1874_v43  ;;  %v3921_v9 = vld [vmem:[%s19596_s3 + $0x78] sm:$0xff] }
 0x163   : > { %1812 = vadd.xlane.f32.xlu0 %v15572_v5  ;;  %v4109_v5 = vld [vmem:[%s19596_s3 + $0x658] sm:$0xff]  ;;  %v16012_v60 = vadd.f32 %v2330_v25, %v2329_v3  ;;  %v16017_v21 = vadd.f32 %v2355_v54, %v2354_v39  ;;  %v3918_v43 = vld [vmem:[%s19596_s3 + $0x60] sm:$0xff]  ;;  %v16034_v15 = vsel %vm1644_vm0, %v1252_v7, 0.0  ;;  %v1266_v3 = vmul.f32 %v14851_v34, %v727_v19 }
 0x164   : > { %v5571_v46 = vpack.c.bf16 %v5323_v31, %v5321_v26  ;;  %v5570_v62 = vpack.c.bf16 %v5322_v29, %v5320_v22  ;;  %v512_v29 = vld [vmem:[%s19594_s1 + $0x684] sm:$0xff]  ;;  %v16019_v31 = vadd.f32 %v1251_v27, %v1250_v30  ;;  %v1267_v25 = vmul.f32 %v14853_v35, %v728_v52 }
 0x165   : > { %v4277_v50 = vpop.permute.xlu1 %4276  ;;  %19601 = vst [vmem:[#allocation2_spill] sm:$0xff] %v16012_v60  ;;  %19602 = vst [vmem:[#allocation3_spill] sm:$0xff] %v16017_v21  ;;  %v16042_v30 = vld [vmem:[%s19594_s1 + $0x224] ss:$60 sps:$4 sm:$0xff]   ;;  %v5327_v39 = vmul.f32 %v15896_v56, %v4109_v5  ;;  %v999_v7 = vunpack.c.l.bf16 %v512_v29  ;;  %v1000_v19 = vunpack.c.h.bf16 %v512_v29  ;;  %v1001_v52 = vunpack.c.l.bf16 %v16005_v20 }
 0x166   : > { %v5132_v14 = vmul.f32 %v4277_v50, %v3914_v45  ;;  %v5133_v22 = vmul.f32 %v4277_v50, %v3915_v36  ;;  %v15997_v26 = vpop.permute.xlu0 %4301  ;;  %10119 = vmatprep.subr.bf16.mxu0 %v5571_v46  ;;  %v1265_v36 = vmul.f32 %v14849_v33, %v726_v37  ;;  %v5326_v46 = vmul.f32 %v15896_v56, %v4108_v40  ;;  %v3919_v37 = vld [vmem:[%s19596_s3 + $0x68] sm:$0xff] }
 0x167   : > { %2287 = vadd.xlane.f32.xlu0 %v15574_v6  ;;  %10120 = vmatpush1.bf16.msra.mxu0 %v5570_v62  ;;  %v324_v62 = vld [vmem:[%s19594_s1 + $0x21c] sm:$0xff]  ;;  %v3920_v6 = vld [vmem:[%s19596_s3 + $0x70] sm:$0xff]  ;;  %v1015_v56 = vunpack.c.h.bf16 %v522_v63  ;;  %v1016_v5 = vunpack.c.h.bf16 %v16005_v20  ;;  %v734_v60 = vunpack.c.h.bf16 %v16042_v30 }
 0x168   : > { %v5477_v2 = vpack.c.bf16 %v5135_v61, %v5133_v22  ;;  %v5476_v45 = vpack.c.bf16 %v5134_v58, %v5132_v14  ;;  %v1014_v58 = vunpack.c.l.bf16 %v522_v63  ;;  %v4110_v14 = vld [vmem:[%s19596_s3 + $0x660] sm:$0xff]  ;;  %v16063_v22 = vadd.f32 %v1266_v3, %v1265_v36  ;;  %v4111_v36 = vld [vmem:[%s19596_s3 + $0x668] sm:$0xff] }
 0x169   : > { %v4757_v48 = vpop.permute.xlu1 %4756  ;;  %v717_v29 = vunpack.c.l.bf16 %v324_v62  ;;  %v719_v63 = vunpack.c.l.bf16 %v16042_v30  ;;  %v5138_v20 = vmul.f32 %v15936_v53, %v3920_v6  ;;  %v1538_v3 = vmul.f32 %v14849_v33, %v999_v7  ;;  %v4115_v30 = vld [vmem:[%s19596_s3 + $0x688] sm:$0xff] }
 0x16a   : > { %v5324_v27 = vmul.f32 %v4757_v48, %v4106_v49  ;;  %v5325_v50 = vmul.f32 %v4757_v48, %v4107_v4  ;;  %v16046_v54 = vpop.permute.xlu0 %4781  ;;  %8708 = vmatprep.subr.bf16.mxu1 %v5477_v2  ;;  %v4112_v49 = vld [vmem:[%s19596_s3 + $0x670] sm:$0xff]  ;;  %v718_v2 = vunpack.c.h.bf16 %v324_v62  ;;  %v1885_v62 = vsel %vm1644_vm0, %v1267_v25, 0.0 }
 0x16b   : > { %1817 = vadd.xlane.f32.xlu0 %v15592_v41  ;;  %8709 = vmatpush1.bf16.msra.mxu1 %v5476_v45  ;;  %v4113_v41 = vld [vmem:[%s19596_s3 + $0x678] sm:$0xff]  ;;  %v5139_v45 = vmul.f32 %v15936_v53, %v3921_v9  ;;  %v1539_v6 = vmul.f32 %v14851_v34, %v1000_v19  ;;  %v1540_v53 = vmul.f32 %v14853_v35, %v1001_v52  ;;  %v3924_v25 = vld [vmem:[%s19596_s3 + $0x90] sm:$0xff]  ;;  %v3922_v19 = vld [vmem:[%s19596_s3 + $0x80] sm:$0xff] }
 0x16c   : > { %v5573_v40 = vpack.c.bf16 %v5327_v39, %v5325_v50  ;;  %v5572_v61 = vpack.c.bf16 %v5326_v46, %v5324_v27  ;;  %v1553_v27 = vmul.f32 %v14849_v33, %v1014_v58  ;;  %v1554_v50 = vmul.f32 %v14851_v34, %v1015_v56  ;;  %v16099_v56 = vld [vmem:[%s19594_s1 + $0x69c] sm:$0xff] }
 0x16d   : > { %v4287_v4 = vpop.permute.xlu1 %4286  ;;  %v1555_v52 = vmul.f32 %v14853_v35, %v1016_v5  ;;  %v1256_v58 = vmul.f32 %v14849_v33, %v717_v29  ;;  %v3923_v5 = vld [vmem:[%s19596_s3 + $0x88] sm:$0xff]  ;;  %v2339_v29 = vadd.f32 %v1539_v6, %v1538_v3  ;;  %v4114_v3 = vld [vmem:[%s19596_s3 + $0x680] sm:$0xff] }
 0x16e   : > { %v5136_v48 = vmul.f32 %v4287_v4, %v3918_v43  ;;  %v5137_v46 = vmul.f32 %v4287_v4, %v3919_v37  ;;  %v16068_v39 = vpop.permute.xlu0 %4311  ;;  %10121 = vmatprep.subr.bf16.mxu0 %v5573_v40  ;;  %v3925_v37 = vld [vmem:[%s19596_s3 + $0x98] sm:$0xff]  ;;  %v1257_v40 = vmul.f32 %v14851_v34, %v718_v2  ;;  %v5330_v4 = vmul.f32 %v15971_v32, %v4112_v49 }
 0x16f   : > { %2297 = vadd.xlane.f32.xlu0 %v15655_v10  ;;  %10122 = vmatpush1.bf16.msra.mxu0 %v5572_v61  ;;  %v334_v10 = vld [vmem:[%s19594_s1 + $0x258] sm:$0xff]  ;;  %v1258_v61 = vmul.f32 %v14853_v35, %v719_v63  ;;  %v2365_v6 = vsel %vm1644_vm0, %v1555_v52, 0.0 }
 0x170   : > { %v5479_v9 = vpack.c.bf16 %v5139_v45, %v5137_v46  ;;  %v5478_v43 = vpack.c.bf16 %v5138_v20, %v5136_v48  ;;  %v5331_v20 = vmul.f32 %v15971_v32, %v4113_v41  ;;  %v732_v2 = vunpack.c.l.bf16 %v334_v10 }
 0x171   : > { %v4767_v7 = vpop.permute.xlu1 %4766  ;;  %v733_v63 = vunpack.c.h.bf16 %v334_v10  ;;  %v2340_v32 = vsel %vm1644_vm0, %v1540_v53, 0.0  ;;  %v2364_v41 = vadd.f32 %v1554_v50, %v1553_v27  ;;  %v1869_v53 = vadd.f32 %v1257_v40, %v1256_v58 }
 0x172   : > { %v5328_v45 = vmul.f32 %v4767_v7, %v4110_v14  ;;  %v5329_v48 = vmul.f32 %v4767_v7, %v4111_v36  ;;  %v16103_v46 = vpop.permute.xlu0 %4791  ;;  %8710 = vmatprep.subr.bf16.mxu1 %v5479_v9  ;;  %v4116_v14 = vld [vmem:[%s19596_s3 + $0x690] sm:$0xff]  ;;  %v1870_v9 = vsel %vm1644_vm0, %v1258_v61, 0.0  ;;  %v5142_v27 = vmul.f32 %v15997_v26, %v3924_v25 }
 0x173   : > { %1827 = vadd.xlane.f32.xlu0 %v15657_v11  ;;  %8711 = vmatpush1.bf16.msra.mxu1 %v5478_v43  ;;  %v4117_v11 = vld [vmem:[%s19596_s3 + $0x698] sm:$0xff]  ;;  %v1005_v43 = vunpack.c.l.bf16 %v16099_v56  ;;  %v5143_v50 = vmul.f32 %v15997_v26, %v3925_v37  ;;  %v1271_v52 = vmul.f32 %v14849_v33, %v732_v2  ;;  %v1272_v58 = vmul.f32 %v14851_v34, %v733_v63 }
 0x174   : > { %v5575_v49 = vpack.c.bf16 %v5331_v20, %v5329_v48  ;;  %v5574_v21 = vpack.c.bf16 %v5330_v4, %v5328_v45  ;;  %v16133_v20 = vld [vmem:[%s19594_s1 + $0x6a4] ss:$60 sps:$4 sm:$0xff]   ;;  %v1273_v25 = vmul.f32 %v14853_v35, %v734_v60  ;;  %v1006_v26 = vunpack.c.h.bf16 %v16099_v56  ;;  %v526_v37 = vld [vmem:[%s19594_s1 + $0x6d8] sm:$0xff] }
 0x175   : > { %v4297_v36 = vpop.permute.xlu1 %4296  ;;  %v16145_v61 = vadd.f32 %v16034_v15, %v16019_v31  ;;  %v3929_v60 = vld [vmem:[%s19596_s3 + $0xb8] sm:$0xff]  ;;  %v3926_v45 = vld [vmem:[%s19596_s3 + $0xa0] sm:$0xff]  ;;  %v3927_v31 = vld [vmem:[%s19596_s3 + $0xa8] sm:$0xff]  ;;  %v16162_v15 = vadd.f32 %v2340_v32, %v2339_v29  ;;  %v1007_v48 = vunpack.c.l.bf16 %v16133_v20  ;;  %v5334_v2 = vmul.f32 %v16046_v54, %v4116_v14 }
 0x176   : > { %v5140_v10 = vmul.f32 %v4297_v36, %v3922_v19  ;;  %v5141_v7 = vmul.f32 %v4297_v36, %v3923_v5  ;;  %v16128_v4 = vpop.permute.xlu0 %4321  ;;  %10123 = vmatprep.subr.bf16.mxu0 %v5575_v49  ;;  %v328_v5 = vld [vmem:[%s19594_s1 + $0x234] sm:$0xff]  ;;  %v5335_v63 = vmul.f32 %v16046_v54, %v4117_v11  ;;  %v16182_v32 = vadd.f32 %v1272_v58, %v1271_v52 }
 0x177   : > { %2307 = vadd.xlane.f32.xlu0 %v15662_v12  ;;  %10124 = vmatpush1.bf16.msra.mxu0 %v5574_v21  ;;  %v16148_v12 = vadd.f32 %v1885_v62, %v16063_v22  ;;  %v3928_v21 = vld [vmem:[%s19596_s3 + $0xb0] sm:$0xff]  ;;  %v16164_v22 = vadd.f32 %v2365_v6, %v2364_v41  ;;  %v16166_v62 = vadd.f32 %v1870_v9, %v1869_v53  ;;  %v16179_v29 = vld [vmem:[%s19594_s1 + $0x23c] ss:$60 sps:$4 sm:$0xff]   ;;  %v16185_v41 = vsel %vm1644_vm0, %v1273_v25, 0.0 }
 0x178   : > { %v5481_v19 = vpack.c.bf16 %v5143_v50, %v5141_v7  ;;  %v5480_v40 = vpack.c.bf16 %v5142_v27, %v5140_v10  ;;  %v1544_v54 = vmul.f32 %v14849_v33, %v1005_v43  ;;  %v1545_v14 = vmul.f32 %v14851_v34, %v1006_v26  ;;  %v338_v11 = vld [vmem:[%s19594_s1 + $0x270] sm:$0xff]  ;;  %v4121_v9 = vld [vmem:[%s19596_s3 + $0x6b8] sm:$0xff]  ;;  %v4118_v50 = vld [vmem:[%s19596_s3 + $0x6a0] sm:$0xff] }
 0x179   : > { %v4777_v56 = vpop.permute.xlu1 %4776  ;;  %v1020_v6 = vunpack.c.l.bf16 %v526_v37  ;;  %v4120_v53 = vld [vmem:[%s19596_s3 + $0x6b0] sm:$0xff]  ;;  %v1546_v10 = vmul.f32 %v14853_v35, %v1007_v48  ;;  %v723_v7 = vunpack.c.l.bf16 %v328_v5  ;;  %v724_v52 = vunpack.c.h.bf16 %v328_v5 }
 0x17a   : > { %v5332_v49 = vmul.f32 %v4777_v56, %v4114_v3  ;;  %v5333_v36 = vmul.f32 %v4777_v56, %v4115_v30  ;;  %v16174_v27 = vpop.permute.xlu0 %4801  ;;  %8712 = vmatprep.subr.bf16.mxu1 %v5481_v19  ;;  %v5146_v58 = vmul.f32 %v16068_v39, %v3928_v21  ;;  %v5147_v25 = vmul.f32 %v16068_v39, %v3929_v60  ;;  %v16216_v39 = vld [vmem:[%s19594_s1 + $0x6b4] sm:$0xff] }
 0x17b   : > { %1837 = vadd.xlane.f32.xlu0 %v15701_v42  ;;  %8713 = vmatpush1.bf16.msra.mxu1 %v5480_v40  ;;  %v1021_v42 = vunpack.c.h.bf16 %v526_v37  ;;  %v4119_v40 = vld [vmem:[%s19596_s3 + $0x6a8] sm:$0xff]  ;;  %v2349_v56 = vadd.f32 %v1545_v14, %v1544_v54  ;;  %v738_v48 = vunpack.c.l.bf16 %v338_v11  ;;  %v739_v5 = vunpack.c.h.bf16 %v338_v11  ;;  %v16237_v11 = vld [vmem:[%s19594_s1 + $0x6bc] ss:$60 sps:$4 sm:$0xff]  }
 0x17c   : > { %1807 = vadd.xlane.f32.xlu1 %v15664_v18  ;;  %v5577_v3 = vpack.c.bf16 %v5335_v63, %v5333_v36  ;;  %v5576_v30 = vpack.c.bf16 %v5334_v2, %v5332_v49  ;;  %v1022_v18 = vunpack.c.h.bf16 %v16133_v20  ;;  %v725_v20 = vunpack.c.l.bf16 %v16179_v29  ;;  %v3933_v2 = vld [vmem:[%s19596_s3 + $0xd8] sm:$0xff]  ;;  %v3930_v49 = vld [vmem:[%s19596_s3 + $0xc0] sm:$0xff] }
 0x17d   : > { %v4307_v43 = vpop.permute.xlu1 %4306  ;;  %v1262_v36 = vmul.f32 %v14849_v33, %v723_v7  ;;  %v1263_v54 = vmul.f32 %v14851_v34, %v724_v52  ;;  %v740_v14 = vunpack.c.h.bf16 %v16179_v29  ;;  %v3931_v29 = vld [vmem:[%s19596_s3 + $0xc8] sm:$0xff] }
 0x17e   : > { %v5144_v26 = vmul.f32 %v4307_v43, %v3926_v45  ;;  %v5145_v37 = vmul.f32 %v4307_v43, %v3927_v31  ;;  %v16206_v19 = vpop.permute.xlu0 %4331  ;;  %10125 = vmatprep.subr.bf16.mxu0 %v5577_v3  ;;  %v1559_v45 = vmul.f32 %v14849_v33, %v1020_v6  ;;  %v1560_v31 = vmul.f32 %v14851_v34, %v1021_v42 }
 0x17f   : > { %2317 = vadd.xlane.f32.xlu0 %v15728_v16  ;;  %10126 = vmatpush1.bf16.msra.mxu0 %v5576_v30  ;;  %v3932_v16 = vld [vmem:[%s19596_s3 + $0xd0] sm:$0xff]  ;;  %v5338_v3 = vmul.f32 %v16103_v46, %v4120_v53  ;;  %v5339_v30 = vmul.f32 %v16103_v46, %v4121_v9  ;;  %v2350_v53 = vsel %vm1644_vm0, %v1546_v10, 0.0  ;;  %v1264_v46 = vmul.f32 %v14853_v35, %v725_v20 }
 0x180   : > { %2292 = vadd.xlane.f32.xlu1 %v15726_v55  ;;  %v5483_v21 = vpack.c.bf16 %v5147_v25, %v5145_v37  ;;  %v5482_v60 = vpack.c.bf16 %v5146_v58, %v5144_v26  ;;  %v1561_v55 = vmul.f32 %v14853_v35, %v1022_v18  ;;  %v530_v18 = vld [vmem:[%s19594_s1 + $0x6f0] sm:$0xff]  ;;  %v1277_v9 = vmul.f32 %v14849_v33, %v738_v48 }
 0x181   : > { %v4787_v63 = vpop.permute.xlu1 %4786  ;;  %v1011_v58 = vunpack.c.l.bf16 %v16216_v39  ;;  %v1279_v26 = vmul.f32 %v14853_v35, %v740_v14  ;;  %v1013_v37 = vunpack.c.l.bf16 %v16237_v11  ;;  %v1026_v10 = vunpack.c.l.bf16 %v530_v18 }
 0x182   : > { %v5336_v6 = vmul.f32 %v4787_v63, %v4118_v50  ;;  %v5337_v42 = vmul.f32 %v4787_v63, %v4119_v40  ;;  %v16241_v43 = vpop.permute.xlu0 %4811  ;;  %8714 = vmatprep.subr.bf16.mxu1 %v5483_v21  ;;  %v1278_v50 = vmul.f32 %v14851_v34, %v739_v5  ;;  %v1027_v40 = vunpack.c.h.bf16 %v530_v18  ;;  %v4125_v5 = vld [vmem:[%s19596_s3 + $0x6d8] sm:$0xff]  ;;  %v4122_v63 = vld [vmem:[%s19596_s3 + $0x6c0] sm:$0xff] }
 0x183   : > { %1847 = vadd.xlane.f32.xlu0 %v15748_v17  ;;  %8715 = vmatpush1.bf16.msra.mxu1 %v5482_v60  ;;  %v1012_v17 = vunpack.c.h.bf16 %v16216_v39  ;;  %v5150_v20 = vmul.f32 %v16128_v4, %v3932_v16  ;;  %v5151_v48 = vmul.f32 %v16128_v4, %v3933_v2  ;;  %v4123_v4 = vld [vmem:[%s19596_s3 + $0x6c8] sm:$0xff]  ;;  %v16278_v16 = vadd.f32 %v16185_v41, %v16182_v32  ;;  %v3936_v32 = vld [vmem:[%s19596_s3 + $0xf0] sm:$0xff] }
 0x184   : > { %1822 = vadd.xlane.f32.xlu1 %v15730_v57  ;;  %v5579_v7 = vpack.c.bf16 %v5339_v30, %v5337_v42  ;;  %v5578_v52 = vpack.c.bf16 %v5338_v3, %v5336_v6  ;;  %v4124_v57 = vld [vmem:[%s19596_s3 + $0x6d0] sm:$0xff]  ;;  %v16280_v2 = vadd.f32 %v2350_v53, %v2349_v56  ;;  %v2375_v14 = vsel %vm1644_vm0, %v1561_v55, 0.0  ;;  %v3937_v55 = vld [vmem:[%s19596_s3 + $0xf8] sm:$0xff] }
 0x185   : > { %v4317_v25 = vpop.permute.xlu1 %4316  ;;  %v332_v3 = vld [vmem:[%s19594_s1 + $0x24c] sm:$0xff]  ;;  %v1028_v42 = vunpack.c.h.bf16 %v16237_v11  ;;  %v1879_v41 = vadd.f32 %v1263_v54, %v1262_v36  ;;  %v1904_v56 = vadd.f32 %v1278_v50, %v1277_v9  ;;  %v3934_v36 = vld [vmem:[%s19596_s3 + $0xe0] sm:$0xff]  ;;  %v1551_v54 = vmul.f32 %v14851_v34, %v1012_v17 }
 0x186   : > { %v5148_v39 = vmul.f32 %v4317_v25, %v3930_v49  ;;  %v5149_v21 = vmul.f32 %v4317_v25, %v3931_v29  ;;  %v16267_v60 = vpop.permute.xlu0 %4341  ;;  %10127 = vmatprep.subr.bf16.mxu0 %v5579_v7  ;;  %v2374_v49 = vadd.f32 %v1560_v31, %v1559_v45  ;;  %v1905_v45 = vsel %vm1644_vm0, %v1279_v26, 0.0 }
 0x187   : > { %2327 = vadd.xlane.f32.xlu0 %v15864_v44  ;;  %10128 = vmatpush1.bf16.msra.mxu0 %v5578_v52  ;;  %v1880_v44 = vsel %vm1644_vm0, %v1264_v46, 0.0  ;;  %v1550_v31 = vmul.f32 %v14849_v33, %v1011_v58  ;;  %v1552_v29 = vmul.f32 %v14853_v35, %v1013_v37  ;;  %v1565_v53 = vmul.f32 %v14849_v33, %v1026_v10  ;;  %v3935_v58 = vld [vmem:[%s19596_s3 + $0xe8] sm:$0xff] }
 0x188   : > { %2302 = vadd.xlane.f32.xlu1 %v15860_v38  ;;  %v5485_v30 = vpack.c.bf16 %v5151_v48, %v5149_v21  ;;  %v5484_v6 = vpack.c.bf16 %v5150_v20, %v5148_v39  ;;  %v16297_v38 = vld [vmem:[%s19594_s1 + $0x254] ss:$60 sps:$4 sm:$0xff]   ;;  %v1566_v46 = vmul.f32 %v14851_v34, %v1027_v40  ;;  %v5342_v9 = vmul.f32 %v16174_v27, %v4124_v57  ;;  %v4127_v39 = vld [vmem:[%s19596_s3 + $0x6e8] sm:$0xff] }
 0x189   : > { %v5343_v50 = vmul.f32 %v16174_v27, %v4125_v5  ;;  %v1567_v17 = vmul.f32 %v14853_v35, %v1028_v42  ;;  %v729_v25 = vunpack.c.l.bf16 %v332_v3  ;;  %v730_v26 = vunpack.c.h.bf16 %v332_v3  ;;  %v4128_v27 = vld [vmem:[%s19596_s3 + $0x6f0] sm:$0xff]  ;;  %v4126_v5 = vld [vmem:[%s19596_s3 + $0x6e0] sm:$0xff] }
 0x18a   : > { %v4797_v11 = vpop.permute.xlu1 %4796  ;;  %v16302_v18 = vpop.permute.xlu0 %4821  ;;  %8716 = vmatprep.subr.bf16.mxu1 %v5485_v30  ;;  %v731_v37 = vunpack.c.l.bf16 %v16297_v38  ;;  %v16325_v20 = vadd.f32 %v1880_v44, %v1879_v41  ;;  %v5154_v48 = vmul.f32 %v16206_v19, %v3936_v32  ;;  %v16337_v21 = vadd.f32 %v1905_v45, %v1904_v56  ;;  %v524_v42 = vld [vmem:[%s19594_s1 + $0x6cc] sm:$0xff] }
 0x18b   : > { %v5340_v7 = vmul.f32 %v4797_v11, %v4122_v63  ;;  %v5341_v52 = vmul.f32 %v4797_v11, %v4123_v4  ;;  %1857 = vadd.xlane.f32.xlu0 %v15874_v51  ;;  %8717 = vmatpush1.bf16.msra.mxu1 %v5484_v6  ;;  %v16323_v51 = vadd.f32 %v2375_v14, %v2374_v49  ;;  %v342_v49 = vld [vmem:[%s19594_s1 + $0x288] sm:$0xff]  ;;  %v2360_v44 = vsel %vm1644_vm0, %v1552_v29, 0.0  ;;  %v3940_v56 = vld [vmem:[%s19596_s3 + $0x110] sm:$0xff] }
 0x18c   : > { %1832 = vadd.xlane.f32.xlu1 %v15868_v47  ;;  %v4129_v47 = vld [vmem:[%s19596_s3 + $0x6f8] sm:$0xff]  ;;  %v2359_v63 = vadd.f32 %v1551_v54, %v1550_v31  ;;  %v2384_v4 = vadd.f32 %v1566_v46, %v1565_v53  ;;  %v5155_v14 = vmul.f32 %v16206_v19, %v3937_v55  ;;  %v2385_v32 = vsel %vm1644_vm0, %v1567_v17, 0.0  ;;  %v3938_v53 = vld [vmem:[%s19596_s3 + $0x100] sm:$0xff] }
 0x18d   : > { %v5581_v10 = vpack.c.bf16 %v5343_v50, %v5341_v52  ;;  %v5580_v40 = vpack.c.bf16 %v5342_v9, %v5340_v7  ;;  %v1268_v19 = vmul.f32 %v14849_v33, %v729_v25  ;;  %v1269_v41 = vmul.f32 %v14851_v34, %v730_v26  ;;  %v3941_v54 = vld [vmem:[%s19596_s3 + $0x118] sm:$0xff]  ;;  %v3939_v25 = vld [vmem:[%s19596_s3 + $0x108] sm:$0xff] }
 0x18e   : > { %v4327_v57 = vpop.permute.xlu1 %4326  ;;  %v744_v55 = vunpack.c.l.bf16 %v342_v49  ;;  %v745_v11 = vunpack.c.h.bf16 %v342_v49  ;;  %v746_v46 = vunpack.c.h.bf16 %v16297_v38  ;;  %v1017_v9 = vunpack.c.l.bf16 %v524_v42 }
 0x18f   : > { %v5152_v3 = vmul.f32 %v4327_v57, %v3934_v36  ;;  %v5153_v30 = vmul.f32 %v4327_v57, %v3935_v58  ;;  %2337 = vadd.xlane.f32.xlu0 %v15878_v23  ;;  %v16344_v6 = vpop.permute.xlu0 %4351  ;;  %10129 = vmatprep.subr.bf16.mxu0 %v5581_v10  ;;  %v1270_v23 = vmul.f32 %v14853_v35, %v731_v37  ;;  %v1018_v50 = vunpack.c.h.bf16 %v524_v42  ;;  %v4133_v57 = vld [vmem:[%s19596_s3 + $0x718] sm:$0xff] }
 0x190   : > { %2312 = vadd.xlane.f32.xlu1 %v15876_v59  ;;  %10130 = vmatpush1.bf16.msra.mxu0 %v5580_v40  ;;  %v16361_v59 = vld [vmem:[%s19594_s1 + $0x6d4] ss:$60 sps:$4 sm:$0xff]   ;;  %v5346_v36 = vmul.f32 %v16241_v43, %v4128_v27  ;;  %v5347_v7 = vmul.f32 %v16241_v43, %v4129_v47  ;;  %v16379_v26 = vadd.f32 %v2360_v44, %v2359_v63  ;;  %v4131_v63 = vld [vmem:[%s19596_s3 + $0x708] sm:$0xff] }
 0x191   : > { %v5487_v45 = vpack.c.bf16 %v5155_v14, %v5153_v30  ;;  %v5486_v31 = vpack.c.bf16 %v5154_v48, %v5152_v3  ;;  %v16381_v38 = vadd.f32 %v2385_v32, %v2384_v4  ;;  %v16383_v37 = vadd.f32 %v1269_v41, %v1268_v19  ;;  %v336_v3 = vld [vmem:[%s19594_s1 + $0x264] sm:$0xff] }
 0x192   : > { %v4807_v29 = vpop.permute.xlu1 %4806  ;;  %v1019_v43 = vunpack.c.l.bf16 %v16361_v59  ;;  %v1283_v40 = vmul.f32 %v14849_v33, %v744_v55  ;;  %v1284_v48 = vmul.f32 %v14851_v34, %v745_v11  ;;  %v5158_v47 = vmul.f32 %v16267_v60, %v3940_v56  ;;  %v16418_v41 = vld [vmem:[%s19594_s1 + $0x26c] ss:$60 sps:$4 sm:$0xff]  }
 0x193   : > { %v5344_v52 = vmul.f32 %v4807_v29, %v4126_v5  ;;  %v5345_v58 = vmul.f32 %v4807_v29, %v4127_v39  ;;  %1867 = vadd.xlane.f32.xlu0 %v15938_v0  ;;  %v16373_v17 = vpop.permute.xlu0 %4831  ;;  %8718 = vmatprep.subr.bf16.mxu1 %v5487_v45  ;;  %v4132_v0 = vld [vmem:[%s19596_s3 + $0x710] sm:$0xff]  ;;  %v4130_v39 = vld [vmem:[%s19596_s3 + $0x700] sm:$0xff]  ;;  %v1285_v4 = vmul.f32 %v14853_v35, %v746_v46  ;;  %v1890_v19 = vsel %vm1644_vm0, %v1270_v23, 0.0 }
 0x194   : > { %1842 = vadd.xlane.f32.xlu1 %v15880_v24  ;;  %8719 = vmatpush1.bf16.msra.mxu1 %v5486_v31  ;;  %v534_v24 = vld [vmem:[%s19594_s1 + $0x708] sm:$0xff]  ;;  %v1556_v49 = vmul.f32 %v14849_v33, %v1017_v9  ;;  %v1557_v14 = vmul.f32 %v14851_v34, %v1018_v50  ;;  %v5159_v30 = vmul.f32 %v16267_v60, %v3941_v54  ;;  %v1034_v31 = vunpack.c.h.bf16 %v16361_v59 }
 0x195   : > { %v5583_v27 = vpack.c.bf16 %v5347_v7, %v5345_v58  ;;  %v5582_v10 = vpack.c.bf16 %v5346_v36, %v5344_v52  ;;  %v1558_v56 = vmul.f32 %v14853_v35, %v1019_v43  ;;  %v1032_v60 = vunpack.c.l.bf16 %v534_v24  ;;  %v3943_v59 = vld [vmem:[%s19596_s3 + $0x128] sm:$0xff] }
 0x196   : > { %v4337_v5 = vpop.permute.xlu1 %4336  ;;  %v1033_v45 = vunpack.c.h.bf16 %v534_v24  ;;  %v735_v11 = vunpack.c.l.bf16 %v336_v3  ;;  %v736_v36 = vunpack.c.h.bf16 %v336_v3  ;;  %v5350_v54 = vmul.f32 %v16302_v18, %v4132_v0  ;;  %v346_v0 = vld [vmem:[%s19594_s1 + $0x2a0] sm:$0xff]  ;;  %v4137_v3 = vld [vmem:[%s19596_s3 + $0x738] sm:$0xff] }
 0x197   : > { %v5156_v44 = vmul.f32 %v4337_v5, %v3938_v53  ;;  %v5157_v42 = vmul.f32 %v4337_v5, %v3939_v25  ;;  %2347 = vadd.xlane.f32.xlu0 %v15942_v8  ;;  %v16412_v32 = vpop.permute.xlu0 %4361  ;;  %10131 = vmatprep.subr.bf16.mxu0 %v5583_v27  ;;  %v3944_v8 = vld [vmem:[%s19596_s3 + $0x130] sm:$0xff]  ;;  %v3942_v53 = vld [vmem:[%s19596_s3 + $0x120] sm:$0xff]  ;;  %v1914_v46 = vadd.f32 %v1284_v48, %v1283_v40  ;;  %v737_v50 = vunpack.c.l.bf16 %v16418_v41 }
 0x198   : > { %2322 = vadd.xlane.f32.xlu1 %v15940_v1  ;;  %10132 = vmatpush1.bf16.msra.mxu0 %v5582_v10  ;;  %v3945_v1 = vld [vmem:[%s19596_s3 + $0x138] sm:$0xff]  ;;  %v2369_v9 = vadd.f32 %v1557_v14, %v1556_v49  ;;  %v5351_v7 = vmul.f32 %v16302_v18, %v4133_v57  ;;  %v1915_v43 = vsel %vm1644_vm0, %v1285_v4, 0.0  ;;  %v2370_v27 = vsel %vm1644_vm0, %v1558_v56, 0.0  ;;  %v528_v4 = vld [vmem:[%s19594_s1 + $0x6e4] sm:$0xff]  ;;  %v4136_v14 = vld [vmem:[%s19596_s3 + $0x730] sm:$0xff] }
 0x199   : > { %v5489_v55 = vpack.c.bf16 %v5159_v30, %v5157_v42  ;;  %v5488_v23 = vpack.c.bf16 %v5158_v47, %v5156_v44  ;;  %v1571_v18 = vmul.f32 %v14849_v33, %v1032_v60  ;;  %v1572_v10 = vmul.f32 %v14851_v34, %v1033_v45  ;;  %v19603_v42 = vld [vmem:[#allocation3_spill] sm:$0xff]  ;;  %v4134_v60 = vld [vmem:[%s19596_s3 + $0x720] sm:$0xff] }
 0x19a   : > { %v4817_v29 = vpop.permute.xlu1 %4816  ;;  %v1274_v24 = vmul.f32 %v14849_v33, %v735_v11  ;;  %v1275_v47 = vmul.f32 %v14851_v34, %v736_v36  ;;  %v5162_v57 = vmul.f32 %v16344_v6, %v3944_v8  ;;  %v5163_v49 = vmul.f32 %v16344_v6, %v3945_v1  ;;  %v16474_v45 = vld [vmem:[%s19594_s1 + $0x6ec] ss:$60 sps:$4 sm:$0xff]  }
 0x19b   : > { %v5348_v52 = vmul.f32 %v4817_v29, %v4130_v39  ;;  %v5349_v58 = vmul.f32 %v4817_v29, %v4131_v63  ;;  %1877 = vadd.xlane.f32.xlu0 %v16010_v28  ;;  %v16439_v25 = vpop.permute.xlu0 %4841  ;;  %8720 = vmatprep.subr.bf16.mxu1 %v5489_v55  ;;  %v1573_v28 = vmul.f32 %v14853_v35, %v1034_v31  ;;  %v750_v39 = vunpack.c.l.bf16 %v346_v0  ;;  %v19604_v31 = vld [vmem:[#allocation2_spill] sm:$0xff]  ;;  %v4135_v11 = vld [vmem:[%s19596_s3 + $0x728] sm:$0xff] }
 0x19c   : > { %1852 = vadd.xlane.f32.xlu1 %v16008_v13  ;;  %8721 = vmatpush1.bf16.msra.mxu1 %v5488_v23  ;;  %v1276_v13 = vmul.f32 %v14853_v35, %v737_v50  ;;  %v751_v63 = vunpack.c.h.bf16 %v346_v0  ;;  %v752_v6 = vunpack.c.h.bf16 %v16418_v41  ;;  %v16478_v8 = vadd.f32 %v1890_v19, %v16383_v37  ;;  %v538_v37 = vld [vmem:[%s19594_s1 + $0x720] sm:$0xff]  ;;  %v3948_v19 = vld [vmem:[%s19596_s3 + $0x150] sm:$0xff] }
 0x19d   : > { %v5585_v40 = vpack.c.bf16 %v5351_v7, %v5349_v58  ;;  %v5584_v48 = vpack.c.bf16 %v5350_v54, %v5348_v52  ;;  %v16480_v55 = vadd.f32 %v1915_v43, %v1914_v46  ;;  %v16482_v23 = vadd.f32 %v2370_v27, %v2369_v9  ;;  %v3949_v46 = vld [vmem:[%s19596_s3 + $0x158] sm:$0xff]  ;;  %v3946_v7 = vld [vmem:[%s19596_s3 + $0x140] sm:$0xff] }
 0x19e   : > { %v4347_v5 = vpop.permute.xlu1 %4346  ;;  %v2394_v54 = vadd.f32 %v1572_v10, %v1571_v18  ;;  %v2395_v1 = vsel %vm1644_vm0, %v1573_v28, 0.0  ;;  %v1899_v29 = vadd.f32 %v1275_v47, %v1274_v24  ;;  %v1024_v50 = vunpack.c.h.bf16 %v528_v4 }
 0x19f   : > { %v5160_v30 = vmul.f32 %v4347_v5, %v3942_v53  ;;  %v5161_v44 = vmul.f32 %v4347_v5, %v3943_v59  ;;  %2357 = vadd.xlane.f32.xlu0 %v19603_v42  ;;  %v16465_v56 = vpop.permute.xlu0 %4371  ;;  %10133 = vmatprep.subr.bf16.mxu0 %v5585_v40  ;;  %v1289_v53 = vmul.f32 %v14849_v33, %v750_v39  ;;  %v1023_v59 = vunpack.c.l.bf16 %v528_v4  ;;  %v3947_v40 = vld [vmem:[%s19596_s3 + $0x148] sm:$0xff]  ;;  %v350_v39 = vld [vmem:[%s19594_s1 + $0x2b8] sm:$0xff] }
 0x1a0   : > { %2332 = vadd.xlane.f32.xlu1 %v19604_v31  ;;  %10134 = vmatpush1.bf16.msra.mxu0 %v5584_v48  ;;  %v1900_v52 = vsel %vm1644_vm0, %v1276_v13, 0.0  ;;  %v1290_v58 = vmul.f32 %v14851_v34, %v751_v63  ;;  %v1291_v43 = vmul.f32 %v14853_v35, %v752_v6  ;;  %v1025_v0 = vunpack.c.l.bf16 %v16474_v45  ;;  %v4140_v63 = vld [vmem:[%s19596_s3 + $0x750] sm:$0xff]  ;;  %v4141_v4 = vld [vmem:[%s19596_s3 + $0x758] sm:$0xff] }
 0x1a1   : > { %v5491_v41 = vpack.c.bf16 %v5163_v49, %v5161_v44  ;;  %v5490_v36 = vpack.c.bf16 %v5162_v57, %v5160_v30  ;;  %v5354_v27 = vmul.f32 %v16373_v17, %v4136_v14  ;;  %v5355_v18 = vmul.f32 %v16373_v17, %v4137_v3  ;;  %v4138_v14 = vld [vmem:[%s19596_s3 + $0x740] sm:$0xff]  ;;  %v4139_v3 = vld [vmem:[%s19596_s3 + $0x748] sm:$0xff] }
 0x1a2   : > { %v16514_v48 = vadd.f32 %v2395_v1, %v2394_v54  ;;  %v1038_v24 = vunpack.c.l.bf16 %v538_v37  ;;  %v1039_v47 = vunpack.c.h.bf16 %v538_v37  ;;  %v1040_v57 = vunpack.c.h.bf16 %v16474_v45  ;;  %v16557_v1 = vld [vmem:[%s19594_s1 + $0x284] ss:$60 sps:$4 sm:$0xff]  }
 0x1a3   : > { %v4827_v9 = vpop.permute.xlu1 %4826  ;;  %1887 = vadd.xlane.f32.xlu0 %v16148_v12  ;;  %8722 = vmatprep.subr.bf16.mxu1 %v5491_v41  ;;  %v16509_v28 = vpop.permute.xlu0 %4851  ;;  %v1562_v17 = vmul.f32 %v14849_v33, %v1023_v59  ;;  %v16535_v30 = vadd.f32 %v1900_v52, %v1899_v29  ;;  %v16537_v44 = vadd.f32 %v1290_v58, %v1289_v53  ;;  %v16540_v42 = vsel %vm1644_vm0, %v1291_v43, 0.0  ;;  %v532_v37 = vld [vmem:[%s19594_s1 + $0x6fc] sm:$0xff] }
 0x1a4   : > { %1862 = vadd.xlane.f32.xlu1 %v16145_v61  ;;  %v5352_v12 = vmul.f32 %v4827_v9, %v4134_v60  ;;  %v5353_v10 = vmul.f32 %v4827_v9, %v4135_v11  ;;  %8723 = vmatpush1.bf16.msra.mxu1 %v5490_v36  ;;  %v1563_v61 = vmul.f32 %v14851_v34, %v1024_v50  ;;  %v756_v29 = vunpack.c.l.bf16 %v350_v39  ;;  %v3953_v9 = vld [vmem:[%s19596_s3 + $0x178] sm:$0xff]  ;;  %v3950_v52 = vld [vmem:[%s19596_s3 + $0x160] sm:$0xff] }
 0x1a5   : > { %v1564_v60 = vmul.f32 %v14853_v35, %v1025_v0  ;;  %v5166_v6 = vmul.f32 %v16412_v32, %v3948_v19  ;;  %v5167_v45 = vmul.f32 %v16412_v32, %v3949_v46  ;;  %v1577_v41 = vmul.f32 %v14849_v33, %v1038_v24  ;;  %v16568_v19 = vld [vmem:[%s19594_s1 + $0x704] ss:$60 sps:$4 sm:$0xff]   ;;  %v3952_v46 = vld [vmem:[%s19596_s3 + $0x170] sm:$0xff]  ;;  %v3951_v24 = vld [vmem:[%s19596_s3 + $0x168] sm:$0xff] }
 0x1a6   : > { %v5587_v5 = vpack.c.bf16 %v5355_v18, %v5353_v10  ;;  %v5586_v13 = vpack.c.bf16 %v5354_v27, %v5352_v12  ;;  %v1578_v36 = vmul.f32 %v14851_v34, %v1039_v47  ;;  %v1579_v54 = vmul.f32 %v14853_v35, %v1040_v57  ;;  %v16586_v18 = vld [vmem:[%s19594_s1 + $0x738] sm:$0xff] }
 0x1a7   : > { %v4357_v49 = vpop.permute.xlu1 %4356  ;;  %2367 = vadd.xlane.f32.xlu0 %v16164_v22  ;;  %v16546_v22 = vld [vmem:[%s19594_s1 + $0x27c] sm:$0xff]  ;;  %v16559_v53 = vpop.permute.xlu0 %4381  ;;  %v2379_v59 = vadd.f32 %v1563_v61, %v1562_v17  ;;  %v2380_v58 = vsel %vm1644_vm0, %v1564_v60, 0.0  ;;  %v757_v0 = vunpack.c.h.bf16 %v350_v39  ;;  %v758_v27 = vunpack.c.h.bf16 %v16557_v1 }
 0x1a8   : > { %2342 = vadd.xlane.f32.xlu1 %v16162_v15  ;;  %v5164_v31 = vmul.f32 %v4357_v49, %v3946_v7  ;;  %v5165_v11 = vmul.f32 %v4357_v49, %v3947_v40  ;;  %10135 = vmatprep.subr.bf16.mxu0 %v5587_v5  ;;  %v741_v50 = vunpack.c.l.bf16 %v16546_v22  ;;  %v742_v43 = vunpack.c.h.bf16 %v16546_v22  ;;  %v4144_v22 = vld [vmem:[%s19596_s3 + $0x770] sm:$0xff] }
 0x1a9   : > { %10136 = vmatpush1.bf16.msra.mxu0 %v5586_v13  ;;  %v5358_v12 = vmul.f32 %v16439_v25, %v4140_v63  ;;  %v2404_v47 = vadd.f32 %v1578_v36, %v1577_v41  ;;  %v2405_v57 = vsel %vm1644_vm0, %v1579_v54, 0.0  ;;  %v743_v5 = vunpack.c.l.bf16 %v16557_v1 }
 0x1aa   : > { %v5493_v32 = vpack.c.bf16 %v5167_v45, %v5165_v11  ;;  %v5492_v15 = vpack.c.bf16 %v5166_v6, %v5164_v31  ;;  %v1295_v13 = vmul.f32 %v14849_v33, %v756_v29  ;;  %v1030_v39 = vunpack.c.h.bf16 %v532_v37  ;;  %v4142_v11 = vld [vmem:[%s19596_s3 + $0x760] sm:$0xff] }
 0x1ab   : > { %v4837_v7 = vpop.permute.xlu1 %4836  ;;  %1897 = vadd.xlane.f32.xlu0 %v16278_v16  ;;  %v5359_v16 = vmul.f32 %v16439_v25, %v4141_v4  ;;  %v1029_v25 = vunpack.c.l.bf16 %v532_v37  ;;  %v1296_v63 = vmul.f32 %v14851_v34, %v757_v0  ;;  %v1297_v4 = vmul.f32 %v14853_v35, %v758_v27  ;;  %v16610_v6 = vpop.permute.xlu0 %4861 }
 0x1ac   : > { %1872 = vadd.xlane.f32.xlu1 %v16166_v62  ;;  %v5356_v10 = vmul.f32 %v4837_v7, %v4138_v14  ;;  %v5357_v40 = vmul.f32 %v4837_v7, %v4139_v3  ;;  %8724 = vmatprep.subr.bf16.mxu1 %v5493_v32  ;;  %v1031_v49 = vunpack.c.l.bf16 %v16568_v19  ;;  %v1044_v14 = vunpack.c.l.bf16 %v16586_v18 }
 0x1ad   : > { %8725 = vmatpush1.bf16.msra.mxu1 %v5492_v15  ;;  %v5170_v3 = vmul.f32 %v16465_v56, %v3952_v46  ;;  %v5171_v60 = vmul.f32 %v16465_v56, %v3953_v9  ;;  %v16618_v56 = vadd.f32 %v16540_v42, %v16537_v44  ;;  %v16620_v41 = vadd.f32 %v2380_v58, %v2379_v59  ;;  %v344_v44 = vld [vmem:[%s19594_s1 + $0x294] sm:$0xff] }
 0x1ae   : > { %v5589_v17 = vpack.c.bf16 %v5359_v16, %v5357_v40  ;;  %v5588_v61 = vpack.c.bf16 %v5358_v12, %v5356_v10  ;;  %v1280_v36 = vmul.f32 %v14849_v33, %v741_v50  ;;  %v1281_v54 = vmul.f32 %v14851_v34, %v742_v43  ;;  %v16640_v46 = vld [vmem:[%s19594_s1 + $0x29c] ss:$60 sps:$4 sm:$0xff]   ;;  %v3956_v9 = vld [vmem:[%s19596_s3 + $0x190] sm:$0xff]  ;;  %v3955_v40 = vld [vmem:[%s19596_s3 + $0x188] sm:$0xff] }
 0x1af   : > { %v4367_v62 = vpop.permute.xlu1 %4366  ;;  %2377 = vadd.xlane.f32.xlu0 %v16323_v51  ;;  %v4145_v51 = vld [vmem:[%s19596_s3 + $0x778] sm:$0xff]  ;;  %v16627_v32 = vadd.f32 %v2405_v57, %v2404_v47  ;;  %v1045_v15 = vunpack.c.h.bf16 %v16586_v18  ;;  %v1282_v42 = vmul.f32 %v14853_v35, %v743_v5  ;;  %v1934_v59 = vadd.f32 %v1296_v63, %v1295_v13  ;;  %v16658_v10 = vpop.permute.xlu0 %4391 }
 0x1b0   : > { %2352 = vadd.xlane.f32.xlu1 %v16280_v2  ;;  %v5168_v45 = vmul.f32 %v4367_v62, %v3950_v52  ;;  %v5169_v31 = vmul.f32 %v4367_v62, %v3951_v24  ;;  %10137 = vmatprep.subr.bf16.mxu0 %v5589_v17  ;;  %v4143_v2 = vld [vmem:[%s19596_s3 + $0x768] sm:$0xff]  ;;  %v1568_v50 = vmul.f32 %v14849_v33, %v1029_v25  ;;  %v1935_v52 = vsel %vm1644_vm0, %v1297_v4, 0.0  ;;  %v536_v25 = vld [vmem:[%s19594_s1 + $0x714] sm:$0xff] }
 0x1b1   : > { %10138 = vmatpush1.bf16.msra.mxu0 %v5588_v61  ;;  %v1569_v37 = vmul.f32 %v14851_v34, %v1030_v39  ;;  %v1570_v58 = vmul.f32 %v14853_v35, %v1031_v49  ;;  %v1046_v43 = vunpack.c.h.bf16 %v16568_v19  ;;  %v1583_v0 = vmul.f32 %v14849_v33, %v1044_v14  ;;  %v4148_v39 = vld [vmem:[%s19596_s3 + $0x790] sm:$0xff]  ;;  %v4149_v62 = vld [vmem:[%s19596_s3 + $0x798] sm:$0xff] }
 0x1b2   : > { %v5495_v1 = vpack.c.bf16 %v5171_v60, %v5169_v31  ;;  %v5494_v29 = vpack.c.bf16 %v5170_v3, %v5168_v45  ;;  %v5362_v27 = vmul.f32 %v16509_v28, %v4144_v22  ;;  %v5363_v18 = vmul.f32 %v16509_v28, %v4145_v51  ;;  %v354_v28 = vld [vmem:[%s19594_s1 + $0x2d0] sm:$0xff]  ;;  %v4146_v45 = vld [vmem:[%s19596_s3 + $0x780] sm:$0xff]  ;;  %v4147_v31 = vld [vmem:[%s19596_s3 + $0x788] sm:$0xff] }
 0x1b3   : > { %1907 = vadd.xlane.f32.xlu0 %v16337_v21  ;;  %v3957_v21 = vld [vmem:[%s19596_s3 + $0x198] sm:$0xff]  ;;  %v1584_v19 = vmul.f32 %v14851_v34, %v1045_v15  ;;  %v747_v24 = vunpack.c.l.bf16 %v344_v44  ;;  %v748_v47 = vunpack.c.h.bf16 %v344_v44  ;;  %v749_v57 = vunpack.c.l.bf16 %v16640_v46  ;;  %v546_v44 = vld [vmem:[%s19594_s1 + $0x750] sm:$0xff] }
 0x1b4   : > { %1882 = vadd.xlane.f32.xlu1 %v16325_v20  ;;  %v4847_v7 = vpop.permute.xlu1 %4846  ;;  %8726 = vmatprep.subr.bf16.mxu1 %v5495_v1  ;;  %v3954_v20 = vld [vmem:[%s19596_s3 + $0x180] sm:$0xff]  ;;  %v16669_v17 = vadd.f32 %v1281_v54, %v1280_v36  ;;  %v16672_v61 = vsel %vm1644_vm0, %v1282_v42, 0.0  ;;  %v16684_v63 = vadd.f32 %v1935_v52, %v1934_v59  ;;  %v16686_v4 = vadd.f32 %v1569_v37, %v1568_v50  ;;  %v3960_v42 = vld [vmem:[%s19596_s3 + $0x1b0] sm:$0xff]  ;;  %v4872_v59 = vpop.permute.xlu0 %4871 }
 0x1b5   : > { %v5360_v12 = vmul.f32 %v4847_v7, %v4142_v11  ;;  %v5361_v16 = vmul.f32 %v4847_v7, %v4143_v2  ;;  %8727 = vmatpush1.bf16.msra.mxu1 %v5494_v29  ;;  %v16689_v49 = vsel %vm1644_vm0, %v1570_v58, 0.0  ;;  %v1585_v14 = vmul.f32 %v14853_v35, %v1046_v43  ;;  %v3961_v58 = vld [vmem:[%s19596_s3 + $0x1b8] sm:$0xff] }
 0x1b6   : > { %v5174_v3 = vmul.f32 %v16559_v53, %v3956_v9  ;;  %v5175_v60 = vmul.f32 %v16559_v53, %v3957_v21  ;;  %v16703_v11 = vadd.f32 %v1584_v19, %v1583_v0  ;;  %v1286_v53 = vmul.f32 %v14849_v33, %v747_v24  ;;  %v4152_v24 = vld [vmem:[%s19596_s3 + $0x7b0] sm:$0xff] }
 0x1b7   : > { %2387 = vadd.xlane.f32.xlu0 %v16381_v38  ;;  %v5591_v5 = vpack.c.bf16 %v5363_v18, %v5361_v16  ;;  %v5590_v13 = vpack.c.bf16 %v5362_v27, %v5360_v12  ;;  %v1287_v36 = vmul.f32 %v14851_v34, %v748_v47  ;;  %v1288_v54 = vmul.f32 %v14853_v35, %v749_v57  ;;  %v4153_v47 = vld [vmem:[%s19596_s3 + $0x7b8] sm:$0xff] }
 0x1b8   : > { %2362 = vadd.xlane.f32.xlu1 %v16379_v26  ;;  %v4377_v38 = vpop.permute.xlu1 %4376  ;;  %v537_v26 = vld [vmem:[%s19594_s1 + $0x71c] ss:$60 sps:$4 sm:$0xff]   ;;  %v762_v29 = vunpack.c.l.bf16 %v354_v28  ;;  %v763_v15 = vunpack.c.h.bf16 %v354_v28  ;;  %v764_v37 = vunpack.c.h.bf16 %v16640_v46  ;;  %v1035_v9 = vunpack.c.l.bf16 %v536_v25  ;;  %v3959_v46 = vld [vmem:[%s19596_s3 + $0x1a8] sm:$0xff] }
 0x1b9   : > { %v5172_v22 = vmul.f32 %v4377_v38, %v3954_v20  ;;  %v5173_v51 = vmul.f32 %v4377_v38, %v3955_v40  ;;  %10139 = vmatprep.subr.bf16.mxu0 %v5591_v5  ;;  %v1037_v21 = vunpack.c.l.bf16 %v537_v26  ;;  %v5366_v7 = vmul.f32 %v16610_v6, %v4148_v39 }
 0x1ba   : > { %10140 = vmatpush1.bf16.msra.mxu0 %v5590_v13  ;;  %v5367_v52 = vmul.f32 %v16610_v6, %v4149_v62  ;;  %v16729_v27 = vsel %vm1644_vm0, %v1585_v14, 0.0  ;;  %v1050_v6 = vunpack.c.l.bf16 %v546_v44  ;;  %v1051_v18 = vunpack.c.h.bf16 %v546_v44 }
 0x1bb   : > { %1917 = vadd.xlane.f32.xlu0 %v16480_v55  ;;  %v5497_v2 = vpack.c.bf16 %v5175_v60, %v5173_v51  ;;  %v5496_v1 = vpack.c.bf16 %v5174_v3, %v5172_v22  ;;  %v1036_v55 = vunpack.c.h.bf16 %v536_v25  ;;  %v1052_v12 = vunpack.c.h.bf16 %v537_v26  ;;  %v16753_v3 = vpop.permute.xlu0 %4401  ;;  %v4151_v60 = vld [vmem:[%s19596_s3 + $0x7a8] sm:$0xff] }
 0x1bc   : > { %1892 = vadd.xlane.f32.xlu1 %v16478_v8  ;;  %v4857_v50 = vpop.permute.xlu1 %4856  ;;  %v3958_v8 = vld [vmem:[%s19596_s3 + $0x1a0] sm:$0xff]  ;;  %v1301_v40 = vmul.f32 %v14849_v33, %v762_v29  ;;  %v1302_v19 = vmul.f32 %v14851_v34, %v763_v15  ;;  %v1303_v28 = vmul.f32 %v14853_v35, %v764_v37  ;;  %v1574_v5 = vmul.f32 %v14849_v33, %v1035_v9 }
 0x1bd   : > { %v5364_v43 = vmul.f32 %v4857_v50, %v4146_v45  ;;  %v5365_v0 = vmul.f32 %v4857_v50, %v4147_v31  ;;  %8728 = vmatprep.subr.bf16.mxu1 %v5497_v2  ;;  %v1575_v13 = vmul.f32 %v14851_v34, %v1036_v55  ;;  %v1576_v25 = vmul.f32 %v14853_v35, %v1037_v21  ;;  %v16764_v45 = vld [vmem:[%s19594_s1 + $0x2b4] ss:$60 sps:$4 sm:$0xff]  }
 0x1be   : > { %8729 = vmatpush1.bf16.msra.mxu1 %v5496_v1  ;;  %v5178_v39 = vmul.f32 %v16658_v10, %v3960_v42  ;;  %v5179_v62 = vmul.f32 %v16658_v10, %v3961_v58  ;;  %v1919_v22 = vadd.f32 %v1287_v36, %v1286_v53  ;;  %v1589_v51 = vmul.f32 %v14849_v33, %v1050_v6  ;;  %v358_v53 = vld [vmem:[%s19594_s1 + $0x2e8] sm:$0xff]  ;;  %v3965_v58 = vld [vmem:[%s19596_s3 + $0x1d8] sm:$0xff] }
 0x1bf   : > { %2397 = vadd.xlane.f32.xlu0 %v16514_v48  ;;  %v5593_v16 = vpack.c.bf16 %v5367_v52, %v5365_v0  ;;  %v5592_v20 = vpack.c.bf16 %v5366_v7, %v5364_v43  ;;  %v4150_v48 = vld [vmem:[%s19596_s3 + $0x7a0] sm:$0xff]  ;;  %v1590_v26 = vmul.f32 %v14851_v34, %v1051_v18  ;;  %v1591_v10 = vmul.f32 %v14853_v35, %v1052_v12  ;;  %v3963_v43 = vld [vmem:[%s19596_s3 + $0x1c8] sm:$0xff]  ;;  %v4882_v18 = vpop.permute.xlu0 %4881 }
 0x1c0   : > { %2372 = vadd.xlane.f32.xlu1 %v16482_v23  ;;  %v4387_v57 = vpop.permute.xlu1 %4386  ;;  %v348_v23 = vld [vmem:[%s19594_s1 + $0x2ac] sm:$0xff]  ;;  %v1920_v1 = vsel %vm1644_vm0, %v1288_v54, 0.0  ;;  %v1944_v29 = vadd.f32 %v1302_v19, %v1301_v40  ;;  %v1945_v15 = vsel %vm1644_vm0, %v1303_v28, 0.0  ;;  %v2399_v44 = vadd.f32 %v1575_v13, %v1574_v5  ;;  %v4154_v28 = vld [vmem:[%s19596_s3 + $0x7c0] sm:$0xff] }
 0x1c1   : > { %v5176_v38 = vmul.f32 %v4387_v57, %v3958_v8  ;;  %v5177_v14 = vmul.f32 %v4387_v57, %v3959_v46  ;;  %10141 = vmatprep.subr.bf16.mxu0 %v5593_v16  ;;  %v2400_v42 = vsel %vm1644_vm0, %v1576_v25, 0.0  ;;  %v753_v50 = vunpack.c.l.bf16 %v348_v23  ;;  %v3964_v54 = vld [vmem:[%s19596_s3 + $0x1d0] sm:$0xff]  ;;  %v4157_v57 = vld [vmem:[%s19596_s3 + $0x7d8] sm:$0xff] }
 0x1c2   : > { %10142 = vmatpush1.bf16.msra.mxu0 %v5592_v20  ;;  %v5370_v37 = vmul.f32 %v4872_v59, %v4152_v24  ;;  %v2424_v21 = vadd.f32 %v1590_v26, %v1589_v51  ;;  %v754_v7 = vunpack.c.h.bf16 %v348_v23  ;;  %v755_v52 = vunpack.c.l.bf16 %v16764_v45  ;;  %v4155_v23 = vld [vmem:[%s19596_s3 + $0x7c8] sm:$0xff]  ;;  %v3968_v26 = vld [vmem:[%s19596_s3 + $0x1f0] sm:$0xff] }
 0x1c3   : > { %1927 = vadd.xlane.f32.xlu0 %v16618_v56  ;;  %v5499_v31 = vpack.c.bf16 %v5179_v62, %v5177_v14  ;;  %v5498_v2 = vpack.c.bf16 %v5178_v39, %v5176_v38  ;;  %v5371_v56 = vmul.f32 %v4872_v59, %v4153_v47  ;;  %v3962_v59 = vld [vmem:[%s19596_s3 + $0x1c0] sm:$0xff]  ;;  %v768_v46 = vunpack.c.l.bf16 %v358_v53 }
 0x1c4   : > { %1902 = vadd.xlane.f32.xlu1 %v16535_v30  ;;  %v4867_v36 = vpop.permute.xlu1 %4866  ;;  %v2425_v30 = vsel %vm1644_vm0, %v1591_v10, 0.0  ;;  %v769_v6 = vunpack.c.h.bf16 %v358_v53  ;;  %v1911_v12 = vadd.f32 %v16672_v61, %v16669_v17  ;;  %v770_v16 = vunpack.c.h.bf16 %v16764_v45  ;;  %v4156_v17 = vld [vmem:[%s19596_s3 + $0x7d0] sm:$0xff]  ;;  %v4412_v10 = vpop.permute.xlu0 %4411 }
 0x1c5   : > { %v5368_v9 = vmul.f32 %v4867_v36, %v4150_v48  ;;  %v5369_v55 = vmul.f32 %v4867_v36, %v4151_v60  ;;  %8730 = vmatprep.subr.bf16.mxu1 %v5499_v31  ;;  %v2391_v20 = vadd.f32 %v16689_v49, %v16686_v4  ;;  %v2416_v40 = vadd.f32 %v16729_v27, %v16703_v11  ;;  %v541_v11 = vld [vmem:[%s19594_s1 + $0x734] ss:$60 sps:$4 sm:$0xff]   ;;  %v550_v27 = vld [vmem:[%s19594_s1 + $0x768] sm:$0xff]  ;;  %v3966_v36 = vld [vmem:[%s19596_s3 + $0x1e0] sm:$0xff] }
 0x1c6   : > { %8731 = vmatpush1.bf16.msra.mxu1 %v5498_v2  ;;  %v16799_v19 = vadd.f32 %v1945_v15, %v1944_v29  ;;  %v16807_v61 = vadd.f32 %v2400_v42, %v2399_v44  ;;  %v16809_v24 = vadd.f32 %v2425_v30, %v2424_v21  ;;  %v1292_v4 = vmul.f32 %v14849_v33, %v753_v50  ;;  %v3969_v29 = vld [vmem:[%s19596_s3 + $0x1f8] sm:$0xff]  ;;  %v352_v50 = vld [vmem:[%s19594_s1 + $0x2c4] sm:$0xff] }
 0x1c7   : > { %2407 = vadd.xlane.f32.xlu0 %v16627_v32  ;;  %v5595_v0 = vpack.c.bf16 %v5371_v56, %v5369_v55  ;;  %v5594_v8 = vpack.c.bf16 %v5370_v37, %v5368_v9  ;;  %v16797_v32 = vadd.f32 %v1920_v1, %v1919_v22  ;;  %v1293_v49 = vmul.f32 %v14851_v34, %v754_v7 }
 0x1c8   : > { %2382 = vadd.xlane.f32.xlu1 %v16620_v41  ;;  %v540_v41 = vld [vmem:[%s19594_s1 + $0x72c] sm:$0xff]  ;;  %v5182_v47 = vmul.f32 %v16753_v3, %v3964_v54  ;;  %v1294_v5 = vmul.f32 %v14853_v35, %v755_v52  ;;  %v1307_v13 = vmul.f32 %v14849_v33, %v768_v46  ;;  %v1308_v25 = vmul.f32 %v14851_v34, %v769_v6 }
 0x1c9   : > { %10143 = vmatprep.subr.bf16.mxu0 %v5595_v0  ;;  %v5183_v39 = vmul.f32 %v16753_v3, %v3965_v58  ;;  %v1309_v14 = vmul.f32 %v14853_v35, %v770_v16  ;;  %v1041_v60 = vunpack.c.l.bf16 %v540_v41  ;;  %v1042_v22 = vunpack.c.h.bf16 %v540_v41  ;;  %v3967_v54 = vld [vmem:[%s19596_s3 + $0x1e8] sm:$0xff]  ;;  %v4160_v58 = vld [vmem:[%s19596_s3 + $0x7f0] sm:$0xff]  ;;  %v4158_v16 = vld [vmem:[%s19596_s3 + $0x7e0] sm:$0xff] }
 0x1ca   : > { %10144 = vmatpush1.bf16.msra.mxu0 %v5594_v8  ;;  %v1056_v51 = vunpack.c.l.bf16 %v550_v27  ;;  %v1057_v31 = vunpack.c.h.bf16 %v550_v27  ;;  %v1058_v2 = vunpack.c.h.bf16 %v541_v11  ;;  %v5374_v1 = vmul.f32 %v4882_v18, %v4156_v17  ;;  %v16864_v46 = vld [vmem:[%s19594_s1 + $0x2cc] ss:$24 sps:$4 sm:$0xff]  }
 0x1cb   : > { %v4397_v48 = vpop.permute.xlu1 %4396  ;;  %1937 = vadd.xlane.f32.xlu0 %v16684_v63  ;;  %v1043_v63 = vunpack.c.l.bf16 %v541_v11  ;;  %v1929_v15 = vadd.f32 %v1293_v49, %v1292_v4  ;;  %v1930_v44 = vsel %vm1644_vm0, %v1294_v5, 0.0  ;;  %v1954_v42 = vadd.f32 %v1308_v25, %v1307_v13  ;;  %v544_v17 = vld [vmem:[%s19594_s1 + $0x744] sm:$0xff]  ;;  %v4892_v49 = vpop.permute.xlu0 %4891  ;;  %v13366_v25 = vld [vmem:[%s15910_s6] ss:$44 sps:$4 sm:$0xff]  }
 0x1cc   : > { %v5180_v62 = vmul.f32 %v4397_v48, %v3962_v59  ;;  %v5181_v38 = vmul.f32 %v4397_v48, %v3963_v43  ;;  %1912 = vadd.xlane.f32.xlu1 %v1911_v12  ;;  %v5375_v37 = vmul.f32 %v4882_v18, %v4157_v57  ;;  %v1955_v55 = vsel %vm1644_vm0, %v1309_v14, 0.0  ;;  %v4161_v18 = vld [vmem:[%s19596_s3 + $0x7f8] sm:$0xff] }
 0x1cd   : > { %v1580_v21 = vmul.f32 %v14849_v33, %v1041_v60  ;;  %v1581_v30 = vmul.f32 %v14851_v34, %v1042_v22  ;;  %v1582_v7 = vmul.f32 %v14853_v35, %v1043_v63  ;;  %v1595_v52 = vmul.f32 %v14849_v33, %v1056_v51  ;;  %v356_v63 = vld [vmem:[%s19594_s1 + $0x2dc] sm:$0xff] }
 0x1ce   : > { %v5501_v45 = vpack.c.bf16 %v5183_v39, %v5181_v38  ;;  %v5500_v3 = vpack.c.bf16 %v5182_v47, %v5180_v62  ;;  %v1596_v0 = vmul.f32 %v14851_v34, %v1057_v31  ;;  %v1597_v8 = vmul.f32 %v14853_v35, %v1058_v2 }
 0x1cf   : > { %v4877_v53 = vpop.permute.xlu1 %4876  ;;  %2417 = vadd.xlane.f32.xlu0 %v2416_v40  ;;  %v5186_v6 = vmul.f32 %v4412_v10, %v3968_v26  ;;  %v759_v40 = vunpack.c.l.bf16 %v352_v50  ;;  %v760_v41 = vunpack.c.h.bf16 %v352_v50  ;;  %v5187_v4 = vmul.f32 %v4412_v10, %v3969_v29 }
 0x1d0   : > { %v5372_v56 = vmul.f32 %v4877_v53, %v4154_v28  ;;  %v5373_v9 = vmul.f32 %v4877_v53, %v4155_v23  ;;  %2392 = vadd.xlane.f32.xlu1 %v2391_v20  ;;  %8732 = vmatprep.subr.bf16.mxu1 %v5501_v45  ;;  %v1931_v20 = vadd.f32 %v1930_v44, %v1929_v15  ;;  %v2410_v48 = vsel %vm1644_vm0, %v1582_v7, 0.0  ;;  %v13378_v7 = vld [vmem:[%s15910_s6 + $0xb4] ss:$44 sps:$4 sm:$0xff]  }
 0x1d1   : > { %8733 = vmatpush1.bf16.msra.mxu1 %v5500_v3  ;;  %v1956_v47 = vadd.f32 %v1955_v55, %v1954_v42  ;;  %v2409_v57 = vadd.f32 %v1581_v30, %v1580_v21  ;;  %v761_v28 = vunpack.c.l.bf16 %v16864_v46  ;;  %v2434_v39 = vadd.f32 %v1596_v0, %v1595_v52  ;;  %v13372_v3 = vld [vmem:[%s15910_s6 + $0x5c] ss:$44 sps:$4 sm:$0xff]   ;;  %v13375_v21 = vld [vmem:[%s15910_s6 + $0x74] ss:$44 sps:$4 sm:$0xff]  }
 0x1d2   : > { %v5597_v59 = vpack.c.bf16 %v5375_v37, %v5373_v9  ;;  %v5596_v43 = vpack.c.bf16 %v5374_v1, %v5372_v56  ;;  %v2435_v62 = vsel %vm1644_vm0, %v1597_v8, 0.0  ;;  %v5378_v38 = vmul.f32 %v4892_v49, %v4160_v58  ;;  %v13369_v56 = vld [vmem:[%s15910_s6 + $0x18] ss:$44 sps:$4 sm:$0xff]  }
 0x1d3   : > { %v4407_v12 = vpop.permute.xlu1 %4406  ;;  %1947 = vadd.xlane.f32.xlu0 %v16799_v19  ;;  %v4159_v19 = vld [vmem:[%s19596_s3 + $0x7e8] sm:$0xff]  ;;  %v1298_v23 = vmul.f32 %v14849_v33, %v759_v40  ;;  %v1299_v60 = vmul.f32 %v14851_v34, %v760_v41  ;;  %v1047_v22 = vunpack.c.l.bf16 %v544_v17  ;;  %v5379_v51 = vmul.f32 %v4892_v49, %v4161_v18  ;;  %v360_v18 = vld [vmem:[%s19594_s1 + $0x2f4] sm:$0xff] }
 0x1d4   : > { %v5184_v11 = vmul.f32 %v4407_v12, %v3966_v36  ;;  %v5185_v27 = vmul.f32 %v4407_v12, %v3967_v54  ;;  %1922 = vadd.xlane.f32.xlu1 %v16797_v32  ;;  %10145 = vmatprep.subr.bf16.mxu0 %v5597_v59  ;;  %v545_v32 = vld [vmem:[%s19594_s1 + $0x74c] ss:$24 sps:$4 sm:$0xff]   ;;  %v1048_v45 = vunpack.c.h.bf16 %v544_v17  ;;  %v765_v29 = vunpack.c.l.bf16 %v356_v63  ;;  %v361_v12 = vld [vmem:[%s19594_s1 + $0x2fc] sm:$0xf] }
 0x1d5   : > { %10146 = vmatpush1.bf16.msra.mxu0 %v5596_v43  ;;  %v1049_v31 = vunpack.c.l.bf16 %v545_v32  ;;  %v2411_v53 = vadd.f32 %v2410_v48, %v2409_v57  ;;  %v2436_v36 = vadd.f32 %v2435_v62, %v2434_v39  ;;  %v766_v15 = vunpack.c.h.bf16 %v356_v63  ;;  %v13374_v54 = vld [vmem:[%s15910_s6 + $0x58] ss:$44 sps:$4 sm:$0xff]   ;;  %v553_v48 = vld [vmem:[%s19594_s1 + $0x77c] sm:$0xf] }
 0x1d6   : > { %v5503_v5 = vpack.c.bf16 %v5187_v4, %v5185_v27  ;;  %v5502_v13 = vpack.c.bf16 %v5186_v6, %v5184_v11  ;;  %v1939_v44 = vadd.f32 %v1299_v60, %v1298_v23  ;;  %v1586_v42 = vmul.f32 %v14849_v33, %v1047_v22  ;;  %v13381_v57 = vld [vmem:[%s15910_s6 + $0xcc] ss:$44 sps:$4 sm:$0xff]  }
 0x1d7   : > { %v4887_v14 = vpop.permute.xlu1 %4886  ;;  %2427 = vadd.xlane.f32.xlu0 %v16809_v24  ;;  %v1300_v24 = vmul.f32 %v14853_v35, %v761_v28  ;;  %v1587_v50 = vmul.f32 %v14851_v34, %v1048_v45  ;;  %v767_v37 = vunpack.c.h.bf16 %v16864_v46  ;;  %v1588_v55 = vmul.f32 %v14853_v35, %v1049_v31  ;;  %v13387_v31 = vld [vmem:[%s15910_s6 + $0x124] ss:$44 sps:$4 sm:$0xff]  }
 0x1d8   : > { %v5376_v26 = vmul.f32 %v4887_v14, %v4158_v16  ;;  %v5377_v10 = vmul.f32 %v4887_v14, %v4159_v19  ;;  %2402 = vadd.xlane.f32.xlu1 %v16807_v61  ;;  %8734 = vmatprep.subr.bf16.mxu1 %v5503_v5  ;;  %v548_v61 = vld [vmem:[%s19594_s1 + $0x75c] sm:$0xff]  ;;  %v1304_v30 = vmul.f32 %v14849_v33, %v765_v29  ;;  %v1055_v43 = vunpack.c.h.bf16 %v545_v32  ;;  %v13384_v14 = vld [vmem:[%s15910_s6 + $0x10c] ss:$44 sps:$4 sm:$0xff]  }
 0x1d9   : > { %8735 = vmatpush1.bf16.msra.mxu1 %v5502_v13  ;;  %v1940_v9 = vsel %vm1644_vm0, %v1300_v24, 0.0  ;;  %v1305_v52 = vmul.f32 %v14851_v34, %v766_v15  ;;  %v1053_v58 = vunpack.c.l.bf16 %v548_v61  ;;  %v1054_v59 = vunpack.c.h.bf16 %v548_v61  ;;  %v13377_v16 = vld [vmem:[%s15910_s6 + $0x70] ss:$44 sps:$4 sm:$0xff]   ;;  %v2547_v24 = vld [vmem:[%s19595_s2 + $0x108] sm:$0xff] }
 0x1da   : > { %v5599_v2 = vpack.c.bf16 %v5379_v51, %v5377_v10  ;;  %v5598_v1 = vpack.c.bf16 %v5378_v38, %v5376_v26  ;;  %v1941_v0 = vadd.f32 %v1940_v9, %v1939_v44  ;;  %v2419_v8 = vadd.f32 %v1587_v50, %v1586_v42  ;;  %v13380_v5 = vld [vmem:[%s15910_s6 + $0xb0] ss:$44 sps:$4 sm:$0xff]   ;;  %v13383_v10 = vld [vmem:[%s15910_s6 + $0xc8] ss:$44 sps:$4 sm:$0xff]   ;;  %v2642_v44 = vld [vmem:[%s19595_s2 + $0x400] sm:$0xff] }
 0x1db   : > { %1957 = vadd.xlane.f32.xlu0 %v1956_v47  ;;  %v1306_v46 = vmul.f32 %v14853_v35, %v767_v37  ;;  %v2420_v6 = vsel %vm1644_vm0, %v1588_v55, 0.0  ;;  %v1592_v40 = vmul.f32 %v14849_v33, %v1053_v58  ;;  %v1593_v41 = vmul.f32 %v14851_v34, %v1054_v59  ;;  %v552_v47 = vld [vmem:[%s19594_s1 + $0x774] sm:$0xff]  ;;  %v13390_v61 = vld [vmem:[%s15910_s6 + $0x164] ss:$44 sps:$4 sm:$0xff]   ;;  %v13389_v50 = vld [vmem:[%s15910_s6 + $0x120] ss:$44 sps:$4 sm:$0xff]  }
 0x1dc   : > { %1932 = vadd.xlane.f32.xlu1 %v1931_v20  ;;  %8737 = vmatmul.mubr.bf16.vlgmr.msra.gmra.mrb[0].mxu1 %v13366_v25  ;;  %v1949_v20 = vadd.f32 %v1305_v52, %v1304_v30  ;;  %v1594_v17 = vmul.f32 %v14853_v35, %v1055_v43  ;;  %v2421_v4 = vadd.f32 %v2420_v6, %v2419_v8  ;;  %v771_v11 = vunpack.c.l.bf16 %v360_v18  ;;  %v2548_v55 = vld [vmem:[%s19595_s2 + $0x110] sm:$0xff]  ;;  %v2550_v6 = vld [vmem:[%s19595_s2 + $0x120] sm:$0xff] }
 0x1dd   : > { %10147 = vmatprep.subr.bf16.mxu0 %v5599_v2  ;;  %8746 = vmatprep.mubr.bf16.mxu1 %v13372_v3  ;;  %v1950_v49 = vsel %vm1644_vm0, %v1306_v46, 0.0  ;;  %v772_v27 = vunpack.c.h.bf16 %v360_v18  ;;  %v773_v19 = vunpack.c.l.bf16 %v361_v12  ;;  %v2429_v13 = vadd.f32 %v1593_v41, %v1592_v40  ;;  %v13386_v2 = vld [vmem:[%s15910_s6 + $0x108] ss:$44 sps:$4 sm:$0xff]   ;;  %v13398_v18 = vld [vmem:[%s15910_s6 + $0x1b8] ss:$44 sps:$4 sm:$0xff]  }
 0x1de   : > { %10148 = vmatpush1.bf16.msra.mxu0 %v5598_v1  ;;  %v1951_v28 = vadd.f32 %v1950_v49, %v1949_v20  ;;  %v2430_v25 = vsel %vm1644_vm0, %v1594_v17, 0.0  ;;  %v1310_v39 = vmul.f32 %v14849_v33, %v771_v11  ;;  %v1059_v32 = vunpack.c.l.bf16 %v552_v47  ;;  %v2644_v59 = vld [vmem:[%s19595_s2 + $0x410] sm:$0xff]  ;;  %v2646_v49 = vld [vmem:[%s19595_s2 + $0x420] sm:$0xff] }
 0x1df   : > { %2437 = vadd.xlane.f32.xlu0 %v2436_v36  ;;  %v1311_v62 = vmul.f32 %v14851_v34, %v772_v27  ;;  %v1060_v38 = vunpack.c.h.bf16 %v552_v47  ;;  %v1312_v23 = vmul.f32 %v14853_v35, %v773_v19  ;;  %v1061_v60 = vunpack.c.l.bf16 %v553_v48  ;;  %v13399_v12 = vld [vmem:[%s15910_s6 + $0x1d4] ss:$44 sps:$4 sm:$0xff]   ;;  %v13401_v19 = vld [vmem:[%s15910_s6 + $0x1d0] ss:$44 sps:$4 sm:$0xff]  }
 0x1e0   : > { %2412 = vadd.xlane.f32.xlu1 %v2411_v53  ;;  %v2431_v22 = vadd.f32 %v2430_v25, %v2429_v13  ;;  %v1598_v51 = vmul.f32 %v14849_v33, %v1059_v32  ;;  %v13402_v40 = vld [vmem:[%s15910_s6 + $0x214] ss:$44 sps:$4 sm:$0xff]   ;;  %v13404_v13 = vld [vmem:[%s15910_s6 + $0x210] ss:$44 sps:$4 sm:$0xff]   ;;  %v13405_v25 = vld [vmem:[%s15910_s6 + $0x22c] ss:$44 sps:$4 sm:$0xff]  }
 0x1e1   : > { %10150 = vmatmul.mubr.bf16.vlgmr.msra.gmra.mrb[0].mxu0 %v13369_v56  ;;  %v1959_v63 = vadd.f32 %v1311_v62, %v1310_v39  ;;  %v1599_v26 = vmul.f32 %v14851_v34, %v1060_v38  ;;  %v1960_v45 = vsel %vm1644_vm0, %v1312_v23, 0.0  ;;  %v1600_v3 = vmul.f32 %v14853_v35, %v1061_v60  ;;  %v13408_v32 = vld [vmem:[%s15910_s6 + $0x26c] ss:$44 sps:$4 sm:$0xff]  }
 0x1e2   : > { %10159 = vmatprep.mubr.bf16.mxu0 %v13375_v21  ;;  %v13393_v21 = vld [vmem:[%s15910_s6 + $0x17c] ss:$44 sps:$4 sm:$0xff]  }
 0x1e3   : > { %v1961_v1 = vadd.f32 %v1960_v45, %v1959_v63  ;;  %v2439_v53 = vadd.f32 %v1599_v26, %v1598_v51  ;;  %v2440_v15 = vsel %vm1644_vm0, %v1600_v3, 0.0  ;;  %v2648_v51 = vld [vmem:[%s19595_s2 + $0x430] sm:$0xff] }
 0x1e4   : > { %1942 = vadd.xlane.f32.xlu1 %v1941_v0  ;;  %8747 = vmatmul.mubr.bf16.gmra.mrb[4].mxu1 %v13374_v54  ;;  %v13392_v54 = vld [vmem:[%s15910_s6 + $0x160] ss:$44 sps:$4 sm:$0xff]   ;;  %v13395_v0 = vld [vmem:[%s15910_s6 + $0x178] ss:$44 sps:$4 sm:$0xff]   ;;  %v13407_v45 = vld [vmem:[%s15910_s6 + $0x228] ss:$44 sps:$4 sm:$0xff]  }
 0x1e5   : > { %8756 = vmatprep.mubr.bf16.mxu1 %v13378_v7  ;;  %v2441_v37 = vadd.f32 %v2440_v15, %v2439_v53  ;;  %v13396_v7 = vld [vmem:[%s15910_s6 + $0x1bc] ss:$44 sps:$4 sm:$0xff]  }
 0x1e8   : > { %2422 = vadd.xlane.f32.xlu1 %v2421_v4 }
 0x1e9   : > { %10160 = vmatmul.mubr.bf16.gmra.mrb[4].mxu0 %v13377_v16 }
 0x1ea   : > { %10169 = vmatprep.mubr.bf16.mxu0 %v13381_v57 }
 0x1ec   : > { %1952 = vadd.xlane.f32.xlu1 %v1951_v28  ;;  %8757 = vmatmul.mubr.bf16.gmra.mrb[8].mxu1 %v13380_v5  ;;  %v2546_v28 = vld [vmem:[%s19595_s2 + $0x100] sm:$0xff]  ;;  %v2552_v5 = vld [vmem:[%s19595_s2 + $0x130] sm:$0xff] }
 0x1ed   : > { %8766 = vmatprep.mubr.bf16.mxu1 %v13384_v14 }
 0x1f0   : > { %2432 = vadd.xlane.f32.xlu1 %v2431_v22  ;;  %v1813_v29 = vpop.xlane.xlu0 %1812  ;;  %v2643_v22 = vld [vmem:[%s19595_s2 + $0x408] sm:$0xff] }
 0x1f1   : > { %10170 = vmatmul.mubr.bf16.gmra.mrb[8].mxu0 %v13383_v10  ;;  %v2721_v36 = vadd.f32 %v2547_v24, %v1813_v29 }
 0x1f2   : > { %10179 = vmatprep.mubr.bf16.mxu0 %v13387_v31 }
 0x1f3   : > { %v11804_v42 = vmul.f32 -1.442695, %v2721_v36  ;;  %v2549_v36 = vld [vmem:[%s19595_s2 + $0x118] sm:$0xff] }
 0x1f4   : > { %1962 = vadd.xlane.f32.xlu1 %v1961_v1  ;;  %8767 = vmatmul.mubr.bf16.gmra.mrb[12].mxu1 %v13386_v2  ;;  %v2288_v56 = vpop.xlane.xlu0 %2287  ;;  %v2554_v1 = vld [vmem:[%s19595_s2 + $0x140] sm:$0xff] }
 0x1f5   : > { %14321 = vpow2.f32 %v11804_v42  ;;  %v2816_v9 = vadd.f32 %v2642_v44, %v2288_v56  ;;  %8776 = vmatprep.mubr.bf16.mxu1 %v13390_v61  ;;  %v13411_v61 = vld [vmem:[%s15910_s6 + $0x284] ss:$44 sps:$4 sm:$0xff]  }
 0x1f7   : > { %v11899_v30 = vmul.f32 -1.442695, %v2816_v9 }
 0x1f8   : > { %2442 = vadd.xlane.f32.xlu1 %v2441_v37  ;;  %v1818_v52 = vpop.xlane.xlu0 %1817 }
 0x1f9   : > { %14323 = vpow2.f32 %v11899_v30  ;;  %10180 = vmatmul.mubr.bf16.gmra.mrb[12].mxu0 %v13389_v50  ;;  %v2722_v58 = vadd.f32 %v2548_v55, %v1818_v52  ;;  %v13410_v50 = vld [vmem:[%s15910_s6 + $0x268] ss:$44 sps:$4 sm:$0xff]   ;;  %v2645_v30 = vld [vmem:[%s19595_s2 + $0x418] sm:$0xff] }
 0x1fa   : > { %10189 = vmatprep.mubr.bf16.mxu0 %v13393_v21 }
 0x1fb   : > { %v11805_v43 = vmul.f32 -1.442695, %v2722_v58  ;;  %v2650_v58 = vld [vmem:[%s19595_s2 + $0x440] sm:$0xff] }
 0x1fc   : > { %8777 = vmatmul.mubr.bf16.gmra.mrb[16].mxu1 %v13392_v54  ;;  %v2298_v8 = vpop.xlane.xlu0 %2297 }
 0x1fd   : > { %14325 = vpow2.f32 %v11805_v43  ;;  %v2818_v46 = vadd.f32 %v2644_v59, %v2298_v8  ;;  %8786 = vmatprep.mubr.bf16.mxu1 %v13396_v7  ;;  %v13414_v7 = vld [vmem:[%s15910_s6 + $0x2c4] ss:$44 sps:$4 sm:$0xff]  }
 0x1ff   : > { %v14322_v16 = vpop.eup %14321  ;;  %v11901_v20 = vmul.f32 -1.442695, %v2818_v46 }
 0x200   : > { %v3417_v41 = vadd.f32 1.0, %v14322_v16  ;;  %v1828_v17 = vpop.xlane.xlu0 %1827 }
 0x201   : > { %14327 = vpow2.f32 %v11901_v20  ;;  %10190 = vmatmul.mubr.bf16.gmra.mrb[16].mxu0 %v13395_v0  ;;  %v2724_v4 = vadd.f32 %v2550_v6, %v1828_v17  ;;  %v13413_v0 = vld [vmem:[%s15910_s6 + $0x280] ss:$44 sps:$4 sm:$0xff]   ;;  %v13417_v17 = vld [vmem:[%s15910_s6 + $0x2dc] ss:$44 sps:$4 sm:$0xff]  }
 0x202   : > { %14329 = vrcp.f32 %v3417_v41  ;;  %10199 = vmatprep.mubr.bf16.mxu0 %v13399_v12  ;;  %v2551_v20 = vld [vmem:[%s19595_s2 + $0x128] sm:$0xff] }
 0x203   : > { %v14324_v11 = vpop.eup %14323  ;;  %v11807_v27 = vmul.f32 -1.442695, %v2724_v4 }
 0x204   : > { %v3512_v47 = vadd.f32 1.0, %v14324_v11  ;;  %8787 = vmatmul.mubr.bf16.gmra.mrb[20].mxu1 %v13398_v18  ;;  %v2308_v57 = vpop.xlane.xlu0 %2307  ;;  %v13416_v11 = vld [vmem:[%s15910_s6 + $0x2c0] ss:$44 sps:$4 sm:$0xff]  }
 0x205   : > { %14331 = vpow2.f32 %v11807_v27  ;;  %v2820_v48 = vadd.f32 %v2646_v49, %v2308_v57  ;;  %8796 = vmatprep.mubr.bf16.mxu1 %v13402_v40  ;;  %v2556_v40 = vld [vmem:[%s19595_s2 + $0x150] sm:$0xff]  ;;  %v13420_v27 = vld [vmem:[%s15910_s6 + $0x31c] ss:$44 sps:$4 sm:$0xff]  }
 0x206   : > { %14333 = vrcp.f32 %v3512_v47 }
 0x207   : > { %v14326_v39 = vpop.eup %14325  ;;  %v11903_v62 = vmul.f32 -1.442695, %v2820_v48 }
 0x208   : > { %v3418_v38 = vadd.f32 1.0, %v14326_v39  ;;  %v1838_v14 = vpop.xlane.xlu0 %1837 }
 0x209   : > { %14335 = vpow2.f32 %v11903_v62  ;;  %10200 = vmatmul.mubr.bf16.gmra.mrb[20].mxu0 %v13401_v19  ;;  %v1808_v23 = vpop.xlane.xlu1 %1807  ;;  %v2726_v60 = vadd.f32 %v2552_v5, %v1838_v14  ;;  %v2652_v62 = vld [vmem:[%s19595_s2 + $0x450] sm:$0xff]  ;;  %v2647_v14 = vld [vmem:[%s19595_s2 + $0x428] sm:$0xff] }
 0x20a   : > { %14337 = vrcp.f32 %v3418_v38  ;;  %v2720_v63 = vadd.f32 %v2546_v28, %v1808_v23  ;;  %10209 = vmatprep.mubr.bf16.mxu0 %v13405_v25  ;;  %v13419_v23 = vld [vmem:[%s15910_s6 + $0x2d8] ss:$44 sps:$4 sm:$0xff]  }
 0x20b   : > { %v14328_v26 = vpop.eup %14327  ;;  %v11809_v10 = vmul.f32 -1.442695, %v2726_v60 }
 0x20c   : > { %v14330_v3 = vpop.eup %14329  ;;  %v3514_v24 = vadd.f32 1.0, %v14328_v26  ;;  %v11803_v31 = vmul.f32 -1.442695, %v2720_v63  ;;  %8797 = vmatmul.mubr.bf16.gmra.mrb[24].mxu1 %v13404_v13  ;;  %v2318_v2 = vpop.xlane.xlu0 %2317  ;;  %v2558_v26 = vld [vmem:[%s19595_s2 + $0x160] sm:$0xff] }
 0x20d   : > { %14339 = vpow2.f32 %v11809_v10  ;;  %v2293_v29 = vpop.xlane.xlu1 %2292  ;;  %v2822_v53 = vadd.f32 %v2648_v51, %v2318_v2  ;;  %4421 = vperm.xlu1 %13365, %v14330_v3   ;;  %8806 = vmatprep.mubr.bf16.mxu1 %v13408_v32 }
 0x20e   : > { %14341 = vrcp.f32 %v3514_v24  ;;  %v2817_v15 = vadd.f32 %v2643_v22, %v2293_v29  ;;  %v2553_v24 = vld [vmem:[%s19595_s2 + $0x138] sm:$0xff] }
 0x20f   : > { %v14332_v44 = vpop.eup %14331  ;;  %14343 = vpow2.f32 %v11803_v31  ;;  %v11905_v42 = vmul.f32 -1.442695, %v2822_v53 }
 0x210   : > { %v14334_v37 = vpop.eup %14333  ;;  %v3420_v56 = vadd.f32 1.0, %v14332_v44  ;;  %v11900_v9 = vmul.f32 -1.442695, %v2817_v15  ;;  %v1848_v55 = vpop.xlane.xlu0 %1847  ;;  %v13426_v15 = vld [vmem:[%s15910_s6 + $0x374] ss:$44 sps:$4 sm:$0xff]  }
 0x211   : > { %14345 = vpow2.f32 %v11905_v42  ;;  %10210 = vmatmul.mubr.bf16.gmra.mrb[24].mxu0 %v13407_v45  ;;  %v1823_v54 = vpop.xlane.xlu1 %1822  ;;  %v2728_v21 = vadd.f32 %v2554_v1, %v1848_v55  ;;  %4896 = vperm.xlu1 %13365, %v14334_v37   ;;  %v13423_v1 = vld [vmem:[%s15910_s6 + $0x334] ss:$44 sps:$4 sm:$0xff]  }
 0x212   : > { %14347 = vrcp.f32 %v3420_v56  ;;  %v2723_v52 = vadd.f32 %v2549_v36, %v1823_v54  ;;  %10219 = vmatprep.mubr.bf16.mxu0 %v13411_v61  ;;  %v13422_v36 = vld [vmem:[%s15910_s6 + $0x318] ss:$44 sps:$4 sm:$0xff]  }
 0x213   : > { %v14336_v59 = vpop.eup %14335  ;;  %14349 = vpow2.f32 %v11900_v9  ;;  %v11811_v43 = vmul.f32 -1.442695, %v2728_v21  ;;  %v2654_v21 = vld [vmem:[%s19595_s2 + $0x460] sm:$0xff] }
 0x214   : > { %v14338_v8 = vpop.eup %14337  ;;  %v3516_v46 = vadd.f32 1.0, %v14336_v59  ;;  %v11806_v6 = vmul.f32 -1.442695, %v2723_v52  ;;  %8807 = vmatmul.mubr.bf16.gmra.mrb[28].mxu1 %v13410_v50  ;;  %v2328_v18 = vpop.xlane.xlu0 %2327  ;;  %v2649_v52 = vld [vmem:[%s19595_s2 + $0x438] sm:$0xff] }
 0x215   : > { %14351 = vpow2.f32 %v11811_v43  ;;  %v2303_v12 = vpop.xlane.xlu1 %2302  ;;  %v2824_v16 = vadd.f32 %v2650_v58, %v2328_v18  ;;  %4426 = vperm.xlu1 %13365, %v14338_v8   ;;  %8816 = vmatprep.mubr.bf16.mxu1 %v13414_v7  ;;  %v13425_v58 = vld [vmem:[%s15910_s6 + $0x330] ss:$44 sps:$4 sm:$0xff]  }
 0x216   : > { %14353 = vrcp.f32 %v3516_v46  ;;  %v2819_v41 = vadd.f32 %v2645_v30, %v2303_v12  ;;  %v2560_v46 = vld [vmem:[%s19595_s2 + $0x170] sm:$0xff] }
 0x217   : > { %v14340_v4 = vpop.eup %14339  ;;  %14355 = vpow2.f32 %v11806_v6  ;;  %v11907_v49 = vmul.f32 -1.442695, %v2824_v16  ;;  %v2555_v16 = vld [vmem:[%s19595_s2 + $0x148] sm:$0xff] }
 0x218   : > { %v14342_v19 = vpop.eup %14341  ;;  %v3422_v47 = vadd.f32 1.0, %v14340_v4  ;;  %v11902_v57 = vmul.f32 -1.442695, %v2819_v41  ;;  %v1858_v48 = vpop.xlane.xlu0 %1857 }
 0x219   : > { %v14344_v28 = vpop.eup %14343  ;;  %14357 = vpow2.f32 %v11907_v49  ;;  %10220 = vmatmul.mubr.bf16.gmra.mrb[28].mxu0 %v13413_v0  ;;  %v1833_v5 = vpop.xlane.xlu1 %1832  ;;  %v2730_v13 = vadd.f32 %v2556_v40, %v1858_v48  ;;  %4906 = vperm.xlu1 %13365, %v14342_v19  }
 0x21a   : > { %v3416_v25 = vadd.f32 1.0, %v14344_v28  ;;  %14359 = vrcp.f32 %v3422_v47  ;;  %v2725_v39 = vadd.f32 %v2551_v20, %v1833_v5  ;;  %10229 = vmatprep.mubr.bf16.mxu0 %v13417_v17  ;;  %v13429_v17 = vld [vmem:[%s15910_s6 + $0x38c] ss:$44 sps:$4 sm:$0xff]  }
 0x21b   : > { %v14346_v32 = vpop.eup %14345  ;;  %14361 = vpow2.f32 %v11902_v57  ;;  %v11813_v38 = vmul.f32 -1.442695, %v2730_v13  ;;  %v13432_v13 = vld [vmem:[%s15910_s6 + $0x3cc] ss:$44 sps:$4 sm:$0xff]  }
 0x21c   : > { %v14348_v60 = vpop.eup %14347  ;;  %14363 = vrcp.f32 %v3416_v25  ;;  %v3518_v22 = vadd.f32 1.0, %v14346_v32  ;;  %v11808_v63 = vmul.f32 -1.442695, %v2725_v39  ;;  %8817 = vmatmul.mubr.bf16.gmra.mrb[32].mxu1 %v13416_v11  ;;  %v2338_v51 = vpop.xlane.xlu0 %2337  ;;  %v13428_v11 = vld [vmem:[%s15910_s6 + $0x370] ss:$44 sps:$4 sm:$0xff]  }
 0x21d   : > { %v14350_v10 = vpop.eup %14349  ;;  %14365 = vpow2.f32 %v11813_v38  ;;  %v2313_v45 = vpop.xlane.xlu1 %2312  ;;  %v2826_v3 = vadd.f32 %v2652_v62, %v2338_v51  ;;  %4436 = vperm.xlu1 %13365, %v14348_v60   ;;  %8826 = vmatprep.mubr.bf16.mxu1 %v13420_v27  ;;  %v2656_v32 = vld [vmem:[%s19595_s2 + $0x470] sm:$0xff] }
 0x21e   : > { %v3513_v31 = vadd.f32 1.0, %v14350_v10  ;;  %14367 = vrcp.f32 %v3518_v22  ;;  %v2821_v2 = vadd.f32 %v2647_v14, %v2313_v45 }
 0x21f   : > { %v14352_v29 = vpop.eup %14351  ;;  %14369 = vpow2.f32 %v11808_v63  ;;  %v11909_v53 = vmul.f32 -1.442695, %v2826_v3  ;;  %v13431_v3 = vld [vmem:[%s15910_s6 + $0x388] ss:$44 sps:$4 sm:$0xff]  }
 0x220   : > { %v14354_v61 = vpop.eup %14353  ;;  %14371 = vrcp.f32 %v3513_v31  ;;  %v3424_v44 = vadd.f32 1.0, %v14352_v29  ;;  %v11904_v42 = vmul.f32 -1.442695, %v2821_v2  ;;  %v1868_v50 = vpop.xlane.xlu0 %1867  ;;  %v2562_v29 = vld [vmem:[%s19595_s2 + $0x180] sm:$0xff] }
 0x221   : > { %v14356_v37 = vpop.eup %14355  ;;  %14373 = vpow2.f32 %v11909_v53  ;;  %10230 = vmatmul.mubr.bf16.gmra.mrb[32].mxu0 %v13419_v23  ;;  %v1843_v56 = vpop.xlane.xlu1 %1842  ;;  %v2732_v9 = vadd.f32 %v2558_v26, %v1868_v50  ;;  %4916 = vperm.xlu1 %13365, %v14354_v61   ;;  %v2651_v23 = vld [vmem:[%s19595_s2 + $0x448] sm:$0xff]  ;;  %v13435_v53 = vld [vmem:[%s15910_s6 + $0x3e4] ss:$44 sps:$4 sm:$0xff]  }
 0x222   : > { %v3419_v55 = vadd.f32 1.0, %v14356_v37  ;;  %14375 = vrcp.f32 %v3424_v44  ;;  %v2727_v54 = vadd.f32 %v2553_v24, %v1843_v56  ;;  %10239 = vmatprep.mubr.bf16.mxu0 %v13423_v1  ;;  %v2557_v1 = vld [vmem:[%s19595_s2 + $0x158] sm:$0xff]  ;;  %v13434_v61 = vld [vmem:[%s15910_s6 + $0x3c8] ss:$44 sps:$4 sm:$0xff]  }
 0x223   : > { %v14358_v30 = vpop.eup %14357  ;;  %14377 = vpow2.f32 %v11904_v42  ;;  %v11815_v7 = vmul.f32 -1.442695, %v2732_v9 }
 0x224   : > { %v14360_v59 = vpop.eup %14359  ;;  %14379 = vrcp.f32 %v3419_v55  ;;  %v3520_v43 = vadd.f32 1.0, %v14358_v30  ;;  %v11810_v0 = vmul.f32 -1.442695, %v2727_v54  ;;  %8827 = vmatmul.mubr.bf16.gmra.mrb[36].mxu1 %v13422_v36  ;;  %v2348_v8 = vpop.xlane.xlu0 %2347  ;;  %v13438_v54 = vld [vmem:[%s15910_s6 + $0x424] ss:$44 sps:$4 sm:$0xff]  }
 0x225   : > { %v14362_v6 = vpop.eup %14361  ;;  %14381 = vpow2.f32 %v11815_v7  ;;  %v2323_v18 = vpop.xlane.xlu1 %2322  ;;  %v2828_v12 = vadd.f32 %v2654_v21, %v2348_v8  ;;  %4446 = vperm.xlu1 %13365, %v14360_v59   ;;  %8836 = vmatprep.mubr.bf16.mxu1 %v13426_v15 }
 0x226   : > { %v14364_v20 = vpop.eup %14363  ;;  %v3515_v40 = vadd.f32 1.0, %v14362_v6  ;;  %14383 = vrcp.f32 %v3520_v43  ;;  %v2823_v41 = vadd.f32 %v2649_v52, %v2323_v18  ;;  %v2658_v52 = vld [vmem:[%s19595_s2 + $0x480] sm:$0xff]  ;;  %v2653_v43 = vld [vmem:[%s19595_s2 + $0x458] sm:$0xff] }
 0x227   : > { %v14366_v4 = vpop.eup %14365  ;;  %14385 = vpow2.f32 %v11810_v0  ;;  %4416 = vperm.xlu0 %13364, %v14364_v20   ;;  %v11911_v49 = vmul.f32 -1.442695, %v2828_v12  ;;  %v13437_v20 = vld [vmem:[%s15910_s6 + $0x3e0] ss:$44 sps:$4 sm:$0xff]  }
 0x228   : > { %v14368_v27 = vpop.eup %14367  ;;  %14387 = vrcp.f32 %v3515_v40  ;;  %v3426_v19 = vadd.f32 1.0, %v14366_v4  ;;  %v11906_v47 = vmul.f32 -1.442695, %v2823_v41  ;;  %v1878_v57 = vpop.xlane.xlu0 %1877  ;;  %v2559_v4 = vld [vmem:[%s19595_s2 + $0x168] sm:$0xff] }
 0x229   : > { %v14370_v48 = vpop.eup %14369  ;;  %14389 = vpow2.f32 %v11911_v49  ;;  %10240 = vmatmul.mubr.bf16.gmra.mrb[36].mxu0 %v13425_v58  ;;  %v1853_v28 = vpop.xlane.xlu1 %1852  ;;  %v2734_v5 = vadd.f32 %v2560_v46, %v1878_v57  ;;  %4926 = vperm.xlu1 %13365, %v14368_v27   ;;  %v2564_v49 = vld [vmem:[%s19595_s2 + $0x190] sm:$0xff] }
 0x22a   : > { %v14372_v25 = vpop.eup %14371  ;;  %v3421_v39 = vadd.f32 1.0, %v14370_v48  ;;  %14391 = vrcp.f32 %v3426_v19  ;;  %v2729_v62 = vadd.f32 %v2555_v16, %v1853_v28  ;;  %10249 = vmatprep.mubr.bf16.mxu0 %v13429_v17 }
 0x22b   : > { %v14374_v38 = vpop.eup %14373  ;;  %14393 = vpow2.f32 %v11906_v47  ;;  %4901 = vperm.xlu0 %13364, %v14372_v25   ;;  %v11817_v14 = vmul.f32 -1.442695, %v2734_v5  ;;  %v13440_v47 = vld [vmem:[%s15910_s6 + $0x420] ss:$44 sps:$4 sm:$0xff]  }
 0x22c   : > { %v14376_v60 = vpop.eup %14375  ;;  %14395 = vrcp.f32 %v3421_v39  ;;  %v3522_v22 = vadd.f32 1.0, %v14374_v38  ;;  %v11812_v63 = vmul.f32 -1.442695, %v2729_v62  ;;  %8837 = vmatmul.mubr.bf16.gmra.mrb[40].mxu1 %v13428_v11  ;;  %v2358_v51 = vpop.xlane.xlu0 %2357  ;;  %v13441_v11 = vld [vmem:[%s15910_s6 + $0x43c] ss:$44 sps:$4 sm:$0xff]  }
 0x22d   : > { %v14378_v26 = vpop.eup %14377  ;;  %14397 = vpow2.f32 %v11817_v14  ;;  %v2333_v10 = vpop.xlane.xlu1 %2332  ;;  %v2830_v45 = vadd.f32 %v2656_v32, %v2358_v51  ;;  %4456 = vperm.xlu1 %13365, %v14376_v60   ;;  %8846 = vmatprep.mubr.bf16.mxu1 %v13432_v13  ;;  %v13444_v62 = vld [vmem:[%s15910_s6 + $0x47c] ss:$44 sps:$4 sm:$0xff]  }
 0x22e   : > { %v14380_v24 = vpop.eup %14379  ;;  %v3517_v31 = vadd.f32 1.0, %v14378_v26  ;;  %14399 = vrcp.f32 %v3522_v22  ;;  %v2825_v2 = vadd.f32 %v2651_v23, %v2333_v10  ;;  %v2660_v23 = vld [vmem:[%s19595_s2 + $0x490] sm:$0xff] }
 0x22f   : > { %v14382_v36 = vpop.eup %14381  ;;  %14401 = vpow2.f32 %v11812_v63  ;;  %4431 = vperm.xlu0 %13364, %v14380_v24   ;;  %v11913_v15 = vmul.f32 -1.442695, %v2830_v45  ;;  %v2655_v63 = vld [vmem:[%s19595_s2 + $0x468] sm:$0xff] }
 0x230   : > { %v14384_v44 = vpop.eup %14383  ;;  %14403 = vrcp.f32 %v3517_v31  ;;  %v3428_v42 = vadd.f32 1.0, %v14382_v36  ;;  %v11908_v50 = vmul.f32 -1.442695, %v2825_v2  ;;  %v1888_v37 = vpop.xlane.xlu0 %1887  ;;  %v13443_v2 = vld [vmem:[%s15910_s6 + $0x438] ss:$44 sps:$4 sm:$0xff]  }
 0x231   : > { %v14386_v56 = vpop.eup %14385  ;;  %14405 = vpow2.f32 %v11913_v15  ;;  %10250 = vmatmul.mubr.bf16.gmra.mrb[40].mxu0 %v13431_v3  ;;  %v1863_v9 = vpop.xlane.xlu1 %1862  ;;  %v2736_v55 = vadd.f32 %v2562_v29, %v1888_v37  ;;  %4936 = vperm.xlu1 %13365, %v14384_v44   ;;  %v2566_v36 = vld [vmem:[%s19595_s2 + $0x1a0] sm:$0xff] }
 0x232   : > { %v14388_v21 = vpop.eup %14387  ;;  %v3423_v30 = vadd.f32 1.0, %v14386_v56  ;;  %14407 = vrcp.f32 %v3428_v42  ;;  %v2731_v7 = vadd.f32 %v2557_v1, %v1863_v9  ;;  %10259 = vmatprep.mubr.bf16.mxu0 %v13435_v53  ;;  %v13447_v15 = vld [vmem:[%s15910_s6 + $0x494] ss:$44 sps:$4 sm:$0xff]   ;;  %v2561_v42 = vld [vmem:[%s19595_s2 + $0x178] sm:$0xff] }
 0x233   : > { %v14390_v58 = vpop.eup %14389  ;;  %14409 = vpow2.f32 %v11908_v50  ;;  %4911 = vperm.xlu0 %13364, %v14388_v21   ;;  %v11819_v59 = vmul.f32 -1.442695, %v2736_v55  ;;  %v13446_v50 = vld [vmem:[%s15910_s6 + $0x478] ss:$44 sps:$4 sm:$0xff]  }
 0x234   : > { %v14392_v0 = vpop.eup %14391  ;;  %14411 = vrcp.f32 %v3423_v30  ;;  %v3524_v8 = vadd.f32 1.0, %v14390_v58  ;;  %v11814_v46 = vmul.f32 -1.442695, %v2731_v7  ;;  %8847 = vmatmul.mubr.bf16.gmra.mrb[44].mxu1 %v13434_v61  ;;  %v2368_v6 = vpop.xlane.xlu0 %2367  ;;  %v13450_v7 = vld [vmem:[%s15910_s6 + $0x4d4] ss:$44 sps:$4 sm:$0xff]  }
 0x235   : > { %v14394_v18 = vpop.eup %14393  ;;  %14413 = vpow2.f32 %v11819_v59  ;;  %v2343_v12 = vpop.xlane.xlu1 %2342  ;;  %v2832_v16 = vadd.f32 %v2658_v52, %v2368_v6  ;;  %4466 = vperm.xlu1 %13365, %v14392_v0   ;;  %8856 = vmatprep.mubr.bf16.mxu1 %v13438_v54 }
 0x236   : > { %v14396_v40 = vpop.eup %14395  ;;  %v3519_v41 = vadd.f32 1.0, %v14394_v18  ;;  %14415 = vrcp.f32 %v3524_v8  ;;  %v2827_v17 = vadd.f32 %v2653_v43, %v2343_v12  ;;  %v2662_v43 = vld [vmem:[%s19595_s2 + $0x4a0] sm:$0xff] }
 0x237   : > { %v14398_v27 = vpop.eup %14397  ;;  %14417 = vpow2.f32 %v11814_v46  ;;  %4441 = vperm.xlu0 %13364, %v14396_v40   ;;  %v11915_v19 = vmul.f32 -1.442695, %v2832_v16  ;;  %v2657_v46 = vld [vmem:[%s19595_s2 + $0x478] sm:$0xff] }
 0x238   : > { %v14400_v57 = vpop.eup %14399  ;;  %14419 = vrcp.f32 %v3519_v41  ;;  %v3430_v48 = vadd.f32 1.0, %v14398_v27  ;;  %v11910_v28 = vmul.f32 -1.442695, %v2827_v17  ;;  %v1898_v5 = vpop.xlane.xlu0 %1897  ;;  %v13449_v17 = vld [vmem:[%s15910_s6 + $0x490] ss:$44 sps:$4 sm:$0xff]  }
 0x239   : > { %v14402_v13 = vpop.eup %14401  ;;  %14421 = vpow2.f32 %v11915_v19  ;;  %10260 = vmatmul.mubr.bf16.gmra.mrb[44].mxu0 %v13437_v20  ;;  %v1873_v25 = vpop.xlane.xlu1 %1872  ;;  %v2738_v39 = vadd.f32 %v2564_v49, %v1898_v5  ;;  %4946 = vperm.xlu1 %13365, %v14400_v57   ;;  %v2568_v27 = vld [vmem:[%s19595_s2 + $0x1b0] sm:$0xff]  ;;  %v13453_v19 = vld [vmem:[%s15910_s6 + $0x4ec] ss:$44 sps:$4 sm:$0xff]  }
 0x23a   : > { %v14404_v32 = vpop.eup %14403  ;;  %v3425_v38 = vadd.f32 1.0, %v14402_v13  ;;  %14423 = vrcp.f32 %v3430_v48  ;;  %v2733_v14 = vadd.f32 %v2559_v4, %v1873_v25  ;;  %10269 = vmatprep.mubr.bf16.mxu0 %v13441_v11  ;;  %v2563_v48 = vld [vmem:[%s19595_s2 + $0x188] sm:$0xff] }
 0x23b   : > { %v14406_v60 = vpop.eup %14405  ;;  %14425 = vpow2.f32 %v11910_v28  ;;  %4921 = vperm.xlu0 %13364, %v14404_v32   ;;  %v11821_v22 = vmul.f32 -1.442695, %v2738_v39  ;;  %v13452_v39 = vld [vmem:[%s15910_s6 + $0x4d0] ss:$44 sps:$4 sm:$0xff]  }
 0x23c   : > { %v14408_v51 = vpop.eup %14407  ;;  %14427 = vrcp.f32 %v3425_v38  ;;  %v3526_v26 = vadd.f32 1.0, %v14406_v60  ;;  %v11816_v10 = vmul.f32 -1.442695, %v2733_v14  ;;  %8857 = vmatmul.mubr.bf16.gmra.mrb[48].mxu1 %v13440_v47  ;;  %v2378_v45 = vpop.xlane.xlu0 %2377  ;;  %v13456_v14 = vld [vmem:[%s15910_s6 + $0x52c] ss:$44 sps:$4 sm:$0xff]  }
 0x23d   : > { %v14410_v3 = vpop.eup %14409  ;;  %14429 = vpow2.f32 %v11821_v22  ;;  %v2353_v24 = vpop.xlane.xlu1 %2352  ;;  %v2834_v31 = vadd.f32 %v2660_v23, %v2378_v45  ;;  %4476 = vperm.xlu1 %13365, %v14408_v51   ;;  %8866 = vmatprep.mubr.bf16.mxu1 %v13444_v62 }
 0x23e   : > { %v14412_v1 = vpop.eup %14411  ;;  %v3521_v29 = vadd.f32 1.0, %v14410_v3  ;;  %14431 = vrcp.f32 %v3526_v26  ;;  %v2829_v53 = vadd.f32 %v2655_v63, %v2353_v24  ;;  %v2664_v63 = vld [vmem:[%s19595_s2 + $0x4b0] sm:$0xff] }
 0x23f   : > { %v14414_v61 = vpop.eup %14413  ;;  %14433 = vpow2.f32 %v11816_v10  ;;  %4451 = vperm.xlu0 %13364, %v14412_v1   ;;  %v11917_v44 = vmul.f32 -1.442695, %v2834_v31  ;;  %v2659_v10 = vld [vmem:[%s19595_s2 + $0x488] sm:$0xff] }
 0x240   : > { %v14416_v37 = vpop.eup %14415  ;;  %14435 = vrcp.f32 %v3521_v29  ;;  %v3432_v56 = vadd.f32 1.0, %v14414_v61  ;;  %v11912_v9 = vmul.f32 -1.442695, %v2829_v53  ;;  %v1908_v55 = vpop.xlane.xlu0 %1907  ;;  %v13455_v53 = vld [vmem:[%s15910_s6 + $0x4e8] ss:$44 sps:$4 sm:$0xff]  }
 0x241   : > { %v14418_v54 = vpop.eup %14417  ;;  %14437 = vpow2.f32 %v11917_v44  ;;  %10270 = vmatmul.mubr.bf16.gmra.mrb[48].mxu0 %v13443_v2  ;;  %v1883_v21 = vpop.xlane.xlu1 %1882  ;;  %v2740_v30 = vadd.f32 %v2566_v36, %v1908_v55  ;;  %4956 = vperm.xlu1 %13365, %v14416_v37   ;;  %v2570_v44 = vld [vmem:[%s19595_s2 + $0x1c0] sm:$0xff] }
 0x242   : > { %v14420_v52 = vpop.eup %14419  ;;  %v3427_v58 = vadd.f32 1.0, %v14418_v54  ;;  %14439 = vrcp.f32 %v3432_v56  ;;  %v2735_v59 = vadd.f32 %v2561_v42, %v1883_v21  ;;  %10279 = vmatprep.mubr.bf16.mxu0 %v13447_v15  ;;  %v13459_v42 = vld [vmem:[%s15910_s6 + $0x544] ss:$44 sps:$4 sm:$0xff]   ;;  %v2565_v56 = vld [vmem:[%s19595_s2 + $0x198] sm:$0xff] }
 0x243   : > { %v14422_v0 = vpop.eup %14421  ;;  %14441 = vpow2.f32 %v11912_v9  ;;  %4931 = vperm.xlu0 %13364, %v14420_v52   ;;  %v11823_v8 = vmul.f32 -1.442695, %v2740_v30  ;;  %v13458_v9 = vld [vmem:[%s15910_s6 + $0x528] ss:$44 sps:$4 sm:$0xff]  }
 0x244   : > { %v14424_v6 = vpop.eup %14423  ;;  %14443 = vrcp.f32 %v3427_v58  ;;  %v3528_v18 = vadd.f32 1.0, %v14422_v0  ;;  %v11818_v12 = vmul.f32 -1.442695, %v2735_v59  ;;  %8867 = vmatmul.mubr.bf16.gmra.mrb[52].mxu1 %v13446_v50  ;;  %v2388_v16 = vpop.xlane.xlu0 %2387  ;;  %v13462_v59 = vld [vmem:[%s15910_s6 + $0x584] ss:$44 sps:$4 sm:$0xff]  }
 0x245   : > { %v14426_v20 = vpop.eup %14425  ;;  %14445 = vpow2.f32 %v11823_v8  ;;  %v2363_v40 = vpop.xlane.xlu1 %2362  ;;  %v2836_v41 = vadd.f32 %v2662_v43, %v2388_v16  ;;  %4486 = vperm.xlu1 %13365, %v14424_v6   ;;  %8876 = vmatprep.mubr.bf16.mxu1 %v13450_v7 }
 0x246   : > { %v14428_v4 = vpop.eup %14427  ;;  %v3523_v49 = vadd.f32 1.0, %v14426_v20  ;;  %14447 = vrcp.f32 %v3528_v18  ;;  %v2831_v11 = vadd.f32 %v2657_v46, %v2363_v40  ;;  %v2666_v46 = vld [vmem:[%s19595_s2 + $0x4c0] sm:$0xff] }
 0x247   : > { %v14430_v47 = vpop.eup %14429  ;;  %14449 = vpow2.f32 %v11818_v12  ;;  %4461 = vperm.xlu0 %13364, %v14428_v4   ;;  %v11919_v57 = vmul.f32 -1.442695, %v2836_v41  ;;  %v2661_v12 = vld [vmem:[%s19595_s2 + $0x498] sm:$0xff] }
 0x248   : > { %v14432_v28 = vpop.eup %14431  ;;  %14451 = vrcp.f32 %v3523_v49  ;;  %v3434_v5 = vadd.f32 1.0, %v14430_v47  ;;  %v11914_v13 = vmul.f32 -1.442695, %v2831_v11  ;;  %v1918_v25 = vpop.xlane.xlu0 %1917  ;;  %v13461_v11 = vld [vmem:[%s15910_s6 + $0x540] ss:$44 sps:$4 sm:$0xff]  }
 0x249   : > { %v14434_v62 = vpop.eup %14433  ;;  %14453 = vpow2.f32 %v11919_v57  ;;  %10280 = vmatmul.mubr.bf16.gmra.mrb[52].mxu0 %v13449_v17  ;;  %v1893_v32 = vpop.xlane.xlu1 %1892  ;;  %v2742_v38 = vadd.f32 %v2568_v27, %v1918_v25  ;;  %4966 = vperm.xlu1 %13365, %v14432_v28   ;;  %v2572_v57 = vld [vmem:[%s19595_s2 + $0x1d0] sm:$0xff]  ;;  %v13464_v25 = vld [vmem:[%s15910_s6 + $0x580] ss:$44 sps:$4 sm:$0xff]  }
 0x24a   : > { %v14436_v23 = vpop.eup %14435  ;;  %v3429_v60 = vadd.f32 1.0, %v14434_v62  ;;  %14455 = vrcp.f32 %v3434_v5  ;;  %v2737_v22 = vadd.f32 %v2563_v48, %v1893_v32  ;;  %10289 = vmatprep.mubr.bf16.mxu0 %v13453_v19  ;;  %v13465_v48 = vld [vmem:[%s15910_s6 + $0x59c] ss:$44 sps:$4 sm:$0xff]  }
 0x24b   : > { %v14438_v51 = vpop.eup %14437  ;;  %14457 = vpow2.f32 %v11914_v13  ;;  %4941 = vperm.xlu0 %13364, %v14436_v23   ;;  %v11825_v26 = vmul.f32 -1.442695, %v2742_v38  ;;  %v2567_v13 = vld [vmem:[%s19595_s2 + $0x1a8] sm:$0xff] }
 0x24c   : > { %v14440_v45 = vpop.eup %14439  ;;  %14459 = vrcp.f32 %v3429_v60  ;;  %v3530_v3 = vadd.f32 1.0, %v14438_v51  ;;  %v11820_v24 = vmul.f32 -1.442695, %v2737_v22  ;;  %8877 = vmatmul.mubr.bf16.gmra.mrb[56].mxu1 %v13452_v39  ;;  %v2398_v31 = vpop.xlane.xlu0 %2397  ;;  %v13468_v22 = vld [vmem:[%s15910_s6 + $0x5dc] ss:$44 sps:$4 sm:$0xff]  }
 0x24d   : > { %v14442_v2 = vpop.eup %14441  ;;  %14461 = vpow2.f32 %v11825_v26  ;;  %v2373_v1 = vpop.xlane.xlu1 %2372  ;;  %v2838_v29 = vadd.f32 %v2664_v63, %v2398_v31  ;;  %4496 = vperm.xlu1 %13365, %v14440_v45   ;;  %8886 = vmatprep.mubr.bf16.mxu1 %v13456_v14 }
 0x24e   : > { %v14444_v36 = vpop.eup %14443  ;;  %v3525_v15 = vadd.f32 1.0, %v14442_v2  ;;  %14463 = vrcp.f32 %v3530_v3  ;;  %v2833_v61 = vadd.f32 %v2659_v10, %v2373_v1  ;;  %v2668_v10 = vld [vmem:[%s19595_s2 + $0x4d0] sm:$0xff] }
 0x24f   : > { %v14446_v50 = vpop.eup %14445  ;;  %14465 = vpow2.f32 %v11820_v24  ;;  %4471 = vperm.xlu0 %13364, %v14444_v36   ;;  %v11921_v37 = vmul.f32 -1.442695, %v2838_v29  ;;  %v2663_v24 = vld [vmem:[%s19595_s2 + $0x4a8] sm:$0xff] }
 0x250   : > { %v14448_v55 = vpop.eup %14447  ;;  %14467 = vrcp.f32 %v3525_v15  ;;  %v3436_v54 = vadd.f32 1.0, %v14446_v50  ;;  %v11916_v21 = vmul.f32 -1.442695, %v2833_v61  ;;  %v1928_v30 = vpop.xlane.xlu0 %1927  ;;  %v13467_v61 = vld [vmem:[%s15910_s6 + $0x598] ss:$44 sps:$4 sm:$0xff]  }
 0x251   : > { %v14450_v7 = vpop.eup %14449  ;;  %14469 = vpow2.f32 %v11921_v37  ;;  %10290 = vmatmul.mubr.bf16.gmra.mrb[56].mxu0 %v13455_v53  ;;  %v1903_v52 = vpop.xlane.xlu1 %1902  ;;  %v2744_v58 = vadd.f32 %v2570_v44, %v1928_v30  ;;  %4976 = vperm.xlu1 %13365, %v14448_v55   ;;  %v2574_v37 = vld [vmem:[%s19595_s2 + $0x1e0] sm:$0xff] }
 0x252   : > { %v14452_v43 = vpop.eup %14451  ;;  %v3431_v0 = vadd.f32 1.0, %v14450_v7  ;;  %14471 = vrcp.f32 %v3436_v54  ;;  %v2739_v8 = vadd.f32 %v2565_v56, %v1903_v52  ;;  %10299 = vmatprep.mubr.bf16.mxu0 %v13459_v42  ;;  %v13471_v56 = vld [vmem:[%s15910_s6 + $0x5f4] ss:$44 sps:$4 sm:$0xff]   ;;  %v2569_v54 = vld [vmem:[%s19595_s2 + $0x1b8] sm:$0xff] }
 0x253   : > { %v14454_v6 = vpop.eup %14453  ;;  %14473 = vpow2.f32 %v11916_v21  ;;  %4951 = vperm.xlu0 %13364, %v14452_v43   ;;  %v11827_v18 = vmul.f32 -1.442695, %v2744_v58  ;;  %v13470_v58 = vld [vmem:[%s15910_s6 + $0x5d8] ss:$44 sps:$4 sm:$0xff]  }
 0x254   : > { %v14456_v16 = vpop.eup %14455  ;;  %14475 = vrcp.f32 %v3431_v0  ;;  %v3532_v20 = vadd.f32 1.0, %v14454_v6  ;;  %v11822_v40 = vmul.f32 -1.442695, %v2739_v8  ;;  %8887 = vmatmul.mubr.bf16.gmra.mrb[60].mxu1 %v13458_v9  ;;  %v2408_v41 = vpop.xlane.xlu0 %2407  ;;  %v13474_v8 = vld [vmem:[%s15910_s6 + $0x634] ss:$44 sps:$4 sm:$0xff]  }
 0x255   : > { %v14458_v17 = vpop.eup %14457  ;;  %14477 = vpow2.f32 %v11827_v18  ;;  %v2383_v4 = vpop.xlane.xlu1 %2382  ;;  %v2840_v49 = vadd.f32 %v2666_v46, %v2408_v41  ;;  %4506 = vperm.xlu1 %13365, %v14456_v16   ;;  %8896 = vmatprep.mubr.bf16.mxu1 %v13462_v59 }
 0x256   : > { %v14460_v27 = vpop.eup %14459  ;;  %v3527_v19 = vadd.f32 1.0, %v14458_v17  ;;  %14479 = vrcp.f32 %v3532_v20  ;;  %v2835_v47 = vadd.f32 %v2661_v12, %v2383_v4  ;;  %v2670_v12 = vld [vmem:[%s19595_s2 + $0x4e0] sm:$0xff] }
 0x257   : > { %v14462_v28 = vpop.eup %14461  ;;  %14481 = vpow2.f32 %v11822_v40  ;;  %4481 = vperm.xlu0 %13364, %v14460_v27   ;;  %v11923_v5 = vmul.f32 -1.442695, %v2840_v49  ;;  %v2665_v40 = vld [vmem:[%s19595_s2 + $0x4b8] sm:$0xff] }
 0x258   : > { %v14464_v39 = vpop.eup %14463  ;;  %14483 = vrcp.f32 %v3527_v19  ;;  %v3438_v62 = vadd.f32 1.0, %v14462_v28  ;;  %v11918_v32 = vmul.f32 -1.442695, %v2835_v47  ;;  %v1938_v38 = vpop.xlane.xlu0 %1937  ;;  %v13473_v47 = vld [vmem:[%s15910_s6 + $0x5f0] ss:$44 sps:$4 sm:$0xff]  }
 0x259   : > { %v14466_v14 = vpop.eup %14465  ;;  %14485 = vpow2.f32 %v11923_v5  ;;  %10300 = vmatmul.mubr.bf16.gmra.mrb[60].mxu0 %v13461_v11  ;;  %v1913_v23 = vpop.xlane.xlu1 %1912  ;;  %v2746_v60 = vadd.f32 %v2572_v57, %v1938_v38  ;;  %4986 = vperm.xlu1 %13365, %v14464_v39   ;;  %v2576_v5 = vld [vmem:[%s19595_s2 + $0x1f0] sm:$0xff] }
 0x25a   : > { %v14468_v63 = vpop.eup %14467  ;;  %v3433_v51 = vadd.f32 1.0, %v14466_v14  ;;  %14487 = vrcp.f32 %v3438_v62  ;;  %v2741_v26 = vadd.f32 %v2567_v13, %v1913_v23  ;;  %10309 = vmatprep.mubr.bf16.mxu0 %v13465_v48  ;;  %v13477_v13 = vld [vmem:[%s15910_s6 + $0x64c] ss:$44 sps:$4 sm:$0xff]  }
 0x25b   : > { %v14470_v45 = vpop.eup %14469  ;;  %14489 = vpow2.f32 %v11918_v32  ;;  %4961 = vperm.xlu0 %13364, %v14468_v63   ;;  %v11829_v3 = vmul.f32 -1.442695, %v2746_v60  ;;  %v2571_v62 = vld [vmem:[%s19595_s2 + $0x1c8] sm:$0xff]  ;;  %v13476_v32 = vld [vmem:[%s15910_s6 + $0x630] ss:$44 sps:$4 sm:$0xff]  }
 0x25c   : > { %v14472_v31 = vpop.eup %14471  ;;  %14491 = vrcp.f32 %v3433_v51  ;;  %v3534_v2 = vadd.f32 1.0, %v14470_v45  ;;  %v11824_v1 = vmul.f32 -1.442695, %v2741_v26  ;;  %8897 = vmatmul.mubr.bf16.gmra.mrb[64].mxu1 %v13464_v25  ;;  %v2418_v29 = vpop.xlane.xlu0 %2417  ;;  %v17179_v45 = vld [vmem:[%s19594_s1 + $0x308] ss:$36 sps:$4 sm:$0xff]  }
 0x25d   : > { %v14474_v53 = vpop.eup %14473  ;;  %14493 = vpow2.f32 %v11829_v3  ;;  %v2393_v36 = vpop.xlane.xlu1 %2392  ;;  %v2842_v15 = vadd.f32 %v2668_v10, %v2418_v29  ;;  %4516 = vperm.xlu1 %13365, %v14472_v31   ;;  %8906 = vmatprep.mubr.bf16.mxu1 %v13468_v22  ;;  %v362_v22 = vld [vmem:[%s19594_s1 + $0x300] sm:$0xff]  ;;  %v13480_v10 = vld [vmem:[%s15910_s6 + $0x68c] ss:$44 sps:$4 sm:$0xff]  }
 0x25e   : > { %v14476_v44 = vpop.eup %14475  ;;  %v3529_v42 = vadd.f32 1.0, %v14474_v53  ;;  %14495 = vrcp.f32 %v3534_v2  ;;  %v2837_v50 = vadd.f32 %v2663_v24, %v2393_v36  ;;  %v2672_v2 = vld [vmem:[%s19595_s2 + $0x4f0] sm:$0xff]  ;;  %v2667_v53 = vld [vmem:[%s19595_s2 + $0x4c8] sm:$0xff]  ;;  %v774_v36 = vunpack.c.l.bf16 %v362_v22 }
 0x25f   : > { %v14478_v9 = vpop.eup %14477  ;;  %14497 = vpow2.f32 %v11824_v1  ;;  %4491 = vperm.xlu0 %13364, %v14476_v44   ;;  %v11925_v55 = vmul.f32 -1.442695, %v2842_v15  ;;  %v775_v15 = vunpack.c.h.bf16 %v362_v22  ;;  %v13485_v22 = vld [vmem:[%s15910_s6 + $0x6a0] ss:$44 sps:$4 sm:$0xff]  }
 0x260   : > { %v14480_v21 = vpop.eup %14479  ;;  %14499 = vrcp.f32 %v3529_v42  ;;  %v3440_v30 = vadd.f32 1.0, %v14478_v9  ;;  %v11920_v7 = vmul.f32 -1.442695, %v2837_v50  ;;  %v1948_v52 = vpop.xlane.xlu0 %1947 }
 0x261   : > { %v14482_v59 = vpop.eup %14481  ;;  %14501 = vpow2.f32 %v11925_v55  ;;  %10310 = vmatmul.mubr.bf16.gmra.mrb[64].mxu0 %v13467_v61  ;;  %v1923_v43 = vpop.xlane.xlu1 %1922  ;;  %v2748_v0 = vadd.f32 %v2574_v37, %v1948_v52  ;;  %4996 = vperm.xlu1 %13365, %v14480_v21   ;;  %v776_v37 = vunpack.c.l.bf16 %v17179_v45  ;;  %v13483_v52 = vld [vmem:[%s15910_s6 + $0x6a4] ss:$44 sps:$4 sm:$0xff]  }
 0x262   : > { %v14484_v46 = vpop.eup %14483  ;;  %v3435_v6 = vadd.f32 1.0, %v14482_v59  ;;  %14503 = vrcp.f32 %v3440_v30  ;;  %v2743_v18 = vadd.f32 %v2569_v54, %v1923_v43  ;;  %10319 = vmatprep.mubr.bf16.mxu0 %v13471_v56  ;;  %v13479_v54 = vld [vmem:[%s15910_s6 + $0x648] ss:$44 sps:$4 sm:$0xff]  }
 0x263   : > { %v14486_v16 = vpop.eup %14485  ;;  %14505 = vpow2.f32 %v11920_v7  ;;  %4971 = vperm.xlu0 %13364, %v14484_v46   ;;  %v11831_v20 = vmul.f32 -1.442695, %v2748_v0  ;;  %v2573_v0 = vld [vmem:[%s19595_s2 + $0x1d8] sm:$0xff]  ;;  %v1313_v46 = vmul.f32 %v14849_v33, %v774_v36  ;;  %v13488_v36 = vld [vmem:[%s15910_s6 + $0x6e0] ss:$44 sps:$4 sm:$0xff]  }
 0x264   : > { %v14488_v41 = vpop.eup %14487  ;;  %14507 = vrcp.f32 %v3435_v6  ;;  %v3536_v17 = vadd.f32 1.0, %v14486_v16  ;;  %v11826_v4 = vmul.f32 -1.442695, %v2743_v18  ;;  %8907 = vmatmul.mubr.bf16.gmra.mrb[68].mxu1 %v13470_v58  ;;  %v2428_v49 = vpop.xlane.xlu0 %2427  ;;  %v368_v58 = vld [vmem:[%s19594_s1 + $0x324] sm:$0xff]  ;;  %v1314_v6 = vmul.f32 %v14851_v34, %v775_v15 }
 0x265   : > { %v14490_v11 = vpop.eup %14489  ;;  %14509 = vpow2.f32 %v11831_v20  ;;  %v2403_v27 = vpop.xlane.xlu1 %2402  ;;  %v2844_v19 = vadd.f32 %v2670_v12, %v2428_v49  ;;  %4526 = vperm.xlu1 %13365, %v14488_v41   ;;  %8916 = vmatprep.mubr.bf16.mxu1 %v13474_v8  ;;  %v13482_v8 = vld [vmem:[%s15910_s6 + $0x688] ss:$44 sps:$4 sm:$0xff]   ;;  %v1315_v20 = vmul.f32 %v14853_v35, %v776_v37  ;;  %v783_v49 = vunpack.c.l.bf16 %v368_v58 }
 0x266   : > { %v14492_v57 = vpop.eup %14491  ;;  %v3531_v48 = vadd.f32 1.0, %v14490_v11  ;;  %14511 = vrcp.f32 %v3536_v17  ;;  %v2839_v28 = vadd.f32 %v2665_v40, %v2403_v27  ;;  %v372_v40 = vld [vmem:[%s19594_s1 + $0x33c] sm:$0xff]  ;;  %v784_v11 = vunpack.c.h.bf16 %v368_v58 }
 0x267   : > { %v14494_v25 = vpop.eup %14493  ;;  %14513 = vpow2.f32 %v11826_v4  ;;  %4501 = vperm.xlu0 %13364, %v14492_v57   ;;  %v11927_v39 = vmul.f32 -1.442695, %v2844_v19  ;;  %v13486_v4 = vld [vmem:[%s15910_s6 + $0x6e4] ss:$44 sps:$4 sm:$0xff]   ;;  %v785_v27 = vunpack.c.h.bf16 %v17179_v45 }
 0x268   : > { %v14496_v38 = vpop.eup %14495  ;;  %14515 = vrcp.f32 %v3531_v48  ;;  %v3442_v14 = vadd.f32 1.0, %v14494_v25  ;;  %v11922_v23 = vmul.f32 -1.442695, %v2839_v28  ;;  %v1958_v60 = vpop.xlane.xlu0 %1957  ;;  %v2669_v28 = vld [vmem:[%s19595_s2 + $0x4d8] sm:$0xff]  ;;  %v790_v25 = vunpack.c.h.bf16 %v372_v40 }
 0x269   : > { %v14498_v63 = vpop.eup %14497  ;;  %14517 = vpow2.f32 %v11927_v39  ;;  %10320 = vmatmul.mubr.bf16.gmra.mrb[68].mxu0 %v13473_v47  ;;  %v1933_v51 = vpop.xlane.xlu1 %1932  ;;  %v2750_v26 = vadd.f32 %v2576_v5, %v1958_v60  ;;  %5006 = vperm.xlu1 %13365, %v14496_v38   ;;  %v17211_v5 = vld [vmem:[%s19594_s1 + $0x344] ss:$24 sps:$4 sm:$0xff]   ;;  %v17216_v39 = vld [vmem:[%s19594_s1 + $0x354] sm:$0xff] }
 0x26a   : > { %v14500_v3 = vpop.eup %14499  ;;  %v3437_v24 = vadd.f32 1.0, %v14498_v63  ;;  %14519 = vrcp.f32 %v3442_v14  ;;  %v2745_v31 = vadd.f32 %v2571_v62, %v1933_v51  ;;  %10329 = vmatprep.mubr.bf16.mxu0 %v13477_v13  ;;  %v789_v13 = vunpack.c.l.bf16 %v372_v40  ;;  %v17263_v40 = vld [vmem:[%s19594_s1 + $0x374] ss:$24 sps:$4 sm:$0xff]  }
 0x26b   : > { %v14502_v1 = vpop.eup %14501  ;;  %14521 = vpow2.f32 %v11922_v23  ;;  %4981 = vperm.xlu0 %13364, %v14500_v3   ;;  %v11833_v29 = vmul.f32 -1.442695, %v2750_v26  ;;  %v17218_v14 = vadd.f32 %v1314_v6, %v1313_v46  ;;  %v17222_v63 = vsel %vm1644_vm0, %v1315_v20, 0.0  ;;  %v2671_v6 = vld [vmem:[%s19595_s2 + $0x4e8] sm:$0xff] }
 0x26c   : > { %v14504_v61 = vpop.eup %14503  ;;  %14523 = vrcp.f32 %v3437_v24  ;;  %v3538_v44 = vadd.f32 1.0, %v14502_v1  ;;  %v11828_v42 = vmul.f32 -1.442695, %v2745_v31  ;;  %8917 = vmatmul.mubr.bf16.gmra.mrb[72].mxu1 %v13476_v32  ;;  %v2438_v50 = vpop.xlane.xlu0 %2437  ;;  %v1322_v51 = vmul.f32 %v14849_v33, %v783_v49  ;;  %v13489_v31 = vld [vmem:[%s15910_s6 + $0x6fc] ss:$44 sps:$4 sm:$0xff]   ;;  %v364_v1 = vld [vmem:[%s19594_s1 + $0x30c] sm:$0xff] }
 0x26d   : > { %v14506_v56 = vpop.eup %14505  ;;  %14525 = vpow2.f32 %v11833_v29  ;;  %v2413_v9 = vpop.xlane.xlu1 %2412  ;;  %v2846_v55 = vadd.f32 %v2672_v2, %v2438_v50  ;;  %4536 = vperm.xlu1 %13365, %v14504_v61   ;;  %8926 = vmatprep.mubr.bf16.mxu1 %v13480_v10  ;;  %v1323_v26 = vmul.f32 %v14851_v34, %v784_v11  ;;  %v1324_v10 = vmul.f32 %v14853_v35, %v785_v27  ;;  %v380_v20 = vld [vmem:[%s19594_s1 + $0x36c] sm:$0xff] }
 0x26e   : > { %v14508_v21 = vpop.eup %14507  ;;  %v3533_v30 = vadd.f32 1.0, %v14506_v56  ;;  %14527 = vrcp.f32 %v3538_v44  ;;  %v2841_v7 = vadd.f32 %v2667_v53, %v2413_v9  ;;  %v791_v2 = vunpack.c.l.bf16 %v17211_v5  ;;  %v2575_v53 = vld [vmem:[%s19595_s2 + $0x1e8] sm:$0xff] }
 0x26f   : > { %v14510_v59 = vpop.eup %14509  ;;  %14529 = vpow2.f32 %v11828_v42  ;;  %4511 = vperm.xlu0 %13364, %v14508_v21   ;;  %v11929_v43 = vmul.f32 -1.442695, %v2846_v55  ;;  %v1328_v15 = vmul.f32 %v14849_v33, %v789_v13  ;;  %v1329_v61 = vmul.f32 %v14851_v34, %v790_v25  ;;  %v17242_v42 = vld [vmem:[%s19594_s1 + $0x314] ss:$12 sps:$4 sm:$0xff]   ;;  %v13492_v21 = vld [vmem:[%s15910_s6 + $0x73c] ss:$44 sps:$4 sm:$0xff]  }
 0x270   : > { %v14512_v18 = vpop.eup %14511  ;;  %14531 = vrcp.f32 %v3533_v30  ;;  %v3444_v12 = vadd.f32 1.0, %v14510_v59  ;;  %v11924_v16 = vmul.f32 -1.442695, %v2841_v7  ;;  %v795_v44 = vunpack.c.l.bf16 %v17216_v39 }
 0x271   : > { %v14514_v41 = vpop.eup %14513  ;;  %14533 = vpow2.f32 %v11929_v43  ;;  %10330 = vmatmul.mubr.bf16.gmra.mrb[72].mxu0 %v13479_v54  ;;  %v1943_v17 = vpop.xlane.xlu1 %1942  ;;  %5016 = vperm.xlu1 %13365, %v14512_v18   ;;  %v796_v9 = vunpack.c.h.bf16 %v17216_v39  ;;  %v17246_v30 = vadd.f32 %v1323_v26, %v1322_v51  ;;  %v797_v7 = vunpack.c.h.bf16 %v17211_v5  ;;  %v366_v5 = vld [vmem:[%s19594_s1 + $0x318] sm:$0xff] }
 0x272   : > { %v14516_v19 = vpop.eup %14515  ;;  %v3439_v47 = vadd.f32 1.0, %v14514_v41  ;;  %14535 = vrcp.f32 %v3444_v12  ;;  %v2747_v57 = vadd.f32 %v2573_v0, %v1943_v17  ;;  %10339 = vmatprep.mubr.bf16.mxu0 %v13483_v52  ;;  %v777_v52 = vunpack.c.l.bf16 %v364_v1 }
 0x273   : > { %v14518_v48 = vpop.eup %14517  ;;  %14537 = vpow2.f32 %v11924_v16  ;;  %4991 = vperm.xlu0 %13364, %v14516_v19   ;;  %v778_v58 = vunpack.c.h.bf16 %v364_v1  ;;  %v1330_v18 = vmul.f32 %v14853_v35, %v791_v2  ;;  %v17254_v12 = vadd.f32 %v1329_v61, %v1328_v15  ;;  %v13491_v19 = vld [vmem:[%s15910_s6 + $0x6f8] ss:$44 sps:$4 sm:$0xff]   ;;  %v13498_v2 = vld [vmem:[%s15910_s6 + $0x794] ss:$44 sps:$4 sm:$0xff]  }
 0x274   : > { %v14520_v62 = vpop.eup %14519  ;;  %14539 = vrcp.f32 %v3439_v47  ;;  %v3540_v32 = vadd.f32 1.0, %v14518_v48  ;;  %v11830_v38 = vmul.f32 -1.442695, %v2747_v57  ;;  %8927 = vmatmul.mubr.bf16.gmra.mrb[76].mxu1 %v13482_v8  ;;  %v779_v8 = vunpack.c.l.bf16 %v17242_v42 }
 0x275   : > { %v14522_v23 = vpop.eup %14521  ;;  %v2423_v60 = vpop.xlane.xlu1 %2422  ;;  %4546 = vperm.xlu1 %13365, %v14520_v62   ;;  %8936 = vmatprep.mubr.bf16.mxu1 %v13486_v4  ;;  %v1334_v16 = vmul.f32 %v14849_v33, %v795_v44  ;;  %v1335_v49 = vmul.f32 %v14851_v34, %v796_v9  ;;  %v17268_v47 = vsel %vm1644_vm0, %v1324_v10, 0.0  ;;  %v1336_v57 = vmul.f32 %v14853_v35, %v797_v7  ;;  %v13495_v62 = vld [vmem:[%s15910_s6 + $0x754] ss:$44 sps:$4 sm:$0xff]  }
 0x276   : > { %v14524_v45 = vpop.eup %14523  ;;  %v3535_v3 = vadd.f32 1.0, %v14522_v23  ;;  %14541 = vrcp.f32 %v3540_v32  ;;  %v2843_v24 = vadd.f32 %v2669_v28, %v2423_v60  ;;  %v1316_v48 = vmul.f32 %v14849_v33, %v777_v52  ;;  %v13494_v23 = vld [vmem:[%s15910_s6 + $0x738] ss:$44 sps:$4 sm:$0xff]  }
 0x277   : > { %v14526_v29 = vpop.eup %14525  ;;  %14543 = vpow2.f32 %v11830_v38  ;;  %4521 = vperm.xlu0 %13364, %v14524_v45   ;;  %v1317_v28 = vmul.f32 %v14851_v34, %v778_v58  ;;  %v1318_v32 = vmul.f32 %v14853_v35, %v779_v8  ;;  %v2577_v38 = vld [vmem:[%s19595_s2 + $0x1f8] sm:$0xff]  ;;  %v801_v60 = vunpack.c.l.bf16 %v380_v20 }
 0x278   : > { %v14528_v50 = vpop.eup %14527  ;;  %14545 = vrcp.f32 %v3535_v3  ;;  %v3446_v37 = vadd.f32 1.0, %v14526_v29  ;;  %v11926_v56 = vmul.f32 -1.442695, %v2843_v24  ;;  %v803_v51 = vunpack.c.l.bf16 %v17263_v40 }
 0x279   : > { %v14530_v55 = vpop.eup %14529  ;;  %10340 = vmatmul.mubr.bf16.gmra.mrb[76].mxu0 %v13485_v22  ;;  %v1953_v54 = vpop.xlane.xlu1 %1952  ;;  %5026 = vperm.xlu1 %13365, %v14528_v50   ;;  %v802_v22 = vunpack.c.h.bf16 %v380_v20  ;;  %v780_v45 = vunpack.c.l.bf16 %v366_v5  ;;  %v781_v3 = vunpack.c.h.bf16 %v366_v5  ;;  %v1990_v1 = vsel %vm1644_vm0, %v1330_v18, 0.0  ;;  %v13501_v20 = vld [vmem:[%s15910_s6 + $0x7ac] ss:$44 sps:$4 sm:$0xff]  }
 0x27a   : > { %v14532_v59 = vpop.eup %14531  ;;  %v3441_v43 = vadd.f32 1.0, %v14530_v55  ;;  %14547 = vrcp.f32 %v3446_v37  ;;  %v2749_v0 = vadd.f32 %v2575_v53, %v1953_v54  ;;  %10349 = vmatprep.mubr.bf16.mxu0 %v13489_v31  ;;  %v1999_v29 = vadd.f32 %v1335_v49, %v1334_v16  ;;  %v2673_v37 = vld [vmem:[%s19595_s2 + $0x4f8] sm:$0xff] }
 0x27b   : > { %v14534_v46 = vpop.eup %14533  ;;  %14549 = vpow2.f32 %v11926_v56  ;;  %5001 = vperm.xlu0 %13364, %v14532_v59   ;;  %v2000_v53 = vsel %vm1644_vm0, %v1336_v57, 0.0  ;;  %v1969_v50 = vadd.f32 %v1317_v28, %v1316_v48  ;;  %v1970_v56 = vsel %vm1644_vm0, %v1318_v32, 0.0  ;;  %v13500_v16 = vld [vmem:[%s15910_s6 + $0x790] ss:$44 sps:$4 sm:$0xff]   ;;  %v13504_v28 = vld [vmem:[%s15910_s6 + $0x7ec] ss:$44 sps:$4 sm:$0xff]  }
 0x27c   : > { %v14536_v41 = vpop.eup %14535  ;;  %14551 = vrcp.f32 %v3441_v43  ;;  %v3542_v17 = vadd.f32 1.0, %v14534_v46  ;;  %v11832_v4 = vmul.f32 -1.442695, %v2749_v0  ;;  %8937 = vmatmul.mubr.bf16.gmra.mrb[80].mxu1 %v13488_v36  ;;  %v782_v36 = vunpack.c.h.bf16 %v17242_v42  ;;  %v13497_v43 = vld [vmem:[%s15910_s6 + $0x750] ss:$44 sps:$4 sm:$0xff]  }
 0x27d   : > { %v14538_v11 = vpop.eup %14537  ;;  %v2433_v27 = vpop.xlane.xlu1 %2432  ;;  %4556 = vperm.xlu1 %13365, %v14536_v41   ;;  %8946 = vmatprep.mubr.bf16.mxu1 %v13492_v21  ;;  %v1340_v9 = vmul.f32 %v14849_v33, %v801_v60  ;;  %v1341_v55 = vmul.f32 %v14851_v34, %v802_v22  ;;  %v1342_v42 = vmul.f32 %v14853_v35, %v803_v51  ;;  %v17343_v32 = vld [vmem:[%s19594_s1 + $0x350] ss:$108 sps:$4 sm:$0xff]  }
 0x27e   : > { %v14540_v13 = vpop.eup %14539  ;;  %v3537_v25 = vadd.f32 1.0, %v14538_v11  ;;  %14553 = vrcp.f32 %v3542_v17  ;;  %v2845_v39 = vadd.f32 %v2671_v6, %v2433_v27  ;;  %v1319_v7 = vmul.f32 %v14849_v33, %v780_v45  ;;  %v384_v17 = vld [vmem:[%s19594_s1 + $0x384] sm:$0xff]  ;;  %v388_v27 = vld [vmem:[%s19594_s1 + $0x39c] sm:$0xff] }
 0x27f   : > { %14555 = vpow2.f32 %v11832_v4  ;;  %4531 = vperm.xlu0 %13364, %v14540_v13   ;;  %v1320_v52 = vmul.f32 %v14851_v34, %v781_v3  ;;  %v17299_v0 = vadd.f32 %v17222_v63, %v17218_v14  ;;  %v1321_v8 = vmul.f32 %v14853_v35, %v782_v36  ;;  %v370_v14 = vld [vmem:[%s19594_s1 + $0x330] sm:$0xff]  ;;  %v371_v11 = vld [vmem:[%s19594_s1 + $0x338] ss:$108 sps:$4 sm:$0xff]  }
 0x280   : > { %v14542_v26 = vpop.eup %14541  ;;  %14557 = vrcp.f32 %v3537_v25  ;;  %v11928_v10 = vmul.f32 -1.442695, %v2845_v39  ;;  %v17306_v41 = vadd.f32 %v17268_v47, %v17246_v30  ;;  %v17315_v63 = vadd.f32 %v1990_v1, %v17254_v12 }
 0x281   : > { %v14544_v24 = vpop.eup %14543  ;;  %10350 = vmatmul.mubr.bf16.gmra.mrb[80].mxu0 %v13491_v19  ;;  %v1963_v31 = vpop.xlane.xlu1 %1962  ;;  %5036 = vperm.xlu1 %13365, %v14542_v26   ;;  %v17317_v4 = vadd.f32 %v2000_v53, %v1999_v29  ;;  %v17319_v49 = vadd.f32 %v1970_v56, %v1969_v50  ;;  %v17322_v30 = vsel %vm1644_vm0, %v1342_v42, 0.0  ;;  %v17330_v12 = vadd.f32 %v1341_v55, %v1340_v9  ;;  %v13503_v53 = vld [vmem:[%s15910_s6 + $0x7a8] ss:$44 sps:$4 sm:$0xff]   ;;  %v13507_v50 = vld [vmem:[%s15910_s6 + $0x804] ss:$44 sps:$4 sm:$0xff]  }
 0x282   : > { %v14546_v15 = vpop.eup %14545  ;;  %v3443_v61 = vadd.f32 1.0, %v14544_v24  ;;  %14559 = vpow2.f32 %v11928_v10  ;;  %v2751_v44 = vadd.f32 %v2577_v38, %v1963_v31  ;;  %10359 = vmatprep.mubr.bf16.mxu0 %v13495_v62  ;;  %v17332_v57 = vadd.f32 %v1320_v52, %v1319_v7  ;;  %v374_v62 = vld [vmem:[%s19594_s1 + $0x348] sm:$0xff]  ;;  %v378_v52 = vld [vmem:[%s19594_s1 + $0x360] sm:$0xff] }
 0x283   : > { %5011 = vperm.xlu0 %13364, %v14546_v15   ;;  %v1975_v5 = vsel %vm1644_vm0, %v1321_v8, 0.0  ;;  %v807_v13 = vunpack.c.l.bf16 %v384_v17  ;;  %v808_v25 = vunpack.c.h.bf16 %v384_v17  ;;  %v809_v39 = vunpack.c.h.bf16 %v17263_v40  ;;  %v392_v40 = vld [vmem:[%s19594_s1 + $0x3b4] sm:$0xff] }
 0x284   : > { %v14548_v54 = vpop.eup %14547  ;;  %14561 = vrcp.f32 %v3443_v61  ;;  %v11834_v21 = vmul.f32 -1.442695, %v2751_v44  ;;  %8947 = vmatmul.mubr.bf16.gmra.mrb[84].mxu1 %v13494_v23  ;;  %v786_v60 = vunpack.c.l.bf16 %v370_v14  ;;  %v787_v22 = vunpack.c.h.bf16 %v370_v14  ;;  %v13506_v42 = vld [vmem:[%s15910_s6 + $0x7e8] ss:$44 sps:$4 sm:$0xff]  }
 0x285   : > { %v14550_v58 = vpop.eup %14549  ;;  %v2443_v59 = vpop.xlane.xlu1 %2442  ;;  %4566 = vperm.xlu1 %13365, %v14548_v54   ;;  %8956 = vmatprep.mubr.bf16.mxu1 %v13498_v2  ;;  %v788_v51 = vunpack.c.l.bf16 %v371_v11  ;;  %v813_v26 = vunpack.c.l.bf16 %v388_v27  ;;  %v814_v10 = vunpack.c.h.bf16 %v388_v27  ;;  %v815_v45 = vunpack.c.h.bf16 %v371_v11 }
 0x286   : > { %v14552_v46 = vpop.eup %14551  ;;  %v3539_v6 = vadd.f32 1.0, %v14550_v58  ;;  %14563 = vpow2.f32 %v11834_v21  ;;  %v2847_v18 = vadd.f32 %v2673_v37, %v2443_v59  ;;  %v792_v31 = vunpack.c.l.bf16 %v374_v62 }
 0x287   : > { %4541 = vperm.xlu0 %13364, %v14552_v46   ;;  %v793_v2 = vunpack.c.h.bf16 %v374_v62  ;;  %v794_v1 = vunpack.c.l.bf16 %v17343_v32  ;;  %v1346_v36 = vmul.f32 %v14849_v33, %v807_v13  ;;  %v819_v15 = vunpack.c.l.bf16 %v392_v40  ;;  %v396_v13 = vld [vmem:[%s19594_s1 + $0x3cc] sm:$0xff]  ;;  %v400_v62 = vld [vmem:[%s19594_s1 + $0x3e4] sm:$0xff] }
 0x288   : > { %v14554_v19 = vpop.eup %14553  ;;  %14565 = vrcp.f32 %v3539_v6  ;;  %v11930_v47 = vmul.f32 -1.442695, %v2847_v18  ;;  %v820_v61 = vunpack.c.h.bf16 %v392_v40  ;;  %v1347_v37 = vmul.f32 %v14851_v34, %v808_v25  ;;  %v382_v25 = vld [vmem:[%s19594_s1 + $0x378] sm:$0xff] }
 0x289   : > { %v14556_v48 = vpop.eup %14555  ;;  %10360 = vmatmul.mubr.bf16.gmra.mrb[84].mxu0 %v13497_v43  ;;  %5046 = vperm.xlu1 %13365, %v14554_v19   ;;  %v1348_v56 = vmul.f32 %v14853_v35, %v809_v39  ;;  %v1325_v9 = vmul.f32 %v14849_v33, %v786_v60  ;;  %v1326_v55 = vmul.f32 %v14851_v34, %v787_v22  ;;  %v17402_v39 = vld [vmem:[%s19594_s1 + $0x380] ss:$108 sps:$4 sm:$0xff]  }
 0x28a   : > { %v14558_v38 = vpop.eup %14557  ;;  %v3445_v23 = vadd.f32 1.0, %v14556_v48  ;;  %14567 = vpow2.f32 %v11930_v47  ;;  %10369 = vmatprep.mubr.bf16.mxu0 %v13501_v20  ;;  %v1327_v54 = vmul.f32 %v14853_v35, %v788_v51  ;;  %v1352_v21 = vmul.f32 %v14849_v33, %v813_v26  ;;  %v379_v47 = vld [vmem:[%s19594_s1 + $0x368] ss:$108 sps:$4 sm:$0xff]  }
 0x28b   : > { %5021 = vperm.xlu0 %13364, %v14558_v38   ;;  %v1353_v7 = vmul.f32 %v14851_v34, %v814_v10  ;;  %v1354_v43 = vmul.f32 %v14853_v35, %v815_v45  ;;  %v1331_v8 = vmul.f32 %v14849_v33, %v792_v31  ;;  %v1332_v46 = vmul.f32 %v14851_v34, %v793_v2  ;;  %v13512_v31 = vld [vmem:[%s15910_s6 + $0x840] ss:$44 sps:$4 sm:$0xff]   ;;  %v13513_v2 = vld [vmem:[%s15910_s6 + $0x85c] ss:$44 sps:$4 sm:$0xff]  }
 0x28c   : > { %v14560_v3 = vpop.eup %14559  ;;  %14569 = vrcp.f32 %v3445_v23  ;;  %8957 = vmatmul.mubr.bf16.gmra.mrb[88].mxu1 %v13500_v16  ;;  %v17348_v24 = vpop.permute.xlu1 %4421  ;;  %v1333_v6 = vmul.f32 %v14853_v35, %v794_v1  ;;  %v13510_v16 = vld [vmem:[%s15910_s6 + $0x844] ss:$44 sps:$4 sm:$0xff]   ;;  %v821_v20 = vunpack.c.h.bf16 %v17343_v32  ;;  %v1358_v17 = vmul.f32 %v14849_v33, %v819_v15 }
 0x28d   : > { %v3541_v29 = vadd.f32 1.0, %v14560_v3  ;;  %8966 = vmatprep.mubr.bf16.mxu1 %v13504_v28  ;;  %v1359_v14 = vmul.f32 %v14851_v34, %v820_v61  ;;  %v17377_v27 = vadd.f32 %v17322_v30, %v17330_v12  ;;  %v17380_v19 = vadd.f32 %v1975_v5, %v17332_v57  ;;  %v13509_v30 = vld [vmem:[%s15910_s6 + $0x800] ss:$44 sps:$4 sm:$0xff]   ;;  %v386_v15 = vld [vmem:[%s19594_s1 + $0x390] sm:$0xff] }
 0x28e   : > { %v14562_v44 = vpop.eup %14561  ;;  %v798_v48 = vunpack.c.l.bf16 %v378_v52  ;;  %v799_v28 = vunpack.c.h.bf16 %v378_v52  ;;  %v17392_v12 = vadd.f32 %v1347_v37, %v1346_v36  ;;  %v17395_v57 = vsel %vm1644_vm0, %v1348_v56, 0.0  ;;  %v387_v61 = vld [vmem:[%s19594_s1 + $0x398] ss:$1020 sps:$4 sm:$0xff]  }
 0x28f   : > { %14571 = vrcp.f32 %v3541_v29  ;;  %4551 = vperm.xlu0 %13364, %v14562_v44   ;;  %v17397_v5 = vadd.f32 %v1326_v55, %v1325_v9  ;;  %v17410_v23 = vsel %vm1644_vm0, %v1327_v54, 0.0  ;;  %v17412_v60 = vadd.f32 %v1353_v7, %v1352_v21  ;;  %v13516_v44 = vld [vmem:[%s15910_s6 + $0x89c] ss:$44 sps:$4 sm:$0xff]   ;;  %v556_v9 = vld [vmem:[%s19594_s1 + $0x78c] sm:$0xff] }
 0x290   : > { %v14564_v58 = vpop.eup %14563  ;;  %v17365_v59 = vpop.permute.xlu1 %4896  ;;  %v17415_v22 = vsel %vm1644_vm0, %v1354_v43, 0.0  ;;  %v17417_v40 = vadd.f32 %v1332_v46, %v1331_v8  ;;  %v17420_v26 = vsel %vm1644_vm0, %v1333_v6, 0.0  ;;  %v1360_v10 = vmul.f32 %v14853_v35, %v821_v20 }
 0x291   : > { %v3447_v18 = vadd.f32 1.0, %v14564_v58  ;;  %10370 = vmatmul.mubr.bf16.gmra.mrb[88].mxu0 %v13503_v53  ;;  %v17423_v45 = vadd.f32 %v1359_v14, %v1358_v17  ;;  %v800_v1 = vunpack.c.l.bf16 %v379_v47  ;;  %v1337_v29 = vmul.f32 %v14849_v33, %v798_v48  ;;  %v390_v48 = vld [vmem:[%s19594_s1 + $0x3a8] sm:$0xff] }
 0x292   : > { %v14566_v11 = vpop.eup %14565  ;;  %10379 = vmatprep.mubr.bf16.mxu0 %v13507_v50  ;;  %v1338_v53 = vmul.f32 %v14851_v34, %v799_v28  ;;  %v825_v36 = vunpack.c.l.bf16 %v396_v13  ;;  %v826_v50 = vunpack.c.h.bf16 %v396_v13  ;;  %v827_v37 = vunpack.c.h.bf16 %v379_v47 }
 0x293   : > { %14573 = vrcp.f32 %v3447_v18  ;;  %5031 = vperm.xlu0 %13364, %v14566_v11   ;;  %v804_v56 = vunpack.c.l.bf16 %v382_v25  ;;  %v806_v54 = vunpack.c.l.bf16 %v17402_v39  ;;  %v831_v21 = vunpack.c.l.bf16 %v400_v62 }
 0x294   : > { %v14568_v32 = vpop.eup %14567  ;;  %8967 = vmatmul.mubr.bf16.gmra.mrb[92].mxu1 %v13506_v42  ;;  %v17407_v38 = vpop.permute.xlu1 %4426  ;;  %v805_v42 = vunpack.c.h.bf16 %v382_v25  ;;  %v832_v7 = vunpack.c.h.bf16 %v400_v62  ;;  %v833_v58 = vunpack.c.h.bf16 %v17402_v39  ;;  %v810_v43 = vunpack.c.l.bf16 %v386_v15 }
 0x295   : > { %v3543_v51 = vadd.f32 1.0, %v14568_v32  ;;  %8976 = vmatprep.mubr.bf16.mxu1 %v13510_v16  ;;  %v811_v8 = vunpack.c.h.bf16 %v386_v15  ;;  %v812_v46 = vunpack.c.l.bf16 %v387_v61  ;;  %v1339_v6 = vmul.f32 %v14853_v35, %v800_v1  ;;  %v13515_v32 = vld [vmem:[%s15910_s6 + $0x858] ss:$44 sps:$4 sm:$0xff]  }
 0x296   : > { %v14570_v3 = vpop.eup %14569  ;;  %v1364_v18 = vmul.f32 %v14849_v33, %v825_v36  ;;  %v1065_v16 = vunpack.c.l.bf16 %v556_v9  ;;  %v1066_v20 = vunpack.c.h.bf16 %v556_v9  ;;  %v1365_v17 = vmul.f32 %v14851_v34, %v826_v50  ;;  %v13518_v36 = vld [vmem:[%s15910_s6 + $0x898] ss:$44 sps:$4 sm:$0xff]  }
 0x297   : > { %14575 = vrcp.f32 %v3543_v51  ;;  %4561 = vperm.xlu0 %13364, %v14570_v3   ;;  %v1366_v14 = vmul.f32 %v14853_v35, %v827_v37  ;;  %v1343_v11 = vmul.f32 %v14849_v33, %v804_v56  ;;  %v1067_v47 = vunpack.c.h.bf16 %v387_v61  ;;  %v13519_v51 = vld [vmem:[%s15910_s6 + $0x8b4] ss:$44 sps:$4 sm:$0xff]   ;;  %v17469_v50 = vld [vmem:[%s19594_s1 + $0x3b0] ss:$84 sps:$4 sm:$0xff]  }
 0x298   : > { %v17439_v55 = vpop.permute.xlu1 %4906  ;;  %v1344_v13 = vmul.f32 %v14851_v34, %v805_v42  ;;  %v1345_v25 = vmul.f32 %v14853_v35, %v806_v54  ;;  %v1371_v39 = vmul.f32 %v14851_v34, %v832_v7  ;;  %v1372_v3 = vmul.f32 %v14853_v35, %v833_v58 }
 0x299   : > { %v14572_v52 = vpop.eup %14571  ;;  %10380 = vmatmul.mubr.bf16.gmra.mrb[92].mxu0 %v13509_v30  ;;  %v1370_v30 = vmul.f32 %v14849_v33, %v831_v21  ;;  %v1351_v1 = vmul.f32 %v14853_v35, %v812_v46  ;;  %v1604_v15 = vmul.f32 %v14849_v33, %v1065_v16  ;;  %v1605_v61 = vmul.f32 %v14851_v34, %v1066_v20  ;;  %v13522_v46 = vld [vmem:[%s15910_s6 + $0x8f4] ss:$44 sps:$4 sm:$0xff]  }
 0x29a   : > { %10389 = vmatprep.mubr.bf16.mxu0 %v13513_v2  ;;  %v1349_v2 = vmul.f32 %v14849_v33, %v810_v43  ;;  %v817_v37 = vunpack.c.h.bf16 %v390_v48  ;;  %v2040_v56 = vsel %vm1644_vm0, %v1360_v10, 0.0  ;;  %v2005_v9 = vsel %vm1644_vm0, %v1339_v6, 0.0 }
 0x29b   : > { %5041 = vperm.xlu0 %13364, %v14572_v52   ;;  %v2050_v42 = vsel %vm1644_vm0, %v1366_v14, 0.0  ;;  %v1606_v54 = vmul.f32 %v14853_v35, %v1067_v47  ;;  %v2004_v7 = vadd.f32 %v1338_v53, %v1337_v29  ;;  %v2049_v52 = vadd.f32 %v1365_v17, %v1364_v18  ;;  %v3972_v14 = vld [vmem:[%s19596_s3 + $0x210] sm:$0xff]  ;;  %v3973_v29 = vld [vmem:[%s19596_s3 + $0x218] sm:$0xff]  ;;  %v3970_v53 = vld [vmem:[%s19596_s3 + $0x200] sm:$0xff] }
 0x29c   : > { %8977 = vmatmul.mubr.bf16.gmra.mrb[96].mxu1 %v13512_v31  ;;  %v17451_v28 = vpop.permute.xlu1 %4436  ;;  %v1350_v31 = vmul.f32 %v14851_v34, %v811_v8  ;;  %v2014_v58 = vadd.f32 %v1344_v13, %v1343_v11  ;;  %v2015_v43 = vsel %vm1644_vm0, %v1345_v25, 0.0  ;;  %v2059_v16 = vadd.f32 %v1371_v39, %v1370_v30  ;;  %v3971_v18 = vld [vmem:[%s19596_s3 + $0x208] sm:$0xff]  ;;  %v404_v13 = vld [vmem:[%s19594_s1 + $0x3fc] sm:$0xff] }
 0x29d   : > { %v14574_v62 = vpop.eup %14573  ;;  %8986 = vmatprep.mubr.bf16.mxu1 %v13516_v44  ;;  %v816_v44 = vunpack.c.l.bf16 %v390_v48  ;;  %v2060_v10 = vsel %vm1644_vm0, %v1372_v3, 0.0  ;;  %v2025_v6 = vsel %vm1644_vm0, %v1351_v1, 0.0  ;;  %v2449_v17 = vadd.f32 %v1605_v61, %v1604_v15  ;;  %v13521_v25 = vld [vmem:[%s15910_s6 + $0x8b0] ss:$44 sps:$4 sm:$0xff]   ;;  %v17519_v3 = vld [vmem:[%s19594_s1 + $0x3c8] ss:$996 sps:$4 sm:$0xff]  }
 0x29e   : > { %v2024_v20 = vadd.f32 %v1350_v31, %v1349_v2  ;;  %v818_v11 = vunpack.c.l.bf16 %v17469_v50  ;;  %v1356_v48 = vmul.f32 %v14851_v34, %v817_v37  ;;  %v17502_v30 = vadd.f32 %v17395_v57, %v17392_v12  ;;  %v13525_v57 = vld [vmem:[%s15910_s6 + $0x90c] ss:$44 sps:$4 sm:$0xff]   ;;  %v560_v37 = vld [vmem:[%s19594_s1 + $0x7a4] sm:$0xff] }
 0x29f   : > { %4571 = vperm.xlu0 %13364, %v14574_v62   ;;  %v1355_v47 = vmul.f32 %v14849_v33, %v816_v44  ;;  %v17506_v39 = vadd.f32 %v17410_v23, %v17397_v5  ;;  %v17510_v62 = vadd.f32 %v17415_v22, %v17412_v60  ;;  %v17526_v5 = vadd.f32 %v17420_v26, %v17417_v40  ;;  %v4162_v40 = vld [vmem:[%s19596_s3 + $0x800] sm:$0xff] }
 0x2a0   : > { %v17475_v21 = vpop.permute.xlu1 %4916  ;;  %v17529_v23 = vadd.f32 %v2040_v56, %v17423_v45  ;;  %v17531_v60 = vadd.f32 %v2005_v9, %v2004_v7  ;;  %v17533_v22 = vadd.f32 %v2050_v42, %v2049_v52  ;;  %v17535_v2 = vadd.f32 %v2015_v43, %v2014_v58  ;;  %v4163_v42 = vld [vmem:[%s19596_s3 + $0x808] sm:$0xff]  ;;  %v4164_v52 = vld [vmem:[%s19596_s3 + $0x810] sm:$0xff]  ;;  %v4165_v58 = vld [vmem:[%s19596_s3 + $0x818] sm:$0xff] }
 0x2a1   : > { %v14576_v8 = vpop.eup %14575  ;;  %10390 = vmatmul.mubr.bf16.gmra.mrb[96].mxu0 %v13515_v32  ;;  %v2450_v32 = vsel %vm1644_vm0, %v1606_v54, 0.0  ;;  %v17537_v31 = vadd.f32 %v2060_v10, %v2059_v16  ;;  %v17539_v1 = vadd.f32 %v2025_v6, %v2024_v20  ;;  %v1357_v45 = vmul.f32 %v14853_v35, %v818_v11  ;;  %v13524_v6 = vld [vmem:[%s15910_s6 + $0x8f0] ss:$44 sps:$4 sm:$0xff]  }
 0x2a2   : > { %10399 = vmatprep.mubr.bf16.mxu0 %v13519_v51  ;;  %v394_v51 = vld [vmem:[%s19594_s1 + $0x3c0] sm:$0xff]  ;;  %v17544_v15 = vadd.f32 %v2450_v32, %v2449_v17  ;;  %v17547_v61 = vadd.f32 %v1356_v48, %v1355_v47  ;;  %v838_v44 = vunpack.c.h.bf16 %v404_v13  ;;  %v5190_v56 = vmul.f32 %v17348_v24, %v3972_v14 }
 0x2a3   : > { %5051 = vperm.xlu0 %13364, %v14576_v8   ;;  %v5191_v9 = vmul.f32 %v17348_v24, %v3973_v29  ;;  %v839_v8 = vunpack.c.h.bf16 %v17469_v50  ;;  %v822_v24 = vunpack.c.l.bf16 %v394_v51  ;;  %v824_v16 = vunpack.c.l.bf16 %v17519_v3 }
 0x2a4   : > { %8987 = vmatmul.mubr.bf16.gmra.mrb[100].mxu1 %v13518_v36  ;;  %v17521_v12 = vpop.permute.xlu1 %4446  ;;  %v837_v36 = vunpack.c.l.bf16 %v404_v13  ;;  %v1071_v14 = vunpack.c.l.bf16 %v560_v37  ;;  %v1072_v29 = vunpack.c.h.bf16 %v560_v37  ;;  %v2035_v17 = vsel %vm1644_vm0, %v1357_v45, 0.0 }
 0x2a5   : > { %8996 = vmatprep.mubr.bf16.mxu1 %v13522_v46  ;;  %v823_v46 = vunpack.c.h.bf16 %v394_v51  ;;  %v1377_v47 = vmul.f32 %v14851_v34, %v838_v44  ;;  %v1073_v50 = vunpack.c.h.bf16 %v17519_v3  ;;  %v5380_v48 = vmul.f32 %v17365_v59, %v4162_v40  ;;  %v17584_v3 = vld [vmem:[%s19594_s1 + $0x3e0] ss:$60 sps:$4 sm:$0xff]  }
 0x2a6   : > { %v4417_v26 = vpop.permute.xlu0 %4416  ;;  %v1376_v11 = vmul.f32 %v14849_v33, %v837_v36  ;;  %v5381_v13 = vmul.f32 %v17365_v59, %v4163_v42  ;;  %v3975_v59 = vld [vmem:[%s19596_s3 + $0x228] sm:$0xff]  ;;  %v3976_v36 = vld [vmem:[%s19596_s3 + $0x230] sm:$0xff]  ;;  %v3977_v40 = vld [vmem:[%s19596_s3 + $0x238] sm:$0xff]  ;;  %v1378_v45 = vmul.f32 %v14853_v35, %v839_v8  ;;  %v1361_v44 = vmul.f32 %v14849_v33, %v822_v24 }
 0x2a7   : > { %v5188_v54 = vmul.f32 %v4417_v26, %v3970_v53  ;;  %v5189_v7 = vmul.f32 %v4417_v26, %v3971_v18  ;;  %v13528_v18 = vld [vmem:[%s15910_s6 + $0x94c] ss:$44 sps:$4 sm:$0xff]   ;;  %v1362_v37 = vmul.f32 %v14851_v34, %v823_v46  ;;  %v1612_v8 = vmul.f32 %v14853_v35, %v1073_v50 }
 0x2a8   : > { %v17563_v43 = vpop.permute.xlu1 %4926  ;;  %v830_v46 = vunpack.c.l.bf16 %v17584_v3 }
 0x2a9   : > { %v5504_v10 = vpack.c.bf16 %v5190_v56, %v5188_v54  ;;  %10400 = vmatmul.mubr.bf16.gmra.mrb[100].mxu0 %v13521_v25  ;;  %v5505_v20 = vpack.c.bf16 %v5191_v9, %v5189_v7  ;;  %v3974_v25 = vld [vmem:[%s19596_s3 + $0x220] sm:$0xff]  ;;  %v1363_v56 = vmul.f32 %v14853_v35, %v824_v16  ;;  %v13527_v54 = vld [vmem:[%s15910_s6 + $0x908] ss:$44 sps:$4 sm:$0xff]   ;;  %v1610_v7 = vmul.f32 %v14849_v33, %v1071_v14 }
 0x2aa   : > { %v4902_v53 = vpop.permute.xlu0 %4901  ;;  %10409 = vmatprep.mubr.bf16.mxu0 %v13525_v57  ;;  %v398_v57 = vld [vmem:[%s19594_s1 + $0x3d8] sm:$0xff]  ;;  %v5192_v16 = vmul.f32 %v17407_v38, %v3974_v25  ;;  %v4166_v14 = vld [vmem:[%s19596_s3 + $0x820] sm:$0xff]  ;;  %v2070_v25 = vsel %vm1644_vm0, %v1378_v45, 0.0  ;;  %v1369_v45 = vmul.f32 %v14853_v35, %v830_v46  ;;  %v845_v46 = vunpack.c.h.bf16 %v17584_v3 }
 0x2ab   : > { %v5382_v32 = vmul.f32 %v4902_v53, %v4164_v52  ;;  %v5383_v51 = vmul.f32 %v4902_v53, %v4165_v58  ;;  %9175 = vmatprep.subr.bf16.mxu1 %v5505_v20  ;;  %v1611_v52 = vmul.f32 %v14851_v34, %v1072_v29  ;;  %v828_v24 = vunpack.c.l.bf16 %v398_v57 }
 0x2ac   : > { %9176 = vmatpush1.bf16.msra.mxu1 %v5504_v10  ;;  %v17595_v26 = vpop.permute.xlu1 %4456  ;;  %v13531_v10 = vld [vmem:[%s15910_s6 + $0x964] ss:$44 sps:$4 sm:$0xff]   ;;  %v829_v20 = vunpack.c.h.bf16 %v398_v57 }
 0x2ad   : > { %v5600_v9 = vpack.c.bf16 %v5382_v32, %v5380_v48  ;;  %8997 = vmatmul.mubr.bf16.gmra.mrb[104].mxu1 %v13524_v6  ;;  %v5601_v42 = vpack.c.bf16 %v5383_v51, %v5381_v13  ;;  %1967 = vadd.xlane.f32.xlu1 %v17299_v0  ;;  %v5193_v6 = vmul.f32 %v17407_v38, %v3975_v59  ;;  %v4167_v0 = vld [vmem:[%s19596_s3 + $0x828] sm:$0xff]  ;;  %v4169_v38 = vld [vmem:[%s19596_s3 + $0x838] sm:$0xff] }
 0x2ae   : > { %v4432_v58 = vpop.permute.xlu0 %4431  ;;  %9006 = vmatprep.mubr.bf16.mxu1 %v13528_v18  ;;  %v4168_v18 = vld [vmem:[%s19596_s3 + $0x830] sm:$0xff]  ;;  %v17625_v48 = vadd.f32 %v2035_v17, %v17547_v61  ;;  %v2069_v13 = vadd.f32 %v1377_v47, %v1376_v11  ;;  %v2044_v32 = vadd.f32 %v1362_v37, %v1361_v44  ;;  %v2460_v17 = vsel %vm1644_vm0, %v1612_v8, 0.0  ;;  %v554_v44 = vld [vmem:[%s19594_s1 + $0x780] sm:$0xff] }
 0x2af   : > { %v5194_v29 = vmul.f32 %v4432_v58, %v3976_v36  ;;  %v5195_v53 = vmul.f32 %v4432_v58, %v3977_v40  ;;  %10588 = vmatprep.subr.bf16.mxu0 %v5601_v42  ;;  %v13530_v59 = vld [vmem:[%s15910_s6 + $0x948] ss:$44 sps:$4 sm:$0xff]   ;;  %v2045_v36 = vsel %vm1644_vm0, %v1363_v56, 0.0  ;;  %v2459_v40 = vadd.f32 %v1611_v52, %v1610_v7  ;;  %v13534_v61 = vld [vmem:[%s15910_s6 + $0x9a4] ss:$44 sps:$4 sm:$0xff]  }
 0x2b0   : > { %10589 = vmatpush1.bf16.msra.mxu0 %v5600_v9  ;;  %v17622_v50 = vpop.permute.xlu1 %4936  ;;  %v408_v9 = vld [vmem:[%s19594_s1 + $0x414] sm:$0xff]  ;;  %v1367_v11 = vmul.f32 %v14849_v33, %v828_v24  ;;  %v1368_v47 = vmul.f32 %v14851_v34, %v829_v20  ;;  %v5384_v37 = vmul.f32 %v17439_v55, %v4166_v14  ;;  %v5385_v56 = vmul.f32 %v17439_v55, %v4167_v0  ;;  %v3979_v52 = vld [vmem:[%s19596_s3 + $0x248] sm:$0xff] }
 0x2b1   : > { %v5506_v51 = vpack.c.bf16 %v5194_v29, %v5192_v16  ;;  %10410 = vmatmul.mubr.bf16.gmra.mrb[104].mxu0 %v13527_v54  ;;  %v5507_v57 = vpack.c.bf16 %v5195_v53, %v5193_v6  ;;  %1982 = vadd.xlane.f32.xlu1 %v17306_v41  ;;  %v3978_v41 = vld [vmem:[%s19596_s3 + $0x240] sm:$0xff]  ;;  %v3980_v58 = vld [vmem:[%s19596_s3 + $0x250] sm:$0xff]  ;;  %v3981_v55 = vld [vmem:[%s19596_s3 + $0x258] sm:$0xff]  ;;  %v17658_v8 = vadd.f32 %v2070_v25, %v2069_v13  ;;  %v843_v24 = vunpack.c.l.bf16 %v408_v9 }
 0x2b2   : > { %v4912_v42 = vpop.permute.xlu0 %4911  ;;  %10419 = vmatprep.mubr.bf16.mxu0 %v13531_v10  ;;  %v844_v20 = vunpack.c.h.bf16 %v408_v9  ;;  %v13533_v14 = vld [vmem:[%s15910_s6 + $0x960] ss:$44 sps:$4 sm:$0xff]   ;;  %v17665_v29 = vld [vmem:[%s19594_s1 + $0x788] ss:$60 sps:$4 sm:$0xff]   ;;  %v1062_v53 = vunpack.c.l.bf16 %v554_v44  ;;  %v1063_v0 = vunpack.c.h.bf16 %v554_v44  ;;  %v17669_v13 = vadd.f32 %v2045_v36, %v2044_v32 }
 0x2b3   : > { %v5386_v54 = vmul.f32 %v4912_v42, %v4168_v18  ;;  %v5387_v7 = vmul.f32 %v4912_v42, %v4169_v38  ;;  %9177 = vmatprep.subr.bf16.mxu1 %v5507_v57  ;;  %v13537_v38 = vld [vmem:[%s15910_s6 + $0x9bc] ss:$44 sps:$4 sm:$0xff]   ;;  %v17671_v25 = vadd.f32 %v2460_v17, %v2459_v40  ;;  %v2054_v3 = vadd.f32 %v1368_v47, %v1367_v11  ;;  %v4170_v9 = vld [vmem:[%s19596_s3 + $0x840] sm:$0xff] }
 0x2b4   : > { %9178 = vmatpush1.bf16.msra.mxu1 %v5506_v51  ;;  %v17656_v10 = vpop.permute.xlu1 %4466  ;;  %v2055_v51 = vsel %vm1644_vm0, %v1369_v45, 0.0  ;;  %v5196_v57 = vmul.f32 %v17451_v28, %v3978_v41  ;;  %v564_v32 = vld [vmem:[%s19594_s1 + $0x7bc] sm:$0xff]  ;;  %v4171_v36 = vld [vmem:[%s19596_s3 + $0x848] sm:$0xff]  ;;  %v1382_v17 = vmul.f32 %v14849_v33, %v843_v24  ;;  %v1383_v11 = vmul.f32 %v14851_v34, %v844_v20 }
 0x2b5   : > { %v5602_v16 = vpack.c.bf16 %v5386_v54, %v5384_v37  ;;  %9007 = vmatmul.mubr.bf16.gmra.mrb[108].mxu1 %v13530_v59  ;;  %v5603_v6 = vpack.c.bf16 %v5387_v7, %v5385_v56  ;;  %1992 = vadd.xlane.f32.xlu1 %v17315_v63  ;;  %v5197_v59 = vmul.f32 %v17451_v28, %v3979_v52  ;;  %v4172_v28 = vld [vmem:[%s19596_s3 + $0x850] sm:$0xff]  ;;  %v4173_v40 = vld [vmem:[%s19596_s3 + $0x858] sm:$0xff]  ;;  %v1064_v45 = vunpack.c.l.bf16 %v17665_v29  ;;  %v13536_v56 = vld [vmem:[%s15910_s6 + $0x9a0] ss:$44 sps:$4 sm:$0xff]  }
 0x2b6   : > { %v4442_v18 = vpop.permute.xlu0 %4441  ;;  %9016 = vmatprep.mubr.bf16.mxu1 %v13534_v61  ;;  %v1384_v47 = vmul.f32 %v14853_v35, %v845_v46  ;;  %v1601_v41 = vmul.f32 %v14849_v33, %v1062_v53  ;;  %v1602_v54 = vmul.f32 %v14851_v34, %v1063_v0  ;;  %v402_v7 = vld [vmem:[%s19594_s1 + $0x3f0] sm:$0xff]  ;;  %v1077_v24 = vunpack.c.l.bf16 %v564_v32 }
 0x2b7   : > { %v5198_v42 = vmul.f32 %v4442_v18, %v3980_v58  ;;  %v5199_v63 = vmul.f32 %v4442_v18, %v3981_v55  ;;  %10590 = vmatprep.subr.bf16.mxu0 %v5603_v6  ;;  %v13540_v58 = vld [vmem:[%s15910_s6 + $0x9fc] ss:$44 sps:$4 sm:$0xff]   ;;  %v17705_v55 = vadd.f32 %v2055_v51, %v2054_v3  ;;  %v1078_v20 = vunpack.c.h.bf16 %v564_v32  ;;  %v3984_v18 = vld [vmem:[%s19596_s3 + $0x270] sm:$0xff] }
 0x2b8   : > { %10591 = vmatpush1.bf16.msra.mxu0 %v5602_v16  ;;  %v17691_v61 = vpop.permute.xlu1 %4946  ;;  %v1079_v46 = vunpack.c.h.bf16 %v17665_v29  ;;  %v17711_v16 = vld [vmem:[%s19594_s1 + $0x3f8] ss:$60 sps:$4 sm:$0xff]   ;;  %v5388_v6 = vmul.f32 %v17475_v21, %v4170_v9  ;;  %v3983_v29 = vld [vmem:[%s19596_s3 + $0x268] sm:$0xff]  ;;  %v2079_v3 = vadd.f32 %v1383_v11, %v1382_v17  ;;  %v1603_v51 = vmul.f32 %v14853_v35, %v1064_v45 }
 0x2b9   : > { %v5508_v44 = vpack.c.bf16 %v5198_v42, %v5196_v57  ;;  %10420 = vmatmul.mubr.bf16.gmra.mrb[108].mxu0 %v13533_v14  ;;  %v5509_v37 = vpack.c.bf16 %v5199_v63, %v5197_v59  ;;  %2002 = vadd.xlane.f32.xlu1 %v17317_v4  ;;  %v5389_v14 = vmul.f32 %v17475_v21, %v4171_v36  ;;  %v3982_v4 = vld [vmem:[%s19596_s3 + $0x260] sm:$0xff]  ;;  %v3985_v21 = vld [vmem:[%s19596_s3 + $0x278] sm:$0xff]  ;;  %v834_v57 = vunpack.c.l.bf16 %v402_v7 }
 0x2ba   : > { %v4922_v52 = vpop.permute.xlu0 %4921  ;;  %10429 = vmatprep.mubr.bf16.mxu0 %v13537_v38  ;;  %v835_v59 = vunpack.c.h.bf16 %v402_v7  ;;  %v13539_v63 = vld [vmem:[%s15910_s6 + $0x9b8] ss:$44 sps:$4 sm:$0xff]   ;;  %v17731_v32 = vadd.f32 %v1602_v54, %v1601_v41  ;;  %v836_v36 = vunpack.c.l.bf16 %v17711_v16  ;;  %v2080_v17 = vsel %vm1644_vm0, %v1384_v47, 0.0  ;;  %v13543_v7 = vld [vmem:[%s15910_s6 + $0xa14] ss:$44 sps:$4 sm:$0xff]   ;;  %v4175_v47 = vld [vmem:[%s19596_s3 + $0x868] sm:$0xff] }
 0x2bb   : > { %v5390_v53 = vmul.f32 %v4922_v52, %v4172_v28  ;;  %v5391_v0 = vmul.f32 %v4922_v52, %v4173_v40  ;;  %9179 = vmatprep.subr.bf16.mxu1 %v5509_v37  ;;  %v412_v28 = vld [vmem:[%s19594_s1 + $0x42c] sm:$0xff]  ;;  %v1616_v11 = vmul.f32 %v14849_v33, %v1077_v24  ;;  %v1617_v45 = vmul.f32 %v14851_v34, %v1078_v20  ;;  %v4174_v41 = vld [vmem:[%s19596_s3 + $0x860] sm:$0xff] }
 0x2bc   : > { %9180 = vmatpush1.bf16.msra.mxu1 %v5508_v44  ;;  %v17727_v38 = vpop.permute.xlu1 %4476  ;;  %v1618_v44 = vmul.f32 %v14853_v35, %v1079_v46  ;;  %v5200_v37 = vmul.f32 %v17521_v12, %v3982_v4  ;;  %v4176_v52 = vld [vmem:[%s19596_s3 + $0x870] sm:$0xff]  ;;  %v1373_v24 = vmul.f32 %v14849_v33, %v834_v57  ;;  %v1374_v20 = vmul.f32 %v14851_v34, %v835_v59 }
 0x2bd   : > { %v5604_v9 = vpack.c.bf16 %v5390_v53, %v5388_v6  ;;  %9017 = vmatmul.mubr.bf16.gmra.mrb[112].mxu1 %v13536_v56  ;;  %v5605_v42 = vpack.c.bf16 %v5391_v0, %v5389_v14  ;;  %2012 = vadd.xlane.f32.xlu1 %v17377_v27  ;;  %v5201_v56 = vmul.f32 %v17521_v12, %v3983_v29  ;;  %v4177_v12 = vld [vmem:[%s19596_s3 + $0x878] sm:$0xff]  ;;  %v849_v46 = vunpack.c.l.bf16 %v412_v28 }
 0x2be   : > { %v4452_v40 = vpop.permute.xlu0 %4451  ;;  %9026 = vmatprep.mubr.bf16.mxu1 %v13540_v58  ;;  %v850_v6 = vunpack.c.h.bf16 %v412_v28  ;;  %v13542_v53 = vld [vmem:[%s15910_s6 + $0x9f8] ss:$44 sps:$4 sm:$0xff]   ;;  %v1375_v0 = vmul.f32 %v14853_v35, %v836_v36  ;;  %v851_v29 = vunpack.c.h.bf16 %v17711_v16  ;;  %v17767_v57 = vadd.f32 %v2080_v17, %v2079_v3  ;;  %v13546_v16 = vld [vmem:[%s15910_s6 + $0xa54] ss:$44 sps:$4 sm:$0xff]  }
 0x2bf   : > { %v5202_v54 = vmul.f32 %v4452_v40, %v3984_v18  ;;  %v5203_v27 = vmul.f32 %v4452_v40, %v3985_v21  ;;  %10592 = vmatprep.subr.bf16.mxu0 %v5605_v42  ;;  %v5392_v18 = vmul.f32 %v17563_v43, %v4174_v41  ;;  %v2469_v59 = vadd.f32 %v1617_v45, %v1616_v11  ;;  %v3986_v42 = vld [vmem:[%s19596_s3 + $0x280] sm:$0xff]  ;;  %v3988_v3 = vld [vmem:[%s19596_s3 + $0x290] sm:$0xff]  ;;  %v3989_v28 = vld [vmem:[%s19596_s3 + $0x298] sm:$0xff] }
 0x2c0   : > { %10593 = vmatpush1.bf16.msra.mxu0 %v5604_v9  ;;  %v17757_v58 = vpop.permute.xlu1 %4956  ;;  %v5393_v9 = vmul.f32 %v17563_v43, %v4175_v47  ;;  %v3987_v43 = vld [vmem:[%s19596_s3 + $0x288] sm:$0xff]  ;;  %v2064_v17 = vadd.f32 %v1374_v20, %v1373_v24  ;;  %v1388_v11 = vmul.f32 %v14849_v33, %v849_v46  ;;  %v1389_v45 = vmul.f32 %v14851_v34, %v850_v6  ;;  %v13545_v41 = vld [vmem:[%s15910_s6 + $0xa10] ss:$44 sps:$4 sm:$0xff]   ;;  %v17809_v20 = vld [vmem:[%s19594_s1 + $0x7d4] sm:$0xff] }
 0x2c1   : > { %v5510_v14 = vpack.c.bf16 %v5202_v54, %v5200_v37  ;;  %10430 = vmatmul.mubr.bf16.gmra.mrb[112].mxu0 %v13539_v63  ;;  %v5511_v4 = vpack.c.bf16 %v5203_v27, %v5201_v56  ;;  %2022 = vadd.xlane.f32.xlu1 %v17502_v30  ;;  %v558_v30 = vld [vmem:[%s19594_s1 + $0x798] sm:$0xff]  ;;  %v2065_v54 = vsel %vm1644_vm0, %v1375_v0, 0.0  ;;  %v1390_v27 = vmul.f32 %v14853_v35, %v851_v29  ;;  %v4178_v6 = vld [vmem:[%s19596_s3 + $0x880] sm:$0xff] }
 0x2c2   : > { %1972 = vadd.xlane.f32.xlu0 %v17319_v49  ;;  %v4932_v21 = vpop.permute.xlu0 %4931  ;;  %10439 = vmatprep.mubr.bf16.mxu0 %v13543_v7  ;;  %v2445_v49 = vsel %vm1644_vm0, %v1603_v51, 0.0  ;;  %v2470_v51 = vsel %vm1644_vm0, %v1618_v44, 0.0  ;;  %v17798_v7 = vld [vmem:[%s19594_s1 + $0x7a0] ss:$60 sps:$4 sm:$0xff]   ;;  %v5204_v44 = vmul.f32 %v17595_v26, %v3986_v42  ;;  %v1069_v24 = vunpack.c.h.bf16 %v558_v30 }
 0x2c3   : > { %v5394_v63 = vmul.f32 %v4932_v21, %v4176_v52  ;;  %v5395_v36 = vmul.f32 %v4932_v21, %v4177_v12  ;;  %9181 = vmatprep.subr.bf16.mxu1 %v5511_v4  ;;  %v17804_v52 = vadd.f32 %v2445_v49, %v17731_v32  ;;  %v1068_v12 = vunpack.c.l.bf16 %v558_v30  ;;  %v4179_v32 = vld [vmem:[%s19596_s3 + $0x888] sm:$0xff]  ;;  %v4180_v4 = vld [vmem:[%s19596_s3 + $0x890] sm:$0xff] }
 0x2c4   : > { %9182 = vmatpush1.bf16.msra.mxu1 %v5510_v14  ;;  %v17787_v40 = vpop.permute.xlu1 %4486  ;;  %v5205_v46 = vmul.f32 %v17595_v26, %v3987_v43  ;;  %v4181_v26 = vld [vmem:[%s19596_s3 + $0x898] sm:$0xff]  ;;  %v17827_v0 = vadd.f32 %v2470_v51, %v2469_v59  ;;  %v17829_v29 = vadd.f32 %v2065_v54, %v2064_v17  ;;  %v1070_v21 = vunpack.c.l.bf16 %v17798_v7  ;;  %v406_v49 = vld [vmem:[%s19594_s1 + $0x408] sm:$0xff]  ;;  %v3990_v51 = vld [vmem:[%s19596_s3 + $0x2a0] sm:$0xff] }
 0x2c5   : > { %v5606_v37 = vpack.c.bf16 %v5394_v63, %v5392_v18  ;;  %9027 = vmatmul.mubr.bf16.gmra.mrb[116].mxu1 %v13542_v53  ;;  %v5607_v56 = vpack.c.bf16 %v5395_v36, %v5393_v9  ;;  %2032 = vadd.xlane.f32.xlu1 %v17510_v62  ;;  %v13549_v62 = vld [vmem:[%s15910_s6 + $0xa6c] ss:$44 sps:$4 sm:$0xff]   ;;  %v2089_v18 = vadd.f32 %v1389_v45, %v1388_v11  ;;  %v13548_v63 = vld [vmem:[%s15910_s6 + $0xa50] ss:$44 sps:$4 sm:$0xff]   ;;  %v2090_v36 = vsel %vm1644_vm0, %v1390_v27, 0.0 }
 0x2c6   : > { %1977 = vadd.xlane.f32.xlu0 %v17380_v19  ;;  %v4462_v47 = vpop.permute.xlu0 %4461  ;;  %9036 = vmatprep.mubr.bf16.mxu1 %v13546_v16  ;;  %v1083_v16 = vunpack.c.l.bf16 %v17809_v20  ;;  %v5396_v59 = vmul.f32 %v17622_v50, %v4178_v6  ;;  %v1607_v43 = vmul.f32 %v14849_v33, %v1068_v12  ;;  %v13552_v45 = vld [vmem:[%s15910_s6 + $0xaac] ss:$44 sps:$4 sm:$0xff]   ;;  %v1609_v54 = vmul.f32 %v14853_v35, %v1070_v21 }
 0x2c7   : > { %v5206_v19 = vmul.f32 %v4462_v47, %v3988_v3  ;;  %v5207_v14 = vmul.f32 %v4462_v47, %v3989_v28  ;;  %10594 = vmatprep.subr.bf16.mxu0 %v5607_v56  ;;  %v1608_v3 = vmul.f32 %v14851_v34, %v1069_v24  ;;  %v5397_v28 = vmul.f32 %v17622_v50, %v4179_v32  ;;  %v3992_v50 = vld [vmem:[%s19596_s3 + $0x2b0] sm:$0xff] }
 0x2c8   : > { %10595 = vmatpush1.bf16.msra.mxu0 %v5606_v37  ;;  %v17825_v53 = vpop.permute.xlu1 %4966  ;;  %v3993_v37 = vld [vmem:[%s19596_s3 + $0x2b8] sm:$0xff]  ;;  %v1084_v27 = vunpack.c.h.bf16 %v17809_v20  ;;  %v13551_v24 = vld [vmem:[%s15910_s6 + $0xa68] ss:$44 sps:$4 sm:$0xff]   ;;  %v407_v6 = vld [vmem:[%s19594_s1 + $0x410] ss:$60 sps:$4 sm:$0xff]  }
 0x2c9   : > { %v5512_v9 = vpack.c.bf16 %v5206_v19, %v5204_v44  ;;  %10440 = vmatmul.mubr.bf16.gmra.mrb[116].mxu0 %v13545_v41  ;;  %v5513_v42 = vpack.c.bf16 %v5207_v14, %v5205_v46  ;;  %2042 = vadd.xlane.f32.xlu1 %v17529_v23  ;;  %v3991_v23 = vld [vmem:[%s19596_s3 + $0x2a8] sm:$0xff]  ;;  %v17862_v41 = vadd.f32 %v2090_v36, %v2089_v18  ;;  %v840_v44 = vunpack.c.l.bf16 %v406_v49  ;;  %v4182_v18 = vld [vmem:[%s19596_s3 + $0x8a0] sm:$0xff] }
 0x2ca   : > { %1987 = vadd.xlane.f32.xlu0 %v17506_v39  ;;  %v4942_v30 = vpop.permute.xlu0 %4941  ;;  %10449 = vmatprep.mubr.bf16.mxu0 %v13549_v62  ;;  %v416_v39 = vld [vmem:[%s19594_s1 + $0x444] sm:$0xff]  ;;  %v1622_v46 = vmul.f32 %v14849_v33, %v1083_v16  ;;  %v841_v19 = vunpack.c.h.bf16 %v406_v49  ;;  %v5208_v14 = vmul.f32 %v17656_v10, %v3990_v51  ;;  %v2454_v20 = vadd.f32 %v1608_v3, %v1607_v43 }
 0x2cb   : > { %v5398_v17 = vmul.f32 %v4942_v30, %v4180_v4  ;;  %v5399_v11 = vmul.f32 %v4942_v30, %v4181_v26  ;;  %9183 = vmatprep.subr.bf16.mxu1 %v5513_v42  ;;  %v855_v32 = vunpack.c.l.bf16 %v416_v39  ;;  %v856_v4 = vunpack.c.h.bf16 %v416_v39  ;;  %v13555_v42 = vld [vmem:[%s15910_s6 + $0xac4] ss:$44 sps:$4 sm:$0xff]   ;;  %v13554_v3 = vld [vmem:[%s15910_s6 + $0xaa8] ss:$44 sps:$4 sm:$0xff]  }
 0x2cc   : > { %9184 = vmatpush1.bf16.msra.mxu1 %v5512_v9  ;;  %v17860_v56 = vpop.permute.xlu1 %4496  ;;  %v5209_v26 = vmul.f32 %v17656_v10, %v3991_v23  ;;  %v4184_v10 = vld [vmem:[%s19596_s3 + $0x8b0] sm:$0xff]  ;;  %v2455_v16 = vsel %vm1644_vm0, %v1609_v54, 0.0  ;;  %v1623_v49 = vmul.f32 %v14851_v34, %v1084_v27  ;;  %v857_v51 = vunpack.c.h.bf16 %v407_v6 }
 0x2cd   : > { %v5608_v47 = vpack.c.bf16 %v5398_v17, %v5396_v59  ;;  %9037 = vmatmul.mubr.bf16.gmra.mrb[120].mxu1 %v13548_v63  ;;  %v5609_v12 = vpack.c.bf16 %v5399_v11, %v5397_v28  ;;  %2052 = vadd.xlane.f32.xlu1 %v17533_v22  ;;  %v4183_v22 = vld [vmem:[%s19596_s3 + $0x8a8] sm:$0xff]  ;;  %v4185_v63 = vld [vmem:[%s19596_s3 + $0x8b8] sm:$0xff]  ;;  %v1379_v59 = vmul.f32 %v14849_v33, %v840_v44  ;;  %v13558_v27 = vld [vmem:[%s15910_s6 + $0xb04] ss:$44 sps:$4 sm:$0xff]  }
 0x2ce   : > { %1997 = vadd.xlane.f32.xlu0 %v17526_v5  ;;  %v4472_v62 = vpop.permute.xlu0 %4471  ;;  %9046 = vmatprep.mubr.bf16.mxu1 %v13552_v45  ;;  %v1085_v5 = vunpack.c.h.bf16 %v17798_v7  ;;  %v842_v7 = vunpack.c.l.bf16 %v407_v6  ;;  %v1380_v28 = vmul.f32 %v14851_v34, %v841_v19  ;;  %v5400_v17 = vmul.f32 %v17691_v61, %v4182_v18  ;;  %v3997_v44 = vld [vmem:[%s19596_s3 + $0x2d8] sm:$0xff] }
 0x2cf   : > { %v5210_v21 = vmul.f32 %v4472_v62, %v3992_v50  ;;  %v5211_v9 = vmul.f32 %v4472_v62, %v3993_v37  ;;  %10596 = vmatprep.subr.bf16.mxu0 %v5609_v12  ;;  %v1394_v45 = vmul.f32 %v14849_v33, %v855_v32  ;;  %v1395_v39 = vmul.f32 %v14851_v34, %v856_v4  ;;  %v3994_v50 = vld [vmem:[%s19596_s3 + $0x2c0] sm:$0xff] }
 0x2d0   : > { %10597 = vmatpush1.bf16.msra.mxu0 %v5608_v47  ;;  %v17889_v36 = vpop.permute.xlu1 %4976  ;;  %v5401_v23 = vmul.f32 %v17691_v61, %v4183_v22  ;;  %v3996_v61 = vld [vmem:[%s19596_s3 + $0x2d0] sm:$0xff]  ;;  %v17920_v12 = vadd.f32 %v2455_v16, %v2454_v20  ;;  %v17923_v6 = vadd.f32 %v1623_v49, %v1622_v46  ;;  %v17926_v19 = vmul.f32 %v14853_v35, %v842_v7  ;;  %v13557_v32 = vld [vmem:[%s15910_s6 + $0xac0] ss:$44 sps:$4 sm:$0xff]  }
 0x2d1   : > { %v5514_v30 = vpack.c.bf16 %v5210_v21, %v5208_v14  ;;  %10450 = vmatmul.mubr.bf16.gmra.mrb[120].mxu0 %v13551_v24  ;;  %v5515_v43 = vpack.c.bf16 %v5211_v9, %v5209_v26  ;;  %2062 = vadd.xlane.f32.xlu1 %v17537_v31  ;;  %v3995_v31 = vld [vmem:[%s19596_s3 + $0x2c8] sm:$0xff]  ;;  %v1624_v24 = vmul.f32 %v14853_v35, %v1085_v5  ;;  %v563_v20 = vld [vmem:[%s19594_s1 + $0x7b8] ss:$60 sps:$4 sm:$0xff]   ;;  %v410_v22 = vld [vmem:[%s19594_s1 + $0x420] sm:$0xff] }
 0x2d2   : > { %2007 = vadd.xlane.f32.xlu0 %v17531_v60  ;;  %v4952_v11 = vpop.permute.xlu0 %4951  ;;  %10459 = vmatprep.mubr.bf16.mxu0 %v13555_v42  ;;  %v562_v60 = vld [vmem:[%s19594_s1 + $0x7b0] sm:$0xff]  ;;  %v17929_v4 = vadd.f32 %v1380_v28, %v1379_v59  ;;  %v17932_v26 = vmul.f32 %v14853_v35, %v857_v51  ;;  %v5212_v18 = vmul.f32 %v17727_v38, %v3994_v50  ;;  %v4187_v7 = vld [vmem:[%s19596_s3 + $0x8c8] sm:$0xff]  ;;  %v4189_v59 = vld [vmem:[%s19596_s3 + $0x8d8] sm:$0xff]  ;;  %v1091_v51 = vunpack.c.h.bf16 %v563_v20 }
 0x2d3   : > { %v5402_v37 = vmul.f32 %v4952_v11, %v4184_v10  ;;  %v5403_v54 = vmul.f32 %v4952_v11, %v4185_v63  ;;  %9185 = vmatprep.subr.bf16.mxu1 %v5515_v43  ;;  %v572_v46 = vld [vmem:[%s19594_s1 + $0x7ec] sm:$0xff]  ;;  %v17943_v9 = vadd.f32 %v1395_v39, %v1394_v45  ;;  %v1074_v42 = vunpack.c.l.bf16 %v562_v60  ;;  %v4186_v63 = vld [vmem:[%s19596_s3 + $0x8c0] sm:$0xff] }
 0x2d4   : > { %9186 = vmatpush1.bf16.msra.mxu1 %v5514_v30  ;;  %v17918_v47 = vpop.permute.xlu1 %4506  ;;  %v1075_v5 = vunpack.c.h.bf16 %v562_v60  ;;  %v5213_v10 = vmul.f32 %v17727_v38, %v3995_v31  ;;  %v4188_v38 = vld [vmem:[%s19596_s3 + $0x8d0] sm:$0xff]  ;;  %v1076_v43 = vunpack.c.l.bf16 %v563_v20  ;;  %v1090_v28 = vunpack.c.h.bf16 %v572_v46  ;;  %v13560_v45 = vld [vmem:[%s15910_s6 + $0xb00] ss:$44 sps:$4 sm:$0xff]   ;;  %v4001_v20 = vld [vmem:[%s19596_s3 + $0x2f8] sm:$0xff] }
 0x2d5   : > { %v5610_v14 = vpack.c.bf16 %v5402_v37, %v5400_v17  ;;  %9047 = vmatmul.mubr.bf16.gmra.mrb[124].mxu1 %v13554_v3  ;;  %v5611_v62 = vpack.c.bf16 %v5403_v54, %v5401_v23  ;;  %2452 = vadd.xlane.f32.xlu1 %v17544_v15  ;;  %v17956_v15 = vld [vmem:[%s19594_s1 + $0x428] ss:$60 sps:$4 sm:$0xff]   ;;  %v1089_v3 = vunpack.c.l.bf16 %v572_v46  ;;  %v846_v39 = vunpack.c.l.bf16 %v410_v22 }
 0x2d6   : > { %2017 = vadd.xlane.f32.xlu0 %v17535_v2  ;;  %v4482_v21 = vpop.permute.xlu0 %4481  ;;  %9056 = vmatprep.mubr.bf16.mxu1 %v13558_v27  ;;  %v13561_v2 = vld [vmem:[%s15910_s6 + $0xb1c] ss:$44 sps:$4 sm:$0xff]   ;;  %v847_v23 = vunpack.c.h.bf16 %v410_v22  ;;  %v5404_v50 = vmul.f32 %v17757_v58, %v4186_v63  ;;  %v1613_v54 = vmul.f32 %v14849_v33, %v1074_v42  ;;  %v1614_v27 = vmul.f32 %v14851_v34, %v1075_v5  ;;  %v13563_v22 = vld [vmem:[%s15910_s6 + $0xb18] ss:$44 sps:$4 sm:$0xff]  }
 0x2d7   : > { %v5214_v16 = vmul.f32 %v4482_v21, %v3996_v61  ;;  %v5215_v49 = vmul.f32 %v4482_v21, %v3997_v44  ;;  %10598 = vmatprep.subr.bf16.mxu0 %v5611_v62  ;;  %v848_v60 = vunpack.c.l.bf16 %v17956_v15  ;;  %v5405_v31 = vmul.f32 %v17757_v58, %v4187_v7  ;;  %v3998_v61 = vld [vmem:[%s19596_s3 + $0x2e0] sm:$0xff]  ;;  %v3999_v58 = vld [vmem:[%s19596_s3 + $0x2e8] sm:$0xff] }
 0x2d8   : > { %10599 = vmatpush1.bf16.msra.mxu0 %v5610_v14  ;;  %v17967_v30 = vpop.permute.xlu1 %4986  ;;  %v420_v62 = vld [vmem:[%s19594_s1 + $0x45c] sm:$0xff]  ;;  %v1628_v46 = vmul.f32 %v14849_v33, %v1089_v3  ;;  %v1630_v21 = vmul.f32 %v14853_v35, %v1091_v51  ;;  %v1386_v63 = vmul.f32 %v14851_v34, %v847_v23 }
 0x2d9   : > { %v5516_v17 = vpack.c.bf16 %v5214_v16, %v5212_v18  ;;  %10460 = vmatmul.mubr.bf16.gmra.mrb[124].mxu0 %v13557_v32  ;;  %v5517_v11 = vpack.c.bf16 %v5215_v49, %v5213_v10  ;;  %2072 = vadd.xlane.f32.xlu1 %v17658_v8  ;;  %v17982_v8 = vsel %vm1644_vm0, %v1624_v24, 0.0  ;;  %v4000_v32 = vld [vmem:[%s19596_s3 + $0x2f0] sm:$0xff]  ;;  %v1615_v24 = vmul.f32 %v14853_v35, %v1076_v43  ;;  %v4190_v3 = vld [vmem:[%s19596_s3 + $0x8e0] sm:$0xff] }
 0x2da   : > { %2027 = vadd.xlane.f32.xlu0 %v17539_v1  ;;  %v4962_v37 = vpop.permute.xlu0 %4961  ;;  %10469 = vmatprep.mubr.bf16.mxu0 %v13561_v2  ;;  %v13564_v1 = vld [vmem:[%s15910_s6 + $0xb5c] ss:$44 sps:$4 sm:$0xff]   ;;  %v1629_v18 = vmul.f32 %v14851_v34, %v1090_v28  ;;  %v1385_v10 = vmul.f32 %v14849_v33, %v846_v39  ;;  %v5216_v16 = vmul.f32 %v17787_v40, %v3998_v61  ;;  %v863_v61 = vunpack.c.h.bf16 %v17956_v15 }
 0x2db   : > { %v5406_v44 = vmul.f32 %v4962_v37, %v4188_v38  ;;  %v5407_v14 = vmul.f32 %v4962_v37, %v4189_v59  ;;  %9187 = vmatprep.subr.bf16.mxu1 %v5517_v11  ;;  %v1387_v7 = vmul.f32 %v14853_v35, %v848_v60  ;;  %v861_v38 = vunpack.c.l.bf16 %v420_v62  ;;  %v4193_v11 = vld [vmem:[%s19596_s3 + $0x8f8] sm:$0xff] }
 0x2dc   : > { %9188 = vmatpush1.bf16.msra.mxu1 %v5516_v17  ;;  %v18005_v2 = vpop.permute.xlu1 %4516  ;;  %v862_v59 = vunpack.c.h.bf16 %v420_v62  ;;  %v5217_v43 = vmul.f32 %v17787_v40, %v3999_v58  ;;  %v2075_v17 = vsel %vm1644_vm0, %v17926_v19, 0.0  ;;  %v4192_v40 = vld [vmem:[%s19596_s3 + $0x8f0] sm:$0xff]  ;;  %v2464_v39 = vadd.f32 %v1614_v27, %v1613_v54  ;;  %v13566_v60 = vld [vmem:[%s15910_s6 + $0xb58] ss:$44 sps:$4 sm:$0xff]  }
 0x2dd   : > { %v5612_v42 = vpack.c.bf16 %v5406_v44, %v5404_v50  ;;  %9057 = vmatmul.mubr.bf16.gmra.mrb[128].mxu1 %v13560_v45  ;;  %v5613_v5 = vpack.c.bf16 %v5407_v14, %v5405_v31  ;;  %2462 = vadd.xlane.f32.xlu1 %v17671_v25  ;;  %v4191_v25 = vld [vmem:[%s19596_s3 + $0x8e8] sm:$0xff]  ;;  %v2100_v45 = vsel %vm1644_vm0, %v17932_v26, 0.0  ;;  %v2465_v23 = vsel %vm1644_vm0, %v1615_v24, 0.0  ;;  %v4002_v62 = vld [vmem:[%s19596_s3 + $0x300] sm:$0xff]  ;;  %v4004_v24 = vld [vmem:[%s19596_s3 + $0x310] sm:$0xff] }
 0x2de   : > { %2037 = vadd.xlane.f32.xlu0 %v17625_v48  ;;  %v4492_v49 = vpop.permute.xlu0 %4491  ;;  %9066 = vmatprep.mubr.bf16.mxu1 %v13564_v1  ;;  %v13567_v48 = vld [vmem:[%s15910_s6 + $0xb74] ss:$44 sps:$4 sm:$0xff]   ;;  %v2489_v19 = vadd.f32 %v1629_v18, %v1628_v46  ;;  %v2084_v31 = vadd.f32 %v1386_v63, %v1385_v10  ;;  %v5408_v44 = vmul.f32 %v17825_v53, %v4190_v3  ;;  %v2490_v26 = vsel %vm1644_vm0, %v1630_v21, 0.0  ;;  %v4005_v46 = vld [vmem:[%s19596_s3 + $0x318] sm:$0xff] }
 0x2df   : > { %v5218_v28 = vmul.f32 %v4492_v49, %v4000_v32  ;;  %v5219_v51 = vmul.f32 %v4492_v49, %v4001_v20  ;;  %10600 = vmatprep.subr.bf16.mxu0 %v5613_v5  ;;  %v1400_v54 = vmul.f32 %v14849_v33, %v861_v38  ;;  %v1401_v27 = vmul.f32 %v14851_v34, %v862_v59  ;;  %v18045_v32 = vld [vmem:[%s19594_s1 + $0x804] sm:$0xff]  ;;  %v13569_v63 = vld [vmem:[%s15910_s6 + $0xb70] ss:$44 sps:$4 sm:$0xff]  }
 0x2e0   : > { %10601 = vmatpush1.bf16.msra.mxu0 %v5612_v42  ;;  %v5409_v1 = vmul.f32 %v17825_v53, %v4191_v25  ;;  %v4003_v53 = vld [vmem:[%s19596_s3 + $0x308] sm:$0xff]  ;;  %v18050_v20 = vpop.permute.xlu1 %4996  ;;  %v18060_v18 = vadd.f32 %v17982_v8, %v17923_v6  ;;  %v18063_v21 = vadd.f32 %v2075_v17, %v17929_v4  ;;  %v18066_v42 = vadd.f32 %v2100_v45, %v17943_v9  ;;  %v4197_v25 = vld [vmem:[%s19596_s3 + $0x918] sm:$0xff] }
 0x2e1   : > { %v5518_v50 = vpack.c.bf16 %v5218_v28, %v5216_v16  ;;  %10470 = vmatmul.mubr.bf16.gmra.mrb[128].mxu0 %v13563_v22  ;;  %v5519_v37 = vpack.c.bf16 %v5219_v51, %v5217_v43  ;;  %2082 = vadd.xlane.f32.xlu1 %v17767_v57  ;;  %v2085_v57 = vsel %vm1644_vm0, %v1387_v7, 0.0  ;;  %v18068_v5 = vadd.f32 %v2465_v23, %v2464_v39  ;;  %v577_v6 = vld [vmem:[%s19594_s1 + $0x7d0] ss:$60 sps:$4 sm:$0xff]   ;;  %v424_v43 = vld [vmem:[%s19594_s1 + $0x474] sm:$0xff]  ;;  %v4194_v28 = vld [vmem:[%s19596_s3 + $0x900] sm:$0xff] }
 0x2e2   : > { %2047 = vadd.xlane.f32.xlu0 %v17669_v13  ;;  %v4972_v14 = vpop.permute.xlu0 %4971  ;;  %10479 = vmatprep.mubr.bf16.mxu0 %v13567_v48  ;;  %v13570_v13 = vld [vmem:[%s15910_s6 + $0xbb4] ss:$44 sps:$4 sm:$0xff]   ;;  %v18071_v16 = vadd.f32 %v2490_v26, %v2489_v19  ;;  %v1402_v49 = vmul.f32 %v14853_v35, %v863_v61  ;;  %v566_v4 = vld [vmem:[%s19594_s1 + $0x7c8] sm:$0xff]  ;;  %v5220_v9 = vmul.f32 %v17860_v56, %v4002_v62  ;;  %v1095_v59 = vunpack.c.l.bf16 %v18045_v32 }
 0x2e3   : > { %v5410_v15 = vmul.f32 %v4972_v14, %v4192_v40  ;;  %v5411_v58 = vmul.f32 %v4972_v14, %v4193_v11  ;;  %9189 = vmatprep.subr.bf16.mxu1 %v5519_v37  ;;  %v18083_v7 = vadd.f32 %v2085_v57, %v2084_v31  ;;  %v18085_v38 = vadd.f32 %v1401_v27, %v1400_v54  ;;  %v18099_v48 = vld [vmem:[%s19594_s1 + $0x440] ss:$60 sps:$4 sm:$0xff]   ;;  %v4195_v17 = vld [vmem:[%s19596_s3 + $0x908] sm:$0xff] }
 0x2e4   : > { %9190 = vmatpush1.bf16.msra.mxu1 %v5518_v50  ;;  %v5221_v3 = vmul.f32 %v17860_v56, %v4003_v53  ;;  %v4196_v56 = vld [vmem:[%s19596_s3 + $0x910] sm:$0xff]  ;;  %v1096_v40 = vunpack.c.h.bf16 %v18045_v32  ;;  %v1097_v11 = vunpack.c.h.bf16 %v577_v6  ;;  %v1080_v45 = vunpack.c.l.bf16 %v566_v4  ;;  %v18113_v61 = vpop.permute.xlu1 %4526 }
 0x2e5   : > { %v5614_v22 = vpack.c.bf16 %v5410_v15, %v5408_v44  ;;  %9067 = vmatmul.mubr.bf16.gmra.mrb[132].mxu1 %v13566_v60  ;;  %v5615_v10 = vpack.c.bf16 %v5411_v58, %v5409_v1  ;;  %2472 = vadd.xlane.f32.xlu1 %v17827_v0  ;;  %v13573_v0 = vld [vmem:[%s15910_s6 + $0xbcc] ss:$44 sps:$4 sm:$0xff]   ;;  %v1081_v39 = vunpack.c.h.bf16 %v566_v4  ;;  %v13572_v50 = vld [vmem:[%s15910_s6 + $0xbb0] ss:$44 sps:$4 sm:$0xff]   ;;  %v1082_v37 = vunpack.c.l.bf16 %v577_v6  ;;  %v4006_v1 = vld [vmem:[%s19596_s3 + $0x320] sm:$0xff] }
 0x2e6   : > { %2057 = vadd.xlane.f32.xlu0 %v17705_v55  ;;  %v4502_v8 = vpop.permute.xlu0 %4501  ;;  %9076 = vmatprep.mubr.bf16.mxu1 %v13570_v13  ;;  %v867_v60 = vunpack.c.l.bf16 %v424_v43  ;;  %v5412_v31 = vmul.f32 %v17889_v36, %v4194_v28  ;;  %v1634_v14 = vmul.f32 %v14849_v33, %v1095_v59  ;;  %v868_v26 = vunpack.c.h.bf16 %v424_v43  ;;  %v4009_v13 = vld [vmem:[%s19596_s3 + $0x338] sm:$0xff] }
 0x2e7   : > { %v5222_v55 = vmul.f32 %v4502_v8, %v4004_v24  ;;  %v5223_v51 = vmul.f32 %v4502_v8, %v4005_v46  ;;  %10602 = vmatprep.subr.bf16.mxu0 %v5615_v10  ;;  %v869_v54 = vunpack.c.h.bf16 %v18099_v48  ;;  %v5413_v27 = vmul.f32 %v17889_v36, %v4195_v17  ;;  %v4008_v36 = vld [vmem:[%s19596_s3 + $0x330] sm:$0xff]  ;;  %v414_v6 = vld [vmem:[%s19594_s1 + $0x438] sm:$0xff] }
 0x2e8   : > { %10603 = vmatpush1.bf16.msra.mxu0 %v5614_v22  ;;  %v2110_v58 = vsel %vm1644_vm0, %v1402_v49, 0.0  ;;  %v1635_v57 = vmul.f32 %v14851_v34, %v1096_v40  ;;  %v1636_v32 = vmul.f32 %v14853_v35, %v1097_v11  ;;  %v1619_v53 = vmul.f32 %v14849_v33, %v1080_v45  ;;  %v13575_v10 = vld [vmem:[%s15910_s6 + $0xbc8] ss:$44 sps:$4 sm:$0xff]  }
 0x2e9   : > { %v5520_v23 = vpack.c.bf16 %v5222_v55, %v5220_v9  ;;  %10480 = vmatmul.mubr.bf16.gmra.mrb[132].mxu0 %v13569_v63  ;;  %v5521_v19 = vpack.c.bf16 %v5223_v51, %v5221_v3  ;;  %2092 = vadd.xlane.f32.xlu1 %v17862_v41  ;;  %v4007_v41 = vld [vmem:[%s19596_s3 + $0x328] sm:$0xff]  ;;  %v1620_v24 = vmul.f32 %v14851_v34, %v1081_v39  ;;  %v4198_v3 = vld [vmem:[%s19596_s3 + $0x920] sm:$0xff]  ;;  %v853_v40 = vunpack.c.h.bf16 %v414_v6 }
 0x2ea   : > { %2447 = vadd.xlane.f32.xlu0 %v17804_v52  ;;  %v4982_v44 = vpop.permute.xlu0 %4981  ;;  %10489 = vmatprep.mubr.bf16.mxu0 %v13573_v0  ;;  %v13576_v52 = vld [vmem:[%s15910_s6 + $0xc0c] ss:$44 sps:$4 sm:$0xff]   ;;  %v1621_v63 = vmul.f32 %v14853_v35, %v1082_v37  ;;  %v1406_v49 = vmul.f32 %v14849_v33, %v867_v60  ;;  %v5224_v4 = vmul.f32 %v17918_v47, %v4006_v1  ;;  %v13579_v51 = vld [vmem:[%s15910_s6 + $0xc24] ss:$44 sps:$4 sm:$0xff]   ;;  %v13578_v39 = vld [vmem:[%s15910_s6 + $0xc08] ss:$44 sps:$4 sm:$0xff]  }
 0x2eb   : > { %v5414_v62 = vmul.f32 %v4982_v44, %v4196_v56  ;;  %v5415_v15 = vmul.f32 %v4982_v44, %v4197_v25  ;;  %9191 = vmatprep.subr.bf16.mxu1 %v5521_v19  ;;  %v1407_v8 = vmul.f32 %v14851_v34, %v868_v26  ;;  %v1408_v59 = vmul.f32 %v14853_v35, %v869_v54  ;;  %v4201_v0 = vld [vmem:[%s19596_s3 + $0x938] sm:$0xff]  ;;  %v4010_v26 = vld [vmem:[%s19596_s3 + $0x340] sm:$0xff] }
 0x2ec   : > { %9192 = vmatpush1.bf16.msra.mxu1 %v5520_v23  ;;  %v5225_v43 = vmul.f32 %v17918_v47, %v4007_v41  ;;  %v4200_v47 = vld [vmem:[%s19596_s3 + $0x930] sm:$0xff]  ;;  %v18166_v17 = vadd.f32 %v2110_v58, %v18085_v38  ;;  %v2499_v56 = vadd.f32 %v1635_v57, %v1634_v14  ;;  %v852_v25 = vunpack.c.l.bf16 %v414_v6  ;;  %v13581_v57 = vld [vmem:[%s15910_s6 + $0xc20] ss:$44 sps:$4 sm:$0xff]  }
 0x2ed   : > { %v5616_v46 = vpack.c.bf16 %v5414_v62, %v5412_v31  ;;  %9077 = vmatmul.mubr.bf16.gmra.mrb[136].mxu1 %v13572_v50  ;;  %v5617_v22 = vpack.c.bf16 %v5415_v15, %v5413_v27  ;;  %2482 = vadd.xlane.f32.xlu1 %v18060_v18  ;;  %v18157_v18 = vpop.permute.xlu1 %5006  ;;  %v2500_v23 = vsel %vm1644_vm0, %v1636_v32, 0.0  ;;  %v2474_v19 = vadd.f32 %v1620_v24, %v1619_v53  ;;  %v580_v50 = vld [vmem:[%s19594_s1 + $0x81c] sm:$0xff] }
 0x2ee   : > { %2067 = vadd.xlane.f32.xlu0 %v17829_v29  ;;  %v4512_v9 = vpop.permute.xlu0 %4511  ;;  %9086 = vmatprep.mubr.bf16.mxu1 %v13576_v52  ;;  %v4199_v29 = vld [vmem:[%s19596_s3 + $0x928] sm:$0xff]  ;;  %v5416_v37 = vmul.f32 %v17967_v30, %v4198_v3  ;;  %v2475_v60 = vsel %vm1644_vm0, %v1621_v63, 0.0  ;;  %v2119_v31 = vadd.f32 %v1407_v8, %v1406_v49  ;;  %v854_v44 = vunpack.c.l.bf16 %v18099_v48  ;;  %v4012_v48 = vld [vmem:[%s19596_s3 + $0x350] sm:$0xff]  ;;  %v4013_v62 = vld [vmem:[%s19596_s3 + $0x358] sm:$0xff] }
 0x2ef   : > { %v5226_v28 = vmul.f32 %v4512_v9, %v4008_v36  ;;  %v5227_v55 = vmul.f32 %v4512_v9, %v4009_v13  ;;  %10604 = vmatprep.subr.bf16.mxu0 %v5617_v22  ;;  %v5417_v14 = vmul.f32 %v17967_v30, %v4199_v29  ;;  %v2120_v1 = vsel %vm1644_vm0, %v1408_v59, 0.0  ;;  %v4011_v30 = vld [vmem:[%s19596_s3 + $0x348] sm:$0xff]  ;;  %v570_v24 = vld [vmem:[%s19594_s1 + $0x7e0] sm:$0xff]  ;;  %v4205_v3 = vld [vmem:[%s19596_s3 + $0x958] sm:$0xff] }
 0x2f0   : > { %10605 = vmatpush1.bf16.msra.mxu0 %v5616_v46  ;;  %v1391_v15 = vmul.f32 %v14849_v33, %v852_v25  ;;  %v1392_v52 = vmul.f32 %v14851_v34, %v853_v40  ;;  %v1101_v58 = vunpack.c.l.bf16 %v580_v50  ;;  %v1102_v41 = vunpack.c.h.bf16 %v580_v50  ;;  %v4202_v9 = vld [vmem:[%s19596_s3 + $0x940] sm:$0xff] }
 0x2f1   : > { %v5522_v11 = vpack.c.bf16 %v5226_v28, %v5224_v4  ;;  %10490 = vmatmul.mubr.bf16.gmra.mrb[136].mxu0 %v13575_v10  ;;  %v5523_v45 = vpack.c.bf16 %v5227_v55, %v5225_v43  ;;  %2102 = vadd.xlane.f32.xlu1 %v18066_v42  ;;  %v18187_v42 = vld [vmem:[%s19594_s1 + $0x7e8] ss:$60 sps:$4 sm:$0xff]   ;;  %v18201_v32 = vadd.f32 %v2500_v23, %v2499_v56  ;;  %v18209_v22 = vpop.permute.xlu1 %4536  ;;  %v1086_v29 = vunpack.c.l.bf16 %v570_v24  ;;  %v13584_v56 = vld [vmem:[%s15910_s6 + $0xc60] ss:$44 sps:$4 sm:$0xff]  }
 0x2f2   : > { %2457 = vadd.xlane.f32.xlu0 %v17920_v12  ;;  %v4992_v38 = vpop.permute.xlu0 %4991  ;;  %10499 = vmatprep.mubr.bf16.mxu0 %v13579_v51  ;;  %v13582_v12 = vld [vmem:[%s15910_s6 + $0xc64] ss:$44 sps:$4 sm:$0xff]   ;;  %v18203_v53 = vadd.f32 %v2475_v60, %v2474_v19  ;;  %v5228_v46 = vmul.f32 %v18005_v2, %v4010_v26  ;;  %v18213_v63 = vadd.f32 %v2120_v1, %v2119_v31  ;;  %v1103_v6 = vunpack.c.h.bf16 %v18187_v42  ;;  %v4203_v43 = vld [vmem:[%s19596_s3 + $0x948] sm:$0xff] }
 0x2f3   : > { %v5418_v54 = vmul.f32 %v4992_v38, %v4200_v47  ;;  %v5419_v27 = vmul.f32 %v4992_v38, %v4201_v0  ;;  %9193 = vmatprep.subr.bf16.mxu1 %v5523_v45  ;;  %v1393_v49 = vmul.f32 %v14853_v35, %v854_v44  ;;  %v5229_v4 = vmul.f32 %v18005_v2, %v4011_v30  ;;  %v4204_v2 = vld [vmem:[%s19596_s3 + $0x950] sm:$0xff]  ;;  %v4014_v38 = vld [vmem:[%s19596_s3 + $0x360] sm:$0xff]  ;;  %v13588_v44 = vld [vmem:[%s15910_s6 + $0xcbc] ss:$44 sps:$4 sm:$0xff]  }
 0x2f4   : > { %9194 = vmatpush1.bf16.msra.mxu1 %v5522_v11  ;;  %v18234_v28 = vadd.f32 %v1392_v52, %v1391_v15  ;;  %v1640_v55 = vmul.f32 %v14849_v33, %v1101_v58  ;;  %v1641_v51 = vmul.f32 %v14851_v34, %v1102_v41  ;;  %v1087_v25 = vunpack.c.h.bf16 %v570_v24  ;;  %v18243_v11 = vld [vmem:[%s19594_s1 + $0x458] ss:$936 sps:$4 sm:$0xff]  }
 0x2f5   : > { %v5618_v36 = vpack.c.bf16 %v5418_v54, %v5416_v37  ;;  %9087 = vmatmul.mubr.bf16.gmra.mrb[140].mxu1 %v13578_v39  ;;  %v5619_v13 = vpack.c.bf16 %v5419_v27, %v5417_v14  ;;  %2492 = vadd.xlane.f32.xlu1 %v18071_v16  ;;  %v418_v16 = vld [vmem:[%s19594_s1 + $0x450] sm:$0xff]  ;;  %v1088_v40 = vunpack.c.l.bf16 %v18187_v42  ;;  %v5420_v45 = vmul.f32 %v18050_v20, %v4202_v9  ;;  %v4017_v14 = vld [vmem:[%s19596_s3 + $0x378] sm:$0xff]  ;;  %v4206_v24 = vld [vmem:[%s19596_s3 + $0x960] sm:$0xff] }
 0x2f6   : > { %2077 = vadd.xlane.f32.xlu0 %v18063_v21  ;;  %v4522_v10 = vpop.permute.xlu0 %4521  ;;  %9096 = vmatprep.mubr.bf16.mxu1 %v13582_v12  ;;  %v13585_v21 = vld [vmem:[%s15910_s6 + $0xc7c] ss:$44 sps:$4 sm:$0xff]   ;;  %v1642_v23 = vmul.f32 %v14853_v35, %v1103_v6  ;;  %v858_v19 = vunpack.c.l.bf16 %v418_v16  ;;  %v859_v50 = vunpack.c.h.bf16 %v418_v16  ;;  %v5421_v37 = vmul.f32 %v18050_v20, %v4203_v43  ;;  %v4016_v20 = vld [vmem:[%s19596_s3 + $0x370] sm:$0xff]  ;;  %v13587_v30 = vld [vmem:[%s15910_s6 + $0xc78] ss:$44 sps:$4 sm:$0xff]  }
 0x2f7   : > { %v5230_v8 = vmul.f32 %v4522_v10, %v4012_v48  ;;  %v5231_v59 = vmul.f32 %v4522_v10, %v4013_v62  ;;  %10606 = vmatprep.subr.bf16.mxu0 %v5619_v13  ;;  %v2095_v26 = vsel %vm1644_vm0, %v1393_v49, 0.0  ;;  %v2509_v54 = vadd.f32 %v1641_v51, %v1640_v55  ;;  %v574_v15 = vld [vmem:[%s19594_s1 + $0x7f8] sm:$0xff]  ;;  %v4208_v49 = vld [vmem:[%s19596_s3 + $0x970] sm:$0xff] }
 0x2f8   : > { %10607 = vmatpush1.bf16.msra.mxu0 %v5618_v36  ;;  %v1625_v27 = vmul.f32 %v14849_v33, %v1086_v29  ;;  %v860_v12 = vunpack.c.l.bf16 %v18243_v11  ;;  %v1626_v48 = vmul.f32 %v14851_v34, %v1087_v25  ;;  %v1627_v62 = vmul.f32 %v14853_v35, %v1088_v40  ;;  %v13590_v16 = vld [vmem:[%s15910_s6 + $0xcb8] ss:$44 sps:$4 sm:$0xff]  }
 0x2f9   : > { %v5524_v47 = vpack.c.bf16 %v5230_v8, %v5228_v46  ;;  %10500 = vmatmul.mubr.bf16.gmra.mrb[140].mxu0 %v13581_v57  ;;  %v5525_v0 = vpack.c.bf16 %v5231_v59, %v5229_v4  ;;  %2112 = vadd.xlane.f32.xlu1 %v18166_v17  ;;  %v18257_v17 = vpop.permute.xlu1 %5016  ;;  %v5232_v52 = vmul.f32 %v18113_v61, %v4014_v38  ;;  %v2510_v41 = vsel %vm1644_vm0, %v1642_v23, 0.0 }
 0x2fa   : > { %2467 = vadd.xlane.f32.xlu0 %v18068_v5  ;;  %v5002_v39 = vpop.permute.xlu0 %5001  ;;  %10509 = vmatprep.mubr.bf16.mxu0 %v13585_v21  ;;  %v4015_v5 = vld [vmem:[%s19596_s3 + $0x368] sm:$0xff]  ;;  %v1397_v36 = vmul.f32 %v14849_v33, %v858_v19  ;;  %v1398_v13 = vmul.f32 %v14851_v34, %v859_v50  ;;  %v1399_v6 = vmul.f32 %v14853_v35, %v860_v12  ;;  %v1092_v4 = vunpack.c.l.bf16 %v574_v15 }
 0x2fb   : > { %v5422_v60 = vmul.f32 %v5002_v39, %v4204_v2  ;;  %v5423_v31 = vmul.f32 %v5002_v39, %v4205_v3  ;;  %9195 = vmatprep.subr.bf16.mxu1 %v5525_v0  ;;  %v5233_v57 = vmul.f32 %v18113_v61, %v4015_v5  ;;  %v4209_v61 = vld [vmem:[%s19596_s3 + $0x978] sm:$0xff]  ;;  %v1093_v9 = vunpack.c.h.bf16 %v574_v15  ;;  %v422_v0 = vld [vmem:[%s19594_s1 + $0x468] sm:$0xff] }
 0x2fc   : > { %9196 = vmatpush1.bf16.msra.mxu1 %v5524_v47  ;;  %v1094_v8 = vunpack.c.h.bf16 %v18243_v11  ;;  %v2096_v43 = vadd.f32 %v2095_v26, %v18234_v28  ;;  %v2511_v2 = vadd.f32 %v2510_v41, %v2509_v54  ;;  %v5424_v3 = vmul.f32 %v18157_v18, %v4206_v24  ;;  %v4018_v28 = vld [vmem:[%s19596_s3 + $0x380] sm:$0xff]  ;;  %v18315_v11 = vld [vmem:[%s19594_s1 + $0x470] ss:$936 sps:$4 sm:$0xff]  }
 0x2fd   : > { %v5620_v1 = vpack.c.bf16 %v5422_v60, %v5420_v45  ;;  %9097 = vmatmul.mubr.bf16.gmra.mrb[144].mxu1 %v13584_v56  ;;  %v5621_v42 = vpack.c.bf16 %v5423_v31, %v5421_v37  ;;  %2502 = vadd.xlane.f32.xlu1 %v18201_v32  ;;  %v4207_v32 = vld [vmem:[%s19596_s3 + $0x968] sm:$0xff]  ;;  %v18299_v55 = vpop.permute.xlu1 %4546  ;;  %v2484_v29 = vadd.f32 %v1626_v48, %v1625_v27  ;;  %v4020_v45 = vld [vmem:[%s19596_s3 + $0x390] sm:$0xff]  ;;  %v4021_v39 = vld [vmem:[%s19596_s3 + $0x398] sm:$0xff]  ;;  %v2105_v23 = vsel %vm1644_vm0, %v1399_v6, 0.0 }
 0x2fe   : > { %2087 = vadd.xlane.f32.xlu0 %v18083_v7  ;;  %v4532_v58 = vpop.permute.xlu0 %4531  ;;  %9106 = vmatprep.mubr.bf16.mxu1 %v13588_v44  ;;  %v13591_v7 = vld [vmem:[%s15910_s6 + $0xcd4] ss:$44 sps:$4 sm:$0xff]   ;;  %v2104_v47 = vadd.f32 %v1398_v13, %v1397_v36  ;;  %v5425_v56 = vmul.f32 %v18157_v18, %v4207_v32  ;;  %v4019_v18 = vld [vmem:[%s19596_s3 + $0x388] sm:$0xff]  ;;  %v1631_v19 = vmul.f32 %v14849_v33, %v1092_v4  ;;  %v13593_v31 = vld [vmem:[%s15910_s6 + $0xcd0] ss:$44 sps:$4 sm:$0xff]   ;;  %v864_v44 = vunpack.c.l.bf16 %v422_v0 }
 0x2ff   : > { %v5234_v46 = vmul.f32 %v4532_v58, %v4016_v20  ;;  %v5235_v10 = vmul.f32 %v4532_v58, %v4017_v14  ;;  %10608 = vmatprep.subr.bf16.mxu0 %v5621_v42  ;;  %v1632_v50 = vmul.f32 %v14851_v34, %v1093_v9  ;;  %v1633_v37 = vmul.f32 %v14853_v35, %v1094_v8  ;;  %v13597_v54 = vld [vmem:[%s15910_s6 + $0xd2c] ss:$44 sps:$4 sm:$0xff]   ;;  %v578_v48 = vld [vmem:[%s19594_s1 + $0x810] sm:$0xff] }
 0x300   : > { %10609 = vmatpush1.bf16.msra.mxu0 %v5620_v1  ;;  %v865_v5 = vunpack.c.h.bf16 %v422_v0  ;;  %v5236_v20 = vmul.f32 %v18209_v22, %v4018_v28  ;;  %v866_v27 = vunpack.c.l.bf16 %v18315_v11  ;;  %v5237_v12 = vmul.f32 %v18209_v22, %v4019_v18  ;;  %v4210_v1 = vld [vmem:[%s19596_s3 + $0x980] sm:$0xff]  ;;  %v4212_v22 = vld [vmem:[%s19596_s3 + $0x990] sm:$0xff]  ;;  %v13600_v32 = vld [vmem:[%s15910_s6 + $0xd6c] ss:$44 sps:$4 sm:$0xff]  }
 0x301   : > { %v5526_v59 = vpack.c.bf16 %v5234_v46, %v5232_v52  ;;  %10510 = vmatmul.mubr.bf16.gmra.mrb[144].mxu0 %v13587_v30  ;;  %v5527_v21 = vpack.c.bf16 %v5235_v10, %v5233_v57  ;;  %2122 = vadd.xlane.f32.xlu1 %v18213_v63  ;;  %v13594_v63 = vld [vmem:[%s15910_s6 + $0xd14] ss:$44 sps:$4 sm:$0xff]   ;;  %v18344_v15 = vpop.permute.xlu1 %5026  ;;  %v4213_v52 = vld [vmem:[%s19596_s3 + $0x998] sm:$0xff]  ;;  %v2106_v58 = vadd.f32 %v2105_v23, %v2104_v47  ;;  %v2495_v36 = vsel %vm1644_vm0, %v1633_v37, 0.0 }
 0x302   : > { %2477 = vadd.xlane.f32.xlu0 %v18203_v53  ;;  %v5012_v51 = vpop.permute.xlu0 %5011  ;;  %10519 = vmatprep.mubr.bf16.mxu0 %v13591_v7  ;;  %v2485_v53 = vsel %vm1644_vm0, %v1627_v62, 0.0  ;;  %v4211_v62 = vld [vmem:[%s19596_s3 + $0x988] sm:$0xff]  ;;  %v2494_v41 = vadd.f32 %v1632_v50, %v1631_v19  ;;  %v13596_v24 = vld [vmem:[%s15910_s6 + $0xd10] ss:$44 sps:$4 sm:$0xff]   ;;  %v1403_v46 = vmul.f32 %v14849_v33, %v864_v44  ;;  %v1404_v10 = vmul.f32 %v14851_v34, %v865_v5 }
 0x303   : > { %v5426_v25 = vmul.f32 %v5012_v51, %v4208_v49  ;;  %v5427_v40 = vmul.f32 %v5012_v51, %v4209_v61  ;;  %9197 = vmatprep.subr.bf16.mxu1 %v5527_v21  ;;  %v2486_v26 = vadd.f32 %v2485_v53, %v2484_v29  ;;  %v1405_v49 = vmul.f32 %v14853_v35, %v866_v27  ;;  %v13599_v29 = vld [vmem:[%s15910_s6 + $0xd28] ss:$44 sps:$4 sm:$0xff]   ;;  %v13606_v5 = vld [vmem:[%s15910_s6 + $0xdc4] ss:$44 sps:$4 sm:$0xff]  }
 0x304   : > { %9198 = vmatpush1.bf16.msra.mxu1 %v5526_v59  ;;  %v1098_v61 = vunpack.c.l.bf16 %v578_v48  ;;  %v1099_v6 = vunpack.c.h.bf16 %v578_v48  ;;  %v1100_v4 = vunpack.c.h.bf16 %v18315_v11  ;;  %v5428_v9 = vmul.f32 %v18257_v17, %v4210_v1  ;;  %v4022_v59 = vld [vmem:[%s19596_s3 + $0x3a0] sm:$0xff]  ;;  %v13602_v37 = vld [vmem:[%s15910_s6 + $0xd68] ss:$44 sps:$4 sm:$0xff]  }
 0x305   : > { %v5622_v38 = vpack.c.bf16 %v5426_v25, %v5424_v3  ;;  %9107 = vmatmul.mubr.bf16.gmra.mrb[148].mxu1 %v13590_v16  ;;  %v5623_v60 = vpack.c.bf16 %v5427_v40, %v5425_v56  ;;  %2512 = vadd.xlane.f32.xlu1 %v2511_v2  ;;  %v5429_v8 = vmul.f32 %v18257_v17, %v4211_v62  ;;  %v4024_v2 = vld [vmem:[%s19596_s3 + $0x3b0] sm:$0xff]  ;;  %v4025_v17 = vld [vmem:[%s19596_s3 + $0x3b8] sm:$0xff]  ;;  %v4557_v56 = vpop.permute.xlu1 %4556  ;;  %v2115_v25 = vsel %vm1644_vm0, %v1405_v49, 0.0 }
 0x306   : > { %2097 = vadd.xlane.f32.xlu0 %v2096_v43  ;;  %v4542_v14 = vpop.permute.xlu0 %4541  ;;  %9116 = vmatprep.mubr.bf16.mxu1 %v13594_v63  ;;  %v4023_v43 = vld [vmem:[%s19596_s3 + $0x3a8] sm:$0xff]  ;;  %v2496_v47 = vadd.f32 %v2495_v36, %v2494_v41  ;;  %v2114_v0 = vadd.f32 %v1404_v10, %v1403_v46  ;;  %v13603_v40 = vld [vmem:[%s15910_s6 + $0xd84] ss:$44 sps:$4 sm:$0xff]   ;;  %v1637_v53 = vmul.f32 %v14849_v33, %v1098_v61 }
 0x307   : > { %v5238_v42 = vmul.f32 %v4542_v14, %v4020_v45  ;;  %v5239_v30 = vmul.f32 %v4542_v14, %v4021_v39  ;;  %10610 = vmatprep.subr.bf16.mxu0 %v5623_v60  ;;  %v1638_v63 = vmul.f32 %v14851_v34, %v1099_v6  ;;  %v1639_v11 = vmul.f32 %v14853_v35, %v1100_v4  ;;  %v4214_v39 = vld [vmem:[%s19596_s3 + $0x9a0] sm:$0xff]  ;;  %v4215_v33 = vld [vmem:[%s19596_s3 + $0x9a8] sm:$0xff]  ;;  %v4216_v34 = vld [vmem:[%s19596_s3 + $0x9b0] sm:$0xff] }
 0x308   : > { %10611 = vmatpush1.bf16.msra.mxu0 %v5622_v38  ;;  %v5240_v18 = vmul.f32 %v18299_v55, %v4022_v59  ;;  %v5241_v45 = vmul.f32 %v18299_v55, %v4023_v43  ;;  %v4217_v35 = vld [vmem:[%s19596_s3 + $0x9b8] sm:$0xff]  ;;  %v2116_v60 = vadd.f32 %v2115_v25, %v2114_v0  ;;  %v5433_v14 = vmul.f32 %v18344_v15, %v4215_v33  ;;  %v4219_v46 = vld [vmem:[%s19596_s3 + $0x9c8] sm:$0xff]  ;;  %v4220_v10 = vld [vmem:[%s19596_s3 + $0x9d0] sm:$0xff] }
 0x309   : > { %v5528_v13 = vpack.c.bf16 %v5238_v42, %v5236_v20  ;;  %10520 = vmatmul.mubr.bf16.gmra.mrb[148].mxu0 %v13593_v31  ;;  %v5529_v57 = vpack.c.bf16 %v5239_v30, %v5237_v12  ;;  %v2504_v31 = vadd.f32 %v1638_v63, %v1637_v53  ;;  %v2505_v44 = vsel %vm1644_vm0, %v1639_v11, 0.0  ;;  %v4027_v12 = vld [vmem:[%s19596_s3 + $0x3c8] sm:$0xff]  ;;  %v5037_v1 = vpop.permute.xlu1 %5036  ;;  %v4028_v42 = vld [vmem:[%s19596_s3 + $0x3d0] sm:$0xff]  ;;  %v4029_v30 = vld [vmem:[%s19596_s3 + $0x3d8] sm:$0xff] }
 0x30a   : > { %2487 = vadd.xlane.f32.xlu0 %v2486_v26  ;;  %v5022_v7 = vpop.permute.xlu0 %5021  ;;  %10529 = vmatprep.mubr.bf16.mxu0 %v13597_v54  ;;  %v5432_v20 = vmul.f32 %v18344_v15, %v4214_v39  ;;  %v4026_v26 = vld [vmem:[%s19596_s3 + $0x3c0] sm:$0xff]  ;;  %v5245_v36 = vmul.f32 %v4557_v56, %v4027_v12  ;;  %v5437_v59 = vmul.f32 %v5037_v1, %v4219_v46  ;;  %v4223_v11 = vld [vmem:[%s19596_s3 + $0x9e8] sm:$0xff]  ;;  %v4225_v39 = vld [vmem:[%s19596_s3 + $0x9f8] sm:$0xff] }
 0x30b   : > { %v5430_v21 = vmul.f32 %v5022_v7, %v4212_v22  ;;  %v5431_v16 = vmul.f32 %v5022_v7, %v4213_v52  ;;  %9199 = vmatprep.subr.bf16.mxu1 %v5529_v57  ;;  %v13605_v15 = vld [vmem:[%s15910_s6 + $0xd80] ss:$44 sps:$4 sm:$0xff]   ;;  %v2506_v52 = vadd.f32 %v2505_v44, %v2504_v31  ;;  %v5244_v41 = vmul.f32 %v4557_v56, %v4026_v26  ;;  %v4221_v7 = vld [vmem:[%s19596_s3 + $0x9d8] sm:$0xff] }
 0x30c   : > { %9200 = vmatpush1.bf16.msra.mxu1 %v5528_v13  ;;  %v4218_v13 = vld [vmem:[%s19596_s3 + $0x9c0] sm:$0xff]  ;;  %v13617_v44 = vld [vmem:[%s15910_s6 + $0xe30] ss:$44 sps:$4 sm:$0xff]  }
 0x30d   : > { %v5624_v3 = vpack.c.bf16 %v5430_v21, %v5428_v9  ;;  %9117 = vmatmul.mubr.bf16.gmra.mrb[152].mxu1 %v13596_v24  ;;  %v5625_v51 = vpack.c.bf16 %v5431_v16, %v5429_v8  ;;  %v13608_v61 = vld [vmem:[%s15910_s6 + $0xdc0] ss:$44 sps:$4 sm:$0xff]   ;;  %v4567_v6 = vpop.permute.xlu1 %4566  ;;  %v13612_v9 = vld [vmem:[%s15910_s6 + $0xe1c] ss:$44 sps:$4 sm:$0xff]   ;;  %v5436_v8 = vmul.f32 %v5037_v1, %v4218_v13  ;;  %v13614_v33 = vld [vmem:[%s15910_s6 + $0xe18] ss:$44 sps:$4 sm:$0xff]  }
 0x30e   : > { %2107 = vadd.xlane.f32.xlu0 %v2106_v58  ;;  %v4552_v28 = vpop.permute.xlu0 %4551  ;;  %9126 = vmatprep.mubr.bf16.mxu1 %v13600_v32  ;;  %v13609_v58 = vld [vmem:[%s15910_s6 + $0xddc] ss:$44 sps:$4 sm:$0xff]   ;;  %v4030_v21 = vld [vmem:[%s19596_s3 + $0x3e0] sm:$0xff] }
 0x30f   : > { %v5242_v23 = vmul.f32 %v4552_v28, %v4024_v2  ;;  %v5243_v19 = vmul.f32 %v4552_v28, %v4025_v17  ;;  %10612 = vmatprep.subr.bf16.mxu0 %v5625_v51  ;;  %v4031_v2 = vld [vmem:[%s19596_s3 + $0x3e8] sm:$0xff]  ;;  %v4032_v17 = vld [vmem:[%s19596_s3 + $0x3f0] sm:$0xff]  ;;  %v5248_v28 = vmul.f32 %v4567_v6, %v4030_v21 }
 0x310   : > { %10613 = vmatpush1.bf16.msra.mxu0 %v5624_v3  ;;  %v4033_v3 = vld [vmem:[%s19596_s3 + $0x3f8] sm:$0xff]  ;;  %v13615_v56 = vld [vmem:[%s15910_s6 + $0xe34] ss:$44 sps:$4 sm:$0xff]   ;;  %v5249_v25 = vmul.f32 %v4567_v6, %v4031_v2  ;;  %v2587_v2 = vld [vmem:[%s19595_s2 + $0x248] sm:$0xff] }
 0x311   : > { %v5530_v55 = vpack.c.bf16 %v5242_v23, %v5240_v18  ;;  %10530 = vmatmul.mubr.bf16.gmra.mrb[152].mxu0 %v13599_v29  ;;  %v5531_v50 = vpack.c.bf16 %v5243_v19, %v5241_v45  ;;  %v5047_v18 = vpop.permute.xlu1 %5046  ;;  %v4224_v45 = vld [vmem:[%s19596_s3 + $0x9f0] sm:$0xff] }
 0x312   : > { %2497 = vadd.xlane.f32.xlu0 %v2496_v47  ;;  %v5032_v38 = vpop.permute.xlu0 %5031  ;;  %10539 = vmatprep.mubr.bf16.mxu0 %v13603_v40  ;;  %v13611_v47 = vld [vmem:[%s15910_s6 + $0xdd8] ss:$44 sps:$4 sm:$0xff]  }
 0x313   : > { %v5434_v54 = vmul.f32 %v5032_v38, %v4216_v34  ;;  %v5435_v27 = vmul.f32 %v5032_v38, %v4217_v35  ;;  %9201 = vmatprep.subr.bf16.mxu1 %v5531_v50  ;;  %v4222_v40 = vld [vmem:[%s19596_s3 + $0x9e0] sm:$0xff]  ;;  %v5441_v50 = vmul.f32 %v5047_v18, %v4223_v11 }
 0x314   : > { %9202 = vmatpush1.bf16.msra.mxu1 %v5530_v55  ;;  %v13618_v35 = vld [vmem:[%s15910_s6 + $0xe74] ss:$44 sps:$4 sm:$0xff]   ;;  %v5440_v55 = vmul.f32 %v5047_v18, %v4222_v40 }
 0x315   : > { %v5626_v48 = vpack.c.bf16 %v5434_v54, %v5432_v20  ;;  %9127 = vmatmul.mubr.bf16.gmra.mrb[156].mxu1 %v13602_v37  ;;  %v5627_v62 = vpack.c.bf16 %v5435_v27, %v5433_v14  ;;  %v6162_v20 = vld [vmem:[%s15910_s6 + $0xec8] sm:$0xff]  ;;  %v13620_v14 = vld [vmem:[%s15910_s6 + $0xe70] ss:$44 sps:$4 sm:$0xff]   ;;  %v6165_v54 = vld [vmem:[%s15910_s6 + $0xee0] sm:$0xff] }
 0x316   : > { %2117 = vadd.xlane.f32.xlu0 %v2116_v60  ;;  %v4562_v22 = vpop.permute.xlu0 %4561  ;;  %9136 = vmatprep.mubr.bf16.mxu1 %v13606_v5  ;;  %v13621_v5 = vld [vmem:[%s15910_s6 + $0xe8c] ss:$44 sps:$4 sm:$0xff]   ;;  %v12419_v26 = vcombine.high %v6162_v20, %v6162_v20  ;;  %v13623_v27 = vld [vmem:[%s15910_s6 + $0xe88] ss:$44 sps:$4 sm:$0xff]   ;;  %v12425_v12 = vcombine.high %v6165_v54, %v6165_v54  ;;  %v12418_v1 = vcombine.low %v6162_v20, %v6162_v20  ;;  %v2582_v20 = vld [vmem:[%s19595_s2 + $0x220] sm:$0xff] }
 0x317   : > { %v5246_v57 = vmul.f32 %v4562_v22, %v4028_v42  ;;  %v5247_v24 = vmul.f32 %v4562_v22, %v4029_v30  ;;  %10614 = vmatprep.subr.bf16.mxu0 %v5627_v62  ;;  %v13630_v42 = vld [vmem:[%s15910_s6 + $0xc] ss:$44 sps:$4 sm:$0xff]   ;;  %v12424_v30 = vcombine.low %v6165_v54, %v6165_v54  ;;  %v13628_v62 = vld [vmem:[%s15910_s6 + $0x8] ss:$44 sps:$4 sm:$0xff]   ;;  %v13634_v22 = vld [vmem:[%s15910_s6 + $0x64] ss:$44 sps:$4 sm:$0xff]  }
 0x318   : > { %10615 = vmatpush1.bf16.msra.mxu0 %v5626_v48  ;;  %v13633_v48 = vld [vmem:[%s15910_s6 + $0x24] ss:$44 sps:$4 sm:$0xff]  }
 0x319   : > { %v5532_v32 = vpack.c.bf16 %v5246_v57, %v5244_v41  ;;  %10540 = vmatmul.mubr.bf16.gmra.mrb[156].mxu0 %v13605_v15  ;;  %v5533_v49 = vpack.c.bf16 %v5247_v24, %v5245_v36  ;;  %v2578_v15 = vld [vmem:[%s19595_s2 + $0x200] sm:$0xff]  ;;  %v2581_v36 = vld [vmem:[%s19595_s2 + $0x218] sm:$0xff] }
 0x31a   : > { %2507 = vadd.xlane.f32.xlu0 %v2506_v52  ;;  %v5042_v4 = vpop.permute.xlu0 %5041  ;;  %10549 = vmatprep.mubr.bf16.mxu0 %v13609_v58  ;;  %v13631_v41 = vld [vmem:[%s15910_s6 + $0x20] ss:$44 sps:$4 sm:$0xff]   ;;  %v13637_v57 = vld [vmem:[%s15910_s6 + $0x7c] ss:$44 sps:$4 sm:$0xff]  }
 0x31b   : > { %v5438_v16 = vmul.f32 %v5042_v4, %v4220_v10  ;;  %v5439_v43 = vmul.f32 %v5042_v4, %v4221_v7  ;;  %9203 = vmatprep.subr.bf16.mxu1 %v5533_v49  ;;  %v13636_v10 = vld [vmem:[%s15910_s6 + $0x60] ss:$44 sps:$4 sm:$0xff]   ;;  %v13640_v49 = vld [vmem:[%s15910_s6 + $0xbc] ss:$44 sps:$4 sm:$0xff]   ;;  %v13639_v4 = vld [vmem:[%s15910_s6 + $0x78] ss:$44 sps:$4 sm:$0xff]  }
 0x31c   : > { %9204 = vmatpush1.bf16.msra.mxu1 %v5532_v32  ;;  %v2583_v7 = vld [vmem:[%s19595_s2 + $0x228] sm:$0xff] }
 0x31d   : > { %v5628_v51 = vpack.c.bf16 %v5438_v16, %v5436_v8  ;;  %v5629_v29 = vpack.c.bf16 %v5439_v43, %v5437_v59  ;;  %9137 = vmatmul.mubr.bf16.gmra.mrb[160].mxu1 %v13608_v61  ;;  %v13643_v59 = vld [vmem:[%s15910_s6 + $0xd4] ss:$44 sps:$4 sm:$0xff]   ;;  %v13642_v43 = vld [vmem:[%s15910_s6 + $0xb8] ss:$44 sps:$4 sm:$0xff]  }
 0x31e   : > { %v4572_v0 = vpop.permute.xlu0 %4571  ;;  %9146 = vmatprep.mubr.bf16.mxu1 %v13612_v9  ;;  %v2585_v9 = vld [vmem:[%s19595_s2 + $0x238] sm:$0xff] }
 0x31f   : > { %v5250_v53 = vmul.f32 %v4572_v0, %v4032_v17  ;;  %v5251_v63 = vmul.f32 %v4572_v0, %v4033_v3  ;;  %10616 = vmatprep.subr.bf16.mxu0 %v5629_v29 }
 0x320   : > { %10617 = vmatpush1.bf16.msra.mxu0 %v5628_v51  ;;  %v13646_v51 = vld [vmem:[%s15910_s6 + $0x114] ss:$44 sps:$4 sm:$0xff]  }
 0x321   : > { %v5534_v23 = vpack.c.bf16 %v5250_v53, %v5248_v28  ;;  %v5535_v19 = vpack.c.bf16 %v5251_v63, %v5249_v25  ;;  %10550 = vmatmul.mubr.bf16.gmra.mrb[160].mxu0 %v13611_v47  ;;  %v13645_v28 = vld [vmem:[%s15910_s6 + $0xd0] ss:$44 sps:$4 sm:$0xff]   ;;  %v13649_v63 = vld [vmem:[%s15910_s6 + $0x12c] ss:$44 sps:$4 sm:$0xff]  }
 0x322   : > { %v5052_v34 = vpop.permute.xlu0 %5051  ;;  %10559 = vmatprep.mubr.bf16.mxu0 %v13615_v56  ;;  %v2579_v56 = vld [vmem:[%s19595_s2 + $0x208] sm:$0xff]  ;;  %v2589_v25 = vld [vmem:[%s19595_s2 + $0x258] sm:$0xff] }
 0x323   : > { %v5442_v37 = vmul.f32 %v5052_v34, %v4224_v45  ;;  %v5443_v38 = vmul.f32 %v5052_v34, %v4225_v39  ;;  %9205 = vmatprep.subr.bf16.mxu1 %v5535_v19  ;;  %v2580_v19 = vld [vmem:[%s19595_s2 + $0x210] sm:$0xff]  ;;  %v2591_v34 = vld [vmem:[%s19595_s2 + $0x268] sm:$0xff] }
 0x324   : > { %9206 = vmatpush1.bf16.msra.mxu1 %v5534_v23 }
 0x325   : > { %v5630_v60 = vpack.c.bf16 %v5442_v37, %v5440_v55  ;;  %v5631_v31 = vpack.c.bf16 %v5443_v38, %v5441_v50  ;;  %9147 = vmatmul.mubr.bf16.gmra.mrb[164].mxu1 %v13614_v33  ;;  %v13648_v33 = vld [vmem:[%s15910_s6 + $0x110] ss:$44 sps:$4 sm:$0xff]   ;;  %v13652_v37 = vld [vmem:[%s15910_s6 + $0x16c] ss:$44 sps:$4 sm:$0xff]  }
 0x326   : > { %9156 = vmatprep.mubr.bf16.mxu1 %v13618_v35 }
 0x327   : > { %10618 = vmatprep.subr.bf16.mxu0 %v5631_v31 }
 0x328   : > { %10619 = vmatpush1.bf16.msra.mxu0 %v5630_v60 }
 0x329   : > { %10560 = vmatmul.mubr.bf16.gmra.mrb[164].mxu0 %v13617_v44 }
 0x32a   : > { %10569 = vmatprep.mubr.bf16.mxu0 %v13621_v5 }
 0x32d   : > { %9157 = vmatmul.mubr.bf16.gmra.mrb[168].mxu1 %v13620_v14  ;;  %v13651_v14 = vld [vmem:[%s15910_s6 + $0x128] ss:$44 sps:$4 sm:$0xff]  }
 0x32e   : > { %9166 = vmatprep.mubr.bf16.mxu1 %v12419_v26  ;;  %v2593_v26 = vld [vmem:[%s19595_s2 + $0x278] sm:$0xff] }
 0x331   : > { %10570 = vmatmul.mubr.bf16.gmra.mrb[168].mxu0 %v13623_v27 }
 0x332   : > { %10579 = vmatprep.mubr.bf16.mxu0 %v12425_v12 }
 0x335   : > { %9167 = vmatmul.mubr.bf16.gmra.mrb[172].mxu1 %v12418_v1  ;;  %v13655_v1 = vld [vmem:[%s15910_s6 + $0x184] ss:$44 sps:$4 sm:$0xff]  }
 0x336   : > { %9207 = vmatprep.mubr.bf16.mxu1 %v13630_v42 }
 0x339   : > { %10580 = vmatmul.mubr.bf16.gmra.mrb[172].mxu0 %v12424_v30 }
 0x33a   : > { %10620 = vmatprep.mubr.bf16.mxu0 %v13633_v48  ;;  %v1968_v52 = vpop.xlane.xlu1 %1967 }
 0x33b   : > { %v2752_v58 = vadd.f32 %v2578_v15, %v1968_v52  ;;  %v2584_v52 = vld [vmem:[%s19595_s2 + $0x230] sm:$0xff] }
 0x33d   : > { %9208 = vmatmul.mubr.bf16.vlgmr.msra.gmra.mrb[0].mxu1 %v13628_v62  ;;  %v11835_v13 = vmul.f32 -1.442695, %v2752_v58  ;;  %v13654_v58 = vld [vmem:[%s15910_s6 + $0x168] ss:$44 sps:$4 sm:$0xff]  }
 0x33e   : > { %9217 = vmatprep.mubr.bf16.mxu1 %v13634_v22  ;;  %v1983_v24 = vpop.xlane.xlu1 %1982 }
 0x33f   : > { %14577 = vpow2.f32 %v11835_v13  ;;  %v2755_v46 = vadd.f32 %v2581_v36, %v1983_v24  ;;  %v13658_v24 = vld [vmem:[%s15910_s6 + $0x1c4] ss:$44 sps:$4 sm:$0xff]  }
 0x341   : > { %10621 = vmatmul.mubr.bf16.vlgmr.msra.gmra.mrb[0].mxu0 %v13631_v41  ;;  %v11838_v32 = vmul.f32 -1.442695, %v2755_v46  ;;  %v2595_v41 = vld [vmem:[%s19595_s2 + $0x288] sm:$0xff] }
 0x342   : > { %10630 = vmatprep.mubr.bf16.mxu0 %v13637_v57  ;;  %v1993_v61 = vpop.xlane.xlu1 %1992 }
 0x343   : > { %14579 = vpow2.f32 %v11838_v32  ;;  %v2757_v6 = vadd.f32 %v2583_v7, %v1993_v61 }
 0x345   : > { %9218 = vmatmul.mubr.bf16.gmra.mrb[4].mxu1 %v13636_v10  ;;  %v11840_v8 = vmul.f32 -1.442695, %v2757_v6  ;;  %v2586_v6 = vld [vmem:[%s19595_s2 + $0x240] sm:$0xff] }
 0x346   : > { %9227 = vmatprep.mubr.bf16.mxu1 %v13640_v49  ;;  %v2003_v21 = vpop.xlane.xlu1 %2002 }
 0x347   : > { %14581 = vpow2.f32 %v11840_v8  ;;  %v2759_v16 = vadd.f32 %v2585_v9, %v2003_v21  ;;  %v2597_v9 = vld [vmem:[%s19595_s2 + $0x298] sm:$0xff] }
 0x349   : > { %10631 = vmatmul.mubr.bf16.gmra.mrb[4].mxu0 %v13639_v4  ;;  %v14578_v17 = vpop.eup %14577  ;;  %v11842_v3 = vmul.f32 -1.442695, %v2759_v16  ;;  %v13657_v4 = vld [vmem:[%s15910_s6 + $0x180] ss:$44 sps:$4 sm:$0xff]   ;;  %v13661_v16 = vld [vmem:[%s15910_s6 + $0x1dc] ss:$44 sps:$4 sm:$0xff]  }
 0x34a   : > { %10640 = vmatprep.mubr.bf16.mxu0 %v13643_v59  ;;  %v3448_v29 = vadd.f32 1.0, %v14578_v17  ;;  %v2013_v47 = vpop.xlane.xlu1 %2012 }
 0x34b   : > { %14583 = vpow2.f32 %v11842_v3  ;;  %v2761_v0 = vadd.f32 %v2587_v2, %v2013_v47 }
 0x34c   : > { %14585 = vrcp.f32 %v3448_v29 }
 0x34d   : > { %9228 = vmatmul.mubr.bf16.gmra.mrb[8].mxu1 %v13642_v43  ;;  %v14580_v40 = vpop.eup %14579  ;;  %v11844_v53 = vmul.f32 -1.442695, %v2761_v0 }
 0x34e   : > { %9237 = vmatprep.mubr.bf16.mxu1 %v13646_v51  ;;  %v3451_v11 = vadd.f32 1.0, %v14580_v40  ;;  %v2023_v45 = vpop.xlane.xlu1 %2022 }
 0x34f   : > { %v1973_v18 = vpop.xlane.xlu0 %1972  ;;  %14587 = vpow2.f32 %v11844_v53  ;;  %v2763_v23 = vadd.f32 %v2589_v25, %v2023_v45  ;;  %v2675_v25 = vld [vmem:[%s19595_s2 + $0x508] sm:$0xff] }
 0x350   : > { %v2753_v39 = vadd.f32 %v2579_v56, %v1973_v18  ;;  %14589 = vrcp.f32 %v3451_v11  ;;  %v2588_v56 = vld [vmem:[%s19595_s2 + $0x250] sm:$0xff]  ;;  %v13664_v11 = vld [vmem:[%s15910_s6 + $0x21c] ss:$44 sps:$4 sm:$0xff]  }
 0x351   : > { %10641 = vmatmul.mubr.bf16.gmra.mrb[8].mxu0 %v13645_v28  ;;  %v14582_v35 = vpop.eup %14581  ;;  %v11846_v50 = vmul.f32 -1.442695, %v2763_v23  ;;  %v13660_v28 = vld [vmem:[%s15910_s6 + $0x1c0] ss:$44 sps:$4 sm:$0xff]  }
 0x352   : > { %v11836_v55 = vmul.f32 -1.442695, %v2753_v39  ;;  %10650 = vmatprep.mubr.bf16.mxu0 %v13649_v63  ;;  %v3453_v38 = vadd.f32 1.0, %v14582_v35  ;;  %v2033_v31 = vpop.xlane.xlu1 %2032 }
 0x353   : > { %v1978_v60 = vpop.xlane.xlu0 %1977  ;;  %v2765_v5 = vadd.f32 %v2591_v34, %v2033_v31 }
 0x354   : > { %14591 = vpow2.f32 %v11836_v55  ;;  %v2754_v44 = vadd.f32 %v2580_v19, %v1978_v60  ;;  %v2590_v55 = vld [vmem:[%s19595_s2 + $0x260] sm:$0xff] }
 0x355   : > { %14593 = vrcp.f32 %v3453_v38  ;;  %9238 = vmatmul.mubr.bf16.gmra.mrb[12].mxu1 %v13648_v33  ;;  %v14584_v54 = vpop.eup %14583  ;;  %v11848_v12 = vmul.f32 -1.442695, %v2765_v5 }
 0x356   : > { %14595 = vpow2.f32 %v11846_v50  ;;  %v11837_v27 = vmul.f32 -1.442695, %v2754_v44  ;;  %9247 = vmatprep.mubr.bf16.mxu1 %v13652_v37  ;;  %v14586_v42 = vpop.eup %14585  ;;  %v3455_v30 = vadd.f32 1.0, %v14584_v54  ;;  %v2043_v62 = vpop.xlane.xlu1 %2042  ;;  %v13663_v50 = vld [vmem:[%s15910_s6 + $0x1d8] ss:$44 sps:$4 sm:$0xff]   ;;  %v2599_v37 = vld [vmem:[%s19595_s2 + $0x2a8] sm:$0xff] }
 0x357   : > { %v1988_v48 = vpop.xlane.xlu0 %1987  ;;  %v2767_v22 = vadd.f32 %v2593_v26, %v2043_v62  ;;  %4576 = vperm.xlu0 %13364, %v14586_v42   ;;  %v13667_v44 = vld [vmem:[%s15910_s6 + $0x234] ss:$44 sps:$4 sm:$0xff]  }
 0x358   : > { %14597 = vpow2.f32 %v11837_v27  ;;  %v2756_v15 = vadd.f32 %v2582_v20, %v1988_v48  ;;  %v2592_v42 = vld [vmem:[%s19595_s2 + $0x270] sm:$0xff]  ;;  %v2677_v48 = vld [vmem:[%s19595_s2 + $0x518] sm:$0xff] }
 0x359   : > { %14599 = vrcp.f32 %v3455_v30  ;;  %10651 = vmatmul.mubr.bf16.gmra.mrb[12].mxu0 %v13651_v14  ;;  %v14588_v36 = vpop.eup %14587  ;;  %v11850_v57 = vmul.f32 -1.442695, %v2767_v22  ;;  %v13666_v30 = vld [vmem:[%s15910_s6 + $0x218] ss:$44 sps:$4 sm:$0xff]  }
 0x35a   : > { %14601 = vpow2.f32 %v11848_v12  ;;  %v11839_v13 = vmul.f32 -1.442695, %v2756_v15  ;;  %10660 = vmatprep.mubr.bf16.mxu0 %v13655_v1  ;;  %v14590_v46 = vpop.eup %14589  ;;  %v3457_v10 = vadd.f32 1.0, %v14588_v36  ;;  %v2053_v32 = vpop.xlane.xlu1 %2052 }
 0x35b   : > { %v1998_v7 = vpop.xlane.xlu0 %1997  ;;  %v2769_v61 = vadd.f32 %v2595_v41, %v2053_v32  ;;  %4591 = vperm.xlu0 %13364, %v14590_v46   ;;  %v2594_v32 = vld [vmem:[%s19595_s2 + $0x280] sm:$0xff] }
 0x35c   : > { %14603 = vpow2.f32 %v11839_v13  ;;  %v2758_v49 = vadd.f32 %v2584_v52, %v1998_v7  ;;  %v13670_v52 = vld [vmem:[%s15910_s6 + $0x274] ss:$44 sps:$4 sm:$0xff]  }
 0x35d   : > { %14605 = vrcp.f32 %v3457_v10  ;;  %9248 = vmatmul.mubr.bf16.gmra.mrb[16].mxu1 %v13654_v58  ;;  %v11852_v21 = vmul.f32 -1.442695, %v2769_v61  ;;  %v2601_v61 = vld [vmem:[%s19595_s2 + $0x2b8] sm:$0xff] }
 0x35e   : > { %v14592_v8 = vpop.eup %14591  ;;  %14607 = vpow2.f32 %v11850_v57  ;;  %v11841_v59 = vmul.f32 -1.442695, %v2758_v49  ;;  %9257 = vmatprep.mubr.bf16.mxu1 %v13658_v24  ;;  %v2063_v3 = vpop.xlane.xlu1 %2062  ;;  %v13669_v49 = vld [vmem:[%s15910_s6 + $0x230] ss:$44 sps:$4 sm:$0xff]  }
 0x35f   : > { %v14594_v43 = vpop.eup %14593  ;;  %v3449_v2 = vadd.f32 1.0, %v14592_v8  ;;  %v2008_v17 = vpop.xlane.xlu0 %2007  ;;  %v2771_v47 = vadd.f32 %v2597_v9, %v2063_v3  ;;  %v13673_v8 = vld [vmem:[%s15910_s6 + $0x28c] ss:$44 sps:$4 sm:$0xff]  }
 0x360   : > { %v14596_v51 = vpop.eup %14595  ;;  %14609 = vpow2.f32 %v11841_v59  ;;  %v2760_v29 = vadd.f32 %v2586_v6, %v2008_v17  ;;  %4601 = vperm.xlu0 %13364, %v14594_v43  }
 0x361   : > { %14611 = vrcp.f32 %v3449_v2  ;;  %v3459_v0 = vadd.f32 1.0, %v14596_v51  ;;  %10661 = vmatmul.mubr.bf16.gmra.mrb[16].mxu0 %v13657_v4  ;;  %v11854_v63 = vmul.f32 -1.442695, %v2771_v47  ;;  %v2596_v47 = vld [vmem:[%s19595_s2 + $0x290] sm:$0xff] }
 0x362   : > { %v14598_v40 = vpop.eup %14597  ;;  %14613 = vpow2.f32 %v11852_v21  ;;  %v11843_v53 = vmul.f32 -1.442695, %v2760_v29  ;;  %10670 = vmatprep.mubr.bf16.mxu0 %v13661_v16  ;;  %v2453_v23 = vpop.xlane.xlu1 %2452 }
 0x363   : > { %v14600_v18 = vpop.eup %14599  ;;  %14615 = vrcp.f32 %v3459_v0  ;;  %v3450_v45 = vadd.f32 1.0, %v14598_v40  ;;  %v2018_v39 = vpop.xlane.xlu0 %2017  ;;  %v2849_v34 = vadd.f32 %v2675_v25, %v2453_v23  ;;  %v13672_v0 = vld [vmem:[%s15910_s6 + $0x270] ss:$44 sps:$4 sm:$0xff]  }
 0x364   : > { %v14602_v19 = vpop.eup %14601  ;;  %14617 = vpow2.f32 %v11843_v53  ;;  %v2762_v33 = vadd.f32 %v2588_v56, %v2018_v39  ;;  %4611 = vperm.xlu0 %13364, %v14600_v18   ;;  %v2679_v56 = vld [vmem:[%s19595_s2 + $0x528] sm:$0xff] }
 0x365   : > { %14619 = vrcp.f32 %v3450_v45  ;;  %v3461_v35 = vadd.f32 1.0, %v14602_v19  ;;  %9258 = vmatmul.mubr.bf16.gmra.mrb[20].mxu1 %v13660_v28  ;;  %v11932_v31 = vmul.f32 -1.442695, %v2849_v34  ;;  %v13676_v53 = vld [vmem:[%s15910_s6 + $0x2cc] ss:$44 sps:$4 sm:$0xff]  }
 0x366   : > { %v14604_v38 = vpop.eup %14603  ;;  %14621 = vpow2.f32 %v11854_v63  ;;  %v11845_v60 = vmul.f32 -1.442695, %v2762_v33  ;;  %9267 = vmatprep.mubr.bf16.mxu1 %v13664_v11  ;;  %v2073_v26 = vpop.xlane.xlu1 %2072 }
 0x367   : > { %v14606_v5 = vpop.eup %14605  ;;  %14623 = vrcp.f32 %v3461_v35  ;;  %v3452_v20 = vadd.f32 1.0, %v14604_v38  ;;  %v2028_v14 = vpop.xlane.xlu0 %2027  ;;  %v2773_v12 = vadd.f32 %v2599_v37, %v2073_v26  ;;  %v2674_v35 = vld [vmem:[%s19595_s2 + $0x500] sm:$0xff] }
 0x368   : > { %v14608_v54 = vpop.eup %14607  ;;  %14625 = vpow2.f32 %v11845_v60  ;;  %v2764_v27 = vadd.f32 %v2590_v55, %v2028_v14  ;;  %4621 = vperm.xlu0 %13364, %v14606_v5   ;;  %v13675_v55 = vld [vmem:[%s15910_s6 + $0x288] ss:$44 sps:$4 sm:$0xff]  }
 0x369   : > { %14627 = vrcp.f32 %v3452_v20  ;;  %v3463_v1 = vadd.f32 1.0, %v14608_v54  ;;  %10671 = vmatmul.mubr.bf16.gmra.mrb[20].mxu0 %v13663_v50  ;;  %v11856_v22 = vmul.f32 -1.442695, %v2773_v12  ;;  %v2603_v50 = vld [vmem:[%s19595_s2 + $0x2c8] sm:$0xff] }
 0x36a   : > { %v14610_v62 = vpop.eup %14609  ;;  %14629 = vpow2.f32 %v11932_v31  ;;  %v11847_v15 = vmul.f32 -1.442695, %v2764_v27  ;;  %10680 = vmatprep.mubr.bf16.mxu0 %v13667_v44  ;;  %v2463_v13 = vpop.xlane.xlu1 %2462  ;;  %v13679_v31 = vld [vmem:[%s15910_s6 + $0x2e4] ss:$44 sps:$4 sm:$0xff]  }
 0x36b   : > { %v14612_v58 = vpop.eup %14611  ;;  %14631 = vrcp.f32 %v3463_v1  ;;  %v3454_v41 = vadd.f32 1.0, %v14610_v62  ;;  %v2038_v36 = vpop.xlane.xlu0 %2037  ;;  %v2851_v46 = vadd.f32 %v2677_v48, %v2463_v13  ;;  %v2681_v48 = vld [vmem:[%s19595_s2 + $0x538] sm:$0xff] }
 0x36c   : > { %v14614_v57 = vpop.eup %14613  ;;  %14633 = vpow2.f32 %v11847_v15  ;;  %v2766_v24 = vadd.f32 %v2592_v42, %v2038_v36  ;;  %4581 = vperm.xlu1 %13365, %v14612_v58   ;;  %v2598_v42 = vld [vmem:[%s19595_s2 + $0x2a0] sm:$0xff] }
 0x36d   : > { %v14616_v10 = vpop.eup %14615  ;;  %14635 = vrcp.f32 %v3454_v41  ;;  %v3465_v7 = vadd.f32 1.0, %v14614_v57  ;;  %9268 = vmatmul.mubr.bf16.gmra.mrb[24].mxu1 %v13666_v30  ;;  %v11934_v9 = vmul.f32 -1.442695, %v2851_v46  ;;  %v13678_v30 = vld [vmem:[%s15910_s6 + $0x2c8] ss:$44 sps:$4 sm:$0xff]  }
 0x36e   : > { %v14618_v6 = vpop.eup %14617  ;;  %14637 = vpow2.f32 %v11856_v22  ;;  %v11849_v4 = vmul.f32 -1.442695, %v2766_v24  ;;  %4631 = vperm.xlu0 %13364, %v14616_v10   ;;  %9277 = vmatprep.mubr.bf16.mxu1 %v13670_v52  ;;  %v2083_v43 = vpop.xlane.xlu1 %2082  ;;  %v13682_v52 = vld [vmem:[%s15910_s6 + $0x324] ss:$44 sps:$4 sm:$0xff]  }
 0x36f   : > { %v14620_v59 = vpop.eup %14619  ;;  %14639 = vrcp.f32 %v3465_v7  ;;  %v3456_v21 = vadd.f32 1.0, %v14618_v6  ;;  %v2048_v16 = vpop.xlane.xlu0 %2047  ;;  %v2775_v3 = vadd.f32 %v2601_v61, %v2083_v43  ;;  %v2605_v61 = vld [vmem:[%s19595_s2 + $0x2d8] sm:$0xff] }
 0x370   : > { %v14622_v2 = vpop.eup %14621  ;;  %14641 = vpow2.f32 %v11849_v4  ;;  %v2768_v17 = vadd.f32 %v2594_v32, %v2048_v16  ;;  %4586 = vperm.xlu1 %13365, %v14620_v59   ;;  %v2676_v32 = vld [vmem:[%s19595_s2 + $0x510] sm:$0xff] }
 0x371   : > { %v14624_v51 = vpop.eup %14623  ;;  %14643 = vrcp.f32 %v3456_v21  ;;  %v3467_v29 = vadd.f32 1.0, %v14622_v2  ;;  %10681 = vmatmul.mubr.bf16.gmra.mrb[24].mxu0 %v13669_v49  ;;  %v11858_v40 = vmul.f32 -1.442695, %v2775_v3  ;;  %v13681_v49 = vld [vmem:[%s15910_s6 + $0x2e0] ss:$44 sps:$4 sm:$0xff]  }
 0x372   : > { %v14626_v28 = vpop.eup %14625  ;;  %14645 = vpow2.f32 %v11934_v9  ;;  %v11851_v25 = vmul.f32 -1.442695, %v2768_v17  ;;  %4641 = vperm.xlu0 %13364, %v14624_v51   ;;  %10690 = vmatprep.mubr.bf16.mxu0 %v13673_v8  ;;  %v2473_v45 = vpop.xlane.xlu1 %2472  ;;  %v13685_v8 = vld [vmem:[%s15910_s6 + $0x33c] ss:$44 sps:$4 sm:$0xff]  }
 0x373   : > { %v14628_v63 = vpop.eup %14627  ;;  %14647 = vrcp.f32 %v3467_v29  ;;  %v3458_v11 = vadd.f32 1.0, %v14626_v28  ;;  %v2058_v18 = vpop.xlane.xlu0 %2057  ;;  %v2853_v19 = vadd.f32 %v2679_v56, %v2473_v45  ;;  %v2683_v56 = vld [vmem:[%s19595_s2 + $0x548] sm:$0xff] }
 0x374   : > { %v14630_v39 = vpop.eup %14629  ;;  %14649 = vpow2.f32 %v11851_v25  ;;  %v2770_v23 = vadd.f32 %v2596_v47, %v2058_v18  ;;  %4596 = vperm.xlu1 %13365, %v14628_v63   ;;  %v2600_v47 = vld [vmem:[%s19595_s2 + $0x2b0] sm:$0xff] }
 0x375   : > { %v14632_v33 = vpop.eup %14631  ;;  %14651 = vrcp.f32 %v3458_v11  ;;  %v3545_v34 = vadd.f32 1.0, %v14630_v39  ;;  %9278 = vmatmul.mubr.bf16.gmra.mrb[28].mxu1 %v13672_v0  ;;  %v11936_v60 = vmul.f32 -1.442695, %v2853_v19  ;;  %v13684_v0 = vld [vmem:[%s15910_s6 + $0x320] ss:$44 sps:$4 sm:$0xff]  }
 0x376   : > { %v14634_v37 = vpop.eup %14633  ;;  %14653 = vpow2.f32 %v11858_v40  ;;  %v11853_v38 = vmul.f32 -1.442695, %v2770_v23  ;;  %4651 = vperm.xlu0 %13364, %v14632_v33   ;;  %9287 = vmatprep.mubr.bf16.mxu1 %v13676_v53  ;;  %v2093_v14 = vpop.xlane.xlu1 %2092  ;;  %v13688_v53 = vld [vmem:[%s15910_s6 + $0x37c] ss:$44 sps:$4 sm:$0xff]  }
 0x377   : > { %v14636_v44 = vpop.eup %14635  ;;  %14655 = vrcp.f32 %v3545_v34  ;;  %v3460_v5 = vadd.f32 1.0, %v14634_v37  ;;  %v2448_v20 = vpop.xlane.xlu0 %2447  ;;  %v2777_v27 = vadd.f32 %v2603_v50, %v2093_v14  ;;  %v2607_v50 = vld [vmem:[%s19595_s2 + $0x2e8] sm:$0xff] }
 0x378   : > { %v14638_v26 = vpop.eup %14637  ;;  %14657 = vpow2.f32 %v11853_v38  ;;  %v2848_v54 = vadd.f32 %v2674_v35, %v2448_v20  ;;  %4606 = vperm.xlu1 %13365, %v14636_v44   ;;  %v2678_v35 = vld [vmem:[%s19595_s2 + $0x520] sm:$0xff] }
 0x379   : > { %v14640_v12 = vpop.eup %14639  ;;  %14659 = vrcp.f32 %v3460_v5  ;;  %v3469_v1 = vadd.f32 1.0, %v14638_v26  ;;  %10691 = vmatmul.mubr.bf16.gmra.mrb[28].mxu0 %v13675_v55  ;;  %v11860_v22 = vmul.f32 -1.442695, %v2777_v27  ;;  %v13687_v55 = vld [vmem:[%s15910_s6 + $0x338] ss:$44 sps:$4 sm:$0xff]  }
 0x37a   : > { %v14642_v62 = vpop.eup %14641  ;;  %14661 = vpow2.f32 %v11936_v60  ;;  %v11931_v15 = vmul.f32 -1.442695, %v2848_v54  ;;  %4661 = vperm.xlu0 %13364, %v14640_v12   ;;  %10700 = vmatprep.mubr.bf16.mxu0 %v13679_v31  ;;  %v2483_v13 = vpop.xlane.xlu1 %2482  ;;  %v13691_v31 = vld [vmem:[%s15910_s6 + $0x394] ss:$44 sps:$4 sm:$0xff]  }
 0x37b   : > { %v14644_v58 = vpop.eup %14643  ;;  %14663 = vrcp.f32 %v3469_v1  ;;  %v3462_v41 = vadd.f32 1.0, %v14642_v62  ;;  %v2068_v36 = vpop.xlane.xlu0 %2067  ;;  %v2855_v46 = vadd.f32 %v2681_v48, %v2483_v13  ;;  %v2685_v48 = vld [vmem:[%s19595_s2 + $0x558] sm:$0xff] }
 0x37c   : > { %v14646_v57 = vpop.eup %14645  ;;  %14665 = vpow2.f32 %v11931_v15  ;;  %v2772_v24 = vadd.f32 %v2598_v42, %v2068_v36  ;;  %4616 = vperm.xlu1 %13365, %v14644_v58   ;;  %v2602_v42 = vld [vmem:[%s19595_s2 + $0x2c0] sm:$0xff] }
 0x37d   : > { %v14648_v10 = vpop.eup %14647  ;;  %14667 = vrcp.f32 %v3462_v41  ;;  %v3547_v7 = vadd.f32 1.0, %v14646_v57  ;;  %9288 = vmatmul.mubr.bf16.gmra.mrb[32].mxu1 %v13678_v30  ;;  %v11938_v9 = vmul.f32 -1.442695, %v2855_v46  ;;  %v13690_v30 = vld [vmem:[%s15910_s6 + $0x378] ss:$44 sps:$4 sm:$0xff]  }
 0x37e   : > { %v14650_v6 = vpop.eup %14649  ;;  %14669 = vpow2.f32 %v11860_v22  ;;  %v11855_v4 = vmul.f32 -1.442695, %v2772_v24  ;;  %4671 = vperm.xlu0 %13364, %v14648_v10   ;;  %9297 = vmatprep.mubr.bf16.mxu1 %v13682_v52  ;;  %v2103_v43 = vpop.xlane.xlu1 %2102  ;;  %v13694_v52 = vld [vmem:[%s15910_s6 + $0x3d4] ss:$44 sps:$4 sm:$0xff]  }
 0x37f   : > { %v14652_v59 = vpop.eup %14651  ;;  %14671 = vrcp.f32 %v3547_v7  ;;  %v3464_v21 = vadd.f32 1.0, %v14650_v6  ;;  %v2458_v16 = vpop.xlane.xlu0 %2457  ;;  %v2779_v3 = vadd.f32 %v2605_v61, %v2103_v43  ;;  %v2609_v61 = vld [vmem:[%s19595_s2 + $0x2f8] sm:$0xff] }
 0x380   : > { %v14654_v2 = vpop.eup %14653  ;;  %14673 = vpow2.f32 %v11855_v4  ;;  %v2850_v17 = vadd.f32 %v2676_v32, %v2458_v16  ;;  %4626 = vperm.xlu1 %13365, %v14652_v59   ;;  %v2680_v32 = vld [vmem:[%s19595_s2 + $0x530] sm:$0xff] }
 0x381   : > { %v14656_v51 = vpop.eup %14655  ;;  %14675 = vrcp.f32 %v3464_v21  ;;  %v3471_v29 = vadd.f32 1.0, %v14654_v2  ;;  %10701 = vmatmul.mubr.bf16.gmra.mrb[32].mxu0 %v13681_v49  ;;  %v11862_v40 = vmul.f32 -1.442695, %v2779_v3  ;;  %v13693_v49 = vld [vmem:[%s15910_s6 + $0x390] ss:$44 sps:$4 sm:$0xff]  }
 0x382   : > { %v14658_v28 = vpop.eup %14657  ;;  %14677 = vpow2.f32 %v11938_v9  ;;  %v11933_v25 = vmul.f32 -1.442695, %v2850_v17  ;;  %5061 = vperm.xlu0 %13364, %v14656_v51   ;;  %10710 = vmatprep.mubr.bf16.mxu0 %v13685_v8  ;;  %v2493_v45 = vpop.xlane.xlu1 %2492  ;;  %v13697_v8 = vld [vmem:[%s15910_s6 + $0x3ec] ss:$44 sps:$4 sm:$0xff]  }
 0x383   : > { %v14660_v63 = vpop.eup %14659  ;;  %14679 = vrcp.f32 %v3471_v29  ;;  %v3466_v11 = vadd.f32 1.0, %v14658_v28  ;;  %v2078_v18 = vpop.xlane.xlu0 %2077  ;;  %v2857_v19 = vadd.f32 %v2683_v56, %v2493_v45  ;;  %v2687_v56 = vld [vmem:[%s19595_s2 + $0x568] sm:$0xff] }
 0x384   : > { %v14662_v39 = vpop.eup %14661  ;;  %14681 = vpow2.f32 %v11933_v25  ;;  %v2774_v23 = vadd.f32 %v2600_v47, %v2078_v18  ;;  %4636 = vperm.xlu1 %13365, %v14660_v63   ;;  %v2604_v47 = vld [vmem:[%s19595_s2 + $0x2d0] sm:$0xff] }
 0x385   : > { %v14664_v33 = vpop.eup %14663  ;;  %14683 = vrcp.f32 %v3466_v11  ;;  %v3549_v34 = vadd.f32 1.0, %v14662_v39  ;;  %9298 = vmatmul.mubr.bf16.gmra.mrb[36].mxu1 %v13684_v0  ;;  %v11940_v60 = vmul.f32 -1.442695, %v2857_v19  ;;  %v13696_v0 = vld [vmem:[%s15910_s6 + $0x3d0] ss:$44 sps:$4 sm:$0xff]  }
 0x386   : > { %v14666_v37 = vpop.eup %14665  ;;  %14685 = vpow2.f32 %v11862_v40  ;;  %v11857_v38 = vmul.f32 -1.442695, %v2774_v23  ;;  %4681 = vperm.xlu0 %13364, %v14664_v33   ;;  %9307 = vmatprep.mubr.bf16.mxu1 %v13688_v53  ;;  %v2113_v14 = vpop.xlane.xlu1 %2112  ;;  %v13700_v53 = vld [vmem:[%s15910_s6 + $0x42c] ss:$44 sps:$4 sm:$0xff]  }
 0x387   : > { %v14668_v44 = vpop.eup %14667  ;;  %14687 = vrcp.f32 %v3549_v34  ;;  %v3544_v5 = vadd.f32 1.0, %v14666_v37  ;;  %v2468_v20 = vpop.xlane.xlu0 %2467  ;;  %v2781_v27 = vadd.f32 %v2607_v50, %v2113_v14 }
 0x388   : > { %v14670_v26 = vpop.eup %14669  ;;  %14689 = vpow2.f32 %v11857_v38  ;;  %v2852_v54 = vadd.f32 %v2678_v35, %v2468_v20  ;;  %4646 = vperm.xlu1 %13365, %v14668_v44   ;;  %v2682_v35 = vld [vmem:[%s19595_s2 + $0x540] sm:$0xff] }
 0x389   : > { %v14672_v12 = vpop.eup %14671  ;;  %14691 = vrcp.f32 %v3544_v5  ;;  %v3473_v1 = vadd.f32 1.0, %v14670_v26  ;;  %10711 = vmatmul.mubr.bf16.gmra.mrb[36].mxu0 %v13687_v55  ;;  %v11864_v22 = vmul.f32 -1.442695, %v2781_v27  ;;  %v13699_v55 = vld [vmem:[%s15910_s6 + $0x3e8] ss:$44 sps:$4 sm:$0xff]   ;;  %v2606_v27 = vld [vmem:[%s19595_s2 + $0x2e0] sm:$0xff] }
 0x38a   : > { %v14674_v62 = vpop.eup %14673  ;;  %14693 = vpow2.f32 %v11940_v60  ;;  %v11935_v15 = vmul.f32 -1.442695, %v2852_v54  ;;  %5071 = vperm.xlu0 %13364, %v14672_v12   ;;  %10720 = vmatprep.mubr.bf16.mxu0 %v13691_v31  ;;  %v2503_v13 = vpop.xlane.xlu1 %2502  ;;  %v13703_v60 = vld [vmem:[%s15910_s6 + $0x444] ss:$44 sps:$4 sm:$0xff]   ;;  %v13702_v12 = vld [vmem:[%s15910_s6 + $0x428] ss:$44 sps:$4 sm:$0xff]  }
 0x38b   : > { %v14676_v58 = vpop.eup %14675  ;;  %14695 = vrcp.f32 %v3473_v1  ;;  %v3468_v41 = vadd.f32 1.0, %v14674_v62  ;;  %v2088_v36 = vpop.xlane.xlu0 %2087  ;;  %v2859_v46 = vadd.f32 %v2685_v48, %v2503_v13  ;;  %v13705_v13 = vld [vmem:[%s15910_s6 + $0x440] ss:$44 sps:$4 sm:$0xff]  }
 0x38c   : > { %v14678_v57 = vpop.eup %14677  ;;  %14697 = vpow2.f32 %v11935_v15  ;;  %v2776_v24 = vadd.f32 %v2602_v42, %v2088_v36  ;;  %4656 = vperm.xlu1 %13365, %v14676_v58   ;;  %v2684_v36 = vld [vmem:[%s19595_s2 + $0x550] sm:$0xff] }
 0x38d   : > { %v14680_v10 = vpop.eup %14679  ;;  %14699 = vrcp.f32 %v3468_v41  ;;  %v3551_v7 = vadd.f32 1.0, %v14678_v57  ;;  %9308 = vmatmul.mubr.bf16.gmra.mrb[40].mxu1 %v13690_v30  ;;  %v11942_v9 = vmul.f32 -1.442695, %v2859_v46  ;;  %v13706_v30 = vld [vmem:[%s15910_s6 + $0x484] ss:$44 sps:$4 sm:$0xff]  }
 0x38e   : > { %v14682_v6 = vpop.eup %14681  ;;  %14701 = vpow2.f32 %v11864_v22  ;;  %v11859_v4 = vmul.f32 -1.442695, %v2776_v24  ;;  %4691 = vperm.xlu0 %13364, %v14680_v10   ;;  %9317 = vmatprep.mubr.bf16.mxu1 %v13694_v52  ;;  %v2123_v43 = vpop.xlane.xlu1 %2122  ;;  %v13709_v46 = vld [vmem:[%s15910_s6 + $0x49c] ss:$44 sps:$4 sm:$0xff]  }
 0x38f   : > { %v14684_v59 = vpop.eup %14683  ;;  %14703 = vrcp.f32 %v3551_v7  ;;  %v3546_v21 = vadd.f32 1.0, %v14682_v6  ;;  %v2478_v16 = vpop.xlane.xlu0 %2477  ;;  %v2783_v3 = vadd.f32 %v2609_v61, %v2123_v43 }
 0x390   : > { %v14686_v2 = vpop.eup %14685  ;;  %14705 = vpow2.f32 %v11859_v4  ;;  %v2854_v17 = vadd.f32 %v2680_v32, %v2478_v16  ;;  %4666 = vperm.xlu1 %13365, %v14684_v59   ;;  %v13712_v16 = vld [vmem:[%s15910_s6 + $0x4dc] ss:$44 sps:$4 sm:$0xff]  }
 0x391   : > { %v14688_v51 = vpop.eup %14687  ;;  %14707 = vrcp.f32 %v3546_v21  ;;  %v3475_v29 = vadd.f32 1.0, %v14686_v2  ;;  %10721 = vmatmul.mubr.bf16.gmra.mrb[40].mxu0 %v13693_v49  ;;  %v11866_v40 = vmul.f32 -1.442695, %v2783_v3 }
 0x392   : > { %v14690_v28 = vpop.eup %14689  ;;  %14709 = vpow2.f32 %v11942_v9  ;;  %v11937_v25 = vmul.f32 -1.442695, %v2854_v17  ;;  %5081 = vperm.xlu0 %13364, %v14688_v51   ;;  %10730 = vmatprep.mubr.bf16.mxu0 %v13697_v8  ;;  %v2513_v45 = vpop.xlane.xlu1 %2512  ;;  %v2608_v9 = vld [vmem:[%s19595_s2 + $0x2f0] sm:$0xff]  ;;  %v13708_v8 = vld [vmem:[%s15910_s6 + $0x480] ss:$44 sps:$4 sm:$0xff]  }
 0x393   : > { %v14692_v63 = vpop.eup %14691  ;;  %14711 = vrcp.f32 %v3475_v29  ;;  %v3470_v11 = vadd.f32 1.0, %v14690_v28  ;;  %v2098_v18 = vpop.xlane.xlu0 %2097  ;;  %v2861_v19 = vadd.f32 %v2687_v56, %v2513_v45  ;;  %v13711_v56 = vld [vmem:[%s15910_s6 + $0x498] ss:$44 sps:$4 sm:$0xff]  }
 0x394   : > { %v14694_v39 = vpop.eup %14693  ;;  %14713 = vpow2.f32 %v11937_v25  ;;  %v2778_v23 = vadd.f32 %v2604_v47, %v2098_v18  ;;  %5056 = vperm.xlu1 %13365, %v14692_v63  }
 0x395   : > { %v14696_v33 = vpop.eup %14695  ;;  %14715 = vrcp.f32 %v3470_v11  ;;  %v3553_v34 = vadd.f32 1.0, %v14694_v39  ;;  %9318 = vmatmul.mubr.bf16.gmra.mrb[44].mxu1 %v13696_v0  ;;  %v11944_v38 = vmul.f32 -1.442695, %v2861_v19  ;;  %v2686_v0 = vld [vmem:[%s19595_s2 + $0x560] sm:$0xff] }
 0x396   : > { %v14698_v50 = vpop.eup %14697  ;;  %14717 = vpow2.f32 %v11866_v40  ;;  %v11861_v37 = vmul.f32 -1.442695, %v2778_v23  ;;  %4701 = vperm.xlu0 %13364, %v14696_v33   ;;  %9327 = vmatprep.mubr.bf16.mxu1 %v13700_v53  ;;  %v13715_v40 = vld [vmem:[%s15910_s6 + $0x4f4] ss:$44 sps:$4 sm:$0xff]   ;;  %v13714_v39 = vld [vmem:[%s15910_s6 + $0x4d8] ss:$44 sps:$4 sm:$0xff]  }
 0x397   : > { %v14700_v31 = vpop.eup %14699  ;;  %14719 = vrcp.f32 %v3553_v34  ;;  %v3548_v44 = vadd.f32 1.0, %v14698_v50  ;;  %v2488_v5 = vpop.xlane.xlu0 %2487  ;;  %v13718_v33 = vld [vmem:[%s15910_s6 + $0x534] ss:$44 sps:$4 sm:$0xff]   ;;  %v13717_v50 = vld [vmem:[%s15910_s6 + $0x4f0] ss:$44 sps:$4 sm:$0xff]  }
 0x398   : > { %v14702_v20 = vpop.eup %14701  ;;  %14721 = vpow2.f32 %v11861_v37  ;;  %v2856_v14 = vadd.f32 %v2682_v35, %v2488_v5  ;;  %4676 = vperm.xlu1 %13365, %v14700_v31   ;;  %v13720_v5 = vld [vmem:[%s15910_s6 + $0x530] ss:$44 sps:$4 sm:$0xff]  }
 0x399   : > { %v14704_v26 = vpop.eup %14703  ;;  %14723 = vrcp.f32 %v3548_v44  ;;  %v3477_v54 = vadd.f32 1.0, %v14702_v20  ;;  %10731 = vmatmul.mubr.bf16.gmra.mrb[44].mxu0 %v13699_v55 }
 0x39a   : > { %v14706_v1 = vpop.eup %14705  ;;  %14725 = vpow2.f32 %v11944_v38  ;;  %v11939_v42 = vmul.f32 -1.442695, %v2856_v14  ;;  %5091 = vperm.xlu0 %13364, %v14704_v26   ;;  %10740 = vmatprep.mubr.bf16.mxu0 %v13703_v60  ;;  %v13721_v38 = vld [vmem:[%s15910_s6 + $0x54c] ss:$44 sps:$4 sm:$0xff]  }
 0x39b   : > { %v14708_v48 = vpop.eup %14707  ;;  %14727 = vrcp.f32 %v3477_v54  ;;  %v3472_v62 = vadd.f32 1.0, %v14706_v1  ;;  %v2108_v15 = vpop.xlane.xlu0 %2107  ;;  %v13724_v14 = vld [vmem:[%s15910_s6 + $0x58c] ss:$44 sps:$4 sm:$0xff]   ;;  %v13727_v1 = vld [vmem:[%s15910_s6 + $0x5a4] ss:$44 sps:$4 sm:$0xff]  }
 0x39c   : > { %v14710_v22 = vpop.eup %14709  ;;  %14729 = vpow2.f32 %v11939_v42  ;;  %v2780_v52 = vadd.f32 %v2606_v27, %v2108_v15  ;;  %5066 = vperm.xlu1 %13365, %v14708_v48   ;;  %v13723_v27 = vld [vmem:[%s15910_s6 + $0x548] ss:$44 sps:$4 sm:$0xff]  }
 0x39d   : > { %v14712_v58 = vpop.eup %14711  ;;  %14731 = vrcp.f32 %v3472_v62  ;;  %v3555_v41 = vadd.f32 1.0, %v14710_v22  ;;  %9328 = vmatmul.mubr.bf16.gmra.mrb[48].mxu1 %v13702_v12  ;;  %v13726_v48 = vld [vmem:[%s15910_s6 + $0x588] ss:$44 sps:$4 sm:$0xff]   ;;  %v13730_v62 = vld [vmem:[%s15910_s6 + $0x5e4] ss:$44 sps:$4 sm:$0xff]  }
 0x39e   : > { %v14714_v57 = vpop.eup %14713  ;;  %v11863_v24 = vmul.f32 -1.442695, %v2780_v52  ;;  %4711 = vperm.xlu0 %13364, %v14712_v58   ;;  %9337 = vmatprep.mubr.bf16.mxu1 %v13706_v30  ;;  %v13729_v22 = vld [vmem:[%s15910_s6 + $0x5a0] ss:$44 sps:$4 sm:$0xff]   ;;  %v13733_v52 = vld [vmem:[%s15910_s6 + $0x5fc] ss:$44 sps:$4 sm:$0xff]  }
 0x39f   : > { %v14716_v10 = vpop.eup %14715  ;;  %14733 = vrcp.f32 %v3555_v41  ;;  %v3550_v7 = vadd.f32 1.0, %v14714_v57  ;;  %v2498_v32 = vpop.xlane.xlu0 %2497  ;;  %v13732_v41 = vld [vmem:[%s15910_s6 + $0x5e0] ss:$44 sps:$4 sm:$0xff]   ;;  %v13735_v57 = vld [vmem:[%s15910_s6 + $0x5f8] ss:$44 sps:$4 sm:$0xff]  }
 0x3a0   : > { %v14718_v49 = vpop.eup %14717  ;;  %14735 = vpow2.f32 %v11863_v24  ;;  %v2858_v61 = vadd.f32 %v2684_v36, %v2498_v32  ;;  %4686 = vperm.xlu1 %13365, %v14716_v10   ;;  %v13736_v36 = vld [vmem:[%s15910_s6 + $0x63c] ss:$44 sps:$4 sm:$0xff]   ;;  %v13739_v24 = vld [vmem:[%s15910_s6 + $0x654] ss:$44 sps:$4 sm:$0xff]   ;;  %v13745_v32 = vld [vmem:[%s15910_s6 + $0x6ac] ss:$44 sps:$4 sm:$0xff]  }
 0x3a1   : > { %v14720_v6 = vpop.eup %14719  ;;  %14737 = vrcp.f32 %v3550_v7  ;;  %v3479_v4 = vadd.f32 1.0, %v14718_v49  ;;  %10741 = vmatmul.mubr.bf16.gmra.mrb[48].mxu0 %v13705_v13  ;;  %v13742_v10 = vld [vmem:[%s15910_s6 + $0x694] ss:$44 sps:$4 sm:$0xff]   ;;  %v13741_v7 = vld [vmem:[%s15910_s6 + $0x650] ss:$44 sps:$4 sm:$0xff]  }
 0x3a2   : > { %v14722_v59 = vpop.eup %14721  ;;  %v11941_v21 = vmul.f32 -1.442695, %v2858_v61  ;;  %5101 = vperm.xlu0 %13364, %v14720_v6   ;;  %10750 = vmatprep.mubr.bf16.mxu0 %v13709_v46  ;;  %v13738_v46 = vld [vmem:[%s15910_s6 + $0x638] ss:$44 sps:$4 sm:$0xff]   ;;  %v13744_v49 = vld [vmem:[%s15910_s6 + $0x690] ss:$44 sps:$4 sm:$0xff]  }
 0x3a3   : > { %v14724_v43 = vpop.eup %14723  ;;  %14739 = vrcp.f32 %v3479_v4  ;;  %v3474_v2 = vadd.f32 1.0, %v14722_v59  ;;  %v2118_v17 = vpop.xlane.xlu0 %2117  ;;  %v13748_v61 = vld [vmem:[%s15910_s6 + $0x6ec] ss:$44 sps:$4 sm:$0xff]   ;;  %v13747_v6 = vld [vmem:[%s15910_s6 + $0x6a8] ss:$44 sps:$4 sm:$0xff]  }
 0x3a4   : > { %v14726_v3 = vpop.eup %14725  ;;  %14741 = vpow2.f32 %v11941_v21  ;;  %v2782_v51 = vadd.f32 %v2608_v9, %v2118_v17  ;;  %5076 = vperm.xlu1 %13365, %v14724_v43   ;;  %v13751_v4 = vld [vmem:[%s15910_s6 + $0x704] ss:$44 sps:$4 sm:$0xff]   ;;  %v13757_v43 = vld [vmem:[%s15910_s6 + $0x75c] ss:$44 sps:$4 sm:$0xff]   ;;  %v13756_v17 = vld [vmem:[%s15910_s6 + $0x740] ss:$44 sps:$4 sm:$0xff]  }
 0x3a5   : > { %v14728_v29 = vpop.eup %14727  ;;  %14743 = vrcp.f32 %v3474_v2  ;;  %v3557_v47 = vadd.f32 1.0, %v14726_v3  ;;  %9338 = vmatmul.mubr.bf16.gmra.mrb[52].mxu1 %v13708_v8  ;;  %v13750_v8 = vld [vmem:[%s15910_s6 + $0x6e8] ss:$44 sps:$4 sm:$0xff]   ;;  %v13754_v59 = vld [vmem:[%s15910_s6 + $0x744] ss:$44 sps:$4 sm:$0xff]  }
 0x3a6   : > { %v14730_v28 = vpop.eup %14729  ;;  %v11865_v25 = vmul.f32 -1.442695, %v2782_v51  ;;  %4721 = vperm.xlu0 %13364, %v14728_v29   ;;  %9347 = vmatprep.mubr.bf16.mxu1 %v13712_v16  ;;  %v13753_v16 = vld [vmem:[%s15910_s6 + $0x700] ss:$44 sps:$4 sm:$0xff]   ;;  %v13760_v3 = vld [vmem:[%s15910_s6 + $0x79c] ss:$44 sps:$4 sm:$0xff]  }
 0x3a7   : > { %v14732_v53 = vpop.eup %14731  ;;  %14745 = vrcp.f32 %v3557_v47  ;;  %v3552_v63 = vadd.f32 1.0, %v14730_v28  ;;  %v2508_v11 = vpop.xlane.xlu0 %2507  ;;  %v13759_v29 = vld [vmem:[%s15910_s6 + $0x758] ss:$44 sps:$4 sm:$0xff]   ;;  %v13763_v47 = vld [vmem:[%s15910_s6 + $0x7b4] ss:$44 sps:$4 sm:$0xff]   ;;  %v4035_v28 = vld [vmem:[%s19596_s3 + $0x408] sm:$0xff] }
 0x3a8   : > { %14747 = vpow2.f32 %v11865_v25  ;;  %v2860_v18 = vadd.f32 %v2686_v0, %v2508_v11  ;;  %4696 = vperm.xlu1 %13365, %v14732_v53   ;;  %v4036_v25 = vld [vmem:[%s19596_s3 + $0x410] sm:$0xff]  ;;  %v13762_v53 = vld [vmem:[%s15910_s6 + $0x798] ss:$44 sps:$4 sm:$0xff]  }
 0x3a9   : > { %v14734_v45 = vpop.eup %14733  ;;  %14749 = vrcp.f32 %v3552_v63  ;;  %10751 = vmatmul.mubr.bf16.gmra.mrb[52].mxu0 %v13711_v56  ;;  %v4034_v56 = vld [vmem:[%s19596_s3 + $0x400] sm:$0xff] }
 0x3aa   : > { %v14736_v23 = vpop.eup %14735  ;;  %v11943_v19 = vmul.f32 -1.442695, %v2860_v18  ;;  %5111 = vperm.xlu0 %13364, %v14734_v45   ;;  %10760 = vmatprep.mubr.bf16.mxu0 %v13715_v40  ;;  %v4037_v40 = vld [vmem:[%s19596_s3 + $0x418] sm:$0xff]  ;;  %v13766_v63 = vld [vmem:[%s15910_s6 + $0x7f4] ss:$44 sps:$4 sm:$0xff]  }
 0x3ab   : > { %v14738_v34 = vpop.eup %14737  ;;  %v3476_v35 = vadd.f32 1.0, %v14736_v23  ;;  %v4041_v23 = vld [vmem:[%s19596_s3 + $0x438] sm:$0xff] }
 0x3ac   : > { %14751 = vpow2.f32 %v11943_v19  ;;  %5086 = vperm.xlu1 %13365, %v14738_v34   ;;  %v4038_v34 = vld [vmem:[%s19596_s3 + $0x420] sm:$0xff] }
 0x3ad   : > { %v14740_v55 = vpop.eup %14739  ;;  %14753 = vrcp.f32 %v3476_v35  ;;  %9348 = vmatmul.mubr.bf16.gmra.mrb[56].mxu1 %v13714_v39  ;;  %v4040_v39 = vld [vmem:[%s19596_s3 + $0x430] sm:$0xff]  ;;  %v4039_v35 = vld [vmem:[%s19596_s3 + $0x428] sm:$0xff] }
 0x3ae   : > { %v14742_v37 = vpop.eup %14741  ;;  %4731 = vperm.xlu0 %13364, %v14740_v55   ;;  %9357 = vmatprep.mubr.bf16.mxu1 %v13718_v33 }
 0x3af   : > { %v14744_v60 = vpop.eup %14743  ;;  %v3554_v31 = vadd.f32 1.0, %v14742_v37 }
 0x3b0   : > { %4706 = vperm.xlu1 %13365, %v14744_v60   ;;  %v13769_v60 = vld [vmem:[%s15910_s6 + $0x80c] ss:$44 sps:$4 sm:$0xff]  }
 0x3b1   : > { %v14746_v44 = vpop.eup %14745  ;;  %14755 = vrcp.f32 %v3554_v31  ;;  %10761 = vmatmul.mubr.bf16.gmra.mrb[56].mxu0 %v13717_v50  ;;  %v13765_v50 = vld [vmem:[%s15910_s6 + $0x7b0] ss:$44 sps:$4 sm:$0xff]  }
 0x3b2   : > { %v14748_v20 = vpop.eup %14747  ;;  %5121 = vperm.xlu0 %13364, %v14746_v44   ;;  %10770 = vmatprep.mubr.bf16.mxu0 %v13721_v38 }
 0x3b3   : > { %v14750_v26 = vpop.eup %14749  ;;  %v3478_v54 = vadd.f32 1.0, %v14748_v20  ;;  %v4044_v20 = vld [vmem:[%s19596_s3 + $0x450] sm:$0xff] }
 0x3b4   : > { %5096 = vperm.xlu1 %13365, %v14750_v26  }
 0x3b5   : > { %14757 = vrcp.f32 %v3478_v54  ;;  %9358 = vmatmul.mubr.bf16.gmra.mrb[60].mxu1 %v13720_v5 }
 0x3b6   : > { %v14752_v12 = vpop.eup %14751  ;;  %9367 = vmatprep.mubr.bf16.mxu1 %v13724_v14  ;;  %v4045_v14 = vld [vmem:[%s19596_s3 + $0x458] sm:$0xff] }
 0x3b7   : > { %v14754_v42 = vpop.eup %14753  ;;  %v3556_v30 = vadd.f32 1.0, %v14752_v12  ;;  %v4043_v12 = vld [vmem:[%s19596_s3 + $0x448] sm:$0xff] }
 0x3b8   : > { %4716 = vperm.xlu1 %13365, %v14754_v42   ;;  %v13768_v42 = vld [vmem:[%s15910_s6 + $0x7f0] ss:$44 sps:$4 sm:$0xff]  }
 0x3b9   : > { %14759 = vrcp.f32 %v3556_v30  ;;  %10771 = vmatmul.mubr.bf16.gmra.mrb[60].mxu0 %v13723_v27  ;;  %v4042_v27 = vld [vmem:[%s19596_s3 + $0x440] sm:$0xff] }
 0x3ba   : > { %10780 = vmatprep.mubr.bf16.mxu0 %v13727_v1 }
 0x3bb   : > { %v14756_v15 = vpop.eup %14755 }
 0x3bc   : > { %5106 = vperm.xlu1 %13365, %v14756_v15   ;;  %v13772_v15 = vld [vmem:[%s15910_s6 + $0x84c] ss:$44 sps:$4 sm:$0xff]  }
 0x3bd   : > { %9368 = vmatmul.mubr.bf16.gmra.mrb[64].mxu1 %v13726_v48 }
 0x3be   : > { %9377 = vmatprep.mubr.bf16.mxu1 %v13730_v62 }
 0x3bf   : > { %v14758_v58 = vpop.eup %14757 }
 0x3c0   : > { %4726 = vperm.xlu1 %13365, %v14758_v58   ;;  %v4048_v58 = vld [vmem:[%s19596_s3 + $0x470] sm:$0xff] }
 0x3c1   : > { %10781 = vmatmul.mubr.bf16.gmra.mrb[64].mxu0 %v13729_v22 }
 0x3c2   : > { %10790 = vmatprep.mubr.bf16.mxu0 %v13733_v52 }
 0x3c3   : > { %v14760_v13 = vpop.eup %14759 }
 0x3c4   : > { %5116 = vperm.xlu1 %13365, %v14760_v13  }
 0x3c5   : > { %9378 = vmatmul.mubr.bf16.gmra.mrb[68].mxu1 %v13732_v41  ;;  %v4049_v41 = vld [vmem:[%s19596_s3 + $0x478] sm:$0xff] }
 0x3c6   : > { %9387 = vmatprep.mubr.bf16.mxu1 %v13736_v36 }
 0x3c9   : > { %10791 = vmatmul.mubr.bf16.gmra.mrb[68].mxu0 %v13735_v57  ;;  %v4046_v57 = vld [vmem:[%s19596_s3 + $0x460] sm:$0xff] }
 0x3ca   : > { %10800 = vmatprep.mubr.bf16.mxu0 %v13739_v24  ;;  %v4047_v24 = vld [vmem:[%s19596_s3 + $0x468] sm:$0xff] }
 0x3cd   : > { %9388 = vmatmul.mubr.bf16.gmra.mrb[72].mxu1 %v13738_v46 }
 0x3ce   : > { %9397 = vmatprep.mubr.bf16.mxu1 %v13742_v10  ;;  %v13771_v10 = vld [vmem:[%s15910_s6 + $0x808] ss:$44 sps:$4 sm:$0xff]  }
 0x3d1   : > { %10801 = vmatmul.mubr.bf16.gmra.mrb[72].mxu0 %v13741_v7 }
 0x3d2   : > { %10810 = vmatprep.mubr.bf16.mxu0 %v13745_v32 }
 0x3d5   : > { %9398 = vmatmul.mubr.bf16.gmra.mrb[76].mxu1 %v13744_v49 }
 0x3d6   : > { %9407 = vmatprep.mubr.bf16.mxu1 %v13748_v61  ;;  %v4577_v9 = vpop.permute.xlu0 %4576  ;;  %v13775_v61 = vld [vmem:[%s15910_s6 + $0x864] ss:$44 sps:$4 sm:$0xff]  }
 0x3d7   : > { %v5252_v18 = vmul.f32 %v4577_v9, %v4034_v56  ;;  %v5253_v45 = vmul.f32 %v4577_v9, %v4035_v28  ;;  %v4052_v9 = vld [vmem:[%s19596_s3 + $0x490] sm:$0xff] }
 0x3d9   : > { %10811 = vmatmul.mubr.bf16.gmra.mrb[76].mxu0 %v13747_v6 }
 0x3da   : > { %10820 = vmatprep.mubr.bf16.mxu0 %v13751_v4  ;;  %v4592_v21 = vpop.permute.xlu0 %4591 }
 0x3db   : > { %v5258_v44 = vmul.f32 %v4592_v21, %v4040_v39  ;;  %v5259_v5 = vmul.f32 %v4592_v21, %v4041_v23 }
 0x3dd   : > { %9408 = vmatmul.mubr.bf16.gmra.mrb[80].mxu1 %v13750_v8  ;;  %v4053_v8 = vld [vmem:[%s19596_s3 + $0x498] sm:$0xff] }
 0x3de   : > { %9417 = vmatprep.mubr.bf16.mxu1 %v13754_v59 }
 0x3df   : > { %v4602_v2 = vpop.permute.xlu0 %4601 }
 0x3e0   : > { %v5262_v22 = vmul.f32 %v4602_v2, %v4044_v20  ;;  %v5263_v52 = vmul.f32 %v4602_v2, %v4045_v14 }
 0x3e1   : > { %10821 = vmatmul.mubr.bf16.gmra.mrb[80].mxu0 %v13753_v16  ;;  %v4050_v16 = vld [vmem:[%s19596_s3 + $0x480] sm:$0xff] }
 0x3e2   : > { %10830 = vmatprep.mubr.bf16.mxu0 %v13757_v43  ;;  %v4051_v43 = vld [vmem:[%s19596_s3 + $0x488] sm:$0xff] }
 0x3e3   : > { %v18686_v51 = vpop.permute.xlu0 %4611 }
 0x3e4   : > { %v5266_v6 = vmul.f32 %v18686_v51, %v4048_v58  ;;  %v5267_v4 = vmul.f32 %v18686_v51, %v4049_v41 }
 0x3e5   : > { %9418 = vmatmul.mubr.bf16.gmra.mrb[84].mxu1 %v13756_v17  ;;  %v13774_v17 = vld [vmem:[%s15910_s6 + $0x848] ss:$44 sps:$4 sm:$0xff]  }
 0x3e6   : > { %9427 = vmatprep.mubr.bf16.mxu1 %v13760_v3 }
 0x3e7   : > { %v18690_v0 = vpop.permute.xlu0 %4621 }
 0x3e8   : > { %v5270_v56 = vmul.f32 %v18690_v0, %v4052_v9  ;;  %v5271_v28 = vmul.f32 %v18690_v0, %v4053_v8  ;;  %v4055_v0 = vld [vmem:[%s19596_s3 + $0x4a8] sm:$0xff] }
 0x3e9   : > { %10831 = vmatmul.mubr.bf16.gmra.mrb[84].mxu0 %v13759_v29 }
 0x3ea   : > { %10840 = vmatprep.mubr.bf16.mxu0 %v13763_v47  ;;  %v13778_v47 = vld [vmem:[%s15910_s6 + $0x8a4] ss:$44 sps:$4 sm:$0xff]  }
 0x3eb   : > { %v4582_v11 = vpop.permute.xlu1 %4581 }
 0x3ec   : > { %v5254_v19 = vmul.f32 %v4582_v11, %v4036_v25  ;;  %v5255_v33 = vmul.f32 %v4582_v11, %v4037_v40  ;;  %v4056_v25 = vld [vmem:[%s19596_s3 + $0x4b0] sm:$0xff]  ;;  %v4057_v40 = vld [vmem:[%s19596_s3 + $0x4b8] sm:$0xff]  ;;  %v4054_v11 = vld [vmem:[%s19596_s3 + $0x4a0] sm:$0xff] }
 0x3ed   : > { %9428 = vmatmul.mubr.bf16.gmra.mrb[88].mxu1 %v13762_v53  ;;  %v18718_v55 = vpop.permute.xlu0 %4631 }
 0x3ee   : > { %v5536_v37 = vpack.c.bf16 %v5254_v19, %v5252_v18  ;;  %v5537_v38 = vpack.c.bf16 %v5255_v33, %v5253_v45  ;;  %9437 = vmatprep.mubr.bf16.mxu1 %v13766_v63  ;;  %v13777_v45 = vld [vmem:[%s15910_s6 + $0x860] ss:$44 sps:$4 sm:$0xff]   ;;  %v13781_v33 = vld [vmem:[%s15910_s6 + $0x8bc] ss:$44 sps:$4 sm:$0xff]  }
 0x3ef   : > { %v4587_v31 = vpop.permute.xlu1 %4586 }
 0x3f0   : > { %v5256_v26 = vmul.f32 %v4587_v31, %v4038_v34  ;;  %v5257_v54 = vmul.f32 %v4587_v31, %v4039_v35  ;;  %9646 = vmatprep.subr.bf16.mxu1 %v5537_v38  ;;  %v5274_v34 = vmul.f32 %v18718_v55, %v4056_v25  ;;  %v5275_v35 = vmul.f32 %v18718_v55, %v4057_v40  ;;  %v4058_v31 = vld [vmem:[%s19596_s3 + $0x4c0] sm:$0xff]  ;;  %v4059_v55 = vld [vmem:[%s19596_s3 + $0x4c8] sm:$0xff] }
 0x3f1   : > { %9647 = vmatpush1.bf16.msra.mxu1 %v5536_v37  ;;  %10841 = vmatmul.mubr.bf16.gmra.mrb[88].mxu0 %v13765_v50  ;;  %v18734_v1 = vpop.permute.xlu0 %4641  ;;  %v4060_v50 = vld [vmem:[%s19596_s3 + $0x4d0] sm:$0xff]  ;;  %v4061_v37 = vld [vmem:[%s19596_s3 + $0x4d8] sm:$0xff] }
 0x3f2   : > { %v5538_v30 = vpack.c.bf16 %v5258_v44, %v5256_v26  ;;  %v5539_v48 = vpack.c.bf16 %v5259_v5, %v5257_v54  ;;  %10850 = vmatprep.mubr.bf16.mxu0 %v13769_v60  ;;  %v13780_v5 = vld [vmem:[%s15910_s6 + $0x8a0] ss:$44 sps:$4 sm:$0xff]   ;;  %v13784_v54 = vld [vmem:[%s15910_s6 + $0x8fc] ss:$44 sps:$4 sm:$0xff]  }
 0x3f3   : > { %v4597_v62 = vpop.permute.xlu1 %4596 }
 0x3f4   : > { %v5260_v36 = vmul.f32 %v4597_v62, %v4042_v27  ;;  %v5261_v13 = vmul.f32 %v4597_v62, %v4043_v12  ;;  %9648 = vmatprep.subr.bf16.mxu1 %v5539_v48  ;;  %v5278_v27 = vmul.f32 %v18734_v1, %v4060_v50  ;;  %v5279_v12 = vmul.f32 %v18734_v1, %v4061_v37  ;;  %v4063_v1 = vld [vmem:[%s19596_s3 + $0x4e8] sm:$0xff] }
 0x3f5   : > { %9438 = vmatmul.mubr.bf16.gmra.mrb[92].mxu1 %v13768_v42  ;;  %v18750_v46 = vpop.permute.xlu0 %4651  ;;  %v4064_v42 = vld [vmem:[%s19596_s3 + $0x4f0] sm:$0xff] }
 0x3f6   : > { %v5540_v7 = vpack.c.bf16 %v5262_v22, %v5260_v36  ;;  %v5541_v32 = vpack.c.bf16 %v5263_v52, %v5261_v13  ;;  %9649 = vmatpush1.bf16.msra.mxu1 %v5538_v30  ;;  %9447 = vmatprep.mubr.bf16.mxu1 %v13772_v15  ;;  %v4065_v30 = vld [vmem:[%s19596_s3 + $0x4f8] sm:$0xff]  ;;  %v4062_v15 = vld [vmem:[%s19596_s3 + $0x4e0] sm:$0xff] }
 0x3f7   : > { %v4607_v49 = vpop.permute.xlu1 %4606  ;;  %v13783_v52 = vld [vmem:[%s15910_s6 + $0x8b8] ss:$44 sps:$4 sm:$0xff]   ;;  %v13787_v13 = vld [vmem:[%s15910_s6 + $0x914] ss:$44 sps:$4 sm:$0xff]  }
 0x3f8   : > { %v5264_v59 = vmul.f32 %v4607_v49, %v4046_v57  ;;  %v5265_v21 = vmul.f32 %v4607_v49, %v4047_v24  ;;  %9650 = vmatprep.subr.bf16.mxu1 %v5541_v32  ;;  %v5282_v57 = vmul.f32 %v18750_v46, %v4064_v42  ;;  %v5283_v24 = vmul.f32 %v18750_v46, %v4065_v30  ;;  %v4067_v46 = vld [vmem:[%s19596_s3 + $0x508] sm:$0xff] }
 0x3f9   : > { %10851 = vmatmul.mubr.bf16.gmra.mrb[92].mxu0 %v13771_v10  ;;  %v18768_v2 = vpop.permute.xlu0 %4661  ;;  %v4068_v10 = vld [vmem:[%s19596_s3 + $0x510] sm:$0xff] }
 0x3fa   : > { %v5542_v3 = vpack.c.bf16 %v5266_v6, %v5264_v59  ;;  %v5543_v51 = vpack.c.bf16 %v5267_v4, %v5265_v21  ;;  %9651 = vmatpush1.bf16.msra.mxu1 %v5540_v7  ;;  %10860 = vmatprep.mubr.bf16.mxu0 %v13775_v61  ;;  %v4069_v7 = vld [vmem:[%s19596_s3 + $0x518] sm:$0xff]  ;;  %v4066_v61 = vld [vmem:[%s19596_s3 + $0x500] sm:$0xff] }
 0x3fb   : > { %v4617_v29 = vpop.permute.xlu1 %4616  ;;  %v13786_v4 = vld [vmem:[%s15910_s6 + $0x8f8] ss:$44 sps:$4 sm:$0xff]   ;;  %v13790_v21 = vld [vmem:[%s15910_s6 + $0x954] ss:$44 sps:$4 sm:$0xff]  }
 0x3fc   : > { %v5268_v53 = vmul.f32 %v4617_v29, %v4050_v16  ;;  %v5269_v63 = vmul.f32 %v4617_v29, %v4051_v43  ;;  %9652 = vmatprep.subr.bf16.mxu1 %v5543_v51  ;;  %v5286_v16 = vmul.f32 %v18768_v2, %v4068_v10  ;;  %v5287_v43 = vmul.f32 %v18768_v2, %v4069_v7  ;;  %v4071_v2 = vld [vmem:[%s19596_s3 + $0x528] sm:$0xff] }
 0x3fd   : > { %9448 = vmatmul.mubr.bf16.gmra.mrb[96].mxu1 %v13774_v17  ;;  %v18786_v18 = vpop.permute.xlu0 %4671  ;;  %v4072_v17 = vld [vmem:[%s19596_s3 + $0x530] sm:$0xff] }
 0x3fe   : > { %v5544_v39 = vpack.c.bf16 %v5270_v56, %v5268_v53  ;;  %v5545_v23 = vpack.c.bf16 %v5271_v28, %v5269_v63  ;;  %9653 = vmatpush1.bf16.msra.mxu1 %v5542_v3  ;;  %9457 = vmatprep.mubr.bf16.mxu1 %v13778_v47  ;;  %v4073_v3 = vld [vmem:[%s19596_s3 + $0x538] sm:$0xff]  ;;  %v4070_v47 = vld [vmem:[%s19596_s3 + $0x520] sm:$0xff] }
 0x3ff   : > { %v4627_v19 = vpop.permute.xlu1 %4626  ;;  %v13789_v28 = vld [vmem:[%s15910_s6 + $0x910] ss:$44 sps:$4 sm:$0xff]   ;;  %v13793_v63 = vld [vmem:[%s15910_s6 + $0x96c] ss:$44 sps:$4 sm:$0xff]  }
 0x400   : > { %v5272_v38 = vmul.f32 %v4627_v19, %v4054_v11  ;;  %v5273_v60 = vmul.f32 %v4627_v19, %v4055_v0  ;;  %9654 = vmatprep.subr.bf16.mxu1 %v5545_v23  ;;  %v5290_v11 = vmul.f32 %v18786_v18, %v4072_v17  ;;  %v5291_v0 = vmul.f32 %v18786_v18, %v4073_v3  ;;  %v4227_v18 = vld [vmem:[%s19596_s3 + $0xa08] sm:$0xff] }
 0x401   : > { %10861 = vmatmul.mubr.bf16.gmra.mrb[96].mxu0 %v13777_v45  ;;  %v18804_v44 = vpop.permute.xlu0 %5061  ;;  %v4228_v45 = vld [vmem:[%s19596_s3 + $0xa10] sm:$0xff] }
 0x402   : > { %v5546_v20 = vpack.c.bf16 %v5274_v34, %v5272_v38  ;;  %v5547_v14 = vpack.c.bf16 %v5275_v35, %v5273_v60  ;;  %9655 = vmatpush1.bf16.msra.mxu1 %v5544_v39  ;;  %10870 = vmatprep.mubr.bf16.mxu0 %v13781_v33  ;;  %v4229_v39 = vld [vmem:[%s19596_s3 + $0xa18] sm:$0xff]  ;;  %v4226_v33 = vld [vmem:[%s19596_s3 + $0xa00] sm:$0xff] }
 0x403   : > { %v4637_v26 = vpop.permute.xlu1 %4636  ;;  %v13792_v35 = vld [vmem:[%s15910_s6 + $0x950] ss:$44 sps:$4 sm:$0xff]   ;;  %v13796_v60 = vld [vmem:[%s15910_s6 + $0x9ac] ss:$44 sps:$4 sm:$0xff]  }
 0x404   : > { %v5276_v48 = vmul.f32 %v4637_v26, %v4058_v31  ;;  %v5277_v62 = vmul.f32 %v4637_v26, %v4059_v55  ;;  %9656 = vmatprep.subr.bf16.mxu1 %v5547_v14  ;;  %v5446_v31 = vmul.f32 %v18804_v44, %v4228_v45  ;;  %v5447_v55 = vmul.f32 %v18804_v44, %v4229_v39  ;;  %v4075_v44 = vld [vmem:[%s19596_s3 + $0x548] sm:$0xff] }
 0x405   : > { %9458 = vmatmul.mubr.bf16.gmra.mrb[100].mxu1 %v13780_v5  ;;  %v18822_v22 = vpop.permute.xlu0 %4681  ;;  %v4076_v5 = vld [vmem:[%s19596_s3 + $0x550] sm:$0xff] }
 0x406   : > { %v5548_v58 = vpack.c.bf16 %v5278_v27, %v5276_v48  ;;  %v5549_v41 = vpack.c.bf16 %v5279_v12, %v5277_v62  ;;  %9657 = vmatpush1.bf16.msra.mxu1 %v5546_v20  ;;  %9467 = vmatprep.mubr.bf16.mxu1 %v13784_v54  ;;  %v4077_v20 = vld [vmem:[%s19596_s3 + $0x558] sm:$0xff]  ;;  %v4074_v54 = vld [vmem:[%s19596_s3 + $0x540] sm:$0xff]  ;;  %v13795_v27 = vld [vmem:[%s15910_s6 + $0x968] ss:$44 sps:$4 sm:$0xff]  }
 0x407   : > { %v4647_v36 = vpop.permute.xlu1 %4646  ;;  %v13799_v62 = vld [vmem:[%s15910_s6 + $0x9c4] ss:$44 sps:$4 sm:$0xff]  }
 0x408   : > { %v5280_v32 = vmul.f32 %v4647_v36, %v4062_v15  ;;  %v5281_v49 = vmul.f32 %v4647_v36, %v4063_v1  ;;  %9658 = vmatprep.subr.bf16.mxu1 %v5549_v41  ;;  %v5294_v15 = vmul.f32 %v18822_v22, %v4076_v5  ;;  %v5295_v1 = vmul.f32 %v18822_v22, %v4077_v20  ;;  %v4231_v22 = vld [vmem:[%s19596_s3 + $0xa28] sm:$0xff]  ;;  %v13811_v20 = vld [vmem:[%s15910_s6 + $0xa74] ss:$44 sps:$4 sm:$0xff]  }
 0x409   : > { %10871 = vmatmul.mubr.bf16.gmra.mrb[100].mxu0 %v13783_v52  ;;  %v18840_v6 = vpop.permute.xlu0 %5071  ;;  %v4232_v52 = vld [vmem:[%s19596_s3 + $0xa30] sm:$0xff] }
 0x40a   : > { %v5550_v9 = vpack.c.bf16 %v5282_v57, %v5280_v32  ;;  %v5551_v8 = vpack.c.bf16 %v5283_v24, %v5281_v49  ;;  %9659 = vmatpush1.bf16.msra.mxu1 %v5548_v58  ;;  %10880 = vmatprep.mubr.bf16.mxu0 %v13787_v13  ;;  %v4233_v58 = vld [vmem:[%s19596_s3 + $0xa38] sm:$0xff]  ;;  %v4230_v13 = vld [vmem:[%s19596_s3 + $0xa20] sm:$0xff]  ;;  %v13798_v57 = vld [vmem:[%s15910_s6 + $0x9a8] ss:$44 sps:$4 sm:$0xff]   ;;  %v5450_v49 = vmul.f32 %v18840_v6, %v4232_v52 }
 0x40b   : > { %v4657_v59 = vpop.permute.xlu1 %4656  ;;  %v13802_v32 = vld [vmem:[%s15910_s6 + $0xa04] ss:$44 sps:$4 sm:$0xff]  }
 0x40c   : > { %v5284_v51 = vmul.f32 %v4657_v59, %v4066_v61  ;;  %v5285_v29 = vmul.f32 %v4657_v59, %v4067_v46  ;;  %9660 = vmatprep.subr.bf16.mxu1 %v5551_v8  ;;  %v5451_v61 = vmul.f32 %v18840_v6, %v4233_v58  ;;  %v4080_v46 = vld [vmem:[%s19596_s3 + $0x570] sm:$0xff]  ;;  %v4079_v6 = vld [vmem:[%s19596_s3 + $0x568] sm:$0xff] }
 0x40d   : > { %9468 = vmatmul.mubr.bf16.gmra.mrb[104].mxu1 %v13786_v4  ;;  %v18858_v56 = vpop.permute.xlu0 %4691  ;;  %v4081_v4 = vld [vmem:[%s19596_s3 + $0x578] sm:$0xff]  ;;  %v13814_v58 = vld [vmem:[%s15910_s6 + $0xab4] ss:$44 sps:$4 sm:$0xff]  }
 0x40e   : > { %v5552_v25 = vpack.c.bf16 %v5286_v16, %v5284_v51  ;;  %v5553_v40 = vpack.c.bf16 %v5287_v43, %v5285_v29  ;;  %9661 = vmatpush1.bf16.msra.mxu1 %v5550_v9  ;;  %9477 = vmatprep.mubr.bf16.mxu1 %v13790_v21  ;;  %v4078_v21 = vld [vmem:[%s19596_s3 + $0x560] sm:$0xff]  ;;  %v13805_v51 = vld [vmem:[%s15910_s6 + $0xa1c] ss:$44 sps:$4 sm:$0xff]   ;;  %v5298_v29 = vmul.f32 %v18858_v56, %v4080_v46 }
 0x40f   : > { %v4667_v53 = vpop.permute.xlu1 %4666  ;;  %v13801_v16 = vld [vmem:[%s15910_s6 + $0x9c0] ss:$44 sps:$4 sm:$0xff]  }
 0x410   : > { %v5288_v23 = vmul.f32 %v4667_v53, %v4070_v47  ;;  %v5289_v19 = vmul.f32 %v4667_v53, %v4071_v2  ;;  %9662 = vmatprep.subr.bf16.mxu1 %v5553_v40  ;;  %v5299_v47 = vmul.f32 %v18858_v56, %v4081_v4  ;;  %v4236_v2 = vld [vmem:[%s19596_s3 + $0xa50] sm:$0xff]  ;;  %v4234_v53 = vld [vmem:[%s19596_s3 + $0xa40] sm:$0xff]  ;;  %v4235_v56 = vld [vmem:[%s19596_s3 + $0xa48] sm:$0xff] }
 0x411   : > { %10881 = vmatmul.mubr.bf16.gmra.mrb[104].mxu0 %v13789_v28  ;;  %v18876_v34 = vpop.permute.xlu0 %5081  ;;  %v4237_v28 = vld [vmem:[%s19596_s3 + $0xa58] sm:$0xff] }
 0x412   : > { %v5554_v50 = vpack.c.bf16 %v5290_v11, %v5288_v23  ;;  %v5555_v37 = vpack.c.bf16 %v5291_v0, %v5289_v19  ;;  %9663 = vmatpush1.bf16.msra.mxu1 %v5552_v25  ;;  %10890 = vmatprep.mubr.bf16.mxu0 %v13793_v63  ;;  %v13804_v63 = vld [vmem:[%s15910_s6 + $0xa00] ss:$44 sps:$4 sm:$0xff]   ;;  %v13808_v23 = vld [vmem:[%s15910_s6 + $0xa5c] ss:$44 sps:$4 sm:$0xff]   ;;  %v5454_v19 = vmul.f32 %v18876_v34, %v4236_v2 }
 0x413   : > { %v5057_v38 = vpop.permute.xlu1 %5056  ;;  %v13820_v2 = vld [vmem:[%s15910_s6 + $0xb0c] ss:$44 sps:$4 sm:$0xff]  }
 0x414   : > { %v5444_v14 = vmul.f32 %v5057_v38, %v4226_v33  ;;  %v5445_v26 = vmul.f32 %v5057_v38, %v4227_v18  ;;  %9664 = vmatprep.subr.bf16.mxu1 %v5555_v37  ;;  %v5455_v33 = vmul.f32 %v18876_v34, %v4237_v28  ;;  %v4084_v18 = vld [vmem:[%s19596_s3 + $0x590] sm:$0xff]  ;;  %v4082_v38 = vld [vmem:[%s19596_s3 + $0x580] sm:$0xff]  ;;  %v4083_v34 = vld [vmem:[%s19596_s3 + $0x588] sm:$0xff] }
 0x415   : > { %9478 = vmatmul.mubr.bf16.gmra.mrb[108].mxu1 %v13792_v35  ;;  %v18895_v48 = vpop.permute.xlu0 %4701  ;;  %v4085_v35 = vld [vmem:[%s19596_s3 + $0x598] sm:$0xff] }
 0x416   : > { %v5632_v12 = vpack.c.bf16 %v5446_v31, %v5444_v14  ;;  %v5633_v42 = vpack.c.bf16 %v5447_v55, %v5445_v26  ;;  %9665 = vmatpush1.bf16.msra.mxu1 %v5554_v50  ;;  %9487 = vmatprep.mubr.bf16.mxu1 %v13796_v60  ;;  %v13807_v60 = vld [vmem:[%s15910_s6 + $0xa18] ss:$44 sps:$4 sm:$0xff]   ;;  %v5302_v14 = vmul.f32 %v18895_v48, %v4084_v18 }
 0x417   : > { %v4677_v30 = vpop.permute.xlu1 %4676  ;;  %v5303_v26 = vmul.f32 %v18895_v48, %v4085_v35  ;;  %v4239_v48 = vld [vmem:[%s19596_s3 + $0xa68] sm:$0xff]  ;;  %v13823_v18 = vld [vmem:[%s15910_s6 + $0xb24] ss:$44 sps:$4 sm:$0xff]  }
 0x418   : > { %v5292_v41 = vmul.f32 %v4677_v30, %v4074_v54  ;;  %v5293_v36 = vmul.f32 %v4677_v30, %v4075_v44  ;;  %11059 = vmatprep.subr.bf16.mxu0 %v5633_v42  ;;  %v4240_v54 = vld [vmem:[%s19596_s3 + $0xa70] sm:$0xff]  ;;  %v4241_v44 = vld [vmem:[%s19596_s3 + $0xa78] sm:$0xff]  ;;  %v4238_v30 = vld [vmem:[%s19596_s3 + $0xa60] sm:$0xff] }
 0x419   : > { %10891 = vmatmul.mubr.bf16.gmra.mrb[108].mxu0 %v13795_v27  ;;  %v18922_v59 = vpop.permute.xlu0 %5091 }
 0x41a   : > { %v5556_v24 = vpack.c.bf16 %v5294_v15, %v5292_v41  ;;  %v5557_v10 = vpack.c.bf16 %v5295_v1, %v5293_v36  ;;  %11060 = vmatpush1.bf16.msra.mxu0 %v5632_v12  ;;  %10900 = vmatprep.mubr.bf16.mxu0 %v13799_v62  ;;  %v13810_v62 = vld [vmem:[%s15910_s6 + $0xa58] ss:$44 sps:$4 sm:$0xff]   ;;  %v5458_v41 = vmul.f32 %v18922_v59, %v4240_v54 }
 0x41b   : > { %v5067_v7 = vpop.permute.xlu1 %5066  ;;  %v5459_v36 = vmul.f32 %v18922_v59, %v4241_v44  ;;  %v13826_v54 = vld [vmem:[%s15910_s6 + $0xb64] ss:$44 sps:$4 sm:$0xff]  }
 0x41c   : > { %v5448_v9 = vmul.f32 %v5067_v7, %v4230_v13  ;;  %v5449_v8 = vmul.f32 %v5067_v7, %v4231_v22  ;;  %9666 = vmatprep.subr.bf16.mxu1 %v5557_v10  ;;  %v4088_v13 = vld [vmem:[%s19596_s3 + $0x5b0] sm:$0xff]  ;;  %v4089_v22 = vld [vmem:[%s19596_s3 + $0x5b8] sm:$0xff]  ;;  %v4086_v10 = vld [vmem:[%s19596_s3 + $0x5a0] sm:$0xff] }
 0x41d   : > { %9488 = vmatmul.mubr.bf16.gmra.mrb[112].mxu1 %v13798_v57  ;;  %v4712_v45 = vpop.permute.xlu0 %4711  ;;  %v4087_v7 = vld [vmem:[%s19596_s3 + $0x5a8] sm:$0xff] }
 0x41e   : > { %v5634_v43 = vpack.c.bf16 %v5450_v49, %v5448_v9  ;;  %v5635_v17 = vpack.c.bf16 %v5451_v61, %v5449_v8  ;;  %9667 = vmatpush1.bf16.msra.mxu1 %v5556_v24  ;;  %9497 = vmatprep.mubr.bf16.mxu1 %v13802_v32  ;;  %v13813_v32 = vld [vmem:[%s15910_s6 + $0xa70] ss:$44 sps:$4 sm:$0xff]   ;;  %v13817_v9 = vld [vmem:[%s15910_s6 + $0xacc] ss:$44 sps:$4 sm:$0xff]   ;;  %v5306_v8 = vmul.f32 %v4712_v45, %v4088_v13 }
 0x41f   : > { %v4687_v3 = vpop.permute.xlu1 %4686  ;;  %v5307_v59 = vmul.f32 %v4712_v45, %v4089_v22  ;;  %v4090_v45 = vld [vmem:[%s19596_s3 + $0x5c0] sm:$0xff]  ;;  %v13829_v13 = vld [vmem:[%s15910_s6 + $0xb7c] ss:$44 sps:$4 sm:$0xff]  }
 0x420   : > { %v5296_v25 = vmul.f32 %v4687_v3, %v4078_v21  ;;  %v5297_v40 = vmul.f32 %v4687_v3, %v4079_v6  ;;  %11061 = vmatprep.subr.bf16.mxu0 %v5635_v17  ;;  %v4244_v21 = vld [vmem:[%s19596_s3 + $0xa90] sm:$0xff]  ;;  %v4245_v6 = vld [vmem:[%s19596_s3 + $0xa98] sm:$0xff]  ;;  %v4242_v17 = vld [vmem:[%s19596_s3 + $0xa80] sm:$0xff] }
 0x421   : > { %10901 = vmatmul.mubr.bf16.gmra.mrb[112].mxu0 %v13801_v16  ;;  %v5102_v42 = vpop.permute.xlu0 %5101  ;;  %v4243_v3 = vld [vmem:[%s19596_s3 + $0xa88] sm:$0xff] }
 0x422   : > { %v5558_v11 = vpack.c.bf16 %v5298_v29, %v5296_v25  ;;  %v5559_v0 = vpack.c.bf16 %v5299_v47, %v5297_v40  ;;  %11062 = vmatpush1.bf16.msra.mxu0 %v5634_v43  ;;  %10910 = vmatprep.mubr.bf16.mxu0 %v13805_v51  ;;  %v13816_v51 = vld [vmem:[%s15910_s6 + $0xab0] ss:$44 sps:$4 sm:$0xff]   ;;  %v5462_v25 = vmul.f32 %v5102_v42, %v4244_v21 }
 0x423   : > { %v5077_v39 = vpop.permute.xlu1 %5076  ;;  %v5463_v40 = vmul.f32 %v5102_v42, %v4245_v6  ;;  %v13832_v21 = vld [vmem:[%s15910_s6 + $0xbbc] ss:$44 sps:$4 sm:$0xff]  }
 0x424   : > { %v5452_v50 = vmul.f32 %v5077_v39, %v4234_v53  ;;  %v5453_v37 = vmul.f32 %v5077_v39, %v4235_v56  ;;  %9668 = vmatprep.subr.bf16.mxu1 %v5559_v0  ;;  %v4092_v53 = vld [vmem:[%s19596_s3 + $0x5d0] sm:$0xff]  ;;  %v4093_v56 = vld [vmem:[%s19596_s3 + $0x5d8] sm:$0xff]  ;;  %v4091_v39 = vld [vmem:[%s19596_s3 + $0x5c8] sm:$0xff] }
 0x425   : > { %9498 = vmatmul.mubr.bf16.gmra.mrb[116].mxu1 %v13804_v63  ;;  %v4722_v46 = vpop.permute.xlu0 %4721 }
 0x426   : > { %v5636_v31 = vpack.c.bf16 %v5454_v19, %v5452_v50  ;;  %v5637_v55 = vpack.c.bf16 %v5455_v33, %v5453_v37  ;;  %9669 = vmatpush1.bf16.msra.mxu1 %v5558_v11  ;;  %9507 = vmatprep.mubr.bf16.mxu1 %v13808_v23  ;;  %v13819_v23 = vld [vmem:[%s15910_s6 + $0xac8] ss:$44 sps:$4 sm:$0xff]   ;;  %v5310_v50 = vmul.f32 %v4722_v46, %v4092_v53  ;;  %v13841_v53 = vld [vmem:[%s15910_s6 + $0xc2c] ss:$44 sps:$4 sm:$0xff]  }
 0x427   : > { %v4697_v5 = vpop.permute.xlu1 %4696  ;;  %v5311_v37 = vmul.f32 %v4722_v46, %v4093_v56  ;;  %v4250_v46 = vld [vmem:[%s19596_s3 + $0xac0] sm:$0xff]  ;;  %v13840_v56 = vld [vmem:[%s15910_s6 + $0xc10] ss:$44 sps:$4 sm:$0xff]  }
 0x428   : > { %v5300_v27 = vmul.f32 %v4697_v5, %v4082_v38  ;;  %v5301_v12 = vmul.f32 %v4697_v5, %v4083_v34  ;;  %11063 = vmatprep.subr.bf16.mxu0 %v5637_v55  ;;  %v4248_v38 = vld [vmem:[%s19596_s3 + $0xab0] sm:$0xff]  ;;  %v4249_v34 = vld [vmem:[%s19596_s3 + $0xab8] sm:$0xff]  ;;  %v4246_v55 = vld [vmem:[%s19596_s3 + $0xaa0] sm:$0xff] }
 0x429   : > { %10911 = vmatmul.mubr.bf16.gmra.mrb[116].mxu0 %v13807_v60  ;;  %v5112_v0 = vpop.permute.xlu0 %5111  ;;  %v4247_v5 = vld [vmem:[%s19596_s3 + $0xaa8] sm:$0xff] }
 0x42a   : > { %v5560_v15 = vpack.c.bf16 %v5302_v14, %v5300_v27  ;;  %v5561_v1 = vpack.c.bf16 %v5303_v26, %v5301_v12  ;;  %11064 = vmatpush1.bf16.msra.mxu0 %v5636_v31  ;;  %10920 = vmatprep.mubr.bf16.mxu0 %v13811_v20  ;;  %v13822_v20 = vld [vmem:[%s15910_s6 + $0xb08] ss:$44 sps:$4 sm:$0xff]   ;;  %v5466_v12 = vmul.f32 %v5112_v0, %v4248_v38 }
 0x42b   : > { %v5087_v52 = vpop.permute.xlu1 %5086  ;;  %v5467_v42 = vmul.f32 %v5112_v0, %v4249_v34  ;;  %v13847_v0 = vld [vmem:[%s15910_s6 + $0xc84] ss:$44 sps:$4 sm:$0xff]   ;;  %v13862_v38 = vld [vmem:[%s15910_s6 + $0xd74] ss:$44 sps:$4 sm:$0xff]  }
 0x42c   : > { %v5456_v57 = vmul.f32 %v5087_v52, %v4238_v30  ;;  %v5457_v24 = vmul.f32 %v5087_v52, %v4239_v48  ;;  %9670 = vmatprep.subr.bf16.mxu1 %v5561_v1  ;;  %v4096_v30 = vld [vmem:[%s19596_s3 + $0x5f0] sm:$0xff]  ;;  %v4097_v48 = vld [vmem:[%s19596_s3 + $0x5f8] sm:$0xff]  ;;  %v4094_v1 = vld [vmem:[%s19596_s3 + $0x5e0] sm:$0xff] }
 0x42d   : > { %9508 = vmatmul.mubr.bf16.gmra.mrb[120].mxu1 %v13810_v62  ;;  %v4732_v44 = vpop.permute.xlu0 %4731  ;;  %v4095_v52 = vld [vmem:[%s19596_s3 + $0x5e8] sm:$0xff]  ;;  %v13861_v34 = vld [vmem:[%s15910_s6 + $0xd30] ss:$44 sps:$4 sm:$0xff]  }
 0x42e   : > { %v5638_v49 = vpack.c.bf16 %v5458_v41, %v5456_v57  ;;  %v5639_v61 = vpack.c.bf16 %v5459_v36, %v5457_v24  ;;  %9671 = vmatpush1.bf16.msra.mxu1 %v5560_v15  ;;  %9517 = vmatprep.mubr.bf16.mxu1 %v13814_v58  ;;  %v13825_v58 = vld [vmem:[%s15910_s6 + $0xb20] ss:$44 sps:$4 sm:$0xff]   ;;  %v5314_v57 = vmul.f32 %v4732_v44, %v4096_v30 }
 0x42f   : > { %v4707_v4 = vpop.permute.xlu1 %4706  ;;  %v5315_v24 = vmul.f32 %v4732_v44, %v4097_v48  ;;  %v13877_v44 = vld [vmem:[%s15910_s6 + $0xe3c] ss:$44 sps:$4 sm:$0xff]   ;;  %v13883_v30 = vld [vmem:[%s15910_s6 + $0xe94] ss:$44 sps:$4 sm:$0xff]  }
 0x430   : > { %v5304_v16 = vmul.f32 %v4707_v4, %v4086_v10  ;;  %v5305_v43 = vmul.f32 %v4707_v4, %v4087_v7  ;;  %11065 = vmatprep.subr.bf16.mxu0 %v5639_v61  ;;  %v4252_v10 = vld [vmem:[%s19596_s3 + $0xad0] sm:$0xff]  ;;  %v4253_v7 = vld [vmem:[%s19596_s3 + $0xad8] sm:$0xff]  ;;  %v4251_v4 = vld [vmem:[%s19596_s3 + $0xac8] sm:$0xff] }
 0x431   : > { %10921 = vmatmul.mubr.bf16.gmra.mrb[120].mxu0 %v13813_v32  ;;  %v5122_v61 = vpop.permute.xlu0 %5121  ;;  %v6163_v48 = vld [vmem:[%s15910_s6 + $0xed0] sm:$0xff] }
 0x432   : > { %v5562_v29 = vpack.c.bf16 %v5306_v8, %v5304_v16  ;;  %v5563_v47 = vpack.c.bf16 %v5307_v59, %v5305_v43  ;;  %11066 = vmatpush1.bf16.msra.mxu0 %v5638_v49  ;;  %10930 = vmatprep.mubr.bf16.mxu0 %v13817_v9  ;;  %v13828_v9 = vld [vmem:[%s15910_s6 + $0xb60] ss:$44 sps:$4 sm:$0xff]   ;;  %v5470_v16 = vmul.f32 %v5122_v61, %v4252_v10  ;;  %v13893_v10 = vld [vmem:[%s15910_s6 + $0x28] ss:$44 sps:$4 sm:$0xff]  }
 0x433   : > { %v5097_v28 = vpop.permute.xlu1 %5096  ;;  %v5471_v43 = vmul.f32 %v5122_v61, %v4253_v7  ;;  %v13896_v7 = vld [vmem:[%s15910_s6 + $0x68] ss:$44 sps:$4 sm:$0xff]   ;;  %v13900_v61 = vld [vmem:[%s15910_s6 + $0xc0] ss:$44 sps:$4 sm:$0xff]  }
 0x434   : > { %v5460_v63 = vmul.f32 %v5097_v28, %v4242_v17  ;;  %v5461_v11 = vmul.f32 %v5097_v28, %v4243_v3  ;;  %9672 = vmatprep.subr.bf16.mxu1 %v5563_v47  ;;  %v13834_v28 = vld [vmem:[%s15910_s6 + $0xbb8] ss:$44 sps:$4 sm:$0xff]  }
 0x435   : > { %9518 = vmatmul.mubr.bf16.gmra.mrb[124].mxu1 %v13816_v51  ;;  %v13831_v51 = vld [vmem:[%s15910_s6 + $0xb78] ss:$44 sps:$4 sm:$0xff]  }
 0x436   : > { %v5640_v19 = vpack.c.bf16 %v5462_v25, %v5460_v63  ;;  %v5641_v33 = vpack.c.bf16 %v5463_v40, %v5461_v11  ;;  %9673 = vmatpush1.bf16.msra.mxu1 %v5562_v29  ;;  %9527 = vmatprep.mubr.bf16.mxu1 %v13820_v2  ;;  %v13835_v2 = vld [vmem:[%s15910_s6 + $0xbd4] ss:$44 sps:$4 sm:$0xff]   ;;  %v13837_v40 = vld [vmem:[%s15910_s6 + $0xbd0] ss:$44 sps:$4 sm:$0xff]   ;;  %v13844_v63 = vld [vmem:[%s15910_s6 + $0xc6c] ss:$44 sps:$4 sm:$0xff]  }
 0x437   : > { %v4717_v35 = vpop.permute.xlu1 %4716  ;;  %v13838_v25 = vld [vmem:[%s15910_s6 + $0xc14] ss:$44 sps:$4 sm:$0xff]  }
 0x438   : > { %v5308_v60 = vmul.f32 %v4717_v35, %v4090_v45  ;;  %v5309_v31 = vmul.f32 %v4717_v35, %v4091_v39  ;;  %11067 = vmatprep.subr.bf16.mxu0 %v5641_v33  ;;  %v13843_v11 = vld [vmem:[%s15910_s6 + $0xc28] ss:$44 sps:$4 sm:$0xff]   ;;  %v13850_v39 = vld [vmem:[%s15910_s6 + $0xcc4] ss:$44 sps:$4 sm:$0xff]   ;;  %v13852_v33 = vld [vmem:[%s15910_s6 + $0xcc0] ss:$44 sps:$4 sm:$0xff]  }
 0x439   : > { %10931 = vmatmul.mubr.bf16.gmra.mrb[124].mxu0 %v13819_v23  ;;  %v13846_v45 = vld [vmem:[%s15910_s6 + $0xc68] ss:$44 sps:$4 sm:$0xff]   ;;  %v13849_v23 = vld [vmem:[%s15910_s6 + $0xc80] ss:$44 sps:$4 sm:$0xff]   ;;  %v13855_v35 = vld [vmem:[%s15910_s6 + $0xcd8] ss:$44 sps:$4 sm:$0xff]  }
 0x43a   : > { %v5564_v14 = vpack.c.bf16 %v5310_v50, %v5308_v60  ;;  %v5565_v26 = vpack.c.bf16 %v5311_v37, %v5309_v31  ;;  %11068 = vmatpush1.bf16.msra.mxu0 %v5640_v19  ;;  %10940 = vmatprep.mubr.bf16.mxu0 %v13823_v18  ;;  %v13853_v19 = vld [vmem:[%s15910_s6 + $0xcdc] ss:$44 sps:$4 sm:$0xff]   ;;  %v13859_v50 = vld [vmem:[%s15910_s6 + $0xd34] ss:$44 sps:$4 sm:$0xff]   ;;  %v13858_v37 = vld [vmem:[%s15910_s6 + $0xd18] ss:$44 sps:$4 sm:$0xff]  }
 0x43b   : > { %v5107_v27 = vpop.permute.xlu1 %5106  ;;  %v13856_v18 = vld [vmem:[%s15910_s6 + $0xd1c] ss:$44 sps:$4 sm:$0xff]   ;;  %v13865_v60 = vld [vmem:[%s15910_s6 + $0xd8c] ss:$44 sps:$4 sm:$0xff]  }
 0x43c   : > { %v5464_v62 = vmul.f32 %v5107_v27, %v4246_v55  ;;  %v5465_v15 = vmul.f32 %v5107_v27, %v4247_v5  ;;  %9674 = vmatprep.subr.bf16.mxu1 %v5565_v26  ;;  %v13864_v31 = vld [vmem:[%s15910_s6 + $0xd70] ss:$44 sps:$4 sm:$0xff]   ;;  %v13868_v55 = vld [vmem:[%s15910_s6 + $0xdcc] ss:$44 sps:$4 sm:$0xff]   ;;  %v13867_v5 = vld [vmem:[%s15910_s6 + $0xd88] ss:$44 sps:$4 sm:$0xff]  }
 0x43d   : > { %9528 = vmatmul.mubr.bf16.gmra.mrb[128].mxu1 %v13822_v20  ;;  %v13871_v20 = vld [vmem:[%s15910_s6 + $0xde4] ss:$44 sps:$4 sm:$0xff]   ;;  %v13876_v27 = vld [vmem:[%s15910_s6 + $0xe20] ss:$44 sps:$4 sm:$0xff]  }
 0x43e   : > { %v5642_v41 = vpack.c.bf16 %v5466_v12, %v5464_v62  ;;  %v5643_v36 = vpack.c.bf16 %v5467_v42, %v5465_v15  ;;  %9675 = vmatpush1.bf16.msra.mxu1 %v5564_v14  ;;  %9537 = vmatprep.mubr.bf16.mxu1 %v13826_v54  ;;  %v13870_v14 = vld [vmem:[%s15910_s6 + $0xdc8] ss:$44 sps:$4 sm:$0xff]   ;;  %v13874_v26 = vld [vmem:[%s15910_s6 + $0xe24] ss:$44 sps:$4 sm:$0xff]   ;;  %v13873_v54 = vld [vmem:[%s15910_s6 + $0xde0] ss:$44 sps:$4 sm:$0xff]   ;;  %v12421_v15 = vcombine.high %v6163_v48, %v6163_v48 }
 0x43f   : > { %v4727_v22 = vpop.permute.xlu1 %4726  ;;  %v13880_v12 = vld [vmem:[%s15910_s6 + $0xe7c] ss:$44 sps:$4 sm:$0xff]   ;;  %v13879_v42 = vld [vmem:[%s15910_s6 + $0xe38] ss:$44 sps:$4 sm:$0xff]  }
 0x440   : > { %v5312_v32 = vmul.f32 %v4727_v22, %v4094_v1  ;;  %v5313_v49 = vmul.f32 %v4727_v22, %v4095_v52  ;;  %11069 = vmatprep.subr.bf16.mxu0 %v5643_v36  ;;  %v13882_v62 = vld [vmem:[%s15910_s6 + $0xe78] ss:$44 sps:$4 sm:$0xff]   ;;  %v6166_v1 = vld [vmem:[%s15910_s6 + $0xee8] sm:$0xff]  ;;  %v13885_v52 = vld [vmem:[%s15910_s6 + $0xe90] ss:$44 sps:$4 sm:$0xff]  }
 0x441   : > { %10941 = vmatmul.mubr.bf16.gmra.mrb[128].mxu0 %v13825_v58  ;;  %v12427_v58 = vcombine.high %v6166_v1, %v6166_v1  ;;  %v13892_v36 = vld [vmem:[%s15910_s6 + $0x14] ss:$44 sps:$4 sm:$0xff]   ;;  %v13890_v22 = vld [vmem:[%s15910_s6 + $0x10] ss:$44 sps:$4 sm:$0xff]  }
 0x442   : > { %v5566_v8 = vpack.c.bf16 %v5314_v57, %v5312_v32  ;;  %v5567_v59 = vpack.c.bf16 %v5315_v24, %v5313_v49  ;;  %11070 = vmatpush1.bf16.msra.mxu0 %v5642_v41  ;;  %10950 = vmatprep.mubr.bf16.mxu0 %v13829_v13  ;;  %v12420_v41 = vcombine.low %v6163_v48, %v6163_v48  ;;  %v19605_v57 = vmov 0   ;;  %v13894_v24 = vld [vmem:[%s15910_s6 + $0x6c] ss:$44 sps:$4 sm:$0xff]   ;;  %v13898_v32 = vld [vmem:[%s15910_s6 + $0xc4] ss:$44 sps:$4 sm:$0xff]  }
 0x443   : > { %v5117_v6 = vpop.permute.xlu1 %5116  ;;  %v12426_v13 = vcombine.low %v6166_v1, %v6166_v1  ;;  %v13897_v49 = vld [vmem:[%s15910_s6 + $0x80] ss:$44 sps:$4 sm:$0xff]   ;;  %v13968_v1 = vld [vmem:[%s15910_s6 + $0x698] ss:$44 sps:$4 sm:$0xff]  }
 0x444   : > { %v5468_v17 = vmul.f32 %v5117_v6, %v4250_v46  ;;  %v5469_v3 = vmul.f32 %v5117_v6, %v4251_v4  ;;  %9676 = vmatprep.subr.bf16.mxu1 %v5567_v59  ;;  %v13902_v46 = vld [vmem:[%s15910_s6 + $0x11c] ss:$44 sps:$4 sm:$0xff]   ;;  %v13901_v4 = vld [vmem:[%s15910_s6 + $0xd8] ss:$44 sps:$4 sm:$0xff]   ;;  %v13964_v48 = vld [vmem:[%s15910_s6 + $0x640] ss:$44 sps:$4 sm:$0xff]  }
 0x445   : > { %9538 = vmatmul.mubr.bf16.gmra.mrb[132].mxu1 %v13828_v9  ;;  %v13904_v9 = vld [vmem:[%s15910_s6 + $0x118] ss:$44 sps:$4 sm:$0xff]   ;;  %v13905_v59 = vld [vmem:[%s15910_s6 + $0x130] ss:$44 sps:$4 sm:$0xff]  }
 0x446   : > { %v5644_v29 = vpack.c.bf16 %v5470_v16, %v5468_v17  ;;  %v5645_v47 = vpack.c.bf16 %v5471_v43, %v5469_v3  ;;  %9677 = vmatpush1.bf16.msra.mxu1 %v5566_v8  ;;  %9547 = vmatprep.mubr.bf16.mxu1 %v13832_v21  ;;  %v13906_v8 = vld [vmem:[%s15910_s6 + $0x174] ss:$44 sps:$4 sm:$0xff]   ;;  %v13908_v21 = vld [vmem:[%s15910_s6 + $0x170] ss:$44 sps:$4 sm:$0xff]   ;;  %v13910_v6 = vld [vmem:[%s15910_s6 + $0x1cc] ss:$44 sps:$4 sm:$0xff]  }
 0x447   : > { %v13909_v16 = vld [vmem:[%s15910_s6 + $0x188] ss:$44 sps:$4 sm:$0xff]   ;;  %v13914_v17 = vld [vmem:[%s15910_s6 + $0x224] ss:$44 sps:$4 sm:$0xff]   ;;  %v13913_v3 = vld [vmem:[%s15910_s6 + $0x1e0] ss:$44 sps:$4 sm:$0xff]  }
 0x448   : > { %11071 = vmatprep.subr.bf16.mxu0 %v5645_v47  ;;  %v13912_v43 = vld [vmem:[%s15910_s6 + $0x1c8] ss:$44 sps:$4 sm:$0xff]   ;;  %v13917_v47 = vld [vmem:[%s15910_s6 + $0x238] ss:$44 sps:$4 sm:$0xff]  }
 0x449   : > { %10951 = vmatmul.mubr.bf16.gmra.mrb[132].mxu0 %v13831_v51  ;;  %v13916_v51 = vld [vmem:[%s15910_s6 + $0x220] ss:$44 sps:$4 sm:$0xff]  }
 0x44a   : > { %11072 = vmatpush1.bf16.msra.mxu0 %v5644_v29  ;;  %10960 = vmatprep.mubr.bf16.mxu0 %v13835_v2  ;;  %v13918_v29 = vld [vmem:[%s15910_s6 + $0x27c] ss:$44 sps:$4 sm:$0xff]   ;;  %v13920_v2 = vld [vmem:[%s15910_s6 + $0x278] ss:$44 sps:$4 sm:$0xff]  }
 0x44d   : > { %9548 = vmatmul.mubr.bf16.gmra.mrb[136].mxu1 %v13834_v28  ;;  %v13922_v28 = vld [vmem:[%s15910_s6 + $0x2d4] ss:$44 sps:$4 sm:$0xff]  }
 0x44e   : > { %9557 = vmatprep.mubr.bf16.mxu1 %v13838_v25  ;;  %v13921_v25 = vld [vmem:[%s15910_s6 + $0x290] ss:$44 sps:$4 sm:$0xff]  }
 0x451   : > { %10961 = vmatmul.mubr.bf16.gmra.mrb[136].mxu0 %v13837_v40  ;;  %v13924_v40 = vld [vmem:[%s15910_s6 + $0x2d0] ss:$44 sps:$4 sm:$0xff]  }
 0x452   : > { %10970 = vmatprep.mubr.bf16.mxu0 %v13841_v53  ;;  %v13926_v53 = vld [vmem:[%s15910_s6 + $0x32c] ss:$44 sps:$4 sm:$0xff]  }
 0x455   : > { %9558 = vmatmul.mubr.bf16.gmra.mrb[140].mxu1 %v13840_v56  ;;  %v13925_v56 = vld [vmem:[%s15910_s6 + $0x2e8] ss:$44 sps:$4 sm:$0xff]  }
 0x456   : > { %9567 = vmatprep.mubr.bf16.mxu1 %v13844_v63  ;;  %v13928_v63 = vld [vmem:[%s15910_s6 + $0x328] ss:$44 sps:$4 sm:$0xff]  }
 0x459   : > { %10971 = vmatmul.mubr.bf16.gmra.mrb[140].mxu0 %v13843_v11  ;;  %v13930_v11 = vld [vmem:[%s15910_s6 + $0x384] ss:$44 sps:$4 sm:$0xff]  }
 0x45a   : > { %10980 = vmatprep.mubr.bf16.mxu0 %v13847_v0  ;;  %v13929_v0 = vld [vmem:[%s15910_s6 + $0x340] ss:$44 sps:$4 sm:$0xff]  }
 0x45d   : > { %9568 = vmatmul.mubr.bf16.gmra.mrb[144].mxu1 %v13846_v45  ;;  %v13932_v45 = vld [vmem:[%s15910_s6 + $0x380] ss:$44 sps:$4 sm:$0xff]  }
 0x45e   : > { %9577 = vmatprep.mubr.bf16.mxu1 %v13850_v39  ;;  %v13934_v39 = vld [vmem:[%s15910_s6 + $0x3dc] ss:$44 sps:$4 sm:$0xff]  }
 0x461   : > { %10981 = vmatmul.mubr.bf16.gmra.mrb[144].mxu0 %v13849_v23  ;;  %v13933_v23 = vld [vmem:[%s15910_s6 + $0x398] ss:$44 sps:$4 sm:$0xff]  }
 0x462   : > { %10990 = vmatprep.mubr.bf16.mxu0 %v13853_v19  ;;  %v13936_v19 = vld [vmem:[%s15910_s6 + $0x3d8] ss:$44 sps:$4 sm:$0xff]  }
 0x465   : > { %9578 = vmatmul.mubr.bf16.gmra.mrb[148].mxu1 %v13852_v33  ;;  %v13938_v33 = vld [vmem:[%s15910_s6 + $0x434] ss:$44 sps:$4 sm:$0xff]  }
 0x466   : > { %9587 = vmatprep.mubr.bf16.mxu1 %v13856_v18  ;;  %v13937_v18 = vld [vmem:[%s15910_s6 + $0x3f0] ss:$44 sps:$4 sm:$0xff]  }
 0x469   : > { %10991 = vmatmul.mubr.bf16.gmra.mrb[148].mxu0 %v13855_v35  ;;  %v13940_v35 = vld [vmem:[%s15910_s6 + $0x430] ss:$44 sps:$4 sm:$0xff]  }
 0x46a   : > { %11000 = vmatprep.mubr.bf16.mxu0 %v13859_v50  ;;  %v13942_v50 = vld [vmem:[%s15910_s6 + $0x48c] ss:$44 sps:$4 sm:$0xff]  }
 0x46d   : > { %9588 = vmatmul.mubr.bf16.gmra.mrb[152].mxu1 %v13858_v37  ;;  %v13941_v37 = vld [vmem:[%s15910_s6 + $0x448] ss:$44 sps:$4 sm:$0xff]  }
 0x46e   : > { %9597 = vmatprep.mubr.bf16.mxu1 %v13862_v38  ;;  %v13944_v38 = vld [vmem:[%s15910_s6 + $0x488] ss:$44 sps:$4 sm:$0xff]  }
 0x471   : > { %11001 = vmatmul.mubr.bf16.gmra.mrb[152].mxu0 %v13861_v34  ;;  %v13946_v34 = vld [vmem:[%s15910_s6 + $0x4e4] ss:$44 sps:$4 sm:$0xff]  }
 0x472   : > { %11010 = vmatprep.mubr.bf16.mxu0 %v13865_v60  ;;  %v13945_v60 = vld [vmem:[%s15910_s6 + $0x4a0] ss:$44 sps:$4 sm:$0xff]  }
 0x475   : > { %9598 = vmatmul.mubr.bf16.gmra.mrb[156].mxu1 %v13864_v31  ;;  %v13948_v31 = vld [vmem:[%s15910_s6 + $0x4e0] ss:$44 sps:$4 sm:$0xff]  }
 0x476   : > { %9607 = vmatprep.mubr.bf16.mxu1 %v13868_v55  ;;  %v13950_v55 = vld [vmem:[%s15910_s6 + $0x53c] ss:$44 sps:$4 sm:$0xff]  }
 0x479   : > { %11011 = vmatmul.mubr.bf16.gmra.mrb[156].mxu0 %v13867_v5  ;;  %v13949_v5 = vld [vmem:[%s15910_s6 + $0x4f8] ss:$44 sps:$4 sm:$0xff]  }
 0x47a   : > { %11020 = vmatprep.mubr.bf16.mxu0 %v13871_v20  ;;  %v13952_v20 = vld [vmem:[%s15910_s6 + $0x538] ss:$44 sps:$4 sm:$0xff]  }
 0x47d   : > { %9608 = vmatmul.mubr.bf16.gmra.mrb[160].mxu1 %v13870_v14  ;;  %v13954_v14 = vld [vmem:[%s15910_s6 + $0x594] ss:$44 sps:$4 sm:$0xff]  }
 0x47e   : > { %9617 = vmatprep.mubr.bf16.mxu1 %v13874_v26  ;;  %v13953_v26 = vld [vmem:[%s15910_s6 + $0x550] ss:$44 sps:$4 sm:$0xff]  }
 0x481   : > { %11021 = vmatmul.mubr.bf16.gmra.mrb[160].mxu0 %v13873_v54  ;;  %v13956_v54 = vld [vmem:[%s15910_s6 + $0x590] ss:$44 sps:$4 sm:$0xff]  }
 0x482   : > { %11030 = vmatprep.mubr.bf16.mxu0 %v13877_v44  ;;  %v13958_v44 = vld [vmem:[%s15910_s6 + $0x5ec] ss:$44 sps:$4 sm:$0xff]  }
 0x485   : > { %9618 = vmatmul.mubr.bf16.gmra.mrb[164].mxu1 %v13876_v27  ;;  %v13957_v27 = vld [vmem:[%s15910_s6 + $0x5a8] ss:$44 sps:$4 sm:$0xff]  }
 0x486   : > { %9627 = vmatprep.mubr.bf16.mxu1 %v13880_v12  ;;  %v13960_v12 = vld [vmem:[%s15910_s6 + $0x5e8] ss:$44 sps:$4 sm:$0xff]  }
 0x489   : > { %11031 = vmatmul.mubr.bf16.gmra.mrb[164].mxu0 %v13879_v42  ;;  %v13962_v42 = vld [vmem:[%s15910_s6 + $0x644] ss:$44 sps:$4 sm:$0xff]  }
 0x48a   : > { %11040 = vmatprep.mubr.bf16.mxu0 %v13883_v30  ;;  %v13961_v30 = vld [vmem:[%s15910_s6 + $0x600] ss:$44 sps:$4 sm:$0xff]  }
 0x48d   : > { %9628 = vmatmul.mubr.bf16.gmra.mrb[168].mxu1 %v13882_v62  ;;  %v13966_v62 = vld [vmem:[%s15910_s6 + $0x69c] ss:$44 sps:$4 sm:$0xff]  }
 0x48e   : > { %9637 = vmatprep.mubr.bf16.mxu1 %v12421_v15  ;;  %v13965_v15 = vld [vmem:[%s15910_s6 + $0x658] ss:$44 sps:$4 sm:$0xff]  }
 0x491   : > { %11041 = vmatmul.mubr.bf16.gmra.mrb[168].mxu0 %v13885_v52  ;;  %v13970_v52 = vld [vmem:[%s15910_s6 + $0x6f4] ss:$44 sps:$4 sm:$0xff]  }
 0x492   : > { %11050 = vmatprep.mubr.bf16.mxu0 %v12427_v58  ;;  %v13969_v58 = vld [vmem:[%s15910_s6 + $0x6b0] ss:$44 sps:$4 sm:$0xff]  }
 0x495   : > { %9638 = vmatmul.mubr.bf16.gmra.mrb[172].mxu1 %v12420_v41  ;;  %v13972_v41 = vld [vmem:[%s15910_s6 + $0x6f0] ss:$44 sps:$4 sm:$0xff]  }
 0x496   : > { %9678 = vmatprep.mubr.bf16.mxu1 %v13892_v36  ;;  %v13974_v36 = vld [vmem:[%s15910_s6 + $0x74c] ss:$44 sps:$4 sm:$0xff]  }
 0x499   : > { %11051 = vmatmul.mubr.bf16.gmra.mrb[172].mxu0 %v12426_v13  ;;  %v13973_v13 = vld [vmem:[%s15910_s6 + $0x708] ss:$44 sps:$4 sm:$0xff]  }
 0x49a   : > { %11091 = vmatprep.mubr.bf16.mxu0 %v19605_v57 }
 0x49d   : > { %9679 = vmatmul.mubr.bf16.vlgmr.msra.gmra.mrb[0].mxu1 %v13890_v22  ;;  %v13976_v22 = vld [vmem:[%s15910_s6 + $0x748] ss:$44 sps:$4 sm:$0xff]  }
 0x49e   : > { %9688 = vmatprep.mubr.bf16.mxu1 %v13894_v24  ;;  %v13978_v24 = vld [vmem:[%s15910_s6 + $0x7a4] ss:$44 sps:$4 sm:$0xff]  }
 0x4a1   : > { %12429 = vmatmul.mubr.msk.bf16.vlgmr.msra.gmra.mrb[0].mxu0 %vm8571_vm1, %v13893_v10  ;;  %v13977_v10 = vld [vmem:[%s15910_s6 + $0x760] ss:$44 sps:$4 sm:$0xff]  }
 0x4a2   : > { %11101 = vmatprep.mubr.bf16.mxu0 %v19605_v57 }
 0x4a5   : > { %9689 = vmatmul.mubr.bf16.gmra.mrb[4].mxu1 %v13896_v7  ;;  %v13980_v7 = vld [vmem:[%s15910_s6 + $0x7a0] ss:$44 sps:$4 sm:$0xff]  }
 0x4a6   : > { %9698 = vmatprep.mubr.bf16.mxu1 %v13898_v32  ;;  %v13982_v32 = vld [vmem:[%s15910_s6 + $0x7fc] ss:$44 sps:$4 sm:$0xff]  }
 0x4a9   : > { %12430 = vmatmul.mubr.msk.bf16.gmra.mrb[4].mxu0 %vm8571_vm1, %v13897_v49  ;;  %v13981_v49 = vld [vmem:[%s15910_s6 + $0x7b8] ss:$44 sps:$4 sm:$0xff]  }
 0x4aa   : > { %11111 = vmatprep.mubr.bf16.mxu0 %v19605_v57 }
 0x4ad   : > { %9699 = vmatmul.mubr.bf16.gmra.mrb[8].mxu1 %v13900_v61  ;;  %v13984_v61 = vld [vmem:[%s15910_s6 + $0x7f8] ss:$44 sps:$4 sm:$0xff]  }
 0x4ae   : > { %9708 = vmatprep.mubr.bf16.mxu1 %v13902_v46  ;;  %v13986_v46 = vld [vmem:[%s15910_s6 + $0x854] ss:$44 sps:$4 sm:$0xff]  }
 0x4b1   : > { %12431 = vmatmul.mubr.msk.bf16.gmra.mrb[8].mxu0 %vm8571_vm1, %v13901_v4  ;;  %v13985_v4 = vld [vmem:[%s15910_s6 + $0x810] ss:$44 sps:$4 sm:$0xff]  }
 0x4b2   : > { %11121 = vmatprep.mubr.bf16.mxu0 %v19605_v57 }
 0x4b5   : > { %9709 = vmatmul.mubr.bf16.gmra.mrb[12].mxu1 %v13904_v9  ;;  %v13988_v9 = vld [vmem:[%s15910_s6 + $0x850] ss:$44 sps:$4 sm:$0xff]  }
 0x4b6   : > { %9718 = vmatprep.mubr.bf16.mxu1 %v13906_v8  ;;  %v13990_v8 = vld [vmem:[%s15910_s6 + $0x8ac] ss:$44 sps:$4 sm:$0xff]  }
 0x4b9   : > { %12432 = vmatmul.mubr.msk.bf16.gmra.mrb[12].mxu0 %vm8571_vm1, %v13905_v59  ;;  %v13989_v59 = vld [vmem:[%s15910_s6 + $0x868] ss:$44 sps:$4 sm:$0xff]  }
 0x4ba   : > { %11131 = vmatprep.mubr.bf16.mxu0 %v19605_v57 }
 0x4bd   : > { %9719 = vmatmul.mubr.bf16.gmra.mrb[16].mxu1 %v13908_v21  ;;  %v13992_v21 = vld [vmem:[%s15910_s6 + $0x8a8] ss:$44 sps:$4 sm:$0xff]  }
 0x4be   : > { %9728 = vmatprep.mubr.bf16.mxu1 %v13910_v6  ;;  %v13994_v6 = vld [vmem:[%s15910_s6 + $0x904] ss:$44 sps:$4 sm:$0xff]  }
 0x4c1   : > { %12433 = vmatmul.mubr.msk.bf16.gmra.mrb[16].mxu0 %vm8571_vm1, %v13909_v16  ;;  %v13993_v16 = vld [vmem:[%s15910_s6 + $0x8c0] ss:$44 sps:$4 sm:$0xff]  }
 0x4c2   : > { %11141 = vmatprep.mubr.bf16.mxu0 %v19605_v57 }
 0x4c5   : > { %9729 = vmatmul.mubr.bf16.gmra.mrb[20].mxu1 %v13912_v43  ;;  %v13996_v43 = vld [vmem:[%s15910_s6 + $0x900] ss:$44 sps:$4 sm:$0xff]  }
 0x4c6   : > { %9738 = vmatprep.mubr.bf16.mxu1 %v13914_v17  ;;  %v13998_v17 = vld [vmem:[%s15910_s6 + $0x95c] ss:$44 sps:$4 sm:$0xff]  }
 0x4c9   : > { %12434 = vmatmul.mubr.msk.bf16.gmra.mrb[20].mxu0 %vm8571_vm1, %v13913_v3  ;;  %v13997_v3 = vld [vmem:[%s15910_s6 + $0x918] ss:$44 sps:$4 sm:$0xff]  }
 0x4ca   : > { %11151 = vmatprep.mubr.bf16.mxu0 %v19605_v57 }
 0x4cd   : > { %9739 = vmatmul.mubr.bf16.gmra.mrb[24].mxu1 %v13916_v51 }
 0x4ce   : > { %9748 = vmatprep.mubr.bf16.mxu1 %v13918_v29 }
 0x4d1   : > { %12435 = vmatmul.mubr.msk.bf16.gmra.mrb[24].mxu0 %vm8571_vm1, %v13917_v47  ;;  %v14000_v47 = vld [vmem:[%s15910_s6 + $0x958] ss:$44 sps:$4 sm:$0xff]  }
 0x4d2   : > { %11161 = vmatprep.mubr.bf16.mxu0 %v19605_v57 }
 0x4d5   : > { %9749 = vmatmul.mubr.bf16.gmra.mrb[28].mxu1 %v13920_v2 }
 0x4d6   : > { %9758 = vmatprep.mubr.bf16.mxu1 %v13922_v28  ;;  %v14002_v28 = vld [vmem:[%s15910_s6 + $0x9b4] ss:$44 sps:$4 sm:$0xff]  }
 0x4d9   : > { %12436 = vmatmul.mubr.msk.bf16.gmra.mrb[28].mxu0 %vm8571_vm1, %v13921_v25 }
 0x4da   : > { %11171 = vmatprep.mubr.bf16.mxu0 %v19605_v57 }
 0x4dd   : > { %9759 = vmatmul.mubr.bf16.gmra.mrb[32].mxu1 %v13924_v40 }
 0x4de   : > { %9768 = vmatprep.mubr.bf16.mxu1 %v13926_v53 }
 0x4e1   : > { %12437 = vmatmul.mubr.msk.bf16.gmra.mrb[32].mxu0 %vm8571_vm1, %v13925_v56 }
 0x4e2   : > { %11181 = vmatprep.mubr.bf16.mxu0 %v19605_v57 }
 0x4e5   : > { %9769 = vmatmul.mubr.bf16.gmra.mrb[36].mxu1 %v13928_v63  ;;  %v14001_v63 = vld [vmem:[%s15910_s6 + $0x970] ss:$44 sps:$4 sm:$0xff]  }
 0x4e6   : > { %9778 = vmatprep.mubr.bf16.mxu1 %v13930_v11 }
 0x4e9   : > { %12438 = vmatmul.mubr.msk.bf16.gmra.mrb[36].mxu0 %vm8571_vm1, %v13929_v0 }
 0x4ea   : > { %11191 = vmatprep.mubr.bf16.mxu0 %v19605_v57 }
 0x4ed   : > { %9779 = vmatmul.mubr.bf16.gmra.mrb[40].mxu1 %v13932_v45 }
 0x4ee   : > { %9788 = vmatprep.mubr.bf16.mxu1 %v13934_v39 }
 0x4f1   : > { %12439 = vmatmul.mubr.msk.bf16.gmra.mrb[40].mxu0 %vm8571_vm1, %v13933_v23 }
 0x4f2   : > { %11201 = vmatprep.mubr.bf16.mxu0 %v19605_v57 }
 0x4f5   : > { %9789 = vmatmul.mubr.bf16.gmra.mrb[44].mxu1 %v13936_v19 }
 0x4f6   : > { %9798 = vmatprep.mubr.bf16.mxu1 %v13938_v33 }
 0x4f9   : > { %12440 = vmatmul.mubr.msk.bf16.gmra.mrb[44].mxu0 %vm8571_vm1, %v13937_v18  ;;  %v14004_v18 = vld [vmem:[%s15910_s6 + $0x9b0] ss:$44 sps:$4 sm:$0xff]  }
 0x4fa   : > { %11211 = vmatprep.mubr.bf16.mxu0 %v19605_v57 }
 0x4fd   : > { %9799 = vmatmul.mubr.bf16.gmra.mrb[48].mxu1 %v13940_v35 }
 0x4fe   : > { %9808 = vmatprep.mubr.bf16.mxu1 %v13942_v50  ;;  %v14006_v50 = vld [vmem:[%s15910_s6 + $0xa0c] ss:$44 sps:$4 sm:$0xff]  }
 0x501   : > { %12441 = vmatmul.mubr.msk.bf16.gmra.mrb[48].mxu0 %vm8571_vm1, %v13941_v37 }
 0x502   : > { %11221 = vmatprep.mubr.bf16.mxu0 %v19605_v57 }
 0x505   : > { %9809 = vmatmul.mubr.bf16.gmra.mrb[52].mxu1 %v13944_v38 }
 0x506   : > { %9818 = vmatprep.mubr.bf16.mxu1 %v13946_v34 }
 0x509   : > { %12442 = vmatmul.mubr.msk.bf16.gmra.mrb[52].mxu0 %vm8571_vm1, %v13945_v60 }
 0x50a   : > { %11231 = vmatprep.mubr.bf16.mxu0 %v19605_v57 }
 0x50d   : > { %9819 = vmatmul.mubr.bf16.gmra.mrb[56].mxu1 %v13948_v31  ;;  %v14005_v31 = vld [vmem:[%s15910_s6 + $0x9c8] ss:$44 sps:$4 sm:$0xff]  }
 0x50e   : > { %9828 = vmatprep.mubr.bf16.mxu1 %v13950_v55 }
 0x511   : > { %12443 = vmatmul.mubr.msk.bf16.gmra.mrb[56].mxu0 %vm8571_vm1, %v13949_v5 }
 0x512   : > { %11241 = vmatprep.mubr.bf16.mxu0 %v19605_v57 }
 0x515   : > { %9829 = vmatmul.mubr.bf16.gmra.mrb[60].mxu1 %v13952_v20 }
 0x516   : > { %9838 = vmatprep.mubr.bf16.mxu1 %v13954_v14 }
 0x519   : > { %12444 = vmatmul.mubr.msk.bf16.gmra.mrb[60].mxu0 %vm8571_vm1, %v13953_v26 }
 0x51a   : > { %11251 = vmatprep.mubr.bf16.mxu0 %v19605_v57 }
 0x51d   : > { %9839 = vmatmul.mubr.bf16.gmra.mrb[64].mxu1 %v13956_v54 }
 0x51e   : > { %9848 = vmatprep.mubr.bf16.mxu1 %v13958_v44 }
 0x521   : > { %12445 = vmatmul.mubr.msk.bf16.gmra.mrb[64].mxu0 %vm8571_vm1, %v13957_v27  ;;  %v14008_v27 = vld [vmem:[%s15910_s6 + $0xa08] ss:$44 sps:$4 sm:$0xff]  }
 0x522   : > { %11261 = vmatprep.mubr.bf16.mxu0 %v19605_v57 }
 0x525   : > { %9849 = vmatmul.mubr.bf16.gmra.mrb[68].mxu1 %v13960_v12 }
 0x526   : > { %9858 = vmatprep.mubr.bf16.mxu1 %v13962_v42  ;;  %v14010_v42 = vld [vmem:[%s15910_s6 + $0xa64] ss:$44 sps:$4 sm:$0xff]  }
 0x529   : > { %12446 = vmatmul.mubr.msk.bf16.gmra.mrb[68].mxu0 %vm8571_vm1, %v13961_v30 }
 0x52a   : > { %11271 = vmatprep.mubr.bf16.mxu0 %v19605_v57 }
 0x52d   : > { %9859 = vmatmul.mubr.bf16.gmra.mrb[72].mxu1 %v13964_v48 }
 0x52e   : > { %9868 = vmatprep.mubr.bf16.mxu1 %v13966_v62 }
 0x531   : > { %12447 = vmatmul.mubr.msk.bf16.gmra.mrb[72].mxu0 %vm8571_vm1, %v13965_v15 }
 0x532   : > { %11281 = vmatprep.mubr.bf16.mxu0 %v19605_v57 }
 0x535   : > { %9869 = vmatmul.mubr.bf16.gmra.mrb[76].mxu1 %v13968_v1  ;;  %v14009_v1 = vld [vmem:[%s15910_s6 + $0xa20] ss:$44 sps:$4 sm:$0xff]  }
 0x536   : > { %9878 = vmatprep.mubr.bf16.mxu1 %v13970_v52 }
 0x539   : > { %12448 = vmatmul.mubr.msk.bf16.gmra.mrb[76].mxu0 %vm8571_vm1, %v13969_v58 }
 0x53a   : > { %11291 = vmatprep.mubr.bf16.mxu0 %v19605_v57 }
 0x53d   : > { %9879 = vmatmul.mubr.bf16.gmra.mrb[80].mxu1 %v13972_v41 }
 0x53e   : > { %9888 = vmatprep.mubr.bf16.mxu1 %v13974_v36 }
 0x541   : > { %12449 = vmatmul.mubr.msk.bf16.gmra.mrb[80].mxu0 %vm8571_vm1, %v13973_v13 }
 0x542   : > { %11301 = vmatprep.mubr.bf16.mxu0 %v19605_v57 }
 0x545   : > { %9889 = vmatmul.mubr.bf16.gmra.mrb[84].mxu1 %v13976_v22 }
 0x546   : > { %9898 = vmatprep.mubr.bf16.mxu1 %v13978_v24 }
 0x549   : > { %12450 = vmatmul.mubr.msk.bf16.gmra.mrb[84].mxu0 %vm8571_vm1, %v13977_v10  ;;  %v14012_v10 = vld [vmem:[%s15910_s6 + $0xa60] ss:$44 sps:$4 sm:$0xff]  }
 0x54a   : > { %11311 = vmatprep.mubr.bf16.mxu0 %v19605_v57 }
 0x54d   : > { %9899 = vmatmul.mubr.bf16.gmra.mrb[88].mxu1 %v13980_v7 }
 0x54e   : > { %9908 = vmatprep.mubr.bf16.mxu1 %v13982_v32  ;;  %v14014_v32 = vld [vmem:[%s15910_s6 + $0xabc] ss:$44 sps:$4 sm:$0xff]  }
 0x551   : > { %12451 = vmatmul.mubr.msk.bf16.gmra.mrb[88].mxu0 %vm8571_vm1, %v13981_v49 }
 0x552   : > { %11321 = vmatprep.mubr.bf16.mxu0 %v19605_v57 }
 0x555   : > { %9909 = vmatmul.mubr.bf16.gmra.mrb[92].mxu1 %v13984_v61 }
 0x556   : > { %9918 = vmatprep.mubr.bf16.mxu1 %v13986_v46 }
 0x559   : > { %12452 = vmatmul.mubr.msk.bf16.gmra.mrb[92].mxu0 %vm8571_vm1, %v13985_v4 }
 0x55a   : > { %11331 = vmatprep.mubr.bf16.mxu0 %v19605_v57 }
 0x55d   : > { %9919 = vmatmul.mubr.bf16.gmra.mrb[96].mxu1 %v13988_v9  ;;  %v14013_v9 = vld [vmem:[%s15910_s6 + $0xa78] ss:$44 sps:$4 sm:$0xff]  }
 0x55e   : > { %9928 = vmatprep.mubr.bf16.mxu1 %v13990_v8 }
 0x561   : > { %12453 = vmatmul.mubr.msk.bf16.gmra.mrb[96].mxu0 %vm8571_vm1, %v13989_v59 }
 0x562   : > { %11341 = vmatprep.mubr.bf16.mxu0 %v19605_v57 }
 0x565   : > { %9929 = vmatmul.mubr.bf16.gmra.mrb[100].mxu1 %v13992_v21 }
 0x566   : > { %9938 = vmatprep.mubr.bf16.mxu1 %v13994_v6 }
 0x569   : > { %12454 = vmatmul.mubr.msk.bf16.gmra.mrb[100].mxu0 %vm8571_vm1, %v13993_v16 }
 0x56a   : > { %11351 = vmatprep.mubr.bf16.mxu0 %v19605_v57 }
 0x56d   : > { %9939 = vmatmul.mubr.bf16.gmra.mrb[104].mxu1 %v13996_v43 }
 0x56e   : > { %9948 = vmatprep.mubr.bf16.mxu1 %v13998_v17 }
 0x570   : > { %v9680_v51 = vpop.f32.mrb[0].mxu1 }
 0x571   : > { %v9682_v29 = vpop.f32.mrb[1].mxu1  ;;  %12455 = vmatmul.mubr.msk.bf16.gmra.mrb[104].mxu0 %vm8571_vm1, %v13997_v3  ;;  %v14016_v3 = vld [vmem:[%s15910_s6 + $0xab8] ss:$44 sps:$4 sm:$0xff]  }
 0x572   : > { %v9684_v2 = vpop.f32.mrb[2].mxu1  ;;  %11361 = vmatprep.mubr.bf16.mxu0 %v19605_v57 }
 0x573   : > { %v9686_v25 = vpop.f32.mrb[3].mxu1 }
 0x574   : > { %v11093_v40 = vpop.f32.mrb[0].mxu0 }
 0x575   : > { %v12476_v53 = vadd.f32 %v11093_v40, %v9680_v51  ;;  %9949 = vmatmul.mubr.bf16.gmra.mrb[108].mxu1 %v14000_v47  ;;  %v11095_v56 = vpop.f32.mrb[1].mxu0  ;;  %v14017_v40 = vld [vmem:[%s15910_s6 + $0xad0] ss:$44 sps:$4 sm:$0xff]  }
 0x576   : > { %v12477_v11 = vadd.f32 %v11095_v56, %v9682_v29  ;;  %v11097_v0 = vpop.f32.mrb[2].mxu0  ;;  %9958 = vmatprep.mubr.bf16.mxu1 %v14002_v28  ;;  %v14018_v29 = vld [vmem:[%s15910_s6 + $0xb14] ss:$44 sps:$4 sm:$0xff]  }
 0x577   : > { %11530 = vst [vmem:[%s19247_s14] sm:$0xff] %v12476_v53  ;;  %v12478_v45 = vadd.f32 %v11097_v0, %v9684_v2  ;;  %v11099_v39 = vpop.f32.mrb[3].mxu0 }
 0x578   : > { %11532 = vst.msk [vmem:[%s19247_s14 + $0x8] sm:$0xff] %vm11531_vm2, %v12477_v11  ;;  %v12479_v23 = vadd.f32 %v11099_v39, %v9686_v25  ;;  %v9690_v19 = vpop.f32.mrb[4].mxu1 }
 0x579   : > { %11533 = vst [vmem:[%s19247_s14 + $0x10] sm:$0xff] %v12478_v45  ;;  %v9692_v33 = vpop.f32.mrb[5].mxu1  ;;  %12456 = vmatmul.mubr.msk.bf16.gmra.mrb[108].mxu0 %vm8571_vm1, %v14001_v63 }
 0x57a   : > { %11534 = vst.msk [vmem:[%s19247_s14 + $0x18] sm:$0xff] %vm11531_vm2, %v12479_v23  ;;  %v9694_v35 = vpop.f32.mrb[6].mxu1  ;;  %11371 = vmatprep.mubr.bf16.mxu0 %v19605_v57  ;;  %v14020_v23 = vld [vmem:[%s15910_s6 + $0xb10] ss:$44 sps:$4 sm:$0xff]  }
 0x57b   : > { %v9696_v37 = vpop.f32.mrb[7].mxu1 }
 0x57c   : > { %v11103_v38 = vpop.f32.mrb[4].mxu0 }
 0x57d   : > { %v12480_v34 = vadd.f32 %v11103_v38, %v9690_v19  ;;  %9959 = vmatmul.mubr.bf16.gmra.mrb[112].mxu1 %v14004_v18  ;;  %v11105_v60 = vpop.f32.mrb[5].mxu0  ;;  %v14021_v38 = vld [vmem:[%s15910_s6 + $0xb28] ss:$44 sps:$4 sm:$0xff]  }
 0x57e   : > { %v12481_v55 = vadd.f32 %v11105_v60, %v9692_v33  ;;  %v11107_v5 = vpop.f32.mrb[6].mxu0  ;;  %9968 = vmatprep.mubr.bf16.mxu1 %v14006_v50  ;;  %v14022_v33 = vld [vmem:[%s15910_s6 + $0xb6c] ss:$44 sps:$4 sm:$0xff]  }
 0x57f   : > { %11535 = vst [vmem:[%s19247_s14 + $0x20] sm:$0xff] %v12480_v34  ;;  %v12482_v20 = vadd.f32 %v11107_v5, %v9694_v35  ;;  %v11109_v14 = vpop.f32.mrb[7].mxu0 }
 0x580   : > { %11536 = vst.msk [vmem:[%s19247_s14 + $0x28] sm:$0xff] %vm11531_vm2, %v12481_v55  ;;  %v12483_v26 = vadd.f32 %v11109_v14, %v9696_v37  ;;  %v9700_v54 = vpop.f32.mrb[8].mxu1 }
 0x581   : > { %11537 = vst [vmem:[%s19247_s14 + $0x30] sm:$0xff] %v12482_v20  ;;  %v9702_v44 = vpop.f32.mrb[9].mxu1  ;;  %12457 = vmatmul.mubr.msk.bf16.gmra.mrb[112].mxu0 %vm8571_vm1, %v14005_v31 }
 0x582   : > { %11538 = vst.msk [vmem:[%s19247_s14 + $0x38] sm:$0xff] %vm11531_vm2, %v12483_v26  ;;  %v9704_v12 = vpop.f32.mrb[10].mxu1  ;;  %11381 = vmatprep.mubr.bf16.mxu0 %v19605_v57  ;;  %v14024_v26 = vld [vmem:[%s15910_s6 + $0xb68] ss:$44 sps:$4 sm:$0xff]  }
 0x583   : > { %v9706_v30 = vpop.f32.mrb[11].mxu1 }
 0x584   : > { %v11113_v48 = vpop.f32.mrb[8].mxu0 }
 0x585   : > { %v12484_v62 = vadd.f32 %v11113_v48, %v9700_v54  ;;  %9969 = vmatmul.mubr.bf16.gmra.mrb[116].mxu1 %v14008_v27  ;;  %v11115_v15 = vpop.f32.mrb[9].mxu0  ;;  %v14025_v48 = vld [vmem:[%s15910_s6 + $0xb80] ss:$44 sps:$4 sm:$0xff]  }
 0x586   : > { %v12485_v52 = vadd.f32 %v11115_v15, %v9702_v44  ;;  %v11117_v58 = vpop.f32.mrb[10].mxu0  ;;  %9978 = vmatprep.mubr.bf16.mxu1 %v14010_v42  ;;  %v14026_v44 = vld [vmem:[%s15910_s6 + $0xbc4] ss:$44 sps:$4 sm:$0xff]  }
 0x587   : > { %11539 = vst [vmem:[%s19247_s14 + $0x40] sm:$0xff] %v12484_v62  ;;  %v12486_v41 = vadd.f32 %v11117_v58, %v9704_v12  ;;  %v11119_v36 = vpop.f32.mrb[11].mxu0 }
 0x588   : > { %11540 = vst.msk [vmem:[%s19247_s14 + $0x48] sm:$0xff] %vm11531_vm2, %v12485_v52  ;;  %v12487_v13 = vadd.f32 %v11119_v36, %v9706_v30  ;;  %v9710_v22 = vpop.f32.mrb[12].mxu1 }
 0x589   : > { %11541 = vst [vmem:[%s19247_s14 + $0x50] sm:$0xff] %v12486_v41  ;;  %v9712_v24 = vpop.f32.mrb[13].mxu1  ;;  %12458 = vmatmul.mubr.msk.bf16.gmra.mrb[116].mxu0 %vm8571_vm1, %v14009_v1 }
 0x58a   : > { %11542 = vst.msk [vmem:[%s19247_s14 + $0x58] sm:$0xff] %vm11531_vm2, %v12487_v13  ;;  %v9714_v7 = vpop.f32.mrb[14].mxu1  ;;  %11391 = vmatprep.mubr.bf16.mxu0 %v19605_v57  ;;  %v14028_v13 = vld [vmem:[%s15910_s6 + $0xbc0] ss:$44 sps:$4 sm:$0xff]  }
 0x58b   : > { %v9716_v49 = vpop.f32.mrb[15].mxu1 }
 0x58c   : > { %v11123_v61 = vpop.f32.mrb[12].mxu0 }
 0x58d   : > { %v12488_v46 = vadd.f32 %v11123_v61, %v9710_v22  ;;  %9979 = vmatmul.mubr.bf16.gmra.mrb[120].mxu1 %v14012_v10  ;;  %v11125_v4 = vpop.f32.mrb[13].mxu0  ;;  %v14029_v61 = vld [vmem:[%s15910_s6 + $0xbd8] ss:$44 sps:$4 sm:$0xff]  }
 0x58e   : > { %v12489_v8 = vadd.f32 %v11125_v4, %v9712_v24  ;;  %v11127_v59 = vpop.f32.mrb[14].mxu0  ;;  %9988 = vmatprep.mubr.bf16.mxu1 %v14014_v32  ;;  %v14030_v24 = vld [vmem:[%s15910_s6 + $0xc1c] ss:$44 sps:$4 sm:$0xff]  }
 0x58f   : > { %11543 = vst [vmem:[%s19247_s14 + $0x60] sm:$0xff] %v12488_v46  ;;  %v12490_v21 = vadd.f32 %v11127_v59, %v9714_v7  ;;  %v11129_v6 = vpop.f32.mrb[15].mxu0 }
 0x590   : > { %11544 = vst.msk [vmem:[%s19247_s14 + $0x68] sm:$0xff] %vm11531_vm2, %v12489_v8  ;;  %v12491_v16 = vadd.f32 %v11129_v6, %v9716_v49  ;;  %v9720_v43 = vpop.f32.mrb[16].mxu1 }
 0x591   : > { %11545 = vst [vmem:[%s19247_s14 + $0x70] sm:$0xff] %v12490_v21  ;;  %v9722_v17 = vpop.f32.mrb[17].mxu1  ;;  %12459 = vmatmul.mubr.msk.bf16.gmra.mrb[120].mxu0 %vm8571_vm1, %v14013_v9 }
 0x592   : > { %11546 = vst.msk [vmem:[%s19247_s14 + $0x78] sm:$0xff] %vm11531_vm2, %v12491_v16  ;;  %v9724_v51 = vpop.f32.mrb[18].mxu1  ;;  %11401 = vmatprep.mubr.bf16.mxu0 %v19605_v57  ;;  %v14032_v16 = vld [vmem:[%s15910_s6 + $0xc18] ss:$44 sps:$4 sm:$0xff]  }
 0x593   : > { %v9726_v47 = vpop.f32.mrb[19].mxu1 }
 0x594   : > { %v11133_v2 = vpop.f32.mrb[16].mxu0 }
 0x595   : > { %v12492_v28 = vadd.f32 %v11133_v2, %v9720_v43  ;;  %9989 = vmatmul.mubr.bf16.gmra.mrb[124].mxu1 %v14016_v3  ;;  %v11135_v25 = vpop.f32.mrb[17].mxu0  ;;  %v14033_v2 = vld [vmem:[%s15910_s6 + $0xc30] ss:$44 sps:$4 sm:$0xff]  }
 0x596   : > { %v12493_v53 = vadd.f32 %v11135_v25, %v9722_v17  ;;  %v11137_v56 = vpop.f32.mrb[18].mxu0  ;;  %9998 = vmatprep.mubr.bf16.mxu1 %v14018_v29  ;;  %v14034_v17 = vld [vmem:[%s15910_s6 + $0xc74] ss:$44 sps:$4 sm:$0xff]  }
 0x597   : > { %11547 = vst [vmem:[%s19247_s14 + $0x80] sm:$0xff] %v12492_v28  ;;  %v12494_v63 = vadd.f32 %v11137_v56, %v9724_v51  ;;  %v11139_v11 = vpop.f32.mrb[19].mxu0 }
 0x598   : > { %11548 = vst.msk [vmem:[%s19247_s14 + $0x88] sm:$0xff] %vm11531_vm2, %v12493_v53  ;;  %v12495_v0 = vadd.f32 %v11139_v11, %v9726_v47  ;;  %v9730_v45 = vpop.f32.mrb[20].mxu1 }
 0x599   : > { %11549 = vst [vmem:[%s19247_s14 + $0x90] sm:$0xff] %v12494_v63  ;;  %v9732_v39 = vpop.f32.mrb[21].mxu1  ;;  %12460 = vmatmul.mubr.msk.bf16.gmra.mrb[124].mxu0 %vm8571_vm1, %v14017_v40 }
 0x59a   : > { %11550 = vst.msk [vmem:[%s19247_s14 + $0x98] sm:$0xff] %vm11531_vm2, %v12495_v0  ;;  %v9734_v19 = vpop.f32.mrb[22].mxu1  ;;  %11411 = vmatprep.mubr.bf16.mxu0 %v19605_v57  ;;  %v14036_v0 = vld [vmem:[%s15910_s6 + $0xc70] ss:$44 sps:$4 sm:$0xff]  }
 0x59b   : > { %v9736_v18 = vpop.f32.mrb[23].mxu1 }
 0x59c   : > { %v11143_v35 = vpop.f32.mrb[20].mxu0 }
 0x59d   : > { %v12496_v50 = vadd.f32 %v11143_v35, %v9730_v45  ;;  %9999 = vmatmul.mubr.bf16.gmra.mrb[128].mxu1 %v14020_v23  ;;  %v11145_v37 = vpop.f32.mrb[21].mxu0  ;;  %v14037_v35 = vld [vmem:[%s15910_s6 + $0xc88] ss:$44 sps:$4 sm:$0xff]  }
 0x59e   : > { %v12497_v34 = vadd.f32 %v11145_v37, %v9732_v39  ;;  %v11147_v60 = vpop.f32.mrb[22].mxu0  ;;  %10008 = vmatprep.mubr.bf16.mxu1 %v14022_v33  ;;  %v14038_v39 = vld [vmem:[%s15910_s6 + $0xccc] ss:$44 sps:$4 sm:$0xff]  }
 0x59f   : > { %11551 = vst [vmem:[%s19247_s14 + $0xa0] sm:$0xff] %v12496_v50  ;;  %v12498_v31 = vadd.f32 %v11147_v60, %v9734_v19  ;;  %v11149_v55 = vpop.f32.mrb[23].mxu0 }
 0x5a0   : > { %11552 = vst.msk [vmem:[%s19247_s14 + $0xa8] sm:$0xff] %vm11531_vm2, %v12497_v34  ;;  %v12499_v5 = vadd.f32 %v11149_v55, %v9736_v18  ;;  %v9740_v20 = vpop.f32.mrb[24].mxu1 }
 0x5a1   : > { %11553 = vst [vmem:[%s19247_s14 + $0xb0] sm:$0xff] %v12498_v31  ;;  %v9742_v14 = vpop.f32.mrb[25].mxu1  ;;  %12461 = vmatmul.mubr.msk.bf16.gmra.mrb[128].mxu0 %vm8571_vm1, %v14021_v38 }
 0x5a2   : > { %11554 = vst.msk [vmem:[%s19247_s14 + $0xb8] sm:$0xff] %vm11531_vm2, %v12499_v5  ;;  %v9744_v54 = vpop.f32.mrb[26].mxu1  ;;  %11421 = vmatprep.mubr.bf16.mxu0 %v19605_v57  ;;  %v14040_v5 = vld [vmem:[%s15910_s6 + $0xcc8] ss:$44 sps:$4 sm:$0xff]  }
 0x5a3   : > { %v9746_v27 = vpop.f32.mrb[27].mxu1 }
 0x5a4   : > { %v11153_v12 = vpop.f32.mrb[24].mxu0 }
 0x5a5   : > { %v12500_v42 = vadd.f32 %v11153_v12, %v9740_v20  ;;  %10009 = vmatmul.mubr.bf16.gmra.mrb[132].mxu1 %v14024_v26  ;;  %v11155_v30 = vpop.f32.mrb[25].mxu0  ;;  %v14041_v12 = vld [vmem:[%s15910_s6 + $0xce0] ss:$44 sps:$4 sm:$0xff]  }
 0x5a6   : > { %v12501_v62 = vadd.f32 %v11155_v30, %v9742_v14  ;;  %v11157_v15 = vpop.f32.mrb[26].mxu0  ;;  %10018 = vmatprep.mubr.bf16.mxu1 %v14026_v44  ;;  %v14042_v14 = vld [vmem:[%s15910_s6 + $0xd24] ss:$44 sps:$4 sm:$0xff]  }
 0x5a7   : > { %11555 = vst [vmem:[%s19247_s14 + $0xc0] sm:$0xff] %v12500_v42  ;;  %v12502_v1 = vadd.f32 %v11157_v15, %v9744_v54  ;;  %v11159_v52 = vpop.f32.mrb[27].mxu0 }
 0x5a8   : > { %11556 = vst.msk [vmem:[%s19247_s14 + $0xc8] sm:$0xff] %vm11531_vm2, %v12501_v62  ;;  %v12503_v58 = vadd.f32 %v11159_v52, %v9746_v27  ;;  %v9750_v41 = vpop.f32.mrb[28].mxu1 }
 0x5a9   : > { %11557 = vst [vmem:[%s19247_s14 + $0xd0] sm:$0xff] %v12502_v1  ;;  %v9752_v36 = vpop.f32.mrb[29].mxu1  ;;  %12462 = vmatmul.mubr.msk.bf16.gmra.mrb[132].mxu0 %vm8571_vm1, %v14025_v48 }
 0x5aa   : > { %11558 = vst.msk [vmem:[%s19247_s14 + $0xd8] sm:$0xff] %vm11531_vm2, %v12503_v58  ;;  %v9754_v22 = vpop.f32.mrb[30].mxu1  ;;  %11431 = vmatprep.mubr.bf16.mxu0 %v19605_v57  ;;  %v14044_v58 = vld [vmem:[%s15910_s6 + $0xd20] ss:$44 sps:$4 sm:$0xff]  }
 0x5ab   : > { %v9756_v10 = vpop.f32.mrb[31].mxu1 }
 0x5ac   : > { %v11163_v7 = vpop.f32.mrb[28].mxu0 }
 0x5ad   : > { %v12504_v32 = vadd.f32 %v11163_v7, %v9750_v41  ;;  %10019 = vmatmul.mubr.bf16.gmra.mrb[136].mxu1 %v14028_v13  ;;  %v11165_v49 = vpop.f32.mrb[29].mxu0  ;;  %v14045_v7 = vld [vmem:[%s15910_s6 + $0xd38] ss:$44 sps:$4 sm:$0xff]  }
 0x5ae   : > { %v12505_v46 = vadd.f32 %v11165_v49, %v9752_v36  ;;  %v11167_v4 = vpop.f32.mrb[30].mxu0  ;;  %10028 = vmatprep.mubr.bf16.mxu1 %v14030_v24  ;;  %v14046_v36 = vld [vmem:[%s15910_s6 + $0xd7c] ss:$44 sps:$4 sm:$0xff]  }
 0x5af   : > { %11559 = vst [vmem:[%s19247_s14 + $0xe0] sm:$0xff] %v12504_v32  ;;  %v12506_v9 = vadd.f32 %v11167_v4, %v9754_v22  ;;  %v11169_v8 = vpop.f32.mrb[31].mxu0 }
 0x5b0   : > { %11560 = vst.msk [vmem:[%s19247_s14 + $0xe8] sm:$0xff] %vm11531_vm2, %v12505_v46  ;;  %v12507_v59 = vadd.f32 %v11169_v8, %v9756_v10  ;;  %v9760_v21 = vpop.f32.mrb[32].mxu1 }
 0x5b1   : > { %11561 = vst [vmem:[%s19247_s14 + $0xf0] sm:$0xff] %v12506_v9  ;;  %v9762_v6 = vpop.f32.mrb[33].mxu1  ;;  %12463 = vmatmul.mubr.msk.bf16.gmra.mrb[136].mxu0 %vm8571_vm1, %v14029_v61 }
 0x5b2   : > { %11562 = vst.msk [vmem:[%s19247_s14 + $0xf8] sm:$0xff] %vm11531_vm2, %v12507_v59  ;;  %v9764_v43 = vpop.f32.mrb[34].mxu1  ;;  %11441 = vmatprep.mubr.bf16.mxu0 %v19605_v57  ;;  %v14048_v59 = vld [vmem:[%s15910_s6 + $0xd78] ss:$44 sps:$4 sm:$0xff]  }
 0x5b3   : > { %v9766_v3 = vpop.f32.mrb[35].mxu1 }
 0x5b4   : > { %v11173_v51 = vpop.f32.mrb[32].mxu0 }
 0x5b5   : > { %v12508_v29 = vadd.f32 %v11173_v51, %v9760_v21  ;;  %10029 = vmatmul.mubr.bf16.gmra.mrb[140].mxu1 %v14032_v16  ;;  %v11175_v47 = vpop.f32.mrb[33].mxu0  ;;  %v14049_v51 = vld [vmem:[%s15910_s6 + $0xd90] ss:$44 sps:$4 sm:$0xff]  }
 0x5b6   : > { %v12509_v28 = vadd.f32 %v11175_v47, %v9762_v6  ;;  %v11177_v25 = vpop.f32.mrb[34].mxu0  ;;  %10038 = vmatprep.mubr.bf16.mxu1 %v14034_v17  ;;  %v14050_v6 = vld [vmem:[%s15910_s6 + $0xdd4] ss:$44 sps:$4 sm:$0xff]  }
 0x5b7   : > { %11563 = vst [vmem:[%s19247_s14 + $0x100] sm:$0xff] %v12508_v29  ;;  %v12510_v40 = vadd.f32 %v11177_v25, %v9764_v43  ;;  %v11179_v53 = vpop.f32.mrb[35].mxu0 }
 0x5b8   : > { %11564 = vst.msk [vmem:[%s19247_s14 + $0x108] sm:$0xff] %vm11531_vm2, %v12509_v28  ;;  %v12511_v56 = vadd.f32 %v11179_v53, %v9766_v3  ;;  %v9770_v63 = vpop.f32.mrb[36].mxu1 }
 0x5b9   : > { %11565 = vst [vmem:[%s19247_s14 + $0x110] sm:$0xff] %v12510_v40  ;;  %v9772_v11 = vpop.f32.mrb[37].mxu1  ;;  %12464 = vmatmul.mubr.msk.bf16.gmra.mrb[140].mxu0 %vm8571_vm1, %v14033_v2 }
 0x5ba   : > { %11566 = vst.msk [vmem:[%s19247_s14 + $0x118] sm:$0xff] %vm11531_vm2, %v12511_v56  ;;  %v9774_v45 = vpop.f32.mrb[38].mxu1  ;;  %11451 = vmatprep.mubr.bf16.mxu0 %v19605_v57  ;;  %v14052_v56 = vld [vmem:[%s15910_s6 + $0xdd0] ss:$44 sps:$4 sm:$0xff]  }
 0x5bb   : > { %v9776_v23 = vpop.f32.mrb[39].mxu1 }
 0x5bc   : > { %v11183_v19 = vpop.f32.mrb[36].mxu0 }
 0x5bd   : > { %v12512_v33 = vadd.f32 %v11183_v19, %v9770_v63  ;;  %10039 = vmatmul.mubr.bf16.gmra.mrb[144].mxu1 %v14036_v0  ;;  %v11185_v18 = vpop.f32.mrb[37].mxu0  ;;  %v14053_v19 = vld [vmem:[%s15910_s6 + $0xde8] ss:$44 sps:$4 sm:$0xff]  }
 0x5be   : > { %v12513_v50 = vadd.f32 %v11185_v18, %v9772_v11  ;;  %v11187_v37 = vpop.f32.mrb[38].mxu0  ;;  %10048 = vmatprep.mubr.bf16.mxu1 %v14038_v39  ;;  %v14054_v11 = vld [vmem:[%s15910_s6 + $0xe2c] ss:$44 sps:$4 sm:$0xff]  }
 0x5bf   : > { %11567 = vst [vmem:[%s19247_s14 + $0x120] sm:$0xff] %v12512_v33  ;;  %v12514_v38 = vadd.f32 %v11187_v37, %v9774_v45  ;;  %v11189_v34 = vpop.f32.mrb[39].mxu0 }
 0x5c0   : > { %11568 = vst.msk [vmem:[%s19247_s14 + $0x128] sm:$0xff] %vm11531_vm2, %v12513_v50  ;;  %v12515_v60 = vadd.f32 %v11189_v34, %v9776_v23  ;;  %v9780_v31 = vpop.f32.mrb[40].mxu1 }
 0x5c1   : > { %11569 = vst [vmem:[%s19247_s14 + $0x130] sm:$0xff] %v12514_v38  ;;  %v9782_v55 = vpop.f32.mrb[41].mxu1  ;;  %12465 = vmatmul.mubr.msk.bf16.gmra.mrb[144].mxu0 %vm8571_vm1, %v14037_v35 }
 0x5c2   : > { %11570 = vst.msk [vmem:[%s19247_s14 + $0x138] sm:$0xff] %vm11531_vm2, %v12515_v60  ;;  %v9784_v20 = vpop.f32.mrb[42].mxu1  ;;  %11461 = vmatprep.mubr.bf16.mxu0 %v19605_v57  ;;  %v14056_v60 = vld [vmem:[%s15910_s6 + $0xe28] ss:$44 sps:$4 sm:$0xff]  }
 0x5c3   : > { %v9786_v26 = vpop.f32.mrb[43].mxu1 }
 0x5c4   : > { %v11193_v54 = vpop.f32.mrb[40].mxu0 }
 0x5c5   : > { %v12516_v44 = vadd.f32 %v11193_v54, %v9780_v31  ;;  %10049 = vmatmul.mubr.bf16.gmra.mrb[148].mxu1 %v14040_v5  ;;  %v11195_v27 = vpop.f32.mrb[41].mxu0  ;;  %v14057_v54 = vld [vmem:[%s15910_s6 + $0xe40] ss:$44 sps:$4 sm:$0xff]  }
 0x5c6   : > { %v12517_v42 = vadd.f32 %v11195_v27, %v9782_v55  ;;  %v11197_v30 = vpop.f32.mrb[42].mxu0  ;;  %10058 = vmatprep.mubr.bf16.mxu1 %v14042_v14  ;;  %v14058_v55 = vld [vmem:[%s15910_s6 + $0xe84] ss:$44 sps:$4 sm:$0xff]  }
 0x5c7   : > { %11571 = vst [vmem:[%s19247_s14 + $0x140] sm:$0xff] %v12516_v44  ;;  %v12518_v48 = vadd.f32 %v11197_v30, %v9784_v20  ;;  %v11199_v62 = vpop.f32.mrb[43].mxu0  ;;  %v6164_v30 = vld [vmem:[%s15910_s6 + $0xed8] sm:$0xff] }
 0x5c8   : > { %11572 = vst.msk [vmem:[%s19247_s14 + $0x148] sm:$0xff] %vm11531_vm2, %v12517_v42  ;;  %v12519_v15 = vadd.f32 %v11199_v62, %v9786_v26  ;;  %v9790_v1 = vpop.f32.mrb[44].mxu1 }
 0x5c9   : > { %11573 = vst [vmem:[%s19247_s14 + $0x150] sm:$0xff] %v12518_v48  ;;  %v9792_v52 = vpop.f32.mrb[45].mxu1  ;;  %12466 = vmatmul.mubr.msk.bf16.gmra.mrb[148].mxu0 %vm8571_vm1, %v14041_v12 }
 0x5ca   : > { %11574 = vst.msk [vmem:[%s19247_s14 + $0x158] sm:$0xff] %vm11531_vm2, %v12519_v15  ;;  %v9794_v41 = vpop.f32.mrb[46].mxu1  ;;  %11471 = vmatprep.mubr.bf16.mxu0 %v19605_v57 }
 0x5cb   : > { %v9796_v13 = vpop.f32.mrb[47].mxu1 }
 0x5cc   : > { %v11203_v22 = vpop.f32.mrb[44].mxu0 }
 0x5cd   : > { %v12520_v24 = vadd.f32 %v11203_v22, %v9790_v1  ;;  %10059 = vmatmul.mubr.bf16.gmra.mrb[152].mxu1 %v14044_v58  ;;  %v11205_v10 = vpop.f32.mrb[45].mxu0  ;;  %v14060_v1 = vld [vmem:[%s15910_s6 + $0xe80] ss:$44 sps:$4 sm:$0xff]   ;;  %v12423_v58 = vcombine.high %v6164_v30, %v6164_v30 }
 0x5ce   : > { %v12521_v32 = vadd.f32 %v11205_v10, %v9792_v52  ;;  %v11207_v49 = vpop.f32.mrb[46].mxu0  ;;  %10068 = vmatprep.mubr.bf16.mxu1 %v14046_v36 }
 0x5cf   : > { %11575 = vst [vmem:[%s19247_s14 + $0x160] sm:$0xff] %v12520_v24  ;;  %v12522_v61 = vadd.f32 %v11207_v49, %v9794_v41  ;;  %v11209_v46 = vpop.f32.mrb[47].mxu0  ;;  %v14061_v24 = vld [vmem:[%s15910_s6 + $0xe98] ss:$44 sps:$4 sm:$0xff]  }
 0x5d0   : > { %11576 = vst.msk [vmem:[%s19247_s14 + $0x168] sm:$0xff] %vm11531_vm2, %v12521_v32  ;;  %v12523_v4 = vadd.f32 %v11209_v46, %v9796_v13  ;;  %v9800_v9 = vpop.f32.mrb[48].mxu1 }
 0x5d1   : > { %11577 = vst [vmem:[%s19247_s14 + $0x170] sm:$0xff] %v12522_v61  ;;  %v9802_v8 = vpop.f32.mrb[49].mxu1  ;;  %12467 = vmatmul.mubr.msk.bf16.gmra.mrb[152].mxu0 %vm8571_vm1, %v14045_v7 }
 0x5d2   : > { %11578 = vst.msk [vmem:[%s19247_s14 + $0x178] sm:$0xff] %vm11531_vm2, %v12523_v4  ;;  %v9804_v21 = vpop.f32.mrb[50].mxu1  ;;  %11481 = vmatprep.mubr.bf16.mxu0 %v19605_v57 }
 0x5d3   : > { %v9806_v16 = vpop.f32.mrb[51].mxu1 }
 0x5d4   : > { %v11213_v43 = vpop.f32.mrb[48].mxu0 }
 0x5d5   : > { %v12524_v17 = vadd.f32 %v11213_v43, %v9800_v9  ;;  %10069 = vmatmul.mubr.bf16.gmra.mrb[156].mxu1 %v14048_v59  ;;  %v11215_v3 = vpop.f32.mrb[49].mxu0  ;;  %v12422_v9 = vcombine.low %v6164_v30, %v6164_v30  ;;  %v14064_v43 = vld [vmem:[%s15910_s6 + $0xef0] ss:$0 sps:$4 sm:$0xff]  }
 0x5d6   : > { %v12525_v29 = vadd.f32 %v11215_v3, %v9802_v8  ;;  %v11217_v47 = vpop.f32.mrb[50].mxu0  ;;  %10078 = vmatprep.mubr.bf16.mxu1 %v14050_v6 }
 0x5d7   : > { %11579 = vst [vmem:[%s19247_s14 + $0x180] sm:$0xff] %v12524_v17  ;;  %v12526_v2 = vadd.f32 %v11217_v47, %v9804_v21  ;;  %v11219_v28 = vpop.f32.mrb[51].mxu0 }
 0x5d8   : > { %11580 = vst.msk [vmem:[%s19247_s14 + $0x188] sm:$0xff] %vm11531_vm2, %v12525_v29  ;;  %v12527_v25 = vadd.f32 %v11219_v28, %v9806_v16  ;;  %v9810_v40 = vpop.f32.mrb[52].mxu1 }
 0x5d9   : > { %11581 = vst [vmem:[%s19247_s14 + $0x190] sm:$0xff] %v12526_v2  ;;  %v9812_v53 = vpop.f32.mrb[53].mxu1  ;;  %12468 = vmatmul.mubr.msk.bf16.gmra.mrb[156].mxu0 %vm8571_vm1, %v14049_v51 }
 0x5da   : > { %11582 = vst.msk [vmem:[%s19247_s14 + $0x198] sm:$0xff] %vm11531_vm2, %v12527_v25  ;;  %v9814_v63 = vpop.f32.mrb[54].mxu1  ;;  %11491 = vmatprep.mubr.bf16.mxu0 %v19605_v57 }
 0x5db   : > { %v9816_v0 = vpop.f32.mrb[55].mxu1 }
 0x5dc   : > { %v11223_v45 = vpop.f32.mrb[52].mxu0 }
 0x5dd   : > { %v12528_v39 = vadd.f32 %v11223_v45, %v9810_v40  ;;  %10079 = vmatmul.mubr.bf16.gmra.mrb[160].mxu1 %v14052_v56  ;;  %v11225_v23 = vpop.f32.mrb[53].mxu0 }
 0x5de   : > { %v12529_v33 = vadd.f32 %v11225_v23, %v9812_v53  ;;  %v11227_v18 = vpop.f32.mrb[54].mxu0  ;;  %10088 = vmatprep.mubr.bf16.mxu1 %v14054_v11 }
 0x5df   : > { %11583 = vst [vmem:[%s19247_s14 + $0x1a0] sm:$0xff] %v12528_v39  ;;  %v12530_v35 = vadd.f32 %v11227_v18, %v9814_v63  ;;  %v11229_v50 = vpop.f32.mrb[55].mxu0 }
 0x5e0   : > { %11584 = vst.msk [vmem:[%s19247_s14 + $0x1a8] sm:$0xff] %vm11531_vm2, %v12529_v33  ;;  %v12531_v37 = vadd.f32 %v11229_v50, %v9816_v0  ;;  %v9820_v38 = vpop.f32.mrb[56].mxu1 }
 0x5e1   : > { %11585 = vst [vmem:[%s19247_s14 + $0x1b0] sm:$0xff] %v12530_v35  ;;  %v9822_v34 = vpop.f32.mrb[57].mxu1  ;;  %12469 = vmatmul.mubr.msk.bf16.gmra.mrb[160].mxu0 %vm8571_vm1, %v14053_v19 }
 0x5e2   : > { %11586 = vst.msk [vmem:[%s19247_s14 + $0x1b8] sm:$0xff] %vm11531_vm2, %v12531_v37  ;;  %v9824_v31 = vpop.f32.mrb[58].mxu1  ;;  %11501 = vmatprep.mubr.bf16.mxu0 %v19605_v57 }
 0x5e3   : > { %v9826_v5 = vpop.f32.mrb[59].mxu1 }
 0x5e4   : > { %v11233_v20 = vpop.f32.mrb[56].mxu0 }
 0x5e5   : > { %v12532_v14 = vadd.f32 %v11233_v20, %v9820_v38  ;;  %10089 = vmatmul.mubr.bf16.gmra.mrb[164].mxu1 %v14056_v60  ;;  %v11235_v26 = vpop.f32.mrb[57].mxu0 }
 0x5e6   : > { %v12533_v44 = vadd.f32 %v11235_v26, %v9822_v34  ;;  %v11237_v27 = vpop.f32.mrb[58].mxu0  ;;  %10098 = vmatprep.mubr.bf16.mxu1 %v14058_v55 }
 0x5e7   : > { %11587 = vst [vmem:[%s19247_s14 + $0x1c0] sm:$0xff] %v12532_v14  ;;  %v12534_v12 = vadd.f32 %v11237_v27, %v9824_v31  ;;  %v11239_v42 = vpop.f32.mrb[59].mxu0 }
 0x5e8   : > { %11588 = vst.msk [vmem:[%s19247_s14 + $0x1c8] sm:$0xff] %vm11531_vm2, %v12533_v44  ;;  %v12535_v48 = vadd.f32 %v11239_v42, %v9826_v5  ;;  %v9830_v62 = vpop.f32.mrb[60].mxu1 }
 0x5e9   : > { %11589 = vst [vmem:[%s19247_s14 + $0x1d0] sm:$0xff] %v12534_v12  ;;  %v9832_v15 = vpop.f32.mrb[61].mxu1  ;;  %12470 = vmatmul.mubr.msk.bf16.gmra.mrb[164].mxu0 %vm8571_vm1, %v14057_v54 }
 0x5ea   : > { %11590 = vst.msk [vmem:[%s19247_s14 + $0x1d8] sm:$0xff] %vm11531_vm2, %v12535_v48  ;;  %v9834_v52 = vpop.f32.mrb[62].mxu1  ;;  %11511 = vmatprep.mubr.bf16.mxu0 %v19605_v57 }
 0x5eb   : > { %v9836_v41 = vpop.f32.mrb[63].mxu1 }
 0x5ec   : > { %v11243_v36 = vpop.f32.mrb[60].mxu0 }
 0x5ed   : > { %v12536_v13 = vadd.f32 %v11243_v36, %v9830_v62  ;;  %10099 = vmatmul.mubr.bf16.gmra.mrb[168].mxu1 %v14060_v1  ;;  %v11245_v22 = vpop.f32.mrb[61].mxu0 }
 0x5ee   : > { %v12537_v10 = vadd.f32 %v11245_v22, %v9832_v15  ;;  %v11247_v7 = vpop.f32.mrb[62].mxu0  ;;  %10108 = vmatprep.mubr.bf16.mxu1 %v12423_v58 }
 0x5ef   : > { %11591 = vst [vmem:[%s19247_s14 + $0x1e0] sm:$0xff] %v12536_v13  ;;  %v12538_v32 = vadd.f32 %v11247_v7, %v9834_v52  ;;  %v11249_v49 = vpop.f32.mrb[63].mxu0 }
 0x5f0   : > { %11592 = vst.msk [vmem:[%s19247_s14 + $0x1e8] sm:$0xff] %vm11531_vm2, %v12537_v10  ;;  %v12539_v61 = vadd.f32 %v11249_v49, %v9836_v41  ;;  %v9840_v46 = vpop.f32.mrb[64].mxu1 }
 0x5f1   : > { %11593 = vst [vmem:[%s19247_s14 + $0x1f0] sm:$0xff] %v12538_v32  ;;  %v9842_v4 = vpop.f32.mrb[65].mxu1  ;;  %12471 = vmatmul.mubr.msk.bf16.gmra.mrb[168].mxu0 %vm8571_vm1, %v14061_v24 }
 0x5f2   : > { %11594 = vst.msk [vmem:[%s19247_s14 + $0x1f8] sm:$0xff] %vm11531_vm2, %v12539_v61  ;;  %v9844_v8 = vpop.f32.mrb[66].mxu1  ;;  %11521 = vmatprep.mubr.bf16.mxu0 %v19605_v57 }
 0x5f3   : > { %v9846_v59 = vpop.f32.mrb[67].mxu1 }
 0x5f4   : > { %v11253_v21 = vpop.f32.mrb[64].mxu0 }
 0x5f5   : > { %v12540_v6 = vadd.f32 %v11253_v21, %v9840_v46  ;;  %10109 = vmatmul.mubr.bf16.gmra.mrb[172].mxu1 %v12422_v9  ;;  %v11255_v16 = vpop.f32.mrb[65].mxu0 }
 0x5f6   : > { %v12541_v17 = vadd.f32 %v11255_v16, %v9842_v4  ;;  %v11257_v3 = vpop.f32.mrb[66].mxu0 }
 0x5f7   : > { %11595 = vst [vmem:[%s19247_s14 + $0x200] sm:$0xff] %v12540_v6  ;;  %v12542_v51 = vadd.f32 %v11257_v3, %v9844_v8  ;;  %v11259_v29 = vpop.f32.mrb[67].mxu0 }
 0x5f8   : > { %11596 = vst.msk [vmem:[%s19247_s14 + $0x208] sm:$0xff] %vm11531_vm2, %v12541_v17  ;;  %v12543_v47 = vadd.f32 %v11259_v29, %v9846_v59  ;;  %v9850_v2 = vpop.f32.mrb[68].mxu1 }
 0x5f9   : > { %11597 = vst [vmem:[%s19247_s14 + $0x210] sm:$0xff] %v12542_v51  ;;  %v9852_v57 = vpop.f32.mrb[69].mxu1  ;;  %12472 = vmatmul.mubr.msk.bf16.gmra.mrb[172].mxu0 %vm8571_vm1, %v14064_v43 }
 0x5fa   : > { %11598 = vst.msk [vmem:[%s19247_s14 + $0x218] sm:$0xff] %vm11531_vm2, %v12543_v47  ;;  %v9854_v28 = vpop.f32.mrb[70].mxu1 }
 0x5fb   : > { %v9856_v25 = vpop.f32.mrb[71].mxu1 }
 0x5fc   : > { %v11263_v40 = vpop.f32.mrb[68].mxu0 }
 0x5fd   : > { %v12544_v53 = vadd.f32 %v11263_v40, %v9850_v2  ;;  %v11265_v56 = vpop.f32.mrb[69].mxu0 }
 0x5fe   : > { %v12545_v63 = vadd.f32 %v11265_v56, %v9852_v57  ;;  %v11267_v11 = vpop.f32.mrb[70].mxu0 }
 0x5ff   : > { %11599 = vst [vmem:[%s19247_s14 + $0x220] sm:$0xff] %v12544_v53  ;;  %v12546_v0 = vadd.f32 %v11267_v11, %v9854_v28  ;;  %v11269_v45 = vpop.f32.mrb[71].mxu0 }
 0x600   : > { %11600 = vst.msk [vmem:[%s19247_s14 + $0x228] sm:$0xff] %vm11531_vm2, %v12545_v63  ;;  %v12547_v39 = vadd.f32 %v11269_v45, %v9856_v25  ;;  %v9860_v23 = vpop.f32.mrb[72].mxu1 }
 0x601   : > { %11601 = vst [vmem:[%s19247_s14 + $0x230] sm:$0xff] %v12546_v0  ;;  %v9862_v19 = vpop.f32.mrb[73].mxu1 }
 0x602   : > { %11602 = vst.msk [vmem:[%s19247_s14 + $0x238] sm:$0xff] %vm11531_vm2, %v12547_v39  ;;  %v9864_v33 = vpop.f32.mrb[74].mxu1 }
 0x603   : > { %v9866_v18 = vpop.f32.mrb[75].mxu1 }
 0x604   : > { %v11273_v35 = vpop.f32.mrb[72].mxu0 }
 0x605   : > { %v12548_v50 = vadd.f32 %v11273_v35, %v9860_v23  ;;  %v11275_v37 = vpop.f32.mrb[73].mxu0 }
 0x606   : > { %v12549_v38 = vadd.f32 %v11275_v37, %v9862_v19  ;;  %v11277_v34 = vpop.f32.mrb[74].mxu0 }
 0x607   : > { %11603 = vst [vmem:[%s19247_s14 + $0x240] sm:$0xff] %v12548_v50  ;;  %v12550_v60 = vadd.f32 %v11277_v34, %v9864_v33  ;;  %v11279_v31 = vpop.f32.mrb[75].mxu0 }
 0x608   : > { %11604 = vst.msk [vmem:[%s19247_s14 + $0x248] sm:$0xff] %vm11531_vm2, %v12549_v38  ;;  %v12551_v55 = vadd.f32 %v11279_v31, %v9866_v18  ;;  %v9870_v5 = vpop.f32.mrb[76].mxu1 }
 0x609   : > { %11605 = vst [vmem:[%s19247_s14 + $0x250] sm:$0xff] %v12550_v60  ;;  %v9872_v20 = vpop.f32.mrb[77].mxu1 }
 0x60a   : > { %11606 = vst.msk [vmem:[%s19247_s14 + $0x258] sm:$0xff] %vm11531_vm2, %v12551_v55  ;;  %v9874_v14 = vpop.f32.mrb[78].mxu1 }
 0x60b   : > { %v9876_v26 = vpop.f32.mrb[79].mxu1 }
 0x60c   : > { %v11283_v54 = vpop.f32.mrb[76].mxu0 }
 0x60d   : > { %v12552_v44 = vadd.f32 %v11283_v54, %v9870_v5  ;;  %v11285_v27 = vpop.f32.mrb[77].mxu0 }
 0x60e   : > { %v12553_v12 = vadd.f32 %v11285_v27, %v9872_v20  ;;  %v11287_v42 = vpop.f32.mrb[78].mxu0 }
 0x60f   : > { %11607 = vst [vmem:[%s19247_s14 + $0x260] sm:$0xff] %v12552_v44  ;;  %v12554_v30 = vadd.f32 %v11287_v42, %v9874_v14  ;;  %v11289_v48 = vpop.f32.mrb[79].mxu0 }
 0x610   : > { %11608 = vst.msk [vmem:[%s19247_s14 + $0x268] sm:$0xff] %vm11531_vm2, %v12553_v12  ;;  %v12555_v62 = vadd.f32 %v11289_v48, %v9876_v26  ;;  %v9880_v15 = vpop.f32.mrb[80].mxu1 }
 0x611   : > { %11609 = vst [vmem:[%s19247_s14 + $0x270] sm:$0xff] %v12554_v30  ;;  %v9882_v1 = vpop.f32.mrb[81].mxu1 }
 0x612   : > { %11610 = vst.msk [vmem:[%s19247_s14 + $0x278] sm:$0xff] %vm11531_vm2, %v12555_v62  ;;  %v9884_v52 = vpop.f32.mrb[82].mxu1 }
 0x613   : > { %v9886_v58 = vpop.f32.mrb[83].mxu1 }
 0x614   : > { %v11293_v41 = vpop.f32.mrb[80].mxu0 }
 0x615   : > { %v12556_v36 = vadd.f32 %v11293_v41, %v9880_v15  ;;  %v11295_v13 = vpop.f32.mrb[81].mxu0 }
 0x616   : > { %v12557_v22 = vadd.f32 %v11295_v13, %v9882_v1  ;;  %v11297_v24 = vpop.f32.mrb[82].mxu0 }
 0x617   : > { %11611 = vst [vmem:[%s19247_s14 + $0x280] sm:$0xff] %v12556_v36  ;;  %v12558_v10 = vadd.f32 %v11297_v24, %v9884_v52  ;;  %v11299_v7 = vpop.f32.mrb[83].mxu0 }
 0x618   : > { %11612 = vst.msk [vmem:[%s19247_s14 + $0x288] sm:$0xff] %vm11531_vm2, %v12557_v22  ;;  %v12559_v32 = vadd.f32 %v11299_v7, %v9886_v58  ;;  %v9890_v49 = vpop.f32.mrb[84].mxu1 }
 0x619   : > { %11613 = vst [vmem:[%s19247_s14 + $0x290] sm:$0xff] %v12558_v10  ;;  %v9892_v61 = vpop.f32.mrb[85].mxu1 }
 0x61a   : > { %11614 = vst.msk [vmem:[%s19247_s14 + $0x298] sm:$0xff] %vm11531_vm2, %v12559_v32  ;;  %v9894_v46 = vpop.f32.mrb[86].mxu1 }
 0x61b   : > { %v9896_v4 = vpop.f32.mrb[87].mxu1 }
 0x61c   : > { %v11303_v9 = vpop.f32.mrb[84].mxu0 }
 0x61d   : > { %v12560_v8 = vadd.f32 %v11303_v9, %v9890_v49  ;;  %v11305_v59 = vpop.f32.mrb[85].mxu0 }
 0x61e   : > { %v12561_v21 = vadd.f32 %v11305_v59, %v9892_v61  ;;  %v11307_v6 = vpop.f32.mrb[86].mxu0 }
 0x61f   : > { %11615 = vst [vmem:[%s19247_s14 + $0x2a0] sm:$0xff] %v12560_v8  ;;  %v12562_v16 = vadd.f32 %v11307_v6, %v9894_v46  ;;  %v11309_v43 = vpop.f32.mrb[87].mxu0 }
 0x620   : > { %11616 = vst.msk [vmem:[%s19247_s14 + $0x2a8] sm:$0xff] %vm11531_vm2, %v12561_v21  ;;  %v12563_v17 = vadd.f32 %v11309_v43, %v9896_v4  ;;  %v9900_v3 = vpop.f32.mrb[88].mxu1 }
 0x621   : > { %11617 = vst [vmem:[%s19247_s14 + $0x2b0] sm:$0xff] %v12562_v16  ;;  %v9902_v51 = vpop.f32.mrb[89].mxu1 }
 0x622   : > { %11618 = vst.msk [vmem:[%s19247_s14 + $0x2b8] sm:$0xff] %vm11531_vm2, %v12563_v17  ;;  %v9904_v29 = vpop.f32.mrb[90].mxu1 }
 0x623   : > { %v9906_v47 = vpop.f32.mrb[91].mxu1 }
 0x624   : > { %v11313_v2 = vpop.f32.mrb[88].mxu0 }
 0x625   : > { %v12564_v57 = vadd.f32 %v11313_v2, %v9900_v3  ;;  %v11315_v28 = vpop.f32.mrb[89].mxu0 }
 0x626   : > { %v12565_v25 = vadd.f32 %v11315_v28, %v9902_v51  ;;  %v11317_v40 = vpop.f32.mrb[90].mxu0 }
 0x627   : > { %11619 = vst [vmem:[%s19247_s14 + $0x2c0] sm:$0xff] %v12564_v57  ;;  %v12566_v53 = vadd.f32 %v11317_v40, %v9904_v29  ;;  %v11319_v56 = vpop.f32.mrb[91].mxu0 }
 0x628   : > { %11620 = vst.msk [vmem:[%s19247_s14 + $0x2c8] sm:$0xff] %vm11531_vm2, %v12565_v25  ;;  %v12567_v63 = vadd.f32 %v11319_v56, %v9906_v47  ;;  %v9910_v11 = vpop.f32.mrb[92].mxu1 }
 0x629   : > { %11621 = vst [vmem:[%s19247_s14 + $0x2d0] sm:$0xff] %v12566_v53  ;;  %v9912_v0 = vpop.f32.mrb[93].mxu1 }
 0x62a   : > { %11622 = vst.msk [vmem:[%s19247_s14 + $0x2d8] sm:$0xff] %vm11531_vm2, %v12567_v63  ;;  %v9914_v45 = vpop.f32.mrb[94].mxu1 }
 0x62b   : > { %v9916_v39 = vpop.f32.mrb[95].mxu1 }
 0x62c   : > { %v11323_v23 = vpop.f32.mrb[92].mxu0 }
 0x62d   : > { %v12568_v19 = vadd.f32 %v11323_v23, %v9910_v11  ;;  %v11325_v33 = vpop.f32.mrb[93].mxu0 }
 0x62e   : > { %v12569_v18 = vadd.f32 %v11325_v33, %v9912_v0  ;;  %v11327_v35 = vpop.f32.mrb[94].mxu0 }
 0x62f   : > { %11623 = vst [vmem:[%s19247_s14 + $0x2e0] sm:$0xff] %v12568_v19  ;;  %v12570_v50 = vadd.f32 %v11327_v35, %v9914_v45  ;;  %v11329_v37 = vpop.f32.mrb[95].mxu0 }
 0x630   : > { %11624 = vst.msk [vmem:[%s19247_s14 + $0x2e8] sm:$0xff] %vm11531_vm2, %v12569_v18  ;;  %v12571_v38 = vadd.f32 %v11329_v37, %v9916_v39  ;;  %v9920_v34 = vpop.f32.mrb[96].mxu1 }
 0x631   : > { %11625 = vst [vmem:[%s19247_s14 + $0x2f0] sm:$0xff] %v12570_v50  ;;  %v9922_v60 = vpop.f32.mrb[97].mxu1 }
 0x632   : > { %11626 = vst.msk [vmem:[%s19247_s14 + $0x2f8] sm:$0xff] %vm11531_vm2, %v12571_v38  ;;  %v9924_v31 = vpop.f32.mrb[98].mxu1 }
 0x633   : > { %v9926_v55 = vpop.f32.mrb[99].mxu1 }
 0x634   : > { %v11333_v5 = vpop.f32.mrb[96].mxu0 }
 0x635   : > { %v12572_v20 = vadd.f32 %v11333_v5, %v9920_v34  ;;  %v11335_v14 = vpop.f32.mrb[97].mxu0 }
 0x636   : > { %v12573_v26 = vadd.f32 %v11335_v14, %v9922_v60  ;;  %v11337_v54 = vpop.f32.mrb[98].mxu0 }
 0x637   : > { %11627 = vst [vmem:[%s19247_s14 + $0x300] sm:$0xff] %v12572_v20  ;;  %v12574_v44 = vadd.f32 %v11337_v54, %v9924_v31  ;;  %v11339_v27 = vpop.f32.mrb[99].mxu0 }
 0x638   : > { %11628 = vst.msk [vmem:[%s19247_s14 + $0x308] sm:$0xff] %vm11531_vm2, %v12573_v26  ;;  %v12575_v12 = vadd.f32 %v11339_v27, %v9926_v55  ;;  %v9930_v42 = vpop.f32.mrb[100].mxu1 }
 0x639   : > { %11629 = vst [vmem:[%s19247_s14 + $0x310] sm:$0xff] %v12574_v44  ;;  %v9932_v30 = vpop.f32.mrb[101].mxu1 }
 0x63a   : > { %11630 = vst.msk [vmem:[%s19247_s14 + $0x318] sm:$0xff] %vm11531_vm2, %v12575_v12  ;;  %v9934_v48 = vpop.f32.mrb[102].mxu1 }
 0x63b   : > { %v9936_v62 = vpop.f32.mrb[103].mxu1 }
 0x63c   : > { %v11343_v15 = vpop.f32.mrb[100].mxu0 }
 0x63d   : > { %v12576_v1 = vadd.f32 %v11343_v15, %v9930_v42  ;;  %v11345_v52 = vpop.f32.mrb[101].mxu0 }
 0x63e   : > { %v12577_v58 = vadd.f32 %v11345_v52, %v9932_v30  ;;  %v11347_v41 = vpop.f32.mrb[102].mxu0 }
 0x63f   : > { %11631 = vst [vmem:[%s19247_s14 + $0x320] sm:$0xff] %v12576_v1  ;;  %v12578_v36 = vadd.f32 %v11347_v41, %v9934_v48  ;;  %v11349_v13 = vpop.f32.mrb[103].mxu0 }
 0x640   : > { %11632 = vst.msk [vmem:[%s19247_s14 + $0x328] sm:$0xff] %vm11531_vm2, %v12577_v58  ;;  %v12579_v22 = vadd.f32 %v11349_v13, %v9936_v62  ;;  %v9940_v24 = vpop.f32.mrb[104].mxu1 }
 0x641   : > { %11633 = vst [vmem:[%s19247_s14 + $0x330] sm:$0xff] %v12578_v36  ;;  %v9942_v10 = vpop.f32.mrb[105].mxu1 }
 0x642   : > { %11634 = vst.msk [vmem:[%s19247_s14 + $0x338] sm:$0xff] %vm11531_vm2, %v12579_v22  ;;  %v9944_v7 = vpop.f32.mrb[106].mxu1 }
 0x643   : > { %v9946_v32 = vpop.f32.mrb[107].mxu1 }
 0x644   : > { %v11353_v49 = vpop.f32.mrb[104].mxu0 }
 0x645   : > { %v12580_v61 = vadd.f32 %v11353_v49, %v9940_v24  ;;  %v11355_v46 = vpop.f32.mrb[105].mxu0 }
 0x646   : > { %v12581_v4 = vadd.f32 %v11355_v46, %v9942_v10  ;;  %v11357_v9 = vpop.f32.mrb[106].mxu0 }
 0x647   : > { %11635 = vst [vmem:[%s19247_s14 + $0x340] sm:$0xff] %v12580_v61  ;;  %v12582_v8 = vadd.f32 %v11357_v9, %v9944_v7  ;;  %v11359_v59 = vpop.f32.mrb[107].mxu0 }
 0x648   : > { %11636 = vst.msk [vmem:[%s19247_s14 + $0x348] sm:$0xff] %vm11531_vm2, %v12581_v4  ;;  %v12583_v21 = vadd.f32 %v11359_v59, %v9946_v32  ;;  %v9950_v6 = vpop.f32.mrb[108].mxu1 }
 0x649   : > { %11637 = vst [vmem:[%s19247_s14 + $0x350] sm:$0xff] %v12582_v8  ;;  %v9952_v16 = vpop.f32.mrb[109].mxu1 }
 0x64a   : > { %11638 = vst.msk [vmem:[%s19247_s14 + $0x358] sm:$0xff] %vm11531_vm2, %v12583_v21  ;;  %v9954_v43 = vpop.f32.mrb[110].mxu1 }
 0x64b   : > { %v9956_v17 = vpop.f32.mrb[111].mxu1 }
 0x64c   : > { %v11363_v3 = vpop.f32.mrb[108].mxu0 }
 0x64d   : > { %v12584_v51 = vadd.f32 %v11363_v3, %v9950_v6  ;;  %v11365_v29 = vpop.f32.mrb[109].mxu0 }
 0x64e   : > { %v12585_v47 = vadd.f32 %v11365_v29, %v9952_v16  ;;  %v11367_v2 = vpop.f32.mrb[110].mxu0 }
 0x64f   : > { %11639 = vst [vmem:[%s19247_s14 + $0x360] sm:$0xff] %v12584_v51  ;;  %v12586_v57 = vadd.f32 %v11367_v2, %v9954_v43  ;;  %v11369_v28 = vpop.f32.mrb[111].mxu0 }
 0x650   : > { %11640 = vst.msk [vmem:[%s19247_s14 + $0x368] sm:$0xff] %vm11531_vm2, %v12585_v47  ;;  %v12587_v25 = vadd.f32 %v11369_v28, %v9956_v17  ;;  %v9960_v40 = vpop.f32.mrb[112].mxu1 }
 0x651   : > { %11641 = vst [vmem:[%s19247_s14 + $0x370] sm:$0xff] %v12586_v57  ;;  %v9962_v53 = vpop.f32.mrb[113].mxu1 }
 0x652   : > { %11642 = vst.msk [vmem:[%s19247_s14 + $0x378] sm:$0xff] %vm11531_vm2, %v12587_v25  ;;  %v9964_v56 = vpop.f32.mrb[114].mxu1 }
 0x653   : > { %v9966_v63 = vpop.f32.mrb[115].mxu1 }
 0x654   : > { %v11373_v11 = vpop.f32.mrb[112].mxu0 }
 0x655   : > { %v12588_v0 = vadd.f32 %v11373_v11, %v9960_v40  ;;  %v11375_v45 = vpop.f32.mrb[113].mxu0 }
 0x656   : > { %v12589_v39 = vadd.f32 %v11375_v45, %v9962_v53  ;;  %v11377_v23 = vpop.f32.mrb[114].mxu0 }
 0x657   : > { %11643 = vst [vmem:[%s19247_s14 + $0x380] sm:$0xff] %v12588_v0  ;;  %v12590_v19 = vadd.f32 %v11377_v23, %v9964_v56  ;;  %v11379_v33 = vpop.f32.mrb[115].mxu0 }
 0x658   : > { %11644 = vst.msk [vmem:[%s19247_s14 + $0x388] sm:$0xff] %vm11531_vm2, %v12589_v39  ;;  %v12591_v18 = vadd.f32 %v11379_v33, %v9966_v63  ;;  %v9970_v35 = vpop.f32.mrb[116].mxu1 }
 0x659   : > { %11645 = vst [vmem:[%s19247_s14 + $0x390] sm:$0xff] %v12590_v19  ;;  %v9972_v50 = vpop.f32.mrb[117].mxu1 }
 0x65a   : > { %11646 = vst.msk [vmem:[%s19247_s14 + $0x398] sm:$0xff] %vm11531_vm2, %v12591_v18  ;;  %v9974_v37 = vpop.f32.mrb[118].mxu1 }
 0x65b   : > { %v9976_v38 = vpop.f32.mrb[119].mxu1 }
 0x65c   : > { %v11383_v34 = vpop.f32.mrb[116].mxu0 }
 0x65d   : > { %v12592_v60 = vadd.f32 %v11383_v34, %v9970_v35  ;;  %v11385_v31 = vpop.f32.mrb[117].mxu0 }
 0x65e   : > { %v12593_v55 = vadd.f32 %v11385_v31, %v9972_v50  ;;  %v11387_v5 = vpop.f32.mrb[118].mxu0 }
 0x65f   : > { %11647 = vst [vmem:[%s19247_s14 + $0x3a0] sm:$0xff] %v12592_v60  ;;  %v12594_v20 = vadd.f32 %v11387_v5, %v9974_v37  ;;  %v11389_v14 = vpop.f32.mrb[119].mxu0 }
 0x660   : > { %11648 = vst.msk [vmem:[%s19247_s14 + $0x3a8] sm:$0xff] %vm11531_vm2, %v12593_v55  ;;  %v12595_v26 = vadd.f32 %v11389_v14, %v9976_v38  ;;  %v9980_v54 = vpop.f32.mrb[120].mxu1 }
 0x661   : > { %11649 = vst [vmem:[%s19247_s14 + $0x3b0] sm:$0xff] %v12594_v20  ;;  %v9982_v44 = vpop.f32.mrb[121].mxu1 }
 0x662   : > { %11650 = vst.msk [vmem:[%s19247_s14 + $0x3b8] sm:$0xff] %vm11531_vm2, %v12595_v26  ;;  %v9984_v27 = vpop.f32.mrb[122].mxu1 }
 0x663   : > { %v9986_v12 = vpop.f32.mrb[123].mxu1 }
 0x664   : > { %v11393_v42 = vpop.f32.mrb[120].mxu0 }
 0x665   : > { %v12596_v30 = vadd.f32 %v11393_v42, %v9980_v54  ;;  %v11395_v48 = vpop.f32.mrb[121].mxu0 }
 0x666   : > { %v12597_v62 = vadd.f32 %v11395_v48, %v9982_v44  ;;  %v11397_v15 = vpop.f32.mrb[122].mxu0 }
 0x667   : > { %11651 = vst [vmem:[%s19247_s14 + $0x3c0] sm:$0xff] %v12596_v30  ;;  %v12598_v1 = vadd.f32 %v11397_v15, %v9984_v27  ;;  %v11399_v52 = vpop.f32.mrb[123].mxu0 }
 0x668   : > { %11652 = vst.msk [vmem:[%s19247_s14 + $0x3c8] sm:$0xff] %vm11531_vm2, %v12597_v62  ;;  %v12599_v58 = vadd.f32 %v11399_v52, %v9986_v12  ;;  %v9990_v41 = vpop.f32.mrb[124].mxu1 }
 0x669   : > { %11653 = vst [vmem:[%s19247_s14 + $0x3d0] sm:$0xff] %v12598_v1  ;;  %v9992_v36 = vpop.f32.mrb[125].mxu1 }
 0x66a   : > { %11654 = vst.msk [vmem:[%s19247_s14 + $0x3d8] sm:$0xff] %vm11531_vm2, %v12599_v58  ;;  %v9994_v13 = vpop.f32.mrb[126].mxu1 }
 0x66b   : > { %v9996_v22 = vpop.f32.mrb[127].mxu1 }
 0x66c   : > { %v11403_v24 = vpop.f32.mrb[124].mxu0 }
 0x66d   : > { %v12600_v10 = vadd.f32 %v11403_v24, %v9990_v41  ;;  %v11405_v7 = vpop.f32.mrb[125].mxu0 }
 0x66e   : > { %v12601_v32 = vadd.f32 %v11405_v7, %v9992_v36  ;;  %v11407_v49 = vpop.f32.mrb[126].mxu0 }
 0x66f   : > { %11655 = vst [vmem:[%s19247_s14 + $0x3e0] sm:$0xff] %v12600_v10  ;;  %v12602_v61 = vadd.f32 %v11407_v49, %v9994_v13  ;;  %v11409_v46 = vpop.f32.mrb[127].mxu0 }
 0x670   : > { %11656 = vst.msk [vmem:[%s19247_s14 + $0x3e8] sm:$0xff] %vm11531_vm2, %v12601_v32  ;;  %v12603_v4 = vadd.f32 %v11409_v46, %v9996_v22  ;;  %v10000_v9 = vpop.f32.mrb[128].mxu1 }
 0x671   : > { %11657 = vst [vmem:[%s19247_s14 + $0x3f0] sm:$0xff] %v12602_v61  ;;  %v10002_v8 = vpop.f32.mrb[129].mxu1 }
 0x672   : > { %11658 = vst.msk [vmem:[%s19247_s14 + $0x3f8] sm:$0xff] %vm11531_vm2, %v12603_v4  ;;  %v10004_v59 = vpop.f32.mrb[130].mxu1 }
 0x673   : > { %v10006_v21 = vpop.f32.mrb[131].mxu1 }
 0x674   : > { %v11413_v6 = vpop.f32.mrb[128].mxu0 }
 0x675   : > { %v12604_v16 = vadd.f32 %v11413_v6, %v10000_v9  ;;  %v11415_v43 = vpop.f32.mrb[129].mxu0 }
 0x676   : > { %v12605_v17 = vadd.f32 %v11415_v43, %v10002_v8  ;;  %v11417_v3 = vpop.f32.mrb[130].mxu0 }
 0x677   : > { %11659 = vst [vmem:[%s19247_s14 + $0x400] sm:$0xff] %v12604_v16  ;;  %v12606_v51 = vadd.f32 %v11417_v3, %v10004_v59  ;;  %v11419_v29 = vpop.f32.mrb[131].mxu0 }
 0x678   : > { %11660 = vst.msk [vmem:[%s19247_s14 + $0x408] sm:$0xff] %vm11531_vm2, %v12605_v17  ;;  %v12607_v47 = vadd.f32 %v11419_v29, %v10006_v21  ;;  %v10010_v2 = vpop.f32.mrb[132].mxu1 }
 0x679   : > { %11661 = vst [vmem:[%s19247_s14 + $0x410] sm:$0xff] %v12606_v51  ;;  %v10012_v57 = vpop.f32.mrb[133].mxu1 }
 0x67a   : > { %11662 = vst.msk [vmem:[%s19247_s14 + $0x418] sm:$0xff] %vm11531_vm2, %v12607_v47  ;;  %v10014_v28 = vpop.f32.mrb[134].mxu1 }
 0x67b   : > { %v10016_v25 = vpop.f32.mrb[135].mxu1 }
 0x67c   : > { %v11423_v40 = vpop.f32.mrb[132].mxu0 }
 0x67d   : > { %v12608_v53 = vadd.f32 %v11423_v40, %v10010_v2  ;;  %v11425_v56 = vpop.f32.mrb[133].mxu0 }
 0x67e   : > { %v12609_v63 = vadd.f32 %v11425_v56, %v10012_v57  ;;  %v11427_v11 = vpop.f32.mrb[134].mxu0 }
 0x67f   : > { %11663 = vst [vmem:[%s19247_s14 + $0x420] sm:$0xff] %v12608_v53  ;;  %v12610_v0 = vadd.f32 %v11427_v11, %v10014_v28  ;;  %v11429_v45 = vpop.f32.mrb[135].mxu0 }
 0x680   : > { %11664 = vst.msk [vmem:[%s19247_s14 + $0x428] sm:$0xff] %vm11531_vm2, %v12609_v63  ;;  %v12611_v39 = vadd.f32 %v11429_v45, %v10016_v25  ;;  %v10020_v23 = vpop.f32.mrb[136].mxu1 }
 0x681   : > { %11665 = vst [vmem:[%s19247_s14 + $0x430] sm:$0xff] %v12610_v0  ;;  %v10022_v19 = vpop.f32.mrb[137].mxu1 }
 0x682   : > { %11666 = vst.msk [vmem:[%s19247_s14 + $0x438] sm:$0xff] %vm11531_vm2, %v12611_v39  ;;  %v10024_v33 = vpop.f32.mrb[138].mxu1 }
 0x683   : > { %v10026_v18 = vpop.f32.mrb[139].mxu1 }
 0x684   : > { %v11433_v35 = vpop.f32.mrb[136].mxu0 }
 0x685   : > { %v12612_v50 = vadd.f32 %v11433_v35, %v10020_v23  ;;  %v11435_v37 = vpop.f32.mrb[137].mxu0 }
 0x686   : > { %v12613_v38 = vadd.f32 %v11435_v37, %v10022_v19  ;;  %v11437_v34 = vpop.f32.mrb[138].mxu0 }
 0x687   : > { %11667 = vst [vmem:[%s19247_s14 + $0x440] sm:$0xff] %v12612_v50  ;;  %v12614_v60 = vadd.f32 %v11437_v34, %v10024_v33  ;;  %v11439_v31 = vpop.f32.mrb[139].mxu0 }
 0x688   : > { %11668 = vst.msk [vmem:[%s19247_s14 + $0x448] sm:$0xff] %vm11531_vm2, %v12613_v38  ;;  %v12615_v55 = vadd.f32 %v11439_v31, %v10026_v18  ;;  %v10030_v5 = vpop.f32.mrb[140].mxu1 }
 0x689   : > { %11669 = vst [vmem:[%s19247_s14 + $0x450] sm:$0xff] %v12614_v60  ;;  %v10032_v20 = vpop.f32.mrb[141].mxu1 }
 0x68a   : > { %11670 = vst.msk [vmem:[%s19247_s14 + $0x458] sm:$0xff] %vm11531_vm2, %v12615_v55  ;;  %v10034_v14 = vpop.f32.mrb[142].mxu1 }
 0x68b   : > { %v10036_v26 = vpop.f32.mrb[143].mxu1 }
 0x68c   : > { %v11443_v54 = vpop.f32.mrb[140].mxu0 }
 0x68d   : > { %v12616_v44 = vadd.f32 %v11443_v54, %v10030_v5  ;;  %v11445_v27 = vpop.f32.mrb[141].mxu0 }
 0x68e   : > { %v12617_v12 = vadd.f32 %v11445_v27, %v10032_v20  ;;  %v11447_v42 = vpop.f32.mrb[142].mxu0 }
 0x68f   : > { %11671 = vst [vmem:[%s19247_s14 + $0x460] sm:$0xff] %v12616_v44  ;;  %v12618_v30 = vadd.f32 %v11447_v42, %v10034_v14  ;;  %v11449_v48 = vpop.f32.mrb[143].mxu0 }
 0x690   : > { %11672 = vst.msk [vmem:[%s19247_s14 + $0x468] sm:$0xff] %vm11531_vm2, %v12617_v12  ;;  %v12619_v62 = vadd.f32 %v11449_v48, %v10036_v26  ;;  %v10040_v15 = vpop.f32.mrb[144].mxu1 }
 0x691   : > { %11673 = vst [vmem:[%s19247_s14 + $0x470] sm:$0xff] %v12618_v30  ;;  %v10042_v1 = vpop.f32.mrb[145].mxu1 }
 0x692   : > { %11674 = vst.msk [vmem:[%s19247_s14 + $0x478] sm:$0xff] %vm11531_vm2, %v12619_v62  ;;  %v10044_v52 = vpop.f32.mrb[146].mxu1 }
 0x693   : > { %v10046_v58 = vpop.f32.mrb[147].mxu1 }
 0x694   : > { %v11453_v41 = vpop.f32.mrb[144].mxu0 }
 0x695   : > { %v12620_v36 = vadd.f32 %v11453_v41, %v10040_v15  ;;  %v11455_v13 = vpop.f32.mrb[145].mxu0 }
 0x696   : > { %v12621_v22 = vadd.f32 %v11455_v13, %v10042_v1  ;;  %v11457_v24 = vpop.f32.mrb[146].mxu0 }
 0x697   : > { %11675 = vst [vmem:[%s19247_s14 + $0x480] sm:$0xff] %v12620_v36  ;;  %v12622_v10 = vadd.f32 %v11457_v24, %v10044_v52  ;;  %v11459_v7 = vpop.f32.mrb[147].mxu0 }
 0x698   : > { %11676 = vst.msk [vmem:[%s19247_s14 + $0x488] sm:$0xff] %vm11531_vm2, %v12621_v22  ;;  %v12623_v32 = vadd.f32 %v11459_v7, %v10046_v58  ;;  %v10050_v49 = vpop.f32.mrb[148].mxu1 }
 0x699   : > { %11677 = vst [vmem:[%s19247_s14 + $0x490] sm:$0xff] %v12622_v10  ;;  %v10052_v61 = vpop.f32.mrb[149].mxu1 }
 0x69a   : > { %11678 = vst.msk [vmem:[%s19247_s14 + $0x498] sm:$0xff] %vm11531_vm2, %v12623_v32  ;;  %v10054_v46 = vpop.f32.mrb[150].mxu1 }
 0x69b   : > { %v10056_v4 = vpop.f32.mrb[151].mxu1 }
 0x69c   : > { %v11463_v9 = vpop.f32.mrb[148].mxu0 }
 0x69d   : > { %v12624_v8 = vadd.f32 %v11463_v9, %v10050_v49  ;;  %v11465_v59 = vpop.f32.mrb[149].mxu0 }
 0x69e   : > { %v12625_v21 = vadd.f32 %v11465_v59, %v10052_v61  ;;  %v11467_v6 = vpop.f32.mrb[150].mxu0 }
 0x69f   : > { %11679 = vst [vmem:[%s19247_s14 + $0x4a0] sm:$0xff] %v12624_v8  ;;  %v12626_v16 = vadd.f32 %v11467_v6, %v10054_v46  ;;  %v11469_v43 = vpop.f32.mrb[151].mxu0 }
 0x6a0   : > { %11680 = vst.msk [vmem:[%s19247_s14 + $0x4a8] sm:$0xff] %vm11531_vm2, %v12625_v21  ;;  %v12627_v17 = vadd.f32 %v11469_v43, %v10056_v4  ;;  %v10060_v3 = vpop.f32.mrb[152].mxu1 }
 0x6a1   : > { %11681 = vst [vmem:[%s19247_s14 + $0x4b0] sm:$0xff] %v12626_v16  ;;  %v10062_v51 = vpop.f32.mrb[153].mxu1 }
 0x6a2   : > { %11682 = vst.msk [vmem:[%s19247_s14 + $0x4b8] sm:$0xff] %vm11531_vm2, %v12627_v17  ;;  %v10064_v29 = vpop.f32.mrb[154].mxu1 }
 0x6a3   : > { %v10066_v47 = vpop.f32.mrb[155].mxu1 }
 0x6a4   : > { %v11473_v2 = vpop.f32.mrb[152].mxu0 }
 0x6a5   : > { %v12628_v57 = vadd.f32 %v11473_v2, %v10060_v3  ;;  %v11475_v28 = vpop.f32.mrb[153].mxu0 }
 0x6a6   : > { %v12629_v25 = vadd.f32 %v11475_v28, %v10062_v51  ;;  %v11477_v40 = vpop.f32.mrb[154].mxu0 }
 0x6a7   : > { %11683 = vst [vmem:[%s19247_s14 + $0x4c0] sm:$0xff] %v12628_v57  ;;  %v12630_v53 = vadd.f32 %v11477_v40, %v10064_v29  ;;  %v11479_v56 = vpop.f32.mrb[155].mxu0 }
 0x6a8   : > { %11684 = vst.msk [vmem:[%s19247_s14 + $0x4c8] sm:$0xff] %vm11531_vm2, %v12629_v25  ;;  %v12631_v63 = vadd.f32 %v11479_v56, %v10066_v47  ;;  %v10070_v11 = vpop.f32.mrb[156].mxu1 }
 0x6a9   : > { %11685 = vst [vmem:[%s19247_s14 + $0x4d0] sm:$0xff] %v12630_v53  ;;  %v10072_v0 = vpop.f32.mrb[157].mxu1 }
 0x6aa   : > { %11686 = vst.msk [vmem:[%s19247_s14 + $0x4d8] sm:$0xff] %vm11531_vm2, %v12631_v63  ;;  %v10074_v45 = vpop.f32.mrb[158].mxu1 }
 0x6ab   : > { %v10076_v39 = vpop.f32.mrb[159].mxu1 }
 0x6ac   : > { %v11483_v23 = vpop.f32.mrb[156].mxu0 }
 0x6ad   : > { %v12632_v19 = vadd.f32 %v11483_v23, %v10070_v11  ;;  %v11485_v33 = vpop.f32.mrb[157].mxu0 }
 0x6ae   : > { %v12633_v18 = vadd.f32 %v11485_v33, %v10072_v0  ;;  %v11487_v35 = vpop.f32.mrb[158].mxu0 }
 0x6af   : > { %11687 = vst [vmem:[%s19247_s14 + $0x4e0] sm:$0xff] %v12632_v19  ;;  %v12634_v50 = vadd.f32 %v11487_v35, %v10074_v45  ;;  %v11489_v37 = vpop.f32.mrb[159].mxu0 }
 0x6b0   : > { %11688 = vst.msk [vmem:[%s19247_s14 + $0x4e8] sm:$0xff] %vm11531_vm2, %v12633_v18  ;;  %v12635_v38 = vadd.f32 %v11489_v37, %v10076_v39  ;;  %v10080_v34 = vpop.f32.mrb[160].mxu1 }
 0x6b1   : > { %11689 = vst [vmem:[%s19247_s14 + $0x4f0] sm:$0xff] %v12634_v50  ;;  %v10082_v60 = vpop.f32.mrb[161].mxu1 }
 0x6b2   : > { %11690 = vst.msk [vmem:[%s19247_s14 + $0x4f8] sm:$0xff] %vm11531_vm2, %v12635_v38  ;;  %v10084_v31 = vpop.f32.mrb[162].mxu1 }
 0x6b3   : > { %v10086_v55 = vpop.f32.mrb[163].mxu1 }
 0x6b4   : > { %v11493_v5 = vpop.f32.mrb[160].mxu0 }
 0x6b5   : > { %v12636_v20 = vadd.f32 %v11493_v5, %v10080_v34  ;;  %v11495_v14 = vpop.f32.mrb[161].mxu0 }
 0x6b6   : > { %v12637_v26 = vadd.f32 %v11495_v14, %v10082_v60  ;;  %v11497_v54 = vpop.f32.mrb[162].mxu0 }
 0x6b7   : > { %11691 = vst [vmem:[%s19247_s14 + $0x500] sm:$0xff] %v12636_v20  ;;  %v12638_v44 = vadd.f32 %v11497_v54, %v10084_v31  ;;  %v11499_v27 = vpop.f32.mrb[163].mxu0 }
 0x6b8   : > { %11692 = vst.msk [vmem:[%s19247_s14 + $0x508] sm:$0xff] %vm11531_vm2, %v12637_v26  ;;  %v12639_v12 = vadd.f32 %v11499_v27, %v10086_v55  ;;  %v10090_v42 = vpop.f32.mrb[164].mxu1 }
 0x6b9   : > { %11693 = vst [vmem:[%s19247_s14 + $0x510] sm:$0xff] %v12638_v44  ;;  %v10092_v30 = vpop.f32.mrb[165].mxu1 }
 0x6ba   : > { %11694 = vst.msk [vmem:[%s19247_s14 + $0x518] sm:$0xff] %vm11531_vm2, %v12639_v12  ;;  %v10094_v48 = vpop.f32.mrb[166].mxu1 }
 0x6bb   : > { %v10096_v62 = vpop.f32.mrb[167].mxu1 }
 0x6bc   : > { %v11503_v15 = vpop.f32.mrb[164].mxu0 }
 0x6bd   : > { %v12640_v1 = vadd.f32 %v11503_v15, %v10090_v42  ;;  %v11505_v52 = vpop.f32.mrb[165].mxu0 }
 0x6be   : > { %v12641_v58 = vadd.f32 %v11505_v52, %v10092_v30  ;;  %v11507_v41 = vpop.f32.mrb[166].mxu0 }
 0x6bf   : > { %11695 = vst [vmem:[%s19247_s14 + $0x520] sm:$0xff] %v12640_v1  ;;  %v12642_v36 = vadd.f32 %v11507_v41, %v10094_v48  ;;  %v11509_v13 = vpop.f32.mrb[167].mxu0 }
 0x6c0   : > { %11696 = vst.msk [vmem:[%s19247_s14 + $0x528] sm:$0xff] %vm11531_vm2, %v12641_v58  ;;  %v12643_v22 = vadd.f32 %v11509_v13, %v10096_v62  ;;  %v10100_v24 = vpop.f32.mrb[168].mxu1 }
 0x6c1   : > { %11697 = vst [vmem:[%s19247_s14 + $0x530] sm:$0xff] %v12642_v36  ;;  %v10102_v10 = vpop.f32.mrb[169].mxu1 }
 0x6c2   : > { %11698 = vst.msk [vmem:[%s19247_s14 + $0x538] sm:$0xff] %vm11531_vm2, %v12643_v22  ;;  %v10104_v7 = vpop.f32.mrb[170].mxu1 }
 0x6c3   : > { %v10106_v32 = vpop.f32.mrb[171].mxu1 }
 0x6c4   : > { %v11513_v49 = vpop.f32.mrb[168].mxu0 }
 0x6c5   : > { %v12644_v61 = vadd.f32 %v11513_v49, %v10100_v24  ;;  %v11515_v46 = vpop.f32.mrb[169].mxu0 }
 0x6c6   : > { %v12645_v4 = vadd.f32 %v11515_v46, %v10102_v10  ;;  %v11517_v9 = vpop.f32.mrb[170].mxu0 }
 0x6c7   : > { %11699 = vst [vmem:[%s19247_s14 + $0x540] sm:$0xff] %v12644_v61  ;;  %v12646_v8 = vadd.f32 %v11517_v9, %v10104_v7  ;;  %v11519_v59 = vpop.f32.mrb[171].mxu0 }
 0x6c8   : > { %11700 = vst.msk [vmem:[%s19247_s14 + $0x548] sm:$0xff] %vm11531_vm2, %v12645_v4  ;;  %v12647_v21 = vadd.f32 %v11519_v59, %v10106_v32  ;;  %v10110_v6 = vpop.f32.mrb[172].mxu1 }
 0x6c9   : > { %11701 = vst [vmem:[%s19247_s14 + $0x550] sm:$0xff] %v12646_v8  ;;  %v10112_v16 = vpop.f32.mrb[173].mxu1 }
 0x6ca   : > { %11702 = vst.msk [vmem:[%s19247_s14 + $0x558] sm:$0xff] %vm11531_vm2, %v12647_v21  ;;  %v10114_v43 = vpop.f32.mrb[174].mxu1 }
 0x6cb   : > { %v10115_v17 = vpop.f32.mrb[175].mxu1 }
 0x6cc   : > { %v11523_v3 = vpop.f32.mrb[172].mxu0 }
 0x6cd   : > { %v12648_v51 = vadd.f32 %v11523_v3, %v10110_v6  ;;  %v11525_v29 = vpop.f32.mrb[173].mxu0 }
 0x6ce   : > { %v12649_v47 = vadd.f32 %v11525_v29, %v10112_v16  ;;  %v11527_v2 = vpop.f32.mrb[174].mxu0 }
 0x6cf   : > { %11703 = vst [vmem:[%s19247_s14 + $0x560] sm:$0xff] %v12648_v51  ;;  %v11528_v57 = vpop.f32.mrb[175].mxu0 }
 0x6d0   : > { %11704 = vst.msk [vmem:[%s19247_s14 + $0x568] sm:$0xff] %vm11531_vm2, %v12649_v47 }
 0x6d1 PF: > { %s15_s18 = sadd.s32 1, %s14767_s18  }
 0x6d2   : > { %p12_p4 = scmp.ge.s32.totalorder %s15_s18, 4  }
 0x6d4   :  { %14 = sbr.rel (!%p12_p4) target bundleno = 1 (0x1), region = 70 }

</bundles_post_ra>
